<compile_context>
chip_gen: v7x
topology: tpu7x:2x2x1
jax: 0.10.0
libtpu: 0.0.40
codegen_flags: <defaults>
</compile_context>

<pallas_src>
import functools

import jax
import jax.numpy as jnp
from jax.experimental import pallas as pl
from jax.experimental.pallas import tpu as pltpu


# Transposed-conv (k=4, s=2, p=1) phase decomposition:
#   out[2*oy + py] = sum_dy xpad[oy + py + dy] * W[..., _PHASE_K[py][dy]]
# (same along width), where xpad is the input zero-padded by 1 on each side.
_PHASE_K = ((3, 1), (2, 0))


# ---------------------------------------------------------------------------
# Kernel 1: conv1 (3x3, pad 1, +bias) + residual stack + trailing ReLU, fused.
# ---------------------------------------------------------------------------
def _stage1_kernel(xpad_ref, w1_ref, b1_ref, w3s_ref, w1s_ref, o_ref, xbuf):
    # xpad_ref: (1, H+2, W+2, Cin)   bf16, halo-padded input
    # w1_ref:   (9, Cin, Chid)       bf16, conv1 weights per tap
    # b1_ref:   (1, Chid)            f32
    # w3s_ref:  (L, 9, Chid, Crh)    bf16, residual 3x3 weights per layer/tap
    # w1s_ref:  (L, Crh, Chid)       bf16, residual 1x1 weights per layer
    # o_ref:    (1, H+2, W+2, Chid)  bf16, halo-padded ReLU'd output
    # xbuf:     VMEM (H+2, W+2, Chid) f32 resident activation (zero halo)
    _, hp2, wp2, cin = xpad_ref.shape
    h, w = hp2 - 2, wp2 - 2
    chid = o_ref.shape[-1]
    num_layers, _, _, crh = w3s_ref.shape

    # ---- conv1: accumulate over the 9 taps (no im2col materialization) ----
    acc = jnp.zeros((h * w, chid), jnp.float32)
    for i in range(3):
        for j in range(3):
            tap = xpad_ref[0, i:i + h, j:j + w, :].reshape(h * w, cin)
            acc += jnp.dot(tap, w1_ref[3 * i + j],
                           preferred_element_type=jnp.float32)
    acc += b1_ref[...]                                   # f32 epilogue

    # Keep the activation resident in VMEM with a zero halo (re-zeroed every
    # grid step -> correct under megacore grid splitting).
    xbuf[...] = jnp.zeros_like(xbuf)
    xbuf[1:1 + h, 1:1 + w, :] = acc.reshape(h, w, chid)

    # ---- residual stack: x = x + conv1x1(relu(conv3x3(relu(x)))) ----
    for l in range(num_layers):
        xr = jnp.maximum(xbuf[...], 0.0).astype(jnp.bfloat16)   # halo stays 0
        hacc = jnp.zeros((h * w, crh), jnp.float32)
        for i in range(3):
            for j in range(3):
                tap = xr[i:i + h, j:j + w, :].reshape(h * w, chid)
                hacc += jnp.dot(tap, w3s_ref[l, 3 * i + j],
                                preferred_element_type=jnp.float32)
        hrelu = jnp.maximum(hacc, 0.0).astype(jnp.bfloat16)
        y = jnp.dot(hrelu, w1s_ref[l], preferred_element_type=jnp.float32)
        xbuf[1:1 + h, 1:1 + w, :] = (xbuf[1:1 + h, 1:1 + w, :]
                                     + y.reshape(h, w, chid))

    # Trailing ReLU of ResidualStack; emit a halo-padded bf16 output so the
    # next (deconv) kernel consumes it with no XLA pad in between.
    o_ref[0] = jnp.maximum(xbuf[...], 0.0).astype(o_ref.dtype)


# ---------------------------------------------------------------------------
# Kernel 2/3: ConvTranspose2d(k=4, s=2, p=1) via phase decomposition (+bias,
# optional fused output ReLU).
# ---------------------------------------------------------------------------
def _deconv_kernel(xpad_ref, w_ref, b_ref, o_ref, *, relu_out):
    # xpad_ref: (1, H+2, W+2, Cin)      bf16, halo-padded input
    # w_ref:    (16, Cin, Cout)         bf16, tap idx = py*8 + px*4 + dy*2 + dx
    # b_ref:    (1, Cout)               f32
    # o_ref:    (1, H, 2, W, 2*Cout)    out[n, oy, py, ox, px*Cout + co]
    _, hp2, wp2, cin = xpad_ref.shape
    h, w = hp2 - 2, wp2 - 2
    cout = w_ref.shape[-1]

    for py in range(2):
        cols = []
        for px in range(2):
            acc = jnp.zeros((h * w, cout), jnp.float32)
            for dy in range(2):
                for dx in range(2):
                    tap = xpad_ref[0, py + dy:py + dy + h,
                                   px + dx:px + dx + w, :].reshape(h * w, cin)
                    acc += jnp.dot(tap, w_ref[py * 8 + px * 4 + dy * 2 + dx],
                                   preferred_element_type=jnp.float32)
            acc += b_ref[...]                            # f32 epilogue
            if relu_out:
                acc = jnp.maximum(acc, 0.0)
            cols.append(acc.reshape(h, w, cout))
        # px is folded into the channel dim so the de-interleave in the wrapper
        # is a free row-major reshape.
        o_ref[0, :, py, :, :] = jnp.concatenate(cols, axis=-1).astype(o_ref.dtype)


# ---------------------------------------------------------------------------
# pallas_call wrappers (grid over batch, "parallel" for megacore)
# ---------------------------------------------------------------------------
def _stage1_call(xpad, w1, b1, w3s, w1s):
    n, hp2, wp2, cin = xpad.shape
    chid = w1.shape[-1]
    num_layers, _, _, crh = w3s.shape
    return pl.pallas_call(
        _stage1_kernel,
        out_shape=jax.ShapeDtypeStruct((n, hp2, wp2, chid), jnp.bfloat16),
        grid_spec=pltpu.PrefetchScalarGridSpec(
            num_scalar_prefetch=0,
            grid=(n,),
            in_specs=[
                pl.BlockSpec((1, hp2, wp2, cin), lambda b: (b, 0, 0, 0)),
                pl.BlockSpec((9, cin, chid), lambda b: (0, 0, 0)),
                pl.BlockSpec((1, chid), lambda b: (0, 0)),
                pl.BlockSpec((num_layers, 9, chid, crh), lambda b: (0, 0, 0, 0)),
                pl.BlockSpec((num_layers, crh, chid), lambda b: (0, 0, 0)),
            ],
            out_specs=pl.BlockSpec((1, hp2, wp2, chid), lambda b: (b, 0, 0, 0)),
            scratch_shapes=[pltpu.VMEM((hp2, wp2, chid), jnp.float32)],
        ),
        compiler_params=pltpu.CompilerParams(
            dimension_semantics=("parallel",)),
    )(xpad, w1, b1, w3s, w1s)


def _deconv_call(xpad, wph, b, *, relu_out, out_dtype):
    n, hp2, wp2, cin = xpad.shape
    h, w = hp2 - 2, wp2 - 2
    cout = wph.shape[-1]
    kernel = functools.partial(_deconv_kernel, relu_out=relu_out)
    return pl.pallas_call(
        kernel,
        out_shape=jax.ShapeDtypeStruct((n, h, 2, w, 2 * cout), out_dtype),
        grid_spec=pltpu.PrefetchScalarGridSpec(
            num_scalar_prefetch=0,
            grid=(n,),
            in_specs=[
                pl.BlockSpec((1, hp2, wp2, cin), lambda b: (b, 0, 0, 0)),
                pl.BlockSpec((16, cin, cout), lambda b: (0, 0, 0)),
                pl.BlockSpec((1, cout), lambda b: (0, 0)),
            ],
            out_specs=pl.BlockSpec((1, h, 2, w, 2 * cout),
                                   lambda b: (b, 0, 0, 0, 0)),
        ),
        compiler_params=pltpu.CompilerParams(
            dimension_semantics=("parallel",)),
    )(xpad, wph, b)


# ---------------------------------------------------------------------------
# Parameters (PyTorch layouts) + one-time prep (re-layout + bf16 cast)
# ---------------------------------------------------------------------------
def init_decoder_params(key, in_channels, num_hiddens, num_residual_layers,
                        num_residual_hiddens):
    keys = jax.random.split(key, 6 + 2 * num_residual_layers)
    it = iter(keys)
    s = 0.1
    p = {
        "conv1_w": jax.random.normal(next(it), (num_hiddens, in_channels, 3, 3)) * s,
        "conv1_b": jax.random.normal(next(it), (num_hiddens,)) * s,
        "res": [],
    }
    for _ in range(num_residual_layers):
        w3 = jax.random.normal(next(it), (num_residual_hiddens, num_hiddens, 3, 3)) * s
        w1 = jax.random.normal(next(it), (num_hiddens, num_residual_hiddens, 1, 1)) * s
        p["res"].append((w3, w1))
    p["ct1_w"] = jax.random.normal(next(it), (num_hiddens, num_hiddens // 2, 4, 4)) * s
    p["ct1_b"] = jax.random.normal(next(it), (num_hiddens // 2,)) * s
    p["ct2_w"] = jax.random.normal(next(it), (num_hiddens // 2, 3, 4, 4)) * s
    p["ct2_b"] = jax.random.normal(next(it), (3,)) * s
    return p


def _phase_weights(w):
    # w: (Cin, Cout, 4, 4) (PyTorch ConvTranspose2d) -> (16, Cin, Cout)
    # tap index = py*8 + px*4 + dy*2 + dx
    taps = []
    for py in range(2):
        for px in range(2):
            for dy in range(2):
                for dx in range(2):
                    taps.append(w[:, :, _PHASE_K[py][dy], _PHASE_K[px][dx]])
    return jnp.stack(taps, axis=0)


def prepare_decoder_params(p, compute_dtype=jnp.bfloat16):
    chid, cin = p["conv1_w"].shape[0], p["conv1_w"].shape[1]
    prep = {
        "conv1_w": jnp.transpose(p["conv1_w"], (2, 3, 1, 0))
                      .reshape(9, cin, chid).astype(compute_dtype),
        "conv1_b": p["conv1_b"].reshape(1, chid).astype(jnp.float32),
        "ct1_w": _phase_weights(p["ct1_w"]).astype(compute_dtype),
        "ct1_b": p["ct1_b"].reshape(1, -1).astype(jnp.float32),
        "ct2_w": _phase_weights(p["ct2_w"]).astype(compute_dtype),
        "ct2_b": p["ct2_b"].reshape(1, -1).astype(jnp.float32),
    }
    w3s, w1s = [], []
    for w3, w1 in p["res"]:
        crh = w3.shape[0]
        w3s.append(jnp.transpose(w3, (2, 3, 1, 0)).reshape(9, chid, crh))
        w1s.append(jnp.transpose(w1[:, :, 0, 0], (1, 0)))
    prep["res_w3"] = jnp.stack(w3s, axis=0).astype(compute_dtype)  # (L,9,Chid,Crh)
    prep["res_w1"] = jnp.stack(w1s, axis=0).astype(compute_dtype)  # (L,Crh,Chid)
    return prep


# ---------------------------------------------------------------------------
# Forward
# ---------------------------------------------------------------------------
def decoder_forward(prep, x_nchw):
    x = jnp.transpose(x_nchw, (0, 2, 3, 1)).astype(jnp.bfloat16)   # NCHW -> NHWC
    xpad = jnp.pad(x, ((0, 0), (1, 1), (1, 1), (0, 0)))
    n, hp2, wp2, _ = xpad.shape
    h, w = hp2 - 2, wp2 - 2

    # conv1 + residual stack + trailing ReLU (single fused kernel,
    # halo-padded output -> no XLA pad before the first deconv).
    y1 = _stage1_call(xpad, prep["conv1_w"], prep["conv1_b"],
                      prep["res_w3"], prep["res_w1"])      # (N, H+2, W+2, Chid)

    # conv_trans_1 (4x4, s2, p1) + ReLU, phase-decomposed.
    c2 = prep["ct1_w"].shape[-1]
    y2 = _deconv_call(y1, prep["ct1_w"], prep["ct1_b"],
                      relu_out=True, out_dtype=jnp.bfloat16)  # (N, H, 2, W, 2*C2)
    y2 = y2.reshape(n, 2 * h, 2 * w, c2)                      # free row-major merge
    y2p = jnp.pad(y2, ((0, 0), (1, 1), (1, 1), (0, 0)))

    # conv_trans_2 (4x4, s2, p1), no output ReLU.
    y3 = _deconv_call(y2p, prep["ct2_w"], prep["ct2_b"],
                      relu_out=False, out_dtype=jnp.float32)  # (N, 2H, 2, 2W, 6)
    y3 = y3.reshape(n, 4 * h, 4 * w, 3)
    return jnp.transpose(y3, (0, 3, 1, 2))                    # NHWC -> NCHW


# ---------------------------------------------------------------------------
# Pure-JAX reference (f32) for a correctness sanity check.
# ---------------------------------------------------------------------------
def _reference_forward(params, x_nchw):
    def conv(x, w, b, pad):
        y = jax.lax.conv_general_dilated(
            x, w, window_strides=(1, 1), padding=((pad, pad), (pad, pad)),
            dimension_numbers=("NCHW", "OIHW", "NCHW"))
        return y if b is None else y + b.reshape(1, -1, 1, 1)

    def deconv(x, w, b, stride, pad):
        k = w.shape[2]
        wt = jnp.transpose(jnp.flip(w, (2, 3)), (1, 0, 2, 3))   # (Cout,Cin,kh,kw)
        y = jax.lax.conv_general_dilated(
            x, wt, window_strides=(1, 1),
            padding=((k - 1 - pad, k - 1 - pad),) * 2,
            lhs_dilation=(stride, stride),
            dimension_numbers=("NCHW", "OIHW", "NCHW"))
        return y + b.reshape(1, -1, 1, 1)

    x = conv(x_nchw, params["conv1_w"], params["conv1_b"], 1)
    for w3, w1 in params["res"]:
        hid = conv(jax.nn.relu(x), w3, None, 1)
        x = x + conv(jax.nn.relu(hid), w1, None, 0)
    x = jax.nn.relu(x)
    x = jax.nn.relu(deconv(x, params["ct1_w"], params["ct1_b"], 2, 1))
    return deconv(x, params["ct2_w"], params["ct2_b"], 2, 1)


if __name__ == "__main__":
    in_channels, num_hiddens = 4, 32
    num_residual_layers, num_residual_hiddens = 2, 8
    batch, spatial = 2, 8

    key = jax.random.PRNGKey(0)
    k_param, k_x = jax.random.split(key)
    params = init_decoder_params(k_param, in_channels, num_hiddens,
                                 num_residual_layers, num_residual_hiddens)
    prep = prepare_decoder_params(params)
    x = jax.random.normal(k_x, (batch, in_channels, spatial, spatial), jnp.float32)

    out = jax.jit(decoder_forward)(prep, x)
    out = jax.block_until_ready(out)

    assert out.shape == (batch, 3, spatial * 4, spatial * 4), out.shape
    assert bool(jnp.all(jnp.isfinite(out)))

    # Loose check vs pure-JAX f32 reference (kernel uses bf16 MXU operands).
    ref = jax.jit(_reference_forward)(params, x)
    ref = jax.block_until_ready(ref)
    rel = float(jnp.linalg.norm((out - ref).ravel())
                / (jnp.linalg.norm(ref.ravel()) + 1e-8))
    assert rel < 5e-2, f"relative error too large: {rel}"

    print("KERNEL_OK")
</pallas_src>

<mosaic_0001>
module attributes {stable_mosaic.version = 11 : i64} {
  func.func @_deconv_kernel(%arg0: i32, %arg1: memref<1x10x10x32xbf16, #tpu.memory_space<vmem>>, %arg2: memref<16x32x16xbf16, #tpu.memory_space<vmem>>, %arg3: memref<1x16xf32, #tpu.memory_space<vmem>>, %arg4: memref<1x8x2x8x32xbf16, #tpu.memory_space<vmem>>) attributes {dimension_semantics = [#tpu.dimension_semantics<parallel>], iteration_bounds = array<i64: 2>, scalar_prefetch = 0 : i64, scratch_operands = 0 : i64, tpu.core_type = #tpu.core_type<tc>, window_params = [{transform_indices = @transform_0, window_bounds = array<i64: 1, 10, 10, 32>}, {pipeline_mode = #tpu.pipeline_mode<synchronous>, transform_indices = @transform_1, window_bounds = array<i64: 16, 32, 16>}, {pipeline_mode = #tpu.pipeline_mode<synchronous>, transform_indices = @transform_2, window_bounds = array<i64: 1, 16>}, {transform_indices = @transform_3, window_bounds = array<i64: 1, 8, 2, 8, 32>}]} {
    %cst = arith.constant 0.000000e+00 : f32
    %0 = vector.broadcast %cst : f32 to vector<64x16xf32>
    %c0 = arith.constant 0 : index
    %c0_0 = arith.constant 0 : index
    %c0_1 = arith.constant 0 : index
    %c0_2 = arith.constant 0 : index
    %1 = vector.load %arg1[%c0, %c0_0, %c0_1, %c0_2] : memref<1x10x10x32xbf16, #tpu.memory_space<vmem>>, vector<1x8x8x32xbf16>
    %2 = vector.shape_cast %1 : vector<1x8x8x32xbf16> to vector<8x8x32xbf16>
    %3 = vector.shape_cast %2 : vector<8x8x32xbf16> to vector<64x32xbf16>
    %c0_3 = arith.constant 0 : index
    %c0_4 = arith.constant 0 : index
    %c0_5 = arith.constant 0 : index
    %4 = vector.load %arg2[%c0_3, %c0_4, %c0_5] : memref<16x32x16xbf16, #tpu.memory_space<vmem>>, vector<1x32x16xbf16>
    %5 = vector.shape_cast %4 : vector<1x32x16xbf16> to vector<32x16xbf16>
    %cst_6 = arith.constant dense<0.000000e+00> : vector<64x16xf32>
    %6 = tpu.matmul %3, %5, %cst_6 {dimension_numbers = #tpu.dot_dimension_numbers<[1], [0], [0], [1], [0, 0, 1, 1], [], []>} : vector<64x32xbf16>, vector<32x16xbf16>, vector<64x16xf32> -> vector<64x16xf32>
    %7 = arith.addf %0, %6 : vector<64x16xf32>
    %c0_7 = arith.constant 0 : index
    %c0_8 = arith.constant 0 : index
    %c1 = arith.constant 1 : index
    %c0_9 = arith.constant 0 : index
    %8 = vector.load %arg1[%c0_7, %c0_8, %c1, %c0_9] : memref<1x10x10x32xbf16, #tpu.memory_space<vmem>>, vector<1x8x8x32xbf16>
    %9 = vector.shape_cast %8 : vector<1x8x8x32xbf16> to vector<8x8x32xbf16>
    %10 = vector.shape_cast %9 : vector<8x8x32xbf16> to vector<64x32xbf16>
    %c1_10 = arith.constant 1 : index
    %c0_11 = arith.constant 0 : index
    %c0_12 = arith.constant 0 : index
    %11 = vector.load %arg2[%c1_10, %c0_11, %c0_12] : memref<16x32x16xbf16, #tpu.memory_space<vmem>>, vector<1x32x16xbf16>
    %12 = vector.shape_cast %11 : vector<1x32x16xbf16> to vector<32x16xbf16>
    %cst_13 = arith.constant dense<0.000000e+00> : vector<64x16xf32>
    %13 = tpu.matmul %10, %12, %cst_13 {dimension_numbers = #tpu.dot_dimension_numbers<[1], [0], [0], [1], [0, 0, 1, 1], [], []>} : vector<64x32xbf16>, vector<32x16xbf16>, vector<64x16xf32> -> vector<64x16xf32>
    %14 = arith.addf %7, %13 : vector<64x16xf32>
    %c0_14 = arith.constant 0 : index
    %c1_15 = arith.constant 1 : index
    %c0_16 = arith.constant 0 : index
    %c0_17 = arith.constant 0 : index
    %15 = vector.load %arg1[%c0_14, %c1_15, %c0_16, %c0_17] : memref<1x10x10x32xbf16, #tpu.memory_space<vmem>>, vector<1x8x8x32xbf16>
    %16 = vector.shape_cast %15 : vector<1x8x8x32xbf16> to vector<8x8x32xbf16>
    %17 = vector.shape_cast %16 : vector<8x8x32xbf16> to vector<64x32xbf16>
    %c2 = arith.constant 2 : index
    %c0_18 = arith.constant 0 : index
    %c0_19 = arith.constant 0 : index
    %18 = vector.load %arg2[%c2, %c0_18, %c0_19] : memref<16x32x16xbf16, #tpu.memory_space<vmem>>, vector<1x32x16xbf16>
    %19 = vector.shape_cast %18 : vector<1x32x16xbf16> to vector<32x16xbf16>
    %cst_20 = arith.constant dense<0.000000e+00> : vector<64x16xf32>
    %20 = tpu.matmul %17, %19, %cst_20 {dimension_numbers = #tpu.dot_dimension_numbers<[1], [0], [0], [1], [0, 0, 1, 1], [], []>} : vector<64x32xbf16>, vector<32x16xbf16>, vector<64x16xf32> -> vector<64x16xf32>
    %21 = arith.addf %14, %20 : vector<64x16xf32>
    %c0_21 = arith.constant 0 : index
    %c1_22 = arith.constant 1 : index
    %c1_23 = arith.constant 1 : index
    %c0_24 = arith.constant 0 : index
    %22 = vector.load %arg1[%c0_21, %c1_22, %c1_23, %c0_24] : memref<1x10x10x32xbf16, #tpu.memory_space<vmem>>, vector<1x8x8x32xbf16>
    %23 = vector.shape_cast %22 : vector<1x8x8x32xbf16> to vector<8x8x32xbf16>
    %24 = vector.shape_cast %23 : vector<8x8x32xbf16> to vector<64x32xbf16>
    %c3 = arith.constant 3 : index
    %c0_25 = arith.constant 0 : index
    %c0_26 = arith.constant 0 : index
    %25 = vector.load %arg2[%c3, %c0_25, %c0_26] : memref<16x32x16xbf16, #tpu.memory_space<vmem>>, vector<1x32x16xbf16>
    %26 = vector.shape_cast %25 : vector<1x32x16xbf16> to vector<32x16xbf16>
    %cst_27 = arith.constant dense<0.000000e+00> : vector<64x16xf32>
    %27 = tpu.matmul %24, %26, %cst_27 {dimension_numbers = #tpu.dot_dimension_numbers<[1], [0], [0], [1], [0, 0, 1, 1], [], []>} : vector<64x32xbf16>, vector<32x16xbf16>, vector<64x16xf32> -> vector<64x16xf32>
    %28 = arith.addf %21, %27 : vector<64x16xf32>
    %c0_28 = arith.constant 0 : index
    %c0_29 = arith.constant 0 : index
    %29 = vector.load %arg3[%c0_28, %c0_29] : memref<1x16xf32, #tpu.memory_space<vmem>>, vector<1x16xf32>
    %30 = vector.broadcast %29 : vector<1x16xf32> to vector<64x16xf32>
    %31 = arith.addf %28, %30 : vector<64x16xf32>
    %cst_30 = arith.constant 0.000000e+00 : f32
    %32 = vector.broadcast %cst_30 : f32 to vector<64x16xf32>
    %33 = arith.maximumf %31, %32 : vector<64x16xf32>
    %34 = vector.shape_cast %33 : vector<64x16xf32> to vector<8x8x16xf32>
    %cst_31 = arith.constant 0.000000e+00 : f32
    %35 = vector.broadcast %cst_31 : f32 to vector<64x16xf32>
    %c0_32 = arith.constant 0 : index
    %c0_33 = arith.constant 0 : index
    %c1_34 = arith.constant 1 : index
    %c0_35 = arith.constant 0 : index
    %36 = vector.load %arg1[%c0_32, %c0_33, %c1_34, %c0_35] : memref<1x10x10x32xbf16, #tpu.memory_space<vmem>>, vector<1x8x8x32xbf16>
    %37 = vector.shape_cast %36 : vector<1x8x8x32xbf16> to vector<8x8x32xbf16>
    %38 = vector.shape_cast %37 : vector<8x8x32xbf16> to vector<64x32xbf16>
    %c4 = arith.constant 4 : index
    %c0_36 = arith.constant 0 : index
    %c0_37 = arith.constant 0 : index
    %39 = vector.load %arg2[%c4, %c0_36, %c0_37] : memref<16x32x16xbf16, #tpu.memory_space<vmem>>, vector<1x32x16xbf16>
    %40 = vector.shape_cast %39 : vector<1x32x16xbf16> to vector<32x16xbf16>
    %cst_38 = arith.constant dense<0.000000e+00> : vector<64x16xf32>
    %41 = tpu.matmul %38, %40, %cst_38 {dimension_numbers = #tpu.dot_dimension_numbers<[1], [0], [0], [1], [0, 0, 1, 1], [], []>} : vector<64x32xbf16>, vector<32x16xbf16>, vector<64x16xf32> -> vector<64x16xf32>
    %42 = arith.addf %35, %41 : vector<64x16xf32>
    %c0_39 = arith.constant 0 : index
    %c0_40 = arith.constant 0 : index
    %c2_41 = arith.constant 2 : index
    %c0_42 = arith.constant 0 : index
    %43 = vector.load %arg1[%c0_39, %c0_40, %c2_41, %c0_42] : memref<1x10x10x32xbf16, #tpu.memory_space<vmem>>, vector<1x8x8x32xbf16>
    %44 = vector.shape_cast %43 : vector<1x8x8x32xbf16> to vector<8x8x32xbf16>
    %45 = vector.shape_cast %44 : vector<8x8x32xbf16> to vector<64x32xbf16>
    %c5 = arith.constant 5 : index
    %c0_43 = arith.constant 0 : index
    %c0_44 = arith.constant 0 : index
    %46 = vector.load %arg2[%c5, %c0_43, %c0_44] : memref<16x32x16xbf16, #tpu.memory_space<vmem>>, vector<1x32x16xbf16>
    %47 = vector.shape_cast %46 : vector<1x32x16xbf16> to vector<32x16xbf16>
    %cst_45 = arith.constant dense<0.000000e+00> : vector<64x16xf32>
    %48 = tpu.matmul %45, %47, %cst_45 {dimension_numbers = #tpu.dot_dimension_numbers<[1], [0], [0], [1], [0, 0, 1, 1], [], []>} : vector<64x32xbf16>, vector<32x16xbf16>, vector<64x16xf32> -> vector<64x16xf32>
    %49 = arith.addf %42, %48 : vector<64x16xf32>
    %c0_46 = arith.constant 0 : index
    %c1_47 = arith.constant 1 : index
    %c1_48 = arith.constant 1 : index
    %c0_49 = arith.constant 0 : index
    %50 = vector.load %arg1[%c0_46, %c1_47, %c1_48, %c0_49] : memref<1x10x10x32xbf16, #tpu.memory_space<vmem>>, vector<1x8x8x32xbf16>
    %51 = vector.shape_cast %50 : vector<1x8x8x32xbf16> to vector<8x8x32xbf16>
    %52 = vector.shape_cast %51 : vector<8x8x32xbf16> to vector<64x32xbf16>
    %c6 = arith.constant 6 : index
    %c0_50 = arith.constant 0 : index
    %c0_51 = arith.constant 0 : index
    %53 = vector.load %arg2[%c6, %c0_50, %c0_51] : memref<16x32x16xbf16, #tpu.memory_space<vmem>>, vector<1x32x16xbf16>
    %54 = vector.shape_cast %53 : vector<1x32x16xbf16> to vector<32x16xbf16>
    %cst_52 = arith.constant dense<0.000000e+00> : vector<64x16xf32>
    %55 = tpu.matmul %52, %54, %cst_52 {dimension_numbers = #tpu.dot_dimension_numbers<[1], [0], [0], [1], [0, 0, 1, 1], [], []>} : vector<64x32xbf16>, vector<32x16xbf16>, vector<64x16xf32> -> vector<64x16xf32>
    %56 = arith.addf %49, %55 : vector<64x16xf32>
    %c0_53 = arith.constant 0 : index
    %c1_54 = arith.constant 1 : index
    %c2_55 = arith.constant 2 : index
    %c0_56 = arith.constant 0 : index
    %57 = vector.load %arg1[%c0_53, %c1_54, %c2_55, %c0_56] : memref<1x10x10x32xbf16, #tpu.memory_space<vmem>>, vector<1x8x8x32xbf16>
    %58 = vector.shape_cast %57 : vector<1x8x8x32xbf16> to vector<8x8x32xbf16>
    %59 = vector.shape_cast %58 : vector<8x8x32xbf16> to vector<64x32xbf16>
    %c7 = arith.constant 7 : index
    %c0_57 = arith.constant 0 : index
    %c0_58 = arith.constant 0 : index
    %60 = vector.load %arg2[%c7, %c0_57, %c0_58] : memref<16x32x16xbf16, #tpu.memory_space<vmem>>, vector<1x32x16xbf16>
    %61 = vector.shape_cast %60 : vector<1x32x16xbf16> to vector<32x16xbf16>
    %cst_59 = arith.constant dense<0.000000e+00> : vector<64x16xf32>
    %62 = tpu.matmul %59, %61, %cst_59 {dimension_numbers = #tpu.dot_dimension_numbers<[1], [0], [0], [1], [0, 0, 1, 1], [], []>} : vector<64x32xbf16>, vector<32x16xbf16>, vector<64x16xf32> -> vector<64x16xf32>
    %63 = arith.addf %56, %62 : vector<64x16xf32>
    %c0_60 = arith.constant 0 : index
    %c0_61 = arith.constant 0 : index
    %64 = vector.load %arg3[%c0_60, %c0_61] : memref<1x16xf32, #tpu.memory_space<vmem>>, vector<1x16xf32>
    %65 = vector.broadcast %64 : vector<1x16xf32> to vector<64x16xf32>
    %66 = arith.addf %63, %65 : vector<64x16xf32>
    %cst_62 = arith.constant 0.000000e+00 : f32
    %67 = vector.broadcast %cst_62 : f32 to vector<64x16xf32>
    %68 = arith.maximumf %66, %67 : vector<64x16xf32>
    %69 = vector.shape_cast %68 : vector<64x16xf32> to vector<8x8x16xf32>
    %70 = tpu.concatenate %34, %69 in 2 : vector<8x8x16xf32>, vector<8x8x16xf32> -> vector<8x8x32xf32>
    %71 = arith.truncf %70 : vector<8x8x32xf32> to vector<8x8x32xbf16>
    %c0_63 = arith.constant 0 : index
    %c0_64 = arith.constant 0 : index
    %c0_65 = arith.constant 0 : index
    %c0_66 = arith.constant 0 : index
    %c0_67 = arith.constant 0 : index
    %72 = vector.load %arg4[%c0_63, %c0_64, %c0_65, %c0_66, %c0_67] : memref<1x8x2x8x32xbf16, #tpu.memory_space<vmem>>, vector<1x8x1x8x32xbf16>
    %73 = vector.shape_cast %72 : vector<1x8x1x8x32xbf16> to vector<8x8x32xbf16>
    %74 = vector.shape_cast %71 : vector<8x8x32xbf16> to vector<1x8x1x8x32xbf16>
    tpu.vector_store %arg4[%c0_63, %c0_64, %c0_65, %c0_66, %c0_67], %74 {strides = array<i32>} : memref<1x8x2x8x32xbf16, #tpu.memory_space<vmem>>, vector<1x8x1x8x32xbf16>,
    %cst_68 = arith.constant 0.000000e+00 : f32
    %75 = vector.broadcast %cst_68 : f32 to vector<64x16xf32>
    %c0_69 = arith.constant 0 : index
    %c1_70 = arith.constant 1 : index
    %c0_71 = arith.constant 0 : index
    %c0_72 = arith.constant 0 : index
    %76 = vector.load %arg1[%c0_69, %c1_70, %c0_71, %c0_72] : memref<1x10x10x32xbf16, #tpu.memory_space<vmem>>, vector<1x8x8x32xbf16>
    %77 = vector.shape_cast %76 : vector<1x8x8x32xbf16> to vector<8x8x32xbf16>
    %78 = vector.shape_cast %77 : vector<8x8x32xbf16> to vector<64x32xbf16>
    %c8 = arith.constant 8 : index
    %c0_73 = arith.constant 0 : index
    %c0_74 = arith.constant 0 : index
    %79 = vector.load %arg2[%c8, %c0_73, %c0_74] : memref<16x32x16xbf16, #tpu.memory_space<vmem>>, vector<1x32x16xbf16>
    %80 = vector.shape_cast %79 : vector<1x32x16xbf16> to vector<32x16xbf16>
    %cst_75 = arith.constant dense<0.000000e+00> : vector<64x16xf32>
    %81 = tpu.matmul %78, %80, %cst_75 {dimension_numbers = #tpu.dot_dimension_numbers<[1], [0], [0], [1], [0, 0, 1, 1], [], []>} : vector<64x32xbf16>, vector<32x16xbf16>, vector<64x16xf32> -> vector<64x16xf32>
    %82 = arith.addf %75, %81 : vector<64x16xf32>
    %c0_76 = arith.constant 0 : index
    %c1_77 = arith.constant 1 : index
    %c1_78 = arith.constant 1 : index
    %c0_79 = arith.constant 0 : index
    %83 = vector.load %arg1[%c0_76, %c1_77, %c1_78, %c0_79] : memref<1x10x10x32xbf16, #tpu.memory_space<vmem>>, vector<1x8x8x32xbf16>
    %84 = vector.shape_cast %83 : vector<1x8x8x32xbf16> to vector<8x8x32xbf16>
    %85 = vector.shape_cast %84 : vector<8x8x32xbf16> to vector<64x32xbf16>
    %c9 = arith.constant 9 : index
    %c0_80 = arith.constant 0 : index
    %c0_81 = arith.constant 0 : index
    %86 = vector.load %arg2[%c9, %c0_80, %c0_81] : memref<16x32x16xbf16, #tpu.memory_space<vmem>>, vector<1x32x16xbf16>
    %87 = vector.shape_cast %86 : vector<1x32x16xbf16> to vector<32x16xbf16>
    %cst_82 = arith.constant dense<0.000000e+00> : vector<64x16xf32>
    %88 = tpu.matmul %85, %87, %cst_82 {dimension_numbers = #tpu.dot_dimension_numbers<[1], [0], [0], [1], [0, 0, 1, 1], [], []>} : vector<64x32xbf16>, vector<32x16xbf16>, vector<64x16xf32> -> vector<64x16xf32>
    %89 = arith.addf %82, %88 : vector<64x16xf32>
    %c0_83 = arith.constant 0 : index
    %c2_84 = arith.constant 2 : index
    %c0_85 = arith.constant 0 : index
    %c0_86 = arith.constant 0 : index
    %90 = vector.load %arg1[%c0_83, %c2_84, %c0_85, %c0_86] : memref<1x10x10x32xbf16, #tpu.memory_space<vmem>>, vector<1x8x8x32xbf16>
    %91 = vector.shape_cast %90 : vector<1x8x8x32xbf16> to vector<8x8x32xbf16>
    %92 = vector.shape_cast %91 : vector<8x8x32xbf16> to vector<64x32xbf16>
    %c10 = arith.constant 10 : index
    %c0_87 = arith.constant 0 : index
    %c0_88 = arith.constant 0 : index
    %93 = vector.load %arg2[%c10, %c0_87, %c0_88] : memref<16x32x16xbf16, #tpu.memory_space<vmem>>, vector<1x32x16xbf16>
    %94 = vector.shape_cast %93 : vector<1x32x16xbf16> to vector<32x16xbf16>
    %cst_89 = arith.constant dense<0.000000e+00> : vector<64x16xf32>
    %95 = tpu.matmul %92, %94, %cst_89 {dimension_numbers = #tpu.dot_dimension_numbers<[1], [0], [0], [1], [0, 0, 1, 1], [], []>} : vector<64x32xbf16>, vector<32x16xbf16>, vector<64x16xf32> -> vector<64x16xf32>
    %96 = arith.addf %89, %95 : vector<64x16xf32>
    %c0_90 = arith.constant 0 : index
    %c2_91 = arith.constant 2 : index
    %c1_92 = arith.constant 1 : index
    %c0_93 = arith.constant 0 : index
    %97 = vector.load %arg1[%c0_90, %c2_91, %c1_92, %c0_93] : memref<1x10x10x32xbf16, #tpu.memory_space<vmem>>, vector<1x8x8x32xbf16>
    %98 = vector.shape_cast %97 : vector<1x8x8x32xbf16> to vector<8x8x32xbf16>
    %99 = vector.shape_cast %98 : vector<8x8x32xbf16> to vector<64x32xbf16>
    %c11 = arith.constant 11 : index
    %c0_94 = arith.constant 0 : index
    %c0_95 = arith.constant 0 : index
    %100 = vector.load %arg2[%c11, %c0_94, %c0_95] : memref<16x32x16xbf16, #tpu.memory_space<vmem>>, vector<1x32x16xbf16>
    %101 = vector.shape_cast %100 : vector<1x32x16xbf16> to vector<32x16xbf16>
    %cst_96 = arith.constant dense<0.000000e+00> : vector<64x16xf32>
    %102 = tpu.matmul %99, %101, %cst_96 {dimension_numbers = #tpu.dot_dimension_numbers<[1], [0], [0], [1], [0, 0, 1, 1], [], []>} : vector<64x32xbf16>, vector<32x16xbf16>, vector<64x16xf32> -> vector<64x16xf32>
    %103 = arith.addf %96, %102 : vector<64x16xf32>
    %c0_97 = arith.constant 0 : index
    %c0_98 = arith.constant 0 : index
    %104 = vector.load %arg3[%c0_97, %c0_98] : memref<1x16xf32, #tpu.memory_space<vmem>>, vector<1x16xf32>
    %105 = vector.broadcast %104 : vector<1x16xf32> to vector<64x16xf32>
    %106 = arith.addf %103, %105 : vector<64x16xf32>
    %cst_99 = arith.constant 0.000000e+00 : f32
    %107 = vector.broadcast %cst_99 : f32 to vector<64x16xf32>
    %108 = arith.maximumf %106, %107 : vector<64x16xf32>
    %109 = vector.shape_cast %108 : vector<64x16xf32> to vector<8x8x16xf32>
    %cst_100 = arith.constant 0.000000e+00 : f32
    %110 = vector.broadcast %cst_100 : f32 to vector<64x16xf32>
    %c0_101 = arith.constant 0 : index
    %c1_102 = arith.constant 1 : index
    %c1_103 = arith.constant 1 : index
    %c0_104 = arith.constant 0 : index
    %111 = vector.load %arg1[%c0_101, %c1_102, %c1_103, %c0_104] : memref<1x10x10x32xbf16, #tpu.memory_space<vmem>>, vector<1x8x8x32xbf16>
    %112 = vector.shape_cast %111 : vector<1x8x8x32xbf16> to vector<8x8x32xbf16>
    %113 = vector.shape_cast %112 : vector<8x8x32xbf16> to vector<64x32xbf16>
    %c12 = arith.constant 12 : index
    %c0_105 = arith.constant 0 : index
    %c0_106 = arith.constant 0 : index
    %114 = vector.load %arg2[%c12, %c0_105, %c0_106] : memref<16x32x16xbf16, #tpu.memory_space<vmem>>, vector<1x32x16xbf16>
    %115 = vector.shape_cast %114 : vector<1x32x16xbf16> to vector<32x16xbf16>
    %cst_107 = arith.constant dense<0.000000e+00> : vector<64x16xf32>
    %116 = tpu.matmul %113, %115, %cst_107 {dimension_numbers = #tpu.dot_dimension_numbers<[1], [0], [0], [1], [0, 0, 1, 1], [], []>} : vector<64x32xbf16>, vector<32x16xbf16>, vector<64x16xf32> -> vector<64x16xf32>
    %117 = arith.addf %110, %116 : vector<64x16xf32>
    %c0_108 = arith.constant 0 : index
    %c1_109 = arith.constant 1 : index
    %c2_110 = arith.constant 2 : index
    %c0_111 = arith.constant 0 : index
    %118 = vector.load %arg1[%c0_108, %c1_109, %c2_110, %c0_111] : memref<1x10x10x32xbf16, #tpu.memory_space<vmem>>, vector<1x8x8x32xbf16>
    %119 = vector.shape_cast %118 : vector<1x8x8x32xbf16> to vector<8x8x32xbf16>
    %120 = vector.shape_cast %119 : vector<8x8x32xbf16> to vector<64x32xbf16>
    %c13 = arith.constant 13 : index
    %c0_112 = arith.constant 0 : index
    %c0_113 = arith.constant 0 : index
    %121 = vector.load %arg2[%c13, %c0_112, %c0_113] : memref<16x32x16xbf16, #tpu.memory_space<vmem>>, vector<1x32x16xbf16>
    %122 = vector.shape_cast %121 : vector<1x32x16xbf16> to vector<32x16xbf16>
    %cst_114 = arith.constant dense<0.000000e+00> : vector<64x16xf32>
    %123 = tpu.matmul %120, %122, %cst_114 {dimension_numbers = #tpu.dot_dimension_numbers<[1], [0], [0], [1], [0, 0, 1, 1], [], []>} : vector<64x32xbf16>, vector<32x16xbf16>, vector<64x16xf32> -> vector<64x16xf32>
    %124 = arith.addf %117, %123 : vector<64x16xf32>
    %c0_115 = arith.constant 0 : index
    %c2_116 = arith.constant 2 : index
    %c1_117 = arith.constant 1 : index
    %c0_118 = arith.constant 0 : index
    %125 = vector.load %arg1[%c0_115, %c2_116, %c1_117, %c0_118] : memref<1x10x10x32xbf16, #tpu.memory_space<vmem>>, vector<1x8x8x32xbf16>
    %126 = vector.shape_cast %125 : vector<1x8x8x32xbf16> to vector<8x8x32xbf16>
    %127 = vector.shape_cast %126 : vector<8x8x32xbf16> to vector<64x32xbf16>
    %c14 = arith.constant 14 : index
    %c0_119 = arith.constant 0 : index
    %c0_120 = arith.constant 0 : index
    %128 = vector.load %arg2[%c14, %c0_119, %c0_120] : memref<16x32x16xbf16, #tpu.memory_space<vmem>>, vector<1x32x16xbf16>
    %129 = vector.shape_cast %128 : vector<1x32x16xbf16> to vector<32x16xbf16>
    %cst_121 = arith.constant dense<0.000000e+00> : vector<64x16xf32>
    %130 = tpu.matmul %127, %129, %cst_121 {dimension_numbers = #tpu.dot_dimension_numbers<[1], [0], [0], [1], [0, 0, 1, 1], [], []>} : vector<64x32xbf16>, vector<32x16xbf16>, vector<64x16xf32> -> vector<64x16xf32>
    %131 = arith.addf %124, %130 : vector<64x16xf32>
    %c0_122 = arith.constant 0 : index
    %c2_123 = arith.constant 2 : index
    %c2_124 = arith.constant 2 : index
    %c0_125 = arith.constant 0 : index
    %132 = vector.load %arg1[%c0_122, %c2_123, %c2_124, %c0_125] : memref<1x10x10x32xbf16, #tpu.memory_space<vmem>>, vector<1x8x8x32xbf16>
    %133 = vector.shape_cast %132 : vector<1x8x8x32xbf16> to vector<8x8x32xbf16>
    %134 = vector.shape_cast %133 : vector<8x8x32xbf16> to vector<64x32xbf16>
    %c15 = arith.constant 15 : index
    %c0_126 = arith.constant 0 : index
    %c0_127 = arith.constant 0 : index
    %135 = vector.load %arg2[%c15, %c0_126, %c0_127] : memref<16x32x16xbf16, #tpu.memory_space<vmem>>, vector<1x32x16xbf16>
    %136 = vector.shape_cast %135 : vector<1x32x16xbf16> to vector<32x16xbf16>
    %cst_128 = arith.constant dense<0.000000e+00> : vector<64x16xf32>
    %137 = tpu.matmul %134, %136, %cst_128 {dimension_numbers = #tpu.dot_dimension_numbers<[1], [0], [0], [1], [0, 0, 1, 1], [], []>} : vector<64x32xbf16>, vector<32x16xbf16>, vector<64x16xf32> -> vector<64x16xf32>
    %138 = arith.addf %131, %137 : vector<64x16xf32>
    %c0_129 = arith.constant 0 : index
    %c0_130 = arith.constant 0 : index
    %139 = vector.load %arg3[%c0_129, %c0_130] : memref<1x16xf32, #tpu.memory_space<vmem>>, vector<1x16xf32>
    %140 = vector.broadcast %139 : vector<1x16xf32> to vector<64x16xf32>
    %141 = arith.addf %138, %140 : vector<64x16xf32>
    %cst_131 = arith.constant 0.000000e+00 : f32
    %142 = vector.broadcast %cst_131 : f32 to vector<64x16xf32>
    %143 = arith.maximumf %141, %142 : vector<64x16xf32>
    %144 = vector.shape_cast %143 : vector<64x16xf32> to vector<8x8x16xf32>
    %145 = tpu.concatenate %109, %144 in 2 : vector<8x8x16xf32>, vector<8x8x16xf32> -> vector<8x8x32xf32>
    %146 = arith.truncf %145 : vector<8x8x32xf32> to vector<8x8x32xbf16>
    %c0_132 = arith.constant 0 : index
    %c0_133 = arith.constant 0 : index
    %c1_134 = arith.constant 1 : index
    %c0_135 = arith.constant 0 : index
    %c0_136 = arith.constant 0 : index
    %147 = vector.load %arg4[%c0_132, %c0_133, %c1_134, %c0_135, %c0_136] : memref<1x8x2x8x32xbf16, #tpu.memory_space<vmem>>, vector<1x8x1x8x32xbf16>
    %148 = vector.shape_cast %147 : vector<1x8x1x8x32xbf16> to vector<8x8x32xbf16>
    %149 = vector.shape_cast %146 : vector<8x8x32xbf16> to vector<1x8x1x8x32xbf16>
    tpu.vector_store %arg4[%c0_132, %c0_133, %c1_134, %c0_135, %c0_136], %149 {strides = array<i32>} : memref<1x8x2x8x32xbf16, #tpu.memory_space<vmem>>, vector<1x8x1x8x32xbf16>,
    return
  }
  func.func @transform_0(%arg0: i32) -> (i32, i32, i32, i32) {
    %c0_i32 = arith.constant 0 : i32
    %c0_i32_0 = arith.constant 0 : i32
    %c0_i32_1 = arith.constant 0 : i32
    %c0_i32_2 = arith.constant 0 : i32
    return %arg0, %c0_i32, %c0_i32_0, %c0_i32_1 : i32, i32, i32, i32
  }
  func.func @transform_1(%arg0: i32) -> (i32, i32, i32) {
    %c0_i32 = arith.constant 0 : i32
    %c0_i32_0 = arith.constant 0 : i32
    %c0_i32_1 = arith.constant 0 : i32
    %c0_i32_2 = arith.constant 0 : i32
    return %c0_i32, %c0_i32_0, %c0_i32_1 : i32, i32, i32
  }
  func.func @transform_2(%arg0: i32) -> (i32, i32) {
    %c0_i32 = arith.constant 0 : i32
    %c0_i32_0 = arith.constant 0 : i32
    %c0_i32_1 = arith.constant 0 : i32
    return %c0_i32, %c0_i32_0 : i32, i32
  }
  func.func @transform_3(%arg0: i32) -> (i32, i32, i32, i32, i32) {
    %c0_i32 = arith.constant 0 : i32
    %c0_i32_0 = arith.constant 0 : i32
    %c0_i32_1 = arith.constant 0 : i32
    %c0_i32_2 = arith.constant 0 : i32
    %c0_i32_3 = arith.constant 0 : i32
    return %arg0, %c0_i32, %c0_i32_0, %c0_i32_1, %c0_i32_2 : i32, i32, i32, i32, i32
  }
}

module attributes {stable_mosaic.version = 11 : i64} {
  func.func @_stage1_kernel(%arg0: i32, %arg1: memref<1x10x10x4xbf16, #tpu.memory_space<vmem>>, %arg2: memref<9x4x32xbf16, #tpu.memory_space<vmem>>, %arg3: memref<1x32xf32, #tpu.memory_space<vmem>>, %arg4: memref<2x9x32x8xbf16, #tpu.memory_space<vmem>>, %arg5: memref<2x8x32xbf16, #tpu.memory_space<vmem>>, %arg6: memref<1x10x10x32xbf16, #tpu.memory_space<vmem>>, %arg7: memref<10x10x32xf32, #tpu.memory_space<vmem>>) attributes {dimension_semantics = [#tpu.dimension_semantics<parallel>], iteration_bounds = array<i64: 2>, scalar_prefetch = 0 : i64, scratch_operands = 1 : i64, tpu.core_type = #tpu.core_type<tc>, window_params = [{transform_indices = @transform_0, window_bounds = array<i64: 1, 10, 10, 4>}, {pipeline_mode = #tpu.pipeline_mode<synchronous>, transform_indices = @transform_1, window_bounds = array<i64: 9, 4, 32>}, {pipeline_mode = #tpu.pipeline_mode<synchronous>, transform_indices = @transform_2, window_bounds = array<i64: 1, 32>}, {pipeline_mode = #tpu.pipeline_mode<synchronous>, transform_indices = @transform_3, window_bounds = array<i64: 2, 9, 32, 8>}, {pipeline_mode = #tpu.pipeline_mode<synchronous>, transform_indices = @transform_4, window_bounds = array<i64: 2, 8, 32>}, {transform_indices = @transform_5, window_bounds = array<i64: 1, 10, 10, 32>}]} {
    %cst = arith.constant 0.000000e+00 : f32
    %0 = vector.broadcast %cst : f32 to vector<64x32xf32>
    %c0 = arith.constant 0 : index
    %c0_0 = arith.constant 0 : index
    %c0_1 = arith.constant 0 : index
    %c0_2 = arith.constant 0 : index
    %1 = vector.load %arg1[%c0, %c0_0, %c0_1, %c0_2] : memref<1x10x10x4xbf16, #tpu.memory_space<vmem>>, vector<1x8x8x4xbf16>
    %2 = vector.shape_cast %1 : vector<1x8x8x4xbf16> to vector<8x8x4xbf16>
    %3 = vector.shape_cast %2 : vector<8x8x4xbf16> to vector<64x4xbf16>
    %c0_3 = arith.constant 0 : index
    %c0_4 = arith.constant 0 : index
    %c0_5 = arith.constant 0 : index
    %4 = vector.load %arg2[%c0_3, %c0_4, %c0_5] : memref<9x4x32xbf16, #tpu.memory_space<vmem>>, vector<1x4x32xbf16>
    %5 = vector.shape_cast %4 : vector<1x4x32xbf16> to vector<4x32xbf16>
    %cst_6 = arith.constant dense<0.000000e+00> : vector<64x32xf32>
    %6 = tpu.matmul %3, %5, %cst_6 {dimension_numbers = #tpu.dot_dimension_numbers<[1], [0], [0], [1], [0, 0, 1, 1], [], []>} : vector<64x4xbf16>, vector<4x32xbf16>, vector<64x32xf32> -> vector<64x32xf32>
    %7 = arith.addf %0, %6 : vector<64x32xf32>
    %c0_7 = arith.constant 0 : index
    %c0_8 = arith.constant 0 : index
    %c1 = arith.constant 1 : index
    %c0_9 = arith.constant 0 : index
    %8 = vector.load %arg1[%c0_7, %c0_8, %c1, %c0_9] : memref<1x10x10x4xbf16, #tpu.memory_space<vmem>>, vector<1x8x8x4xbf16>
    %9 = vector.shape_cast %8 : vector<1x8x8x4xbf16> to vector<8x8x4xbf16>
    %10 = vector.shape_cast %9 : vector<8x8x4xbf16> to vector<64x4xbf16>
    %c1_10 = arith.constant 1 : index
    %c0_11 = arith.constant 0 : index
    %c0_12 = arith.constant 0 : index
    %11 = vector.load %arg2[%c1_10, %c0_11, %c0_12] : memref<9x4x32xbf16, #tpu.memory_space<vmem>>, vector<1x4x32xbf16>
    %12 = vector.shape_cast %11 : vector<1x4x32xbf16> to vector<4x32xbf16>
    %cst_13 = arith.constant dense<0.000000e+00> : vector<64x32xf32>
    %13 = tpu.matmul %10, %12, %cst_13 {dimension_numbers = #tpu.dot_dimension_numbers<[1], [0], [0], [1], [0, 0, 1, 1], [], []>} : vector<64x4xbf16>, vector<4x32xbf16>, vector<64x32xf32> -> vector<64x32xf32>
    %14 = arith.addf %7, %13 : vector<64x32xf32>
    %c0_14 = arith.constant 0 : index
    %c0_15 = arith.constant 0 : index
    %c2 = arith.constant 2 : index
    %c0_16 = arith.constant 0 : index
    %15 = vector.load %arg1[%c0_14, %c0_15, %c2, %c0_16] : memref<1x10x10x4xbf16, #tpu.memory_space<vmem>>, vector<1x8x8x4xbf16>
    %16 = vector.shape_cast %15 : vector<1x8x8x4xbf16> to vector<8x8x4xbf16>
    %17 = vector.shape_cast %16 : vector<8x8x4xbf16> to vector<64x4xbf16>
    %c2_17 = arith.constant 2 : index
    %c0_18 = arith.constant 0 : index
    %c0_19 = arith.constant 0 : index
    %18 = vector.load %arg2[%c2_17, %c0_18, %c0_19] : memref<9x4x32xbf16, #tpu.memory_space<vmem>>, vector<1x4x32xbf16>
    %19 = vector.shape_cast %18 : vector<1x4x32xbf16> to vector<4x32xbf16>
    %cst_20 = arith.constant dense<0.000000e+00> : vector<64x32xf32>
    %20 = tpu.matmul %17, %19, %cst_20 {dimension_numbers = #tpu.dot_dimension_numbers<[1], [0], [0], [1], [0, 0, 1, 1], [], []>} : vector<64x4xbf16>, vector<4x32xbf16>, vector<64x32xf32> -> vector<64x32xf32>
    %21 = arith.addf %14, %20 : vector<64x32xf32>
    %c0_21 = arith.constant 0 : index
    %c1_22 = arith.constant 1 : index
    %c0_23 = arith.constant 0 : index
    %c0_24 = arith.constant 0 : index
    %22 = vector.load %arg1[%c0_21, %c1_22, %c0_23, %c0_24] : memref<1x10x10x4xbf16, #tpu.memory_space<vmem>>, vector<1x8x8x4xbf16>
    %23 = vector.shape_cast %22 : vector<1x8x8x4xbf16> to vector<8x8x4xbf16>
    %24 = vector.shape_cast %23 : vector<8x8x4xbf16> to vector<64x4xbf16>
    %c3 = arith.constant 3 : index
    %c0_25 = arith.constant 0 : index
    %c0_26 = arith.constant 0 : index
    %25 = vector.load %arg2[%c3, %c0_25, %c0_26] : memref<9x4x32xbf16, #tpu.memory_space<vmem>>, vector<1x4x32xbf16>
    %26 = vector.shape_cast %25 : vector<1x4x32xbf16> to vector<4x32xbf16>
    %cst_27 = arith.constant dense<0.000000e+00> : vector<64x32xf32>
    %27 = tpu.matmul %24, %26, %cst_27 {dimension_numbers = #tpu.dot_dimension_numbers<[1], [0], [0], [1], [0, 0, 1, 1], [], []>} : vector<64x4xbf16>, vector<4x32xbf16>, vector<64x32xf32> -> vector<64x32xf32>
    %28 = arith.addf %21, %27 : vector<64x32xf32>
    %c0_28 = arith.constant 0 : index
    %c1_29 = arith.constant 1 : index
    %c1_30 = arith.constant 1 : index
    %c0_31 = arith.constant 0 : index
    %29 = vector.load %arg1[%c0_28, %c1_29, %c1_30, %c0_31] : memref<1x10x10x4xbf16, #tpu.memory_space<vmem>>, vector<1x8x8x4xbf16>
    %30 = vector.shape_cast %29 : vector<1x8x8x4xbf16> to vector<8x8x4xbf16>
    %31 = vector.shape_cast %30 : vector<8x8x4xbf16> to vector<64x4xbf16>
    %c4 = arith.constant 4 : index
    %c0_32 = arith.constant 0 : index
    %c0_33 = arith.constant 0 : index
    %32 = vector.load %arg2[%c4, %c0_32, %c0_33] : memref<9x4x32xbf16, #tpu.memory_space<vmem>>, vector<1x4x32xbf16>
    %33 = vector.shape_cast %32 : vector<1x4x32xbf16> to vector<4x32xbf16>
    %cst_34 = arith.constant dense<0.000000e+00> : vector<64x32xf32>
    %34 = tpu.matmul %31, %33, %cst_34 {dimension_numbers = #tpu.dot_dimension_numbers<[1], [0], [0], [1], [0, 0, 1, 1], [], []>} : vector<64x4xbf16>, vector<4x32xbf16>, vector<64x32xf32> -> vector<64x32xf32>
    %35 = arith.addf %28, %34 : vector<64x32xf32>
    %c0_35 = arith.constant 0 : index
    %c1_36 = arith.constant 1 : index
    %c2_37 = arith.constant 2 : index
    %c0_38 = arith.constant 0 : index
    %36 = vector.load %arg1[%c0_35, %c1_36, %c2_37, %c0_38] : memref<1x10x10x4xbf16, #tpu.memory_space<vmem>>, vector<1x8x8x4xbf16>
    %37 = vector.shape_cast %36 : vector<1x8x8x4xbf16> to vector<8x8x4xbf16>
    %38 = vector.shape_cast %37 : vector<8x8x4xbf16> to vector<64x4xbf16>
    %c5 = arith.constant 5 : index
    %c0_39 = arith.constant 0 : index
    %c0_40 = arith.constant 0 : index
    %39 = vector.load %arg2[%c5, %c0_39, %c0_40] : memref<9x4x32xbf16, #tpu.memory_space<vmem>>, vector<1x4x32xbf16>
    %40 = vector.shape_cast %39 : vector<1x4x32xbf16> to vector<4x32xbf16>
    %cst_41 = arith.constant dense<0.000000e+00> : vector<64x32xf32>
    %41 = tpu.matmul %38, %40, %cst_41 {dimension_numbers = #tpu.dot_dimension_numbers<[1], [0], [0], [1], [0, 0, 1, 1], [], []>} : vector<64x4xbf16>, vector<4x32xbf16>, vector<64x32xf32> -> vector<64x32xf32>
    %42 = arith.addf %35, %41 : vector<64x32xf32>
    %c0_42 = arith.constant 0 : index
    %c2_43 = arith.constant 2 : index
    %c0_44 = arith.constant 0 : index
    %c0_45 = arith.constant 0 : index
    %43 = vector.load %arg1[%c0_42, %c2_43, %c0_44, %c0_45] : memref<1x10x10x4xbf16, #tpu.memory_space<vmem>>, vector<1x8x8x4xbf16>
    %44 = vector.shape_cast %43 : vector<1x8x8x4xbf16> to vector<8x8x4xbf16>
    %45 = vector.shape_cast %44 : vector<8x8x4xbf16> to vector<64x4xbf16>
    %c6 = arith.constant 6 : index
    %c0_46 = arith.constant 0 : index
    %c0_47 = arith.constant 0 : index
    %46 = vector.load %arg2[%c6, %c0_46, %c0_47] : memref<9x4x32xbf16, #tpu.memory_space<vmem>>, vector<1x4x32xbf16>
    %47 = vector.shape_cast %46 : vector<1x4x32xbf16> to vector<4x32xbf16>
    %cst_48 = arith.constant dense<0.000000e+00> : vector<64x32xf32>
    %48 = tpu.matmul %45, %47, %cst_48 {dimension_numbers = #tpu.dot_dimension_numbers<[1], [0], [0], [1], [0, 0, 1, 1], [], []>} : vector<64x4xbf16>, vector<4x32xbf16>, vector<64x32xf32> -> vector<64x32xf32>
    %49 = arith.addf %42, %48 : vector<64x32xf32>
    %c0_49 = arith.constant 0 : index
    %c2_50 = arith.constant 2 : index
    %c1_51 = arith.constant 1 : index
    %c0_52 = arith.constant 0 : index
    %50 = vector.load %arg1[%c0_49, %c2_50, %c1_51, %c0_52] : memref<1x10x10x4xbf16, #tpu.memory_space<vmem>>, vector<1x8x8x4xbf16>
    %51 = vector.shape_cast %50 : vector<1x8x8x4xbf16> to vector<8x8x4xbf16>
    %52 = vector.shape_cast %51 : vector<8x8x4xbf16> to vector<64x4xbf16>
    %c7 = arith.constant 7 : index
    %c0_53 = arith.constant 0 : index
    %c0_54 = arith.constant 0 : index
    %53 = vector.load %arg2[%c7, %c0_53, %c0_54] : memref<9x4x32xbf16, #tpu.memory_space<vmem>>, vector<1x4x32xbf16>
    %54 = vector.shape_cast %53 : vector<1x4x32xbf16> to vector<4x32xbf16>
    %cst_55 = arith.constant dense<0.000000e+00> : vector<64x32xf32>
    %55 = tpu.matmul %52, %54, %cst_55 {dimension_numbers = #tpu.dot_dimension_numbers<[1], [0], [0], [1], [0, 0, 1, 1], [], []>} : vector<64x4xbf16>, vector<4x32xbf16>, vector<64x32xf32> -> vector<64x32xf32>
    %56 = arith.addf %49, %55 : vector<64x32xf32>
    %c0_56 = arith.constant 0 : index
    %c2_57 = arith.constant 2 : index
    %c2_58 = arith.constant 2 : index
    %c0_59 = arith.constant 0 : index
    %57 = vector.load %arg1[%c0_56, %c2_57, %c2_58, %c0_59] : memref<1x10x10x4xbf16, #tpu.memory_space<vmem>>, vector<1x8x8x4xbf16>
    %58 = vector.shape_cast %57 : vector<1x8x8x4xbf16> to vector<8x8x4xbf16>
    %59 = vector.shape_cast %58 : vector<8x8x4xbf16> to vector<64x4xbf16>
    %c8 = arith.constant 8 : index
    %c0_60 = arith.constant 0 : index
    %c0_61 = arith.constant 0 : index
    %60 = vector.load %arg2[%c8, %c0_60, %c0_61] : memref<9x4x32xbf16, #tpu.memory_space<vmem>>, vector<1x4x32xbf16>
    %61 = vector.shape_cast %60 : vector<1x4x32xbf16> to vector<4x32xbf16>
    %cst_62 = arith.constant dense<0.000000e+00> : vector<64x32xf32>
    %62 = tpu.matmul %59, %61, %cst_62 {dimension_numbers = #tpu.dot_dimension_numbers<[1], [0], [0], [1], [0, 0, 1, 1], [], []>} : vector<64x4xbf16>, vector<4x32xbf16>, vector<64x32xf32> -> vector<64x32xf32>
    %63 = arith.addf %56, %62 : vector<64x32xf32>
    %c0_63 = arith.constant 0 : index
    %c0_64 = arith.constant 0 : index
    %64 = vector.load %arg3[%c0_63, %c0_64] : memref<1x32xf32, #tpu.memory_space<vmem>>, vector<1x32xf32>
    %65 = vector.broadcast %64 : vector<1x32xf32> to vector<64x32xf32>
    %66 = arith.addf %63, %65 : vector<64x32xf32>
    %cst_65 = arith.constant 0.000000e+00 : f32
    %67 = vector.broadcast %cst_65 : f32 to vector<10x10x32xf32>
    %c0_66 = arith.constant 0 : index
    %c0_67 = arith.constant 0 : index
    %c0_68 = arith.constant 0 : index
    %68 = vector.load %arg7[%c0_66, %c0_67, %c0_68] : memref<10x10x32xf32, #tpu.memory_space<vmem>>, vector<10x10x32xf32>
    tpu.vector_store %arg7[%c0_66, %c0_67, %c0_68], %67 {strides = array<i32>} : memref<10x10x32xf32, #tpu.memory_space<vmem>>, vector<10x10x32xf32>,
    %69 = vector.shape_cast %66 : vector<64x32xf32> to vector<8x8x32xf32>
    %c1_69 = arith.constant 1 : index
    %c1_70 = arith.constant 1 : index
    %c0_71 = arith.constant 0 : index
    %70 = vector.load %arg7[%c1_69, %c1_70, %c0_71] : memref<10x10x32xf32, #tpu.memory_space<vmem>>, vector<8x8x32xf32>
    tpu.vector_store %arg7[%c1_69, %c1_70, %c0_71], %69 {strides = array<i32>} : memref<10x10x32xf32, #tpu.memory_space<vmem>>, vector<8x8x32xf32>,
    %c0_72 = arith.constant 0 : index
    %c0_73 = arith.constant 0 : index
    %c0_74 = arith.constant 0 : index
    %71 = vector.load %arg7[%c0_72, %c0_73, %c0_74] : memref<10x10x32xf32, #tpu.memory_space<vmem>>, vector<10x10x32xf32>
    %cst_75 = arith.constant 0.000000e+00 : f32
    %72 = vector.broadcast %cst_75 : f32 to vector<10x10x32xf32>
    %73 = arith.maximumf %71, %72 : vector<10x10x32xf32>
    %74 = arith.truncf %73 : vector<10x10x32xf32> to vector<10x10x32xbf16>
    %cst_76 = arith.constant 0.000000e+00 : f32
    %75 = vector.broadcast %cst_76 : f32 to vector<64x8xf32>
    %76 = vector.extract_strided_slice %74 {offsets = [0, 0, 0], sizes = [8, 8, 32], strides = [1, 1, 1]} : vector<10x10x32xbf16> to vector<8x8x32xbf16>
    %77 = vector.shape_cast %76 : vector<8x8x32xbf16> to vector<64x32xbf16>
    %c0_77 = arith.constant 0 : index
    %c0_78 = arith.constant 0 : index
    %c0_79 = arith.constant 0 : index
    %c0_80 = arith.constant 0 : index
    %78 = vector.load %arg4[%c0_77, %c0_78, %c0_79, %c0_80] : memref<2x9x32x8xbf16, #tpu.memory_space<vmem>>, vector<1x1x32x8xbf16>
    %79 = vector.shape_cast %78 : vector<1x1x32x8xbf16> to vector<32x8xbf16>
    %cst_81 = arith.constant dense<0.000000e+00> : vector<64x8xf32>
    %80 = tpu.matmul %77, %79, %cst_81 {dimension_numbers = #tpu.dot_dimension_numbers<[1], [0], [0], [1], [0, 0, 1, 1], [], []>} : vector<64x32xbf16>, vector<32x8xbf16>, vector<64x8xf32> -> vector<64x8xf32>
    %81 = arith.addf %75, %80 : vector<64x8xf32>
    %82 = vector.extract_strided_slice %74 {offsets = [0, 1, 0], sizes = [8, 8, 32], strides = [1, 1, 1]} : vector<10x10x32xbf16> to vector<8x8x32xbf16>
    %83 = vector.shape_cast %82 : vector<8x8x32xbf16> to vector<64x32xbf16>
    %c0_82 = arith.constant 0 : index
    %c1_83 = arith.constant 1 : index
    %c0_84 = arith.constant 0 : index
    %c0_85 = arith.constant 0 : index
    %84 = vector.load %arg4[%c0_82, %c1_83, %c0_84, %c0_85] : memref<2x9x32x8xbf16, #tpu.memory_space<vmem>>, vector<1x1x32x8xbf16>
    %85 = vector.shape_cast %84 : vector<1x1x32x8xbf16> to vector<32x8xbf16>
    %cst_86 = arith.constant dense<0.000000e+00> : vector<64x8xf32>
    %86 = tpu.matmul %83, %85, %cst_86 {dimension_numbers = #tpu.dot_dimension_numbers<[1], [0], [0], [1], [0, 0, 1, 1], [], []>} : vector<64x32xbf16>, vector<32x8xbf16>, vector<64x8xf32> -> vector<64x8xf32>
    %87 = arith.addf %81, %86 : vector<64x8xf32>
    %88 = vector.extract_strided_slice %74 {offsets = [0, 2, 0], sizes = [8, 8, 32], strides = [1, 1, 1]} : vector<10x10x32xbf16> to vector<8x8x32xbf16>
    %89 = vector.shape_cast %88 : vector<8x8x32xbf16> to vector<64x32xbf16>
    %c0_87 = arith.constant 0 : index
    %c2_88 = arith.constant 2 : index
    %c0_89 = arith.constant 0 : index
    %c0_90 = arith.constant 0 : index
    %90 = vector.load %arg4[%c0_87, %c2_88, %c0_89, %c0_90] : memref<2x9x32x8xbf16, #tpu.memory_space<vmem>>, vector<1x1x32x8xbf16>
    %91 = vector.shape_cast %90 : vector<1x1x32x8xbf16> to vector<32x8xbf16>
    %cst_91 = arith.constant dense<0.000000e+00> : vector<64x8xf32>
    %92 = tpu.matmul %89, %91, %cst_91 {dimension_numbers = #tpu.dot_dimension_numbers<[1], [0], [0], [1], [0, 0, 1, 1], [], []>} : vector<64x32xbf16>, vector<32x8xbf16>, vector<64x8xf32> -> vector<64x8xf32>
    %93 = arith.addf %87, %92 : vector<64x8xf32>
    %94 = vector.extract_strided_slice %74 {offsets = [1, 0, 0], sizes = [8, 8, 32], strides = [1, 1, 1]} : vector<10x10x32xbf16> to vector<8x8x32xbf16>
    %95 = vector.shape_cast %94 : vector<8x8x32xbf16> to vector<64x32xbf16>
    %c0_92 = arith.constant 0 : index
    %c3_93 = arith.constant 3 : index
    %c0_94 = arith.constant 0 : index
    %c0_95 = arith.constant 0 : index
    %96 = vector.load %arg4[%c0_92, %c3_93, %c0_94, %c0_95] : memref<2x9x32x8xbf16, #tpu.memory_space<vmem>>, vector<1x1x32x8xbf16>
    %97 = vector.shape_cast %96 : vector<1x1x32x8xbf16> to vector<32x8xbf16>
    %cst_96 = arith.constant dense<0.000000e+00> : vector<64x8xf32>
    %98 = tpu.matmul %95, %97, %cst_96 {dimension_numbers = #tpu.dot_dimension_numbers<[1], [0], [0], [1], [0, 0, 1, 1], [], []>} : vector<64x32xbf16>, vector<32x8xbf16>, vector<64x8xf32> -> vector<64x8xf32>
    %99 = arith.addf %93, %98 : vector<64x8xf32>
    %100 = vector.extract_strided_slice %74 {offsets = [1, 1, 0], sizes = [8, 8, 32], strides = [1, 1, 1]} : vector<10x10x32xbf16> to vector<8x8x32xbf16>
    %101 = vector.shape_cast %100 : vector<8x8x32xbf16> to vector<64x32xbf16>
    %c0_97 = arith.constant 0 : index
    %c4_98 = arith.constant 4 : index
    %c0_99 = arith.constant 0 : index
    %c0_100 = arith.constant 0 : index
    %102 = vector.load %arg4[%c0_97, %c4_98, %c0_99, %c0_100] : memref<2x9x32x8xbf16, #tpu.memory_space<vmem>>, vector<1x1x32x8xbf16>
    %103 = vector.shape_cast %102 : vector<1x1x32x8xbf16> to vector<32x8xbf16>
    %cst_101 = arith.constant dense<0.000000e+00> : vector<64x8xf32>
    %104 = tpu.matmul %101, %103, %cst_101 {dimension_numbers = #tpu.dot_dimension_numbers<[1], [0], [0], [1], [0, 0, 1, 1], [], []>} : vector<64x32xbf16>, vector<32x8xbf16>, vector<64x8xf32> -> vector<64x8xf32>
    %105 = arith.addf %99, %104 : vector<64x8xf32>
    %106 = vector.extract_strided_slice %74 {offsets = [1, 2, 0], sizes = [8, 8, 32], strides = [1, 1, 1]} : vector<10x10x32xbf16> to vector<8x8x32xbf16>
    %107 = vector.shape_cast %106 : vector<8x8x32xbf16> to vector<64x32xbf16>
    %c0_102 = arith.constant 0 : index
    %c5_103 = arith.constant 5 : index
    %c0_104 = arith.constant 0 : index
    %c0_105 = arith.constant 0 : index
    %108 = vector.load %arg4[%c0_102, %c5_103, %c0_104, %c0_105] : memref<2x9x32x8xbf16, #tpu.memory_space<vmem>>, vector<1x1x32x8xbf16>
    %109 = vector.shape_cast %108 : vector<1x1x32x8xbf16> to vector<32x8xbf16>
    %cst_106 = arith.constant dense<0.000000e+00> : vector<64x8xf32>
    %110 = tpu.matmul %107, %109, %cst_106 {dimension_numbers = #tpu.dot_dimension_numbers<[1], [0], [0], [1], [0, 0, 1, 1], [], []>} : vector<64x32xbf16>, vector<32x8xbf16>, vector<64x8xf32> -> vector<64x8xf32>
    %111 = arith.addf %105, %110 : vector<64x8xf32>
    %112 = vector.extract_strided_slice %74 {offsets = [2, 0, 0], sizes = [8, 8, 32], strides = [1, 1, 1]} : vector<10x10x32xbf16> to vector<8x8x32xbf16>
    %113 = vector.shape_cast %112 : vector<8x8x32xbf16> to vector<64x32xbf16>
    %c0_107 = arith.constant 0 : index
    %c6_108 = arith.constant 6 : index
    %c0_109 = arith.constant 0 : index
    %c0_110 = arith.constant 0 : index
    %114 = vector.load %arg4[%c0_107, %c6_108, %c0_109, %c0_110] : memref<2x9x32x8xbf16, #tpu.memory_space<vmem>>, vector<1x1x32x8xbf16>
    %115 = vector.shape_cast %114 : vector<1x1x32x8xbf16> to vector<32x8xbf16>
    %cst_111 = arith.constant dense<0.000000e+00> : vector<64x8xf32>
    %116 = tpu.matmul %113, %115, %cst_111 {dimension_numbers = #tpu.dot_dimension_numbers<[1], [0], [0], [1], [0, 0, 1, 1], [], []>} : vector<64x32xbf16>, vector<32x8xbf16>, vector<64x8xf32> -> vector<64x8xf32>
    %117 = arith.addf %111, %116 : vector<64x8xf32>
    %118 = vector.extract_strided_slice %74 {offsets = [2, 1, 0], sizes = [8, 8, 32], strides = [1, 1, 1]} : vector<10x10x32xbf16> to vector<8x8x32xbf16>
    %119 = vector.shape_cast %118 : vector<8x8x32xbf16> to vector<64x32xbf16>
    %c0_112 = arith.constant 0 : index
    %c7_113 = arith.constant 7 : index
    %c0_114 = arith.constant 0 : index
    %c0_115 = arith.constant 0 : index
    %120 = vector.load %arg4[%c0_112, %c7_113, %c0_114, %c0_115] : memref<2x9x32x8xbf16, #tpu.memory_space<vmem>>, vector<1x1x32x8xbf16>
    %121 = vector.shape_cast %120 : vector<1x1x32x8xbf16> to vector<32x8xbf16>
    %cst_116 = arith.constant dense<0.000000e+00> : vector<64x8xf32>
    %122 = tpu.matmul %119, %121, %cst_116 {dimension_numbers = #tpu.dot_dimension_numbers<[1], [0], [0], [1], [0, 0, 1, 1], [], []>} : vector<64x32xbf16>, vector<32x8xbf16>, vector<64x8xf32> -> vector<64x8xf32>
    %123 = arith.addf %117, %122 : vector<64x8xf32>
    %124 = vector.extract_strided_slice %74 {offsets = [2, 2, 0], sizes = [8, 8, 32], strides = [1, 1, 1]} : vector<10x10x32xbf16> to vector<8x8x32xbf16>
    %125 = vector.shape_cast %124 : vector<8x8x32xbf16> to vector<64x32xbf16>
    %c0_117 = arith.constant 0 : index
    %c8_118 = arith.constant 8 : index
    %c0_119 = arith.constant 0 : index
    %c0_120 = arith.constant 0 : index
    %126 = vector.load %arg4[%c0_117, %c8_118, %c0_119, %c0_120] : memref<2x9x32x8xbf16, #tpu.memory_space<vmem>>, vector<1x1x32x8xbf16>
    %127 = vector.shape_cast %126 : vector<1x1x32x8xbf16> to vector<32x8xbf16>
    %cst_121 = arith.constant dense<0.000000e+00> : vector<64x8xf32>
    %128 = tpu.matmul %125, %127, %cst_121 {dimension_numbers = #tpu.dot_dimension_numbers<[1], [0], [0], [1], [0, 0, 1, 1], [], []>} : vector<64x32xbf16>, vector<32x8xbf16>, vector<64x8xf32> -> vector<64x8xf32>
    %129 = arith.addf %123, %128 : vector<64x8xf32>
    %cst_122 = arith.constant 0.000000e+00 : f32
    %130 = vector.broadcast %cst_122 : f32 to vector<64x8xf32>
    %131 = arith.maximumf %129, %130 : vector<64x8xf32>
    %132 = arith.truncf %131 : vector<64x8xf32> to vector<64x8xbf16>
    %c0_123 = arith.constant 0 : index
    %c0_124 = arith.constant 0 : index
    %c0_125 = arith.constant 0 : index
    %133 = vector.load %arg5[%c0_123, %c0_124, %c0_125] : memref<2x8x32xbf16, #tpu.memory_space<vmem>>, vector<1x8x32xbf16>
    %134 = vector.shape_cast %133 : vector<1x8x32xbf16> to vector<8x32xbf16>
    %cst_126 = arith.constant dense<0.000000e+00> : vector<64x32xf32>
    %135 = tpu.matmul %132, %134, %cst_126 {dimension_numbers = #tpu.dot_dimension_numbers<[1], [0], [0], [1], [0, 0, 1, 1], [], []>} : vector<64x8xbf16>, vector<8x32xbf16>, vector<64x32xf32> -> vector<64x32xf32>
    %c1_127 = arith.constant 1 : index
    %c1_128 = arith.constant 1 : index
    %c0_129 = arith.constant 0 : index
    %136 = vector.load %arg7[%c1_127, %c1_128, %c0_129] : memref<10x10x32xf32, #tpu.memory_space<vmem>>, vector<8x8x32xf32>
    %137 = vector.shape_cast %135 : vector<64x32xf32> to vector<8x8x32xf32>
    %138 = arith.addf %136, %137 : vector<8x8x32xf32>
    %c1_130 = arith.constant 1 : index
    %c1_131 = arith.constant 1 : index
    %c0_132 = arith.constant 0 : index
    %139 = vector.load %arg7[%c1_130, %c1_131, %c0_132] : memref<10x10x32xf32, #tpu.memory_space<vmem>>, vector<8x8x32xf32>
    tpu.vector_store %arg7[%c1_130, %c1_131, %c0_132], %138 {strides = array<i32>} : memref<10x10x32xf32, #tpu.memory_space<vmem>>, vector<8x8x32xf32>,
    %c0_133 = arith.constant 0 : index
    %c0_134 = arith.constant 0 : index
    %c0_135 = arith.constant 0 : index
    %140 = vector.load %arg7[%c0_133, %c0_134, %c0_135] : memref<10x10x32xf32, #tpu.memory_space<vmem>>, vector<10x10x32xf32>
    %cst_136 = arith.constant 0.000000e+00 : f32
    %141 = vector.broadcast %cst_136 : f32 to vector<10x10x32xf32>
    %142 = arith.maximumf %140, %141 : vector<10x10x32xf32>
    %143 = arith.truncf %142 : vector<10x10x32xf32> to vector<10x10x32xbf16>
    %cst_137 = arith.constant 0.000000e+00 : f32
    %144 = vector.broadcast %cst_137 : f32 to vector<64x8xf32>
    %145 = vector.extract_strided_slice %143 {offsets = [0, 0, 0], sizes = [8, 8, 32], strides = [1, 1, 1]} : vector<10x10x32xbf16> to vector<8x8x32xbf16>
    %146 = vector.shape_cast %145 : vector<8x8x32xbf16> to vector<64x32xbf16>
    %c1_138 = arith.constant 1 : index
    %c0_139 = arith.constant 0 : index
    %c0_140 = arith.constant 0 : index
    %c0_141 = arith.constant 0 : index
    %147 = vector.load %arg4[%c1_138, %c0_139, %c0_140, %c0_141] : memref<2x9x32x8xbf16, #tpu.memory_space<vmem>>, vector<1x1x32x8xbf16>
    %148 = vector.shape_cast %147 : vector<1x1x32x8xbf16> to vector<32x8xbf16>
    %cst_142 = arith.constant dense<0.000000e+00> : vector<64x8xf32>
    %149 = tpu.matmul %146, %148, %cst_142 {dimension_numbers = #tpu.dot_dimension_numbers<[1], [0], [0], [1], [0, 0, 1, 1], [], []>} : vector<64x32xbf16>, vector<32x8xbf16>, vector<64x8xf32> -> vector<64x8xf32>
    %150 = arith.addf %144, %149 : vector<64x8xf32>
    %151 = vector.extract_strided_slice %143 {offsets = [0, 1, 0], sizes = [8, 8, 32], strides = [1, 1, 1]} : vector<10x10x32xbf16> to vector<8x8x32xbf16>
    %152 = vector.shape_cast %151 : vector<8x8x32xbf16> to vector<64x32xbf16>
    %c1_143 = arith.constant 1 : index
    %c1_144 = arith.constant 1 : index
    %c0_145 = arith.constant 0 : index
    %c0_146 = arith.constant 0 : index
    %153 = vector.load %arg4[%c1_143, %c1_144, %c0_145, %c0_146] : memref<2x9x32x8xbf16, #tpu.memory_space<vmem>>, vector<1x1x32x8xbf16>
    %154 = vector.shape_cast %153 : vector<1x1x32x8xbf16> to vector<32x8xbf16>
    %cst_147 = arith.constant dense<0.000000e+00> : vector<64x8xf32>
    %155 = tpu.matmul %152, %154, %cst_147 {dimension_numbers = #tpu.dot_dimension_numbers<[1], [0], [0], [1], [0, 0, 1, 1], [], []>} : vector<64x32xbf16>, vector<32x8xbf16>, vector<64x8xf32> -> vector<64x8xf32>
    %156 = arith.addf %150, %155 : vector<64x8xf32>
    %157 = vector.extract_strided_slice %143 {offsets = [0, 2, 0], sizes = [8, 8, 32], strides = [1, 1, 1]} : vector<10x10x32xbf16> to vector<8x8x32xbf16>
    %158 = vector.shape_cast %157 : vector<8x8x32xbf16> to vector<64x32xbf16>
    %c1_148 = arith.constant 1 : index
    %c2_149 = arith.constant 2 : index
    %c0_150 = arith.constant 0 : index
    %c0_151 = arith.constant 0 : index
    %159 = vector.load %arg4[%c1_148, %c2_149, %c0_150, %c0_151] : memref<2x9x32x8xbf16, #tpu.memory_space<vmem>>, vector<1x1x32x8xbf16>
    %160 = vector.shape_cast %159 : vector<1x1x32x8xbf16> to vector<32x8xbf16>
    %cst_152 = arith.constant dense<0.000000e+00> : vector<64x8xf32>
    %161 = tpu.matmul %158, %160, %cst_152 {dimension_numbers = #tpu.dot_dimension_numbers<[1], [0], [0], [1], [0, 0, 1, 1], [], []>} : vector<64x32xbf16>, vector<32x8xbf16>, vector<64x8xf32> -> vector<64x8xf32>
    %162 = arith.addf %156, %161 : vector<64x8xf32>
    %163 = vector.extract_strided_slice %143 {offsets = [1, 0, 0], sizes = [8, 8, 32], strides = [1, 1, 1]} : vector<10x10x32xbf16> to vector<8x8x32xbf16>
    %164 = vector.shape_cast %163 : vector<8x8x32xbf16> to vector<64x32xbf16>
    %c1_153 = arith.constant 1 : index
    %c3_154 = arith.constant 3 : index
    %c0_155 = arith.constant 0 : index
    %c0_156 = arith.constant 0 : index
    %165 = vector.load %arg4[%c1_153, %c3_154, %c0_155, %c0_156] : memref<2x9x32x8xbf16, #tpu.memory_space<vmem>>, vector<1x1x32x8xbf16>
    %166 = vector.shape_cast %165 : vector<1x1x32x8xbf16> to vector<32x8xbf16>
    %cst_157 = arith.constant dense<0.000000e+00> : vector<64x8xf32>
    %167 = tpu.matmul %164, %166, %cst_157 {dimension_numbers = #tpu.dot_dimension_numbers<[1], [0], [0], [1], [0, 0, 1, 1], [], []>} : vector<64x32xbf16>, vector<32x8xbf16>, vector<64x8xf32> -> vector<64x8xf32>
    %168 = arith.addf %162, %167 : vector<64x8xf32>
    %169 = vector.extract_strided_slice %143 {offsets = [1, 1, 0], sizes = [8, 8, 32], strides = [1, 1, 1]} : vector<10x10x32xbf16> to vector<8x8x32xbf16>
    %170 = vector.shape_cast %169 : vector<8x8x32xbf16> to vector<64x32xbf16>
    %c1_158 = arith.constant 1 : index
    %c4_159 = arith.constant 4 : index
    %c0_160 = arith.constant 0 : index
    %c0_161 = arith.constant 0 : index
    %171 = vector.load %arg4[%c1_158, %c4_159, %c0_160, %c0_161] : memref<2x9x32x8xbf16, #tpu.memory_space<vmem>>, vector<1x1x32x8xbf16>
    %172 = vector.shape_cast %171 : vector<1x1x32x8xbf16> to vector<32x8xbf16>
    %cst_162 = arith.constant dense<0.000000e+00> : vector<64x8xf32>
    %173 = tpu.matmul %170, %172, %cst_162 {dimension_numbers = #tpu.dot_dimension_numbers<[1], [0], [0], [1], [0, 0, 1, 1], [], []>} : vector<64x32xbf16>, vector<32x8xbf16>, vector<64x8xf32> -> vector<64x8xf32>
    %174 = arith.addf %168, %173 : vector<64x8xf32>
    %175 = vector.extract_strided_slice %143 {offsets = [1, 2, 0], sizes = [8, 8, 32], strides = [1, 1, 1]} : vector<10x10x32xbf16> to vector<8x8x32xbf16>
    %176 = vector.shape_cast %175 : vector<8x8x32xbf16> to vector<64x32xbf16>
    %c1_163 = arith.constant 1 : index
    %c5_164 = arith.constant 5 : index
    %c0_165 = arith.constant 0 : index
    %c0_166 = arith.constant 0 : index
    %177 = vector.load %arg4[%c1_163, %c5_164, %c0_165, %c0_166] : memref<2x9x32x8xbf16, #tpu.memory_space<vmem>>, vector<1x1x32x8xbf16>
    %178 = vector.shape_cast %177 : vector<1x1x32x8xbf16> to vector<32x8xbf16>
    %cst_167 = arith.constant dense<0.000000e+00> : vector<64x8xf32>
    %179 = tpu.matmul %176, %178, %cst_167 {dimension_numbers = #tpu.dot_dimension_numbers<[1], [0], [0], [1], [0, 0, 1, 1], [], []>} : vector<64x32xbf16>, vector<32x8xbf16>, vector<64x8xf32> -> vector<64x8xf32>
    %180 = arith.addf %174, %179 : vector<64x8xf32>
    %181 = vector.extract_strided_slice %143 {offsets = [2, 0, 0], sizes = [8, 8, 32], strides = [1, 1, 1]} : vector<10x10x32xbf16> to vector<8x8x32xbf16>
    %182 = vector.shape_cast %181 : vector<8x8x32xbf16> to vector<64x32xbf16>
    %c1_168 = arith.constant 1 : index
    %c6_169 = arith.constant 6 : index
    %c0_170 = arith.constant 0 : index
    %c0_171 = arith.constant 0 : index
    %183 = vector.load %arg4[%c1_168, %c6_169, %c0_170, %c0_171] : memref<2x9x32x8xbf16, #tpu.memory_space<vmem>>, vector<1x1x32x8xbf16>
    %184 = vector.shape_cast %183 : vector<1x1x32x8xbf16> to vector<32x8xbf16>
    %cst_172 = arith.constant dense<0.000000e+00> : vector<64x8xf32>
    %185 = tpu.matmul %182, %184, %cst_172 {dimension_numbers = #tpu.dot_dimension_numbers<[1], [0], [0], [1], [0, 0, 1, 1], [], []>} : vector<64x32xbf16>, vector<32x8xbf16>, vector<64x8xf32> -> vector<64x8xf32>
    %186 = arith.addf %180, %185 : vector<64x8xf32>
    %187 = vector.extract_strided_slice %143 {offsets = [2, 1, 0], sizes = [8, 8, 32], strides = [1, 1, 1]} : vector<10x10x32xbf16> to vector<8x8x32xbf16>
    %188 = vector.shape_cast %187 : vector<8x8x32xbf16> to vector<64x32xbf16>
    %c1_173 = arith.constant 1 : index
    %c7_174 = arith.constant 7 : index
    %c0_175 = arith.constant 0 : index
    %c0_176 = arith.constant 0 : index
    %189 = vector.load %arg4[%c1_173, %c7_174, %c0_175, %c0_176] : memref<2x9x32x8xbf16, #tpu.memory_space<vmem>>, vector<1x1x32x8xbf16>
    %190 = vector.shape_cast %189 : vector<1x1x32x8xbf16> to vector<32x8xbf16>
    %cst_177 = arith.constant dense<0.000000e+00> : vector<64x8xf32>
    %191 = tpu.matmul %188, %190, %cst_177 {dimension_numbers = #tpu.dot_dimension_numbers<[1], [0], [0], [1], [0, 0, 1, 1], [], []>} : vector<64x32xbf16>, vector<32x8xbf16>, vector<64x8xf32> -> vector<64x8xf32>
    %192 = arith.addf %186, %191 : vector<64x8xf32>
    %193 = vector.extract_strided_slice %143 {offsets = [2, 2, 0], sizes = [8, 8, 32], strides = [1, 1, 1]} : vector<10x10x32xbf16> to vector<8x8x32xbf16>
    %194 = vector.shape_cast %193 : vector<8x8x32xbf16> to vector<64x32xbf16>
    %c1_178 = arith.constant 1 : index
    %c8_179 = arith.constant 8 : index
    %c0_180 = arith.constant 0 : index
    %c0_181 = arith.constant 0 : index
    %195 = vector.load %arg4[%c1_178, %c8_179, %c0_180, %c0_181] : memref<2x9x32x8xbf16, #tpu.memory_space<vmem>>, vector<1x1x32x8xbf16>
    %196 = vector.shape_cast %195 : vector<1x1x32x8xbf16> to vector<32x8xbf16>
    %cst_182 = arith.constant dense<0.000000e+00> : vector<64x8xf32>
    %197 = tpu.matmul %194, %196, %cst_182 {dimension_numbers = #tpu.dot_dimension_numbers<[1], [0], [0], [1], [0, 0, 1, 1], [], []>} : vector<64x32xbf16>, vector<32x8xbf16>, vector<64x8xf32> -> vector<64x8xf32>
    %198 = arith.addf %192, %197 : vector<64x8xf32>
    %cst_183 = arith.constant 0.000000e+00 : f32
    %199 = vector.broadcast %cst_183 : f32 to vector<64x8xf32>
    %200 = arith.maximumf %198, %199 : vector<64x8xf32>
    %201 = arith.truncf %200 : vector<64x8xf32> to vector<64x8xbf16>
    %c1_184 = arith.constant 1 : index
    %c0_185 = arith.constant 0 : index
    %c0_186 = arith.constant 0 : index
    %202 = vector.load %arg5[%c1_184, %c0_185, %c0_186] : memref<2x8x32xbf16, #tpu.memory_space<vmem>>, vector<1x8x32xbf16>
    %203 = vector.shape_cast %202 : vector<1x8x32xbf16> to vector<8x32xbf16>
    %cst_187 = arith.constant dense<0.000000e+00> : vector<64x32xf32>
    %204 = tpu.matmul %201, %203, %cst_187 {dimension_numbers = #tpu.dot_dimension_numbers<[1], [0], [0], [1], [0, 0, 1, 1], [], []>} : vector<64x8xbf16>, vector<8x32xbf16>, vector<64x32xf32> -> vector<64x32xf32>
    %c1_188 = arith.constant 1 : index
    %c1_189 = arith.constant 1 : index
    %c0_190 = arith.constant 0 : index
    %205 = vector.load %arg7[%c1_188, %c1_189, %c0_190] : memref<10x10x32xf32, #tpu.memory_space<vmem>>, vector<8x8x32xf32>
    %206 = vector.shape_cast %204 : vector<64x32xf32> to vector<8x8x32xf32>
    %207 = arith.addf %205, %206 : vector<8x8x32xf32>
    %c1_191 = arith.constant 1 : index
    %c1_192 = arith.constant 1 : index
    %c0_193 = arith.constant 0 : index
    %208 = vector.load %arg7[%c1_191, %c1_192, %c0_193] : memref<10x10x32xf32, #tpu.memory_space<vmem>>, vector<8x8x32xf32>
    tpu.vector_store %arg7[%c1_191, %c1_192, %c0_193], %207 {strides = array<i32>} : memref<10x10x32xf32, #tpu.memory_space<vmem>>, vector<8x8x32xf32>,
    %c0_194 = arith.constant 0 : index
    %c0_195 = arith.constant 0 : index
    %c0_196 = arith.constant 0 : index
    %209 = vector.load %arg7[%c0_194, %c0_195, %c0_196] : memref<10x10x32xf32, #tpu.memory_space<vmem>>, vector<10x10x32xf32>
    %cst_197 = arith.constant 0.000000e+00 : f32
    %210 = vector.broadcast %cst_197 : f32 to vector<10x10x32xf32>
    %211 = arith.maximumf %209, %210 : vector<10x10x32xf32>
    %212 = arith.truncf %211 : vector<10x10x32xf32> to vector<10x10x32xbf16>
    %c0_198 = arith.constant 0 : index
    %c0_199 = arith.constant 0 : index
    %c0_200 = arith.constant 0 : index
    %c0_201 = arith.constant 0 : index
    %213 = vector.load %arg6[%c0_198, %c0_199, %c0_200, %c0_201] : memref<1x10x10x32xbf16, #tpu.memory_space<vmem>>, vector<1x10x10x32xbf16>
    %214 = vector.shape_cast %213 : vector<1x10x10x32xbf16> to vector<10x10x32xbf16>
    %215 = vector.shape_cast %212 : vector<10x10x32xbf16> to vector<1x10x10x32xbf16>
    tpu.vector_store %arg6[%c0_198, %c0_199, %c0_200, %c0_201], %215 {strides = array<i32>} : memref<1x10x10x32xbf16, #tpu.memory_space<vmem>>, vector<1x10x10x32xbf16>,
    return
  }
  func.func @transform_0(%arg0: i32) -> (i32, i32, i32, i32) {
    %c0_i32 = arith.constant 0 : i32
    %c0_i32_0 = arith.constant 0 : i32
    %c0_i32_1 = arith.constant 0 : i32
    %c0_i32_2 = arith.constant 0 : i32
    return %arg0, %c0_i32, %c0_i32_0, %c0_i32_1 : i32, i32, i32, i32
  }
  func.func @transform_1(%arg0: i32) -> (i32, i32, i32) {
    %c0_i32 = arith.constant 0 : i32
    %c0_i32_0 = arith.constant 0 : i32
    %c0_i32_1 = arith.constant 0 : i32
    %c0_i32_2 = arith.constant 0 : i32
    return %c0_i32, %c0_i32_0, %c0_i32_1 : i32, i32, i32
  }
  func.func @transform_2(%arg0: i32) -> (i32, i32) {
    %c0_i32 = arith.constant 0 : i32
    %c0_i32_0 = arith.constant 0 : i32
    %c0_i32_1 = arith.constant 0 : i32
    return %c0_i32, %c0_i32_0 : i32, i32
  }
  func.func @transform_3(%arg0: i32) -> (i32, i32, i32, i32) {
    %c0_i32 = arith.constant 0 : i32
    %c0_i32_0 = arith.constant 0 : i32
    %c0_i32_1 = arith.constant 0 : i32
    %c0_i32_2 = arith.constant 0 : i32
    %c0_i32_3 = arith.constant 0 : i32
    return %c0_i32, %c0_i32_0, %c0_i32_1, %c0_i32_2 : i32, i32, i32, i32
  }
  func.func @transform_4(%arg0: i32) -> (i32, i32, i32) {
    %c0_i32 = arith.constant 0 : i32
    %c0_i32_0 = arith.constant 0 : i32
    %c0_i32_1 = arith.constant 0 : i32
    %c0_i32_2 = arith.constant 0 : i32
    return %c0_i32, %c0_i32_0, %c0_i32_1 : i32, i32, i32
  }
  func.func @transform_5(%arg0: i32) -> (i32, i32, i32, i32) {
    %c0_i32 = arith.constant 0 : i32
    %c0_i32_0 = arith.constant 0 : i32
    %c0_i32_1 = arith.constant 0 : i32
    %c0_i32_2 = arith.constant 0 : i32
    return %arg0, %c0_i32, %c0_i32_0, %c0_i32_1 : i32, i32, i32, i32
  }
}

module attributes {stable_mosaic.version = 11 : i64} {
  func.func @_deconv_kernel(%arg0: i32, %arg1: memref<1x18x18x16xbf16, #tpu.memory_space<vmem>>, %arg2: memref<16x16x3xbf16, #tpu.memory_space<vmem>>, %arg3: memref<1x3xf32, #tpu.memory_space<vmem>>, %arg4: memref<1x16x2x16x6xf32, #tpu.memory_space<vmem>>) attributes {dimension_semantics = [#tpu.dimension_semantics<parallel>], iteration_bounds = array<i64: 2>, scalar_prefetch = 0 : i64, scratch_operands = 0 : i64, tpu.core_type = #tpu.core_type<tc>, window_params = [{transform_indices = @transform_0, window_bounds = array<i64: 1, 18, 18, 16>}, {pipeline_mode = #tpu.pipeline_mode<synchronous>, transform_indices = @transform_1, window_bounds = array<i64: 16, 16, 3>}, {pipeline_mode = #tpu.pipeline_mode<synchronous>, transform_indices = @transform_2, window_bounds = array<i64: 1, 3>}, {transform_indices = @transform_3, window_bounds = array<i64: 1, 16, 2, 16, 6>}]} {
    %cst = arith.constant 0.000000e+00 : f32
    %0 = vector.broadcast %cst : f32 to vector<256x3xf32>
    %c0 = arith.constant 0 : index
    %c0_0 = arith.constant 0 : index
    %c0_1 = arith.constant 0 : index
    %c0_2 = arith.constant 0 : index
    %1 = vector.load %arg1[%c0, %c0_0, %c0_1, %c0_2] : memref<1x18x18x16xbf16, #tpu.memory_space<vmem>>, vector<1x16x16x16xbf16>
    %2 = vector.shape_cast %1 : vector<1x16x16x16xbf16> to vector<16x16x16xbf16>
    %3 = vector.shape_cast %2 : vector<16x16x16xbf16> to vector<256x16xbf16>
    %c0_3 = arith.constant 0 : index
    %c0_4 = arith.constant 0 : index
    %c0_5 = arith.constant 0 : index
    %4 = vector.load %arg2[%c0_3, %c0_4, %c0_5] : memref<16x16x3xbf16, #tpu.memory_space<vmem>>, vector<1x16x3xbf16>
    %5 = vector.shape_cast %4 : vector<1x16x3xbf16> to vector<16x3xbf16>
    %cst_6 = arith.constant dense<0.000000e+00> : vector<256x3xf32>
    %6 = tpu.matmul %3, %5, %cst_6 {dimension_numbers = #tpu.dot_dimension_numbers<[1], [0], [0], [1], [0, 0, 1, 1], [], []>} : vector<256x16xbf16>, vector<16x3xbf16>, vector<256x3xf32> -> vector<256x3xf32>
    %7 = arith.addf %0, %6 : vector<256x3xf32>
    %c0_7 = arith.constant 0 : index
    %c0_8 = arith.constant 0 : index
    %c1 = arith.constant 1 : index
    %c0_9 = arith.constant 0 : index
    %8 = vector.load %arg1[%c0_7, %c0_8, %c1, %c0_9] : memref<1x18x18x16xbf16, #tpu.memory_space<vmem>>, vector<1x16x16x16xbf16>
    %9 = vector.shape_cast %8 : vector<1x16x16x16xbf16> to vector<16x16x16xbf16>
    %10 = vector.shape_cast %9 : vector<16x16x16xbf16> to vector<256x16xbf16>
    %c1_10 = arith.constant 1 : index
    %c0_11 = arith.constant 0 : index
    %c0_12 = arith.constant 0 : index
    %11 = vector.load %arg2[%c1_10, %c0_11, %c0_12] : memref<16x16x3xbf16, #tpu.memory_space<vmem>>, vector<1x16x3xbf16>
    %12 = vector.shape_cast %11 : vector<1x16x3xbf16> to vector<16x3xbf16>
    %cst_13 = arith.constant dense<0.000000e+00> : vector<256x3xf32>
    %13 = tpu.matmul %10, %12, %cst_13 {dimension_numbers = #tpu.dot_dimension_numbers<[1], [0], [0], [1], [0, 0, 1, 1], [], []>} : vector<256x16xbf16>, vector<16x3xbf16>, vector<256x3xf32> -> vector<256x3xf32>
    %14 = arith.addf %7, %13 : vector<256x3xf32>
    %c0_14 = arith.constant 0 : index
    %c1_15 = arith.constant 1 : index
    %c0_16 = arith.constant 0 : index
    %c0_17 = arith.constant 0 : index
    %15 = vector.load %arg1[%c0_14, %c1_15, %c0_16, %c0_17] : memref<1x18x18x16xbf16, #tpu.memory_space<vmem>>, vector<1x16x16x16xbf16>
    %16 = vector.shape_cast %15 : vector<1x16x16x16xbf16> to vector<16x16x16xbf16>
    %17 = vector.shape_cast %16 : vector<16x16x16xbf16> to vector<256x16xbf16>
    %c2 = arith.constant 2 : index
    %c0_18 = arith.constant 0 : index
    %c0_19 = arith.constant 0 : index
    %18 = vector.load %arg2[%c2, %c0_18, %c0_19] : memref<16x16x3xbf16, #tpu.memory_space<vmem>>, vector<1x16x3xbf16>
    %19 = vector.shape_cast %18 : vector<1x16x3xbf16> to vector<16x3xbf16>
    %cst_20 = arith.constant dense<0.000000e+00> : vector<256x3xf32>
    %20 = tpu.matmul %17, %19, %cst_20 {dimension_numbers = #tpu.dot_dimension_numbers<[1], [0], [0], [1], [0, 0, 1, 1], [], []>} : vector<256x16xbf16>, vector<16x3xbf16>, vector<256x3xf32> -> vector<256x3xf32>
    %21 = arith.addf %14, %20 : vector<256x3xf32>
    %c0_21 = arith.constant 0 : index
    %c1_22 = arith.constant 1 : index
    %c1_23 = arith.constant 1 : index
    %c0_24 = arith.constant 0 : index
    %22 = vector.load %arg1[%c0_21, %c1_22, %c1_23, %c0_24] : memref<1x18x18x16xbf16, #tpu.memory_space<vmem>>, vector<1x16x16x16xbf16>
    %23 = vector.shape_cast %22 : vector<1x16x16x16xbf16> to vector<16x16x16xbf16>
    %24 = vector.shape_cast %23 : vector<16x16x16xbf16> to vector<256x16xbf16>
    %c3 = arith.constant 3 : index
    %c0_25 = arith.constant 0 : index
    %c0_26 = arith.constant 0 : index
    %25 = vector.load %arg2[%c3, %c0_25, %c0_26] : memref<16x16x3xbf16, #tpu.memory_space<vmem>>, vector<1x16x3xbf16>
    %26 = vector.shape_cast %25 : vector<1x16x3xbf16> to vector<16x3xbf16>
    %cst_27 = arith.constant dense<0.000000e+00> : vector<256x3xf32>
    %27 = tpu.matmul %24, %26, %cst_27 {dimension_numbers = #tpu.dot_dimension_numbers<[1], [0], [0], [1], [0, 0, 1, 1], [], []>} : vector<256x16xbf16>, vector<16x3xbf16>, vector<256x3xf32> -> vector<256x3xf32>
    %28 = arith.addf %21, %27 : vector<256x3xf32>
    %c0_28 = arith.constant 0 : index
    %c0_29 = arith.constant 0 : index
    %29 = vector.load %arg3[%c0_28, %c0_29] : memref<1x3xf32, #tpu.memory_space<vmem>>, vector<1x3xf32>
    %30 = vector.broadcast %29 : vector<1x3xf32> to vector<256x3xf32>
    %31 = arith.addf %28, %30 : vector<256x3xf32>
    %32 = vector.shape_cast %31 : vector<256x3xf32> to vector<16x16x3xf32>
    %cst_30 = arith.constant 0.000000e+00 : f32
    %33 = vector.broadcast %cst_30 : f32 to vector<256x3xf32>
    %c0_31 = arith.constant 0 : index
    %c0_32 = arith.constant 0 : index
    %c1_33 = arith.constant 1 : index
    %c0_34 = arith.constant 0 : index
    %34 = vector.load %arg1[%c0_31, %c0_32, %c1_33, %c0_34] : memref<1x18x18x16xbf16, #tpu.memory_space<vmem>>, vector<1x16x16x16xbf16>
    %35 = vector.shape_cast %34 : vector<1x16x16x16xbf16> to vector<16x16x16xbf16>
    %36 = vector.shape_cast %35 : vector<16x16x16xbf16> to vector<256x16xbf16>
    %c4 = arith.constant 4 : index
    %c0_35 = arith.constant 0 : index
    %c0_36 = arith.constant 0 : index
    %37 = vector.load %arg2[%c4, %c0_35, %c0_36] : memref<16x16x3xbf16, #tpu.memory_space<vmem>>, vector<1x16x3xbf16>
    %38 = vector.shape_cast %37 : vector<1x16x3xbf16> to vector<16x3xbf16>
    %cst_37 = arith.constant dense<0.000000e+00> : vector<256x3xf32>
    %39 = tpu.matmul %36, %38, %cst_37 {dimension_numbers = #tpu.dot_dimension_numbers<[1], [0], [0], [1], [0, 0, 1, 1], [], []>} : vector<256x16xbf16>, vector<16x3xbf16>, vector<256x3xf32> -> vector<256x3xf32>
    %40 = arith.addf %33, %39 : vector<256x3xf32>
    %c0_38 = arith.constant 0 : index
    %c0_39 = arith.constant 0 : index
    %c2_40 = arith.constant 2 : index
    %c0_41 = arith.constant 0 : index
    %41 = vector.load %arg1[%c0_38, %c0_39, %c2_40, %c0_41] : memref<1x18x18x16xbf16, #tpu.memory_space<vmem>>, vector<1x16x16x16xbf16>
    %42 = vector.shape_cast %41 : vector<1x16x16x16xbf16> to vector<16x16x16xbf16>
    %43 = vector.shape_cast %42 : vector<16x16x16xbf16> to vector<256x16xbf16>
    %c5 = arith.constant 5 : index
    %c0_42 = arith.constant 0 : index
    %c0_43 = arith.constant 0 : index
    %44 = vector.load %arg2[%c5, %c0_42, %c0_43] : memref<16x16x3xbf16, #tpu.memory_space<vmem>>, vector<1x16x3xbf16>
    %45 = vector.shape_cast %44 : vector<1x16x3xbf16> to vector<16x3xbf16>
    %cst_44 = arith.constant dense<0.000000e+00> : vector<256x3xf32>
    %46 = tpu.matmul %43, %45, %cst_44 {dimension_numbers = #tpu.dot_dimension_numbers<[1], [0], [0], [1], [0, 0, 1, 1], [], []>} : vector<256x16xbf16>, vector<16x3xbf16>, vector<256x3xf32> -> vector<256x3xf32>
    %47 = arith.addf %40, %46 : vector<256x3xf32>
    %c0_45 = arith.constant 0 : index
    %c1_46 = arith.constant 1 : index
    %c1_47 = arith.constant 1 : index
    %c0_48 = arith.constant 0 : index
    %48 = vector.load %arg1[%c0_45, %c1_46, %c1_47, %c0_48] : memref<1x18x18x16xbf16, #tpu.memory_space<vmem>>, vector<1x16x16x16xbf16>
    %49 = vector.shape_cast %48 : vector<1x16x16x16xbf16> to vector<16x16x16xbf16>
    %50 = vector.shape_cast %49 : vector<16x16x16xbf16> to vector<256x16xbf16>
    %c6 = arith.constant 6 : index
    %c0_49 = arith.constant 0 : index
    %c0_50 = arith.constant 0 : index
    %51 = vector.load %arg2[%c6, %c0_49, %c0_50] : memref<16x16x3xbf16, #tpu.memory_space<vmem>>, vector<1x16x3xbf16>
    %52 = vector.shape_cast %51 : vector<1x16x3xbf16> to vector<16x3xbf16>
    %cst_51 = arith.constant dense<0.000000e+00> : vector<256x3xf32>
    %53 = tpu.matmul %50, %52, %cst_51 {dimension_numbers = #tpu.dot_dimension_numbers<[1], [0], [0], [1], [0, 0, 1, 1], [], []>} : vector<256x16xbf16>, vector<16x3xbf16>, vector<256x3xf32> -> vector<256x3xf32>
    %54 = arith.addf %47, %53 : vector<256x3xf32>
    %c0_52 = arith.constant 0 : index
    %c1_53 = arith.constant 1 : index
    %c2_54 = arith.constant 2 : index
    %c0_55 = arith.constant 0 : index
    %55 = vector.load %arg1[%c0_52, %c1_53, %c2_54, %c0_55] : memref<1x18x18x16xbf16, #tpu.memory_space<vmem>>, vector<1x16x16x16xbf16>
    %56 = vector.shape_cast %55 : vector<1x16x16x16xbf16> to vector<16x16x16xbf16>
    %57 = vector.shape_cast %56 : vector<16x16x16xbf16> to vector<256x16xbf16>
    %c7 = arith.constant 7 : index
    %c0_56 = arith.constant 0 : index
    %c0_57 = arith.constant 0 : index
    %58 = vector.load %arg2[%c7, %c0_56, %c0_57] : memref<16x16x3xbf16, #tpu.memory_space<vmem>>, vector<1x16x3xbf16>
    %59 = vector.shape_cast %58 : vector<1x16x3xbf16> to vector<16x3xbf16>
    %cst_58 = arith.constant dense<0.000000e+00> : vector<256x3xf32>
    %60 = tpu.matmul %57, %59, %cst_58 {dimension_numbers = #tpu.dot_dimension_numbers<[1], [0], [0], [1], [0, 0, 1, 1], [], []>} : vector<256x16xbf16>, vector<16x3xbf16>, vector<256x3xf32> -> vector<256x3xf32>
    %61 = arith.addf %54, %60 : vector<256x3xf32>
    %c0_59 = arith.constant 0 : index
    %c0_60 = arith.constant 0 : index
    %62 = vector.load %arg3[%c0_59, %c0_60] : memref<1x3xf32, #tpu.memory_space<vmem>>, vector<1x3xf32>
    %63 = vector.broadcast %62 : vector<1x3xf32> to vector<256x3xf32>
    %64 = arith.addf %61, %63 : vector<256x3xf32>
    %65 = vector.shape_cast %64 : vector<256x3xf32> to vector<16x16x3xf32>
    %66 = tpu.concatenate %32, %65 in 2 : vector<16x16x3xf32>, vector<16x16x3xf32> -> vector<16x16x6xf32>
    %c0_61 = arith.constant 0 : index
    %c0_62 = arith.constant 0 : index
    %c0_63 = arith.constant 0 : index
    %c0_64 = arith.constant 0 : index
    %c0_65 = arith.constant 0 : index
    %67 = vector.load %arg4[%c0_61, %c0_62, %c0_63, %c0_64, %c0_65] : memref<1x16x2x16x6xf32, #tpu.memory_space<vmem>>, vector<1x16x1x16x6xf32>
    %68 = vector.shape_cast %67 : vector<1x16x1x16x6xf32> to vector<16x16x6xf32>
    %69 = vector.shape_cast %66 : vector<16x16x6xf32> to vector<1x16x1x16x6xf32>
    tpu.vector_store %arg4[%c0_61, %c0_62, %c0_63, %c0_64, %c0_65], %69 {strides = array<i32>} : memref<1x16x2x16x6xf32, #tpu.memory_space<vmem>>, vector<1x16x1x16x6xf32>,
    %cst_66 = arith.constant 0.000000e+00 : f32
    %70 = vector.broadcast %cst_66 : f32 to vector<256x3xf32>
    %c0_67 = arith.constant 0 : index
    %c1_68 = arith.constant 1 : index
    %c0_69 = arith.constant 0 : index
    %c0_70 = arith.constant 0 : index
    %71 = vector.load %arg1[%c0_67, %c1_68, %c0_69, %c0_70] : memref<1x18x18x16xbf16, #tpu.memory_space<vmem>>, vector<1x16x16x16xbf16>
    %72 = vector.shape_cast %71 : vector<1x16x16x16xbf16> to vector<16x16x16xbf16>
    %73 = vector.shape_cast %72 : vector<16x16x16xbf16> to vector<256x16xbf16>
    %c8 = arith.constant 8 : index
    %c0_71 = arith.constant 0 : index
    %c0_72 = arith.constant 0 : index
    %74 = vector.load %arg2[%c8, %c0_71, %c0_72] : memref<16x16x3xbf16, #tpu.memory_space<vmem>>, vector<1x16x3xbf16>
    %75 = vector.shape_cast %74 : vector<1x16x3xbf16> to vector<16x3xbf16>
    %cst_73 = arith.constant dense<0.000000e+00> : vector<256x3xf32>
    %76 = tpu.matmul %73, %75, %cst_73 {dimension_numbers = #tpu.dot_dimension_numbers<[1], [0], [0], [1], [0, 0, 1, 1], [], []>} : vector<256x16xbf16>, vector<16x3xbf16>, vector<256x3xf32> -> vector<256x3xf32>
    %77 = arith.addf %70, %76 : vector<256x3xf32>
    %c0_74 = arith.constant 0 : index
    %c1_75 = arith.constant 1 : index
    %c1_76 = arith.constant 1 : index
    %c0_77 = arith.constant 0 : index
    %78 = vector.load %arg1[%c0_74, %c1_75, %c1_76, %c0_77] : memref<1x18x18x16xbf16, #tpu.memory_space<vmem>>, vector<1x16x16x16xbf16>
    %79 = vector.shape_cast %78 : vector<1x16x16x16xbf16> to vector<16x16x16xbf16>
    %80 = vector.shape_cast %79 : vector<16x16x16xbf16> to vector<256x16xbf16>
    %c9 = arith.constant 9 : index
    %c0_78 = arith.constant 0 : index
    %c0_79 = arith.constant 0 : index
    %81 = vector.load %arg2[%c9, %c0_78, %c0_79] : memref<16x16x3xbf16, #tpu.memory_space<vmem>>, vector<1x16x3xbf16>
    %82 = vector.shape_cast %81 : vector<1x16x3xbf16> to vector<16x3xbf16>
    %cst_80 = arith.constant dense<0.000000e+00> : vector<256x3xf32>
    %83 = tpu.matmul %80, %82, %cst_80 {dimension_numbers = #tpu.dot_dimension_numbers<[1], [0], [0], [1], [0, 0, 1, 1], [], []>} : vector<256x16xbf16>, vector<16x3xbf16>, vector<256x3xf32> -> vector<256x3xf32>
    %84 = arith.addf %77, %83 : vector<256x3xf32>
    %c0_81 = arith.constant 0 : index
    %c2_82 = arith.constant 2 : index
    %c0_83 = arith.constant 0 : index
    %c0_84 = arith.constant 0 : index
    %85 = vector.load %arg1[%c0_81, %c2_82, %c0_83, %c0_84] : memref<1x18x18x16xbf16, #tpu.memory_space<vmem>>, vector<1x16x16x16xbf16>
    %86 = vector.shape_cast %85 : vector<1x16x16x16xbf16> to vector<16x16x16xbf16>
    %87 = vector.shape_cast %86 : vector<16x16x16xbf16> to vector<256x16xbf16>
    %c10 = arith.constant 10 : index
    %c0_85 = arith.constant 0 : index
    %c0_86 = arith.constant 0 : index
    %88 = vector.load %arg2[%c10, %c0_85, %c0_86] : memref<16x16x3xbf16, #tpu.memory_space<vmem>>, vector<1x16x3xbf16>
    %89 = vector.shape_cast %88 : vector<1x16x3xbf16> to vector<16x3xbf16>
    %cst_87 = arith.constant dense<0.000000e+00> : vector<256x3xf32>
    %90 = tpu.matmul %87, %89, %cst_87 {dimension_numbers = #tpu.dot_dimension_numbers<[1], [0], [0], [1], [0, 0, 1, 1], [], []>} : vector<256x16xbf16>, vector<16x3xbf16>, vector<256x3xf32> -> vector<256x3xf32>
    %91 = arith.addf %84, %90 : vector<256x3xf32>
    %c0_88 = arith.constant 0 : index
    %c2_89 = arith.constant 2 : index
    %c1_90 = arith.constant 1 : index
    %c0_91 = arith.constant 0 : index
    %92 = vector.load %arg1[%c0_88, %c2_89, %c1_90, %c0_91] : memref<1x18x18x16xbf16, #tpu.memory_space<vmem>>, vector<1x16x16x16xbf16>
    %93 = vector.shape_cast %92 : vector<1x16x16x16xbf16> to vector<16x16x16xbf16>
    %94 = vector.shape_cast %93 : vector<16x16x16xbf16> to vector<256x16xbf16>
    %c11 = arith.constant 11 : index
    %c0_92 = arith.constant 0 : index
    %c0_93 = arith.constant 0 : index
    %95 = vector.load %arg2[%c11, %c0_92, %c0_93] : memref<16x16x3xbf16, #tpu.memory_space<vmem>>, vector<1x16x3xbf16>
    %96 = vector.shape_cast %95 : vector<1x16x3xbf16> to vector<16x3xbf16>
    %cst_94 = arith.constant dense<0.000000e+00> : vector<256x3xf32>
    %97 = tpu.matmul %94, %96, %cst_94 {dimension_numbers = #tpu.dot_dimension_numbers<[1], [0], [0], [1], [0, 0, 1, 1], [], []>} : vector<256x16xbf16>, vector<16x3xbf16>, vector<256x3xf32> -> vector<256x3xf32>
    %98 = arith.addf %91, %97 : vector<256x3xf32>
    %c0_95 = arith.constant 0 : index
    %c0_96 = arith.constant 0 : index
    %99 = vector.load %arg3[%c0_95, %c0_96] : memref<1x3xf32, #tpu.memory_space<vmem>>, vector<1x3xf32>
    %100 = vector.broadcast %99 : vector<1x3xf32> to vector<256x3xf32>
    %101 = arith.addf %98, %100 : vector<256x3xf32>
    %102 = vector.shape_cast %101 : vector<256x3xf32> to vector<16x16x3xf32>
    %cst_97 = arith.constant 0.000000e+00 : f32
    %103 = vector.broadcast %cst_97 : f32 to vector<256x3xf32>
    %c0_98 = arith.constant 0 : index
    %c1_99 = arith.constant 1 : index
    %c1_100 = arith.constant 1 : index
    %c0_101 = arith.constant 0 : index
    %104 = vector.load %arg1[%c0_98, %c1_99, %c1_100, %c0_101] : memref<1x18x18x16xbf16, #tpu.memory_space<vmem>>, vector<1x16x16x16xbf16>
    %105 = vector.shape_cast %104 : vector<1x16x16x16xbf16> to vector<16x16x16xbf16>
    %106 = vector.shape_cast %105 : vector<16x16x16xbf16> to vector<256x16xbf16>
    %c12 = arith.constant 12 : index
    %c0_102 = arith.constant 0 : index
    %c0_103 = arith.constant 0 : index
    %107 = vector.load %arg2[%c12, %c0_102, %c0_103] : memref<16x16x3xbf16, #tpu.memory_space<vmem>>, vector<1x16x3xbf16>
    %108 = vector.shape_cast %107 : vector<1x16x3xbf16> to vector<16x3xbf16>
    %cst_104 = arith.constant dense<0.000000e+00> : vector<256x3xf32>
    %109 = tpu.matmul %106, %108, %cst_104 {dimension_numbers = #tpu.dot_dimension_numbers<[1], [0], [0], [1], [0, 0, 1, 1], [], []>} : vector<256x16xbf16>, vector<16x3xbf16>, vector<256x3xf32> -> vector<256x3xf32>
    %110 = arith.addf %103, %109 : vector<256x3xf32>
    %c0_105 = arith.constant 0 : index
    %c1_106 = arith.constant 1 : index
    %c2_107 = arith.constant 2 : index
    %c0_108 = arith.constant 0 : index
    %111 = vector.load %arg1[%c0_105, %c1_106, %c2_107, %c0_108] : memref<1x18x18x16xbf16, #tpu.memory_space<vmem>>, vector<1x16x16x16xbf16>
    %112 = vector.shape_cast %111 : vector<1x16x16x16xbf16> to vector<16x16x16xbf16>
    %113 = vector.shape_cast %112 : vector<16x16x16xbf16> to vector<256x16xbf16>
    %c13 = arith.constant 13 : index
    %c0_109 = arith.constant 0 : index
    %c0_110 = arith.constant 0 : index
    %114 = vector.load %arg2[%c13, %c0_109, %c0_110] : memref<16x16x3xbf16, #tpu.memory_space<vmem>>, vector<1x16x3xbf16>
    %115 = vector.shape_cast %114 : vector<1x16x3xbf16> to vector<16x3xbf16>
    %cst_111 = arith.constant dense<0.000000e+00> : vector<256x3xf32>
    %116 = tpu.matmul %113, %115, %cst_111 {dimension_numbers = #tpu.dot_dimension_numbers<[1], [0], [0], [1], [0, 0, 1, 1], [], []>} : vector<256x16xbf16>, vector<16x3xbf16>, vector<256x3xf32> -> vector<256x3xf32>
    %117 = arith.addf %110, %116 : vector<256x3xf32>
    %c0_112 = arith.constant 0 : index
    %c2_113 = arith.constant 2 : index
    %c1_114 = arith.constant 1 : index
    %c0_115 = arith.constant 0 : index
    %118 = vector.load %arg1[%c0_112, %c2_113, %c1_114, %c0_115] : memref<1x18x18x16xbf16, #tpu.memory_space<vmem>>, vector<1x16x16x16xbf16>
    %119 = vector.shape_cast %118 : vector<1x16x16x16xbf16> to vector<16x16x16xbf16>
    %120 = vector.shape_cast %119 : vector<16x16x16xbf16> to vector<256x16xbf16>
    %c14 = arith.constant 14 : index
    %c0_116 = arith.constant 0 : index
    %c0_117 = arith.constant 0 : index
    %121 = vector.load %arg2[%c14, %c0_116, %c0_117] : memref<16x16x3xbf16, #tpu.memory_space<vmem>>, vector<1x16x3xbf16>
    %122 = vector.shape_cast %121 : vector<1x16x3xbf16> to vector<16x3xbf16>
    %cst_118 = arith.constant dense<0.000000e+00> : vector<256x3xf32>
    %123 = tpu.matmul %120, %122, %cst_118 {dimension_numbers = #tpu.dot_dimension_numbers<[1], [0], [0], [1], [0, 0, 1, 1], [], []>} : vector<256x16xbf16>, vector<16x3xbf16>, vector<256x3xf32> -> vector<256x3xf32>
    %124 = arith.addf %117, %123 : vector<256x3xf32>
    %c0_119 = arith.constant 0 : index
    %c2_120 = arith.constant 2 : index
    %c2_121 = arith.constant 2 : index
    %c0_122 = arith.constant 0 : index
    %125 = vector.load %arg1[%c0_119, %c2_120, %c2_121, %c0_122] : memref<1x18x18x16xbf16, #tpu.memory_space<vmem>>, vector<1x16x16x16xbf16>
    %126 = vector.shape_cast %125 : vector<1x16x16x16xbf16> to vector<16x16x16xbf16>
    %127 = vector.shape_cast %126 : vector<16x16x16xbf16> to vector<256x16xbf16>
    %c15 = arith.constant 15 : index
    %c0_123 = arith.constant 0 : index
    %c0_124 = arith.constant 0 : index
    %128 = vector.load %arg2[%c15, %c0_123, %c0_124] : memref<16x16x3xbf16, #tpu.memory_space<vmem>>, vector<1x16x3xbf16>
    %129 = vector.shape_cast %128 : vector<1x16x3xbf16> to vector<16x3xbf16>
    %cst_125 = arith.constant dense<0.000000e+00> : vector<256x3xf32>
    %130 = tpu.matmul %127, %129, %cst_125 {dimension_numbers = #tpu.dot_dimension_numbers<[1], [0], [0], [1], [0, 0, 1, 1], [], []>} : vector<256x16xbf16>, vector<16x3xbf16>, vector<256x3xf32> -> vector<256x3xf32>
    %131 = arith.addf %124, %130 : vector<256x3xf32>
    %c0_126 = arith.constant 0 : index
    %c0_127 = arith.constant 0 : index
    %132 = vector.load %arg3[%c0_126, %c0_127] : memref<1x3xf32, #tpu.memory_space<vmem>>, vector<1x3xf32>
    %133 = vector.broadcast %132 : vector<1x3xf32> to vector<256x3xf32>
    %134 = arith.addf %131, %133 : vector<256x3xf32>
    %135 = vector.shape_cast %134 : vector<256x3xf32> to vector<16x16x3xf32>
    %136 = tpu.concatenate %102, %135 in 2 : vector<16x16x3xf32>, vector<16x16x3xf32> -> vector<16x16x6xf32>
    %c0_128 = arith.constant 0 : index
    %c0_129 = arith.constant 0 : index
    %c1_130 = arith.constant 1 : index
    %c0_131 = arith.constant 0 : index
    %c0_132 = arith.constant 0 : index
    %137 = vector.load %arg4[%c0_128, %c0_129, %c1_130, %c0_131, %c0_132] : memref<1x16x2x16x6xf32, #tpu.memory_space<vmem>>, vector<1x16x1x16x6xf32>
    %138 = vector.shape_cast %137 : vector<1x16x1x16x6xf32> to vector<16x16x6xf32>
    %139 = vector.shape_cast %136 : vector<16x16x6xf32> to vector<1x16x1x16x6xf32>
    tpu.vector_store %arg4[%c0_128, %c0_129, %c1_130, %c0_131, %c0_132], %139 {strides = array<i32>} : memref<1x16x2x16x6xf32, #tpu.memory_space<vmem>>, vector<1x16x1x16x6xf32>,
    return
  }
  func.func @transform_0(%arg0: i32) -> (i32, i32, i32, i32) {
    %c0_i32 = arith.constant 0 : i32
    %c0_i32_0 = arith.constant 0 : i32
    %c0_i32_1 = arith.constant 0 : i32
    %c0_i32_2 = arith.constant 0 : i32
    return %arg0, %c0_i32, %c0_i32_0, %c0_i32_1 : i32, i32, i32, i32
  }
  func.func @transform_1(%arg0: i32) -> (i32, i32, i32) {
    %c0_i32 = arith.constant 0 : i32
    %c0_i32_0 = arith.constant 0 : i32
    %c0_i32_1 = arith.constant 0 : i32
    %c0_i32_2 = arith.constant 0 : i32
    return %c0_i32, %c0_i32_0, %c0_i32_1 : i32, i32, i32
  }
  func.func @transform_2(%arg0: i32) -> (i32, i32) {
    %c0_i32 = arith.constant 0 : i32
    %c0_i32_0 = arith.constant 0 : i32
    %c0_i32_1 = arith.constant 0 : i32
    return %c0_i32, %c0_i32_0 : i32, i32
  }
  func.func @transform_3(%arg0: i32) -> (i32, i32, i32, i32, i32) {
    %c0_i32 = arith.constant 0 : i32
    %c0_i32_0 = arith.constant 0 : i32
    %c0_i32_1 = arith.constant 0 : i32
    %c0_i32_2 = arith.constant 0 : i32
    %c0_i32_3 = arith.constant 0 : i32
    return %arg0, %c0_i32, %c0_i32_0, %c0_i32_1, %c0_i32_2 : i32, i32, i32, i32, i32
  }
}

</mosaic_0001>

<bundles_post_ra>
// kernel: decoder_forward.4
= control target key start
LH: loop header
LB: loop body
LE: loop exit
PB: predicated region body
PF: predicated region fallthrough
CT: control target
= control target key end

     0   :  { %s3732_s12 = smov 0   ;;  %s4638_s0 = inlined_call_operand.vmem [shape: bf16[2,10,10,32], index: 0, kind: input, shape index: {}]   ;;  %s4639_s1 = inlined_call_operand.vmem [shape: bf16[16,32,16], index: 1, kind: input, shape index: {}]   ;;  %s4640_s2 = inlined_call_operand.vmem [shape: f32[1,16], index: 2, kind: input, shape index: {}]   ;;  %s4641_s3 = inlined_call_operand.vmem [shape: bf16[2,8,2,8,32], index: 3, kind: output, shape index: {}]  }
   0x1 LB: > { %s2876_s13 = sadd.s32 4294967295, %s3709_s12   ;;  %p2880_p0 = scmp.ge.s32.totalorder %s3709_s12, 1  ;;  %s3709_s12 = sphi %s3732_s12, %s13_s12  }
   0x2   : > { %p137_p1 = scmp.lt.s32.totalorder %s3709_s12, 3 }
   0x4   : > { %p138_p2 = pnand %p2880_p0, %p137_p1 }
   0x5   : > { %v3655_v0 = vld [vmem:[%s4639_s1 + $0x50] sm:$0xff] (!%p138_p2)   ;;  %p161_p3 = scmp.lt.s32.totalorder (!%p138_p2), %s2876_s13, 1  ;;  %v3656_v1 = vld [vmem:[%s4639_s1 + $0x58] sm:$0xff] (!%p138_p2)   ;;  %vm948_vm0 = vcmask (!%p138_p2), 1042432   ;;  %vm949_vm1 = vcmask (!%p138_p2), 1046532   ;;  %v3657_v2 = vld [vmem:[%s4639_s1 + $0x40] sm:$0xff] (!%p138_p2)  }
   0x6   : > { %141 = sbr.rel (%p138_p2) target bundleno = 494 (0x1ee), region = 32  ;;  %3365 = vmatprep.subr.bf16.mxu1 (!%p138_p2), %v3655_v0  ;;  %vm336_vm2 = vcmask (!%p138_p2), 261120   ;;  %vm3757_vm3 = vmor (!%p138_p2), %vm948_vm0, %vm949_vm1  ;;  %vm192_vm4 = vsmask.f32 (!%p138_p2), 3328  ;;  %vm193_vm5 = vsmask.f32 (!%p138_p2), 7440 }
   0x7   : > { %3366 = vmatpush3.bf16.msra.mxu1 (!%p138_p2), %v3655_v0  ;;  %v3658_v36 = vld [vmem:[%s4639_s1 + $0x48] sm:$0xff] (!%p138_p2)   ;;  %vm3852_vm6 = vmor (!%p138_p2), %vm192_vm4, %vm193_vm5  ;;  %vm1474_vm7 = vcmask (!%p138_p2), 130048   ;;  %vm1491_vm8 = vcmask (!%p138_p2), 257024  }
   0x8   : > { %3367 = vmatprep.subr.bf16.mxu1 (!%p138_p2), %v3656_v1 }
   0xb   : > { %3368 = vmatpush3.bf16.msra.mxu1 (!%p138_p2), %v3656_v1 }
   0xc   : > { %3377 = vmatprep.subr.bf16.mxu1 (!%p138_p2), %v3657_v2 }
   0xd   : > { %s4647_s13 = smov (!%p161_p3, %s2876_s13), 1 }
   0xe   : > { %s3605_s18 = smul.u32 80, %s4647_s13  ;;  %s3220_s9 = sshll.u32 %s4647_s13, 6 }
   0xf   : > { %s4562_s14 = scalar_lea.vmem %s4641_s3, %s3220_s9 }
  0x10   : > { %s3755_s23 = scalar_lea.vmem %s4638_s0, %s3605_s18 }
  0x11   : > { %v184_v4 = vld [vmem:[%s3755_s23 + $0x4] sm:$0x1]  ;;  %v185_v5 = vld [vmem:[%s3755_s23 + $0xc] sm:$0x1]  ;;  %v924_v6 = vld [vmem:[%s3755_s23] sm:$0xe] }
  0x12   : > { %v205_v7 = vshll.u32 %v184_v4, 16  ;;  %v219_v8 = vshll.u32 %v185_v5, 16  ;;  %v925_v9 = vld [vmem:[%s3755_s23 + $0x8] sm:$0xe]  ;;  %v2965_v10 = vrot.slane %v924_v6, 9  ;;  %v953_v11 = vrot.slane %v184_v4, 5 }
  0x13   : > { %v2966_v12 = vrot.slane %v925_v9, 9  ;;  %v957_v13 = vrot.slane %v185_v5, 5  ;;  %v186_v14 = vld [vmem:[%s3755_s23 + $0x14] sm:$0x1]  ;;  %v187_v15 = vld [vmem:[%s3755_s23 + $0x1c] sm:$0x1] }
  0x14   : > { %v3767_v16 = vrot.slane %v205_v7, 5  ;;  %v3769_v17 = vrot.slane %v219_v8, 5  ;;  %v954_v18 = vsel %vm3757_vm3, %v2965_v10, %v953_v11  ;;  %v233_v19 = vshll.u32 %v186_v14, 16  ;;  %v926_v20 = vld [vmem:[%s3755_s23 + $0x10] sm:$0xe] }
  0x15   : > { %v958_v21 = vsel %vm3757_vm3, %v2966_v12, %v957_v13  ;;  %v247_v22 = vshll.u32 %v187_v15, 16  ;;  %v927_v23 = vld [vmem:[%s3755_s23 + $0x18] sm:$0xe]  ;;  %v2967_v24 = vrot.slane %v926_v20, 9  ;;  %v961_v25 = vrot.slane %v186_v14, 5  ;;  %v3665_v10 = vld [vmem:[%s4639_s1 + $0x10] sm:$0xff]  }
  0x16   : > { %v2977_v26 = vcombine.low %v954_v18, %v958_v21  ;;  %v3777_v27 = vrot.slane %v233_v19, 5  ;;  %v2968_v28 = vrot.slane %v927_v23, 9  ;;  %v965_v29 = vrot.slane %v187_v15, 5  ;;  %v3780_v30 = vld [vmem:[%s3755_s23 + $0x24] sm:$0x1]  ;;  %3317 = vmatprep.subr.bf16.mxu0 %v3665_v10  ;;  %v3667_v23 = vld [vmem:[%s4639_s1 + $0x18] sm:$0xff]  }
  0x17   : > { %v3782_v31 = vrot.slane %v247_v22, 5  ;;  %v962_v32 = vsel %vm3757_vm3, %v2967_v24, %v961_v25  ;;  %v3787_v33 = vld [vmem:[%s3755_s23 + $0x2c] sm:$0x1]  ;;  %v928_v34 = vld [vmem:[%s3755_s23 + $0x20] sm:$0xe]  ;;  %v969_v35 = vrot.slane %v3780_v30, 5  ;;  %3318 = vmatpush3.bf16.msra.mxu0 %v3665_v10 }
  0x18   : > { %3369 = vmatprep.mubr.msk.bf16.mxu1 %vm336_vm2, %v2977_v26  ;;  %v966_v37 = vsel %vm3757_vm3, %v2968_v28, %v965_v29  ;;  %v929_v38 = vld [vmem:[%s3755_s23 + $0x28] sm:$0xe]  ;;  %v2969_v39 = vrot.slane %v928_v34, 9  ;;  %v973_v40 = vrot.slane %v3787_v33, 5  ;;  %v3800_v41 = vld [vmem:[%s3755_s23 + $0x34] sm:$0x1]  ;;  %3319 = vmatprep.subr.bf16.mxu0 %v3667_v23 }
  0x19   : > { %v2978_v42 = vcombine.low %v962_v32, %v966_v37  ;;  %v2970_v43 = vrot.slane %v929_v38, 9  ;;  %v3803_v44 = vld [vmem:[%s3755_s23 + $0x3c] sm:$0x1]  ;;  %v930_v45 = vld [vmem:[%s3755_s23 + $0x30] sm:$0xe]  ;;  %v977_v46 = vrot.slane %v3800_v41, 5 }
  0x1a   : > { %v970_v47 = vsel %vm3757_vm3, %v2969_v39, %v969_v35  ;;  %v931_v48 = vld [vmem:[%s3755_s23 + $0x38] sm:$0xe]  ;;  %v2971_v49 = vrot.slane %v930_v45, 9  ;;  %v981_v50 = vrot.slane %v3803_v44, 5  ;;  %v3812_v51 = vld [vmem:[%s3755_s23] sm:$0xf] }
  0x1b   : > { %3370 = vmatmul.mubr.msk.bf16.vlgmr.msra.gmra.mrb[0].mxu1 %vm336_vm2, %v2978_v42  ;;  %v974_v52 = vsel %vm3757_vm3, %v2970_v43, %v973_v40  ;;  %v2972_v53 = vrot.slane %v931_v48, 9  ;;  %v3818_v54 = vld [vmem:[%s3755_s23 + $0x8] sm:$0xf]  ;;  %v196_v55 = vshrl.u32 %v3812_v51, 16  ;;  %v199_v56 = vshll.u32 %v3812_v51, 16  ;;  %3320 = vmatpush3.bf16.msra.mxu0 %v3667_v23 }
  0x1c   : > { %3378 = vmatpush3.bf16.msra.mxu1 %v3657_v2  ;;  %v2979_v57 = vcombine.low %v970_v47, %v974_v52  ;;  %v978_v58 = vsel %vm3757_vm3, %v2971_v49, %v977_v46  ;;  %v210_v59 = vshrl.u32 %v3818_v54, 16  ;;  %v213_v60 = vshll.u32 %v3818_v54, 16  ;;  %v3827_v61 = vld [vmem:[%s3755_s23 + $0x10] sm:$0xf]  ;;  %v3830_v62 = vld [vmem:[%s3755_s23 + $0x18] sm:$0xf] }
  0x1d   : > { %3379 = vmatprep.subr.bf16.mxu1 %v3658_v36  ;;  %v982_v63 = vsel %vm3757_vm3, %v2972_v53, %v981_v50  ;;  %v198_v0 = vrot.slane %v196_v55, 4  ;;  %v201_v1 = vrot.slane %v199_v56, 5  ;;  %v3837_v2 = vld [vmem:[%s4639_s1 + $0x60] sm:$0xff]   ;;  %v224_v4 = vshrl.u32 %v3827_v61, 16  ;;  %v3857_v20 = vld [vmem:[%s3755_s23 + $0x28] sm:$0xf] }
  0x1e   : > { %v3841_v5 = vld [vmem:[%s3755_s23 + $0x20] sm:$0xf]  ;;  %3373 = vmatprep.mubr.msk.bf16.mxu1 %vm336_vm2, %v2979_v57  ;;  %v2980_v6 = vcombine.low %v978_v58, %v982_v63  ;;  %v212_v7 = vrot.slane %v210_v59, 4  ;;  %v215_v8 = vrot.slane %v213_v60, 5  ;;  %v227_v9 = vshll.u32 %v3827_v61, 16 }
  0x1f   : > { %v202_v11 = vor.u32 %v201_v1, %v198_v0  ;;  %v226_v12 = vrot.slane %v224_v4, 4  ;;  %v238_v13 = vshrl.u32 %v3830_v62, 16  ;;  %v241_v14 = vshll.u32 %v3830_v62, 16  ;;  %v3872_v40 = vld [vmem:[%s3755_s23 + $0x30] sm:$0xf]  ;;  %v3669_v49 = vld [vmem:[%s4639_s1] sm:$0xff]  }
  0x20   : > { %3380 = vmatpush3.bf16.msra.mxu1 %v3658_v36  ;;  %v216_v18 = vor.u32 %v215_v8, %v212_v7  ;;  %v229_v19 = vrot.slane %v227_v9, 5  ;;  %v252_v21 = vshrl.u32 %v3841_v5, 16  ;;  %v255_v22 = vshll.u32 %v3841_v5, 16  ;;  %v3886_v53 = vld [vmem:[%s3755_s23 + $0x38] sm:$0xf]  ;;  %v3660_v0 = vld [vmem:[%s4639_s1 + $0x68] sm:$0xff]   ;;  %3329 = vmatprep.subr.bf16.mxu0 %v3669_v49 }
  0x21   : > { %v203_v24 = vrot.slane %v202_v11, 4  ;;  %3389 = vmatprep.subr.bf16.mxu1 %v3837_v2  ;;  %v240_v25 = vrot.slane %v238_v13, 4  ;;  %v243_v26 = vrot.slane %v241_v14, 5  ;;  %v261_v28 = vshll.u32 %v3780_v30, 16  ;;  %v3903_v1 = vld [vmem:[%s3755_s23 + $0xc] sm:$0x1] }
  0x22   : > { %v217_v29 = vrot.slane %v216_v18, 4  ;;  %v230_v32 = vor.u32 %v229_v19, %v226_v12  ;;  %v254_v34 = vrot.slane %v252_v21, 4  ;;  %v257_v35 = vrot.slane %v255_v22, 5  ;;  %v2932_v9 = vld [vmem:[%s3755_s23 + $0x10] sm:$0xf] }
  0x23   : > { %3374 = vmatmul.mubr.msk.bf16.gmra.mrb[4].mxu1 %vm336_vm2, %v2980_v6  ;;  %v208_v36 = vsel %vm3852_vm6, %v203_v24, %v3767_v16  ;;  %v244_v37 = vor.u32 %v243_v26, %v240_v25  ;;  %v263_v38 = vrot.slane %v261_v28, 5  ;;  %v266_v39 = vshrl.u32 %v3857_v20, 16  ;;  %v3913_v12 = vld [vmem:[%s3755_s23 + $0x14] sm:$0x1]  ;;  %v2934_v23 = vld [vmem:[%s3755_s23 + $0x18] sm:$0xf] }
  0x24   : > { %v222_v30 = vsel %vm3852_vm6, %v217_v29, %v3769_v17  ;;  %v231_v42 = vrot.slane %v230_v32, 4  ;;  %v258_v43 = vor.u32 %v257_v35, %v254_v34  ;;  %v269_v45 = vshll.u32 %v3857_v20, 16  ;;  %v3925_v35 = vld [vmem:[%s4639_s1 + $0x70] sm:$0xff]  }
  0x25   : > { %v2888_v46 = vcombine.low %v208_v36, %v222_v30  ;;  %v245_v47 = vrot.slane %v244_v37, 4  ;;  %v268_v48 = vrot.slane %v266_v39, 4  ;;  %v275_v16 = vshll.u32 %v3787_v33, 16  ;;  %v3934_v30 = vld [vmem:[%s3755_s23 + $0x1c] sm:$0x1] }
  0x26   : > { %v236_v50 = vsel %vm3852_vm6, %v231_v42, %v3777_v27  ;;  %v259_v17 = vrot.slane %v258_v43, 4  ;;  %v271_v52 = vrot.slane %v269_v45, 5  ;;  %v280_v55 = vshrl.u32 %v3872_v40, 16  ;;  %v2930_v27 = vld [vmem:[%s3755_s23 + $0x8] sm:$0xf] }
  0x27   : > { %3381 = vmatprep.mubr.msk.bf16.mxu1 %vm336_vm2, %v2888_v46  ;;  %v250_v33 = vsel %vm3852_vm6, %v245_v47, %v3782_v31  ;;  %v277_v56 = vrot.slane %v275_v16, 5  ;;  %v283_v57 = vshll.u32 %v3872_v40, 16  ;;  %v289_v58 = vshll.u32 %v3800_v41, 16  ;;  %3321 = vmatprep.mubr.msk.bf16.mxu0 %vm336_vm2, %v2888_v46  ;;  %v3671_v41 = vld [vmem:[%s4639_s1 + $0x8] sm:$0xff]   ;;  %v2936_v45 = vld [vmem:[%s3755_s23 + $0x20] sm:$0xf] }
  0x28   : > { %v2889_v59 = vcombine.low %v236_v50, %v250_v33  ;;  %v264_v60 = vsel %vm3852_vm6, %v259_v17, %v263_v38  ;;  %v272_v63 = vor.u32 %v271_v52, %v268_v48  ;;  %v282_v31 = vrot.slane %v280_v55, 4  ;;  %v3942_v50 = vld [vmem:[%s3755_s23 + $0x24] sm:$0x1] }
  0x29   : > { %v285_v4 = vrot.slane %v283_v57, 5  ;;  %v291_v6 = vrot.slane %v289_v58, 5  ;;  %v294_v7 = vshrl.u32 %v3886_v53, 16  ;;  %v297_v8 = vshll.u32 %v3886_v53, 16 }
  0x2a   : > { %v273_v10 = vrot.slane %v272_v63, 4  ;;  %v303_v11 = vshll.u32 %v3803_v44, 16  ;;  %v671_v13 = vshrl.u32 %v2930_v27, 16  ;;  %v674_v14 = vshll.u32 %v2930_v27, 16  ;;  %3322 = vmatmul.mubr.msk.bf16.vlgmr.msra.gmra.mrb[0].mxu0 %vm336_vm2, %v2889_v59 }
  0x2b   : > { %3382 = vmatmul.mubr.msk.bf16.vlgmr.msra.gmra.mrb[0].mxu1 %vm336_vm2, %v2889_v59  ;;  %v286_v18 = vor.u32 %v285_v4, %v282_v31  ;;  %v296_v19 = vrot.slane %v294_v7, 4  ;;  %v299_v21 = vrot.slane %v297_v8, 5  ;;  %v680_v22 = vshll.u32 %v3903_v1, 16  ;;  %3330 = vmatpush3.bf16.msra.mxu0 %v3669_v49  ;;  %v2940_v4 = vld [vmem:[%s3755_s23 + $0x30] sm:$0xf] }
  0x2c   : > { %3390 = vmatpush3.bf16.msra.mxu1 %v3837_v2  ;;  %v278_v44 = vsel %vm3852_vm6, %v273_v10, %v277_v56  ;;  %v305_v24 = vrot.slane %v303_v11, 5  ;;  %v673_v25 = vrot.slane %v671_v13, 4  ;;  %v676_v26 = vrot.slane %v674_v14, 5  ;;  %3331 = vmatprep.subr.bf16.mxu0 %v3671_v41  ;;  %v3930_v2 = vld [vmem:[%s4639_s1 + $0x20] sm:$0xff]   ;;  %v2938_v56 = vld [vmem:[%s3755_s23 + $0x28] sm:$0xf] }
  0x2d   : > { %v2890_v28 = vcombine.low %v264_v60, %v278_v44  ;;  %3391 = vmatprep.subr.bf16.mxu1 %v3660_v0  ;;  %v287_v29 = vrot.slane %v286_v18, 4  ;;  %v300_v32 = vor.u32 %v299_v21, %v296_v19  ;;  %v682_v34 = vrot.slane %v680_v22, 5  ;;  %v3951_v60 = vld [vmem:[%s3755_s23 + $0x2c] sm:$0x1]  ;;  %v3959_v8 = vld [vmem:[%s3755_s23 + $0x34] sm:$0x1] }
  0x2e   : > { %v677_v36 = vor.u32 %v676_v26, %v673_v25  ;;  %v685_v37 = vshrl.u32 %v2932_v9, 16  ;;  %v688_v38 = vshll.u32 %v2932_v9, 16  ;;  %v694_v39 = vshll.u32 %v3913_v12, 16  ;;  %v2942_v19 = vld [vmem:[%s3755_s23 + $0x38] sm:$0xf] }
  0x2f   : > { %3385 = vmatprep.mubr.msk.bf16.mxu1 %vm336_vm2, %v2890_v28  ;;  %v292_v42 = vsel %vm3852_vm6, %v287_v29, %v291_v6  ;;  %v301_v43 = vrot.slane %v300_v32, 4  ;;  %v699_v46 = vshrl.u32 %v2934_v23, 16  ;;  %v702_v47 = vshll.u32 %v2934_v23, 16  ;;  %3325 = vmatprep.mubr.msk.bf16.mxu0 %vm336_vm2, %v2890_v28  ;;  %v2944_v32 = vld [vmem:[%s3755_s23 + $0x40] sm:$0xf] }
  0x30   : > { %3392 = vmatpush3.bf16.msra.mxu1 %v3660_v0  ;;  %v678_v48 = vrot.slane %v677_v36, 4  ;;  %v687_v16 = vrot.slane %v685_v37, 4  ;;  %v690_v49 = vrot.slane %v688_v38, 5  ;;  %3332 = vmatpush3.bf16.msra.mxu0 %v3671_v41  ;;  %v708_v33 = vshll.u32 %v3934_v30, 16 }
  0x31   : > { %v306_v17 = vsel %vm3852_vm6, %v301_v43, %v305_v24  ;;  %3401 = vmatprep.subr.bf16.mxu1 %v3925_v35  ;;  %v701_v52 = vrot.slane %v699_v46, 4  ;;  %v704_v55 = vrot.slane %v702_v47, 5  ;;  %3341 = vmatprep.subr.bf16.mxu0 %v3930_v2  ;;  %v696_v27 = vrot.slane %v694_v39, 5  ;;  %v3967_v24 = vld [vmem:[%s3755_s23 + $0x3c] sm:$0x1] }
  0x32   : > { %v2891_v57 = vcombine.low %v292_v42, %v306_v17  ;;  %v691_v58 = vor.u32 %v690_v49, %v687_v16  ;;  %v713_v59 = vshrl.u32 %v2936_v45, 16  ;;  %v683_v63 = vsel %vm3852_vm6, %v678_v48, %v682_v34  ;;  %v3974_v39 = vld [vmem:[%s3755_s23 + $0x44] sm:$0x1]  ;;  %v3003_v47 = vld [vmem:[%s3755_s23 + $0x8] sm:$0xe] }
  0x33   : > { %v705_v0 = vor.u32 %v704_v55, %v701_v52  ;;  %v716_v31 = vshll.u32 %v2936_v45, 16  ;;  %v722_v41 = vshll.u32 %v3942_v50, 16  ;;  %v727_v9 = vshrl.u32 %v2938_v56, 16  ;;  %v3004_v52 = vld [vmem:[%s3755_s23 + $0x10] sm:$0xe] }
  0x34   : > { %3386 = vmatmul.mubr.msk.bf16.gmra.mrb[4].mxu1 %vm336_vm2, %v2891_v57  ;;  %v692_v6 = vrot.slane %v691_v58, 4  ;;  %v715_v7 = vrot.slane %v713_v59, 4  ;;  %v730_v10 = vshll.u32 %v2938_v56, 16  ;;  %3326 = vmatmul.mubr.msk.bf16.gmra.mrb[4].mxu0 %vm336_vm2, %v2891_v57  ;;  %v710_v13 = vrot.slane %v708_v33, 5 }
  0x35   : > { %v706_v11 = vrot.slane %v705_v0, 4  ;;  %v718_v14 = vrot.slane %v716_v31, 5  ;;  %v736_v18 = vshll.u32 %v3951_v60, 16  ;;  %v729_v22 = vrot.slane %v727_v9, 4 }
  0x36   : > { %v697_v21 = vsel %vm3852_vm6, %v692_v6, %v696_v27  ;;  %v732_v23 = vrot.slane %v730_v10, 5  ;;  %v741_v44 = vshrl.u32 %v2940_v4, 16  ;;  %v724_v28 = vrot.slane %v722_v41, 5 }
  0x37   : > { %v3969_v25 = vcombine.low %v683_v63, %v697_v21  ;;  %v719_v26 = vor.u32 %v718_v14, %v715_v7  ;;  %v738_v29 = vrot.slane %v736_v18, 5  ;;  %v744_v37 = vshll.u32 %v2940_v4, 16  ;;  %v3662_v63 = vld [vmem:[%s4639_s1 + $0x78] sm:$0xff]   ;;  %v3006_v14 = vld [vmem:[%s3755_s23 + $0x20] sm:$0xe] }
  0x38   : > { %v733_v34 = vor.u32 %v732_v23, %v729_v22  ;;  %v743_v36 = vrot.slane %v741_v44, 4  ;;  %v750_v38 = vshll.u32 %v3959_v8, 16  ;;  %v711_v42 = vsel %vm3852_vm6, %v706_v11, %v710_v13  ;;  %v3005_v7 = vld [vmem:[%s3755_s23 + $0x18] sm:$0xe]  ;;  %v4003_v22 = vld [vmem:[%s4639_s1 + $0xd0] sm:$0xff]  }
  0x39   : > { %3393 = vmatprep.mubr.msk.bf16.mxu1 %vm336_vm2, %v3969_v25  ;;  %v720_v43 = vrot.slane %v719_v26, 4  ;;  %v755_v45 = vshrl.u32 %v2942_v19, 16  ;;  %v758_v46 = vshll.u32 %v2942_v19, 16  ;;  %v746_v16 = vrot.slane %v744_v37, 5  ;;  %v3007_v23 = vld [vmem:[%s3755_s23 + $0x28] sm:$0xe] }
  0x3a   : > { %v734_v48 = vrot.slane %v733_v34, 4  ;;  %v764_v49 = vshll.u32 %v3967_v24, 16  ;;  %v769_v17 = vshrl.u32 %v2944_v32, 16  ;;  %v752_v33 = vrot.slane %v750_v38, 5 }
  0x3b   : > { %v725_v55 = vsel %vm3852_vm6, %v720_v43, %v724_v28  ;;  %v757_v56 = vrot.slane %v755_v45, 4  ;;  %v760_v57 = vrot.slane %v758_v46, 5  ;;  %v747_v59 = vor.u32 %v746_v16, %v743_v36  ;;  %v3009_v43 = vld [vmem:[%s3755_s23 + $0x38] sm:$0xe] }
  0x3c   : > { %v3985_v58 = vcombine.low %v711_v42, %v725_v55  ;;  %v739_v27 = vsel %vm3852_vm6, %v734_v48, %v738_v29  ;;  %v771_v0 = vrot.slane %v769_v17, 4  ;;  %v772_v41 = vshll.u32 %v2944_v32, 16  ;;  %v3010_v48 = vld [vmem:[%s3755_s23 + $0x40] sm:$0xe]  ;;  %v4029_v17 = vld [vmem:[%s3755_s23 + $0xc] sm:$0x1] }
  0x3d   : > { %v761_v31 = vor.u32 %v760_v57, %v757_v56  ;;  %v778_v4 = vshll.u32 %v3974_v39, 16  ;;  %v3011_v6 = vrot.slane %v3003_v47, 9  ;;  %v748_v9 = vrot.slane %v747_v59, 4  ;;  %v3134_v55 = vld [vmem:[%s3755_s23 + $0x8] sm:$0xe] }
  0x3e   : > { %3394 = vmatmul.mubr.msk.bf16.vlgmr.msra.gmra.mrb[0].mxu1 %vm336_vm2, %v3985_v58  ;;  %v1282_v10 = vrot.slane %v3903_v1, 5  ;;  %v3012_v11 = vrot.slane %v3004_v52, 9  ;;  %v1286_v13 = vrot.slane %v3913_v12, 5  ;;  %v766_v19 = vrot.slane %v764_v49, 5  ;;  %v3008_v1 = vld [vmem:[%s3755_s23 + $0x30] sm:$0xe] }
  0x3f   : > { %3402 = vmatpush3.bf16.msra.mxu1 %v3925_v35  ;;  %v762_v18 = vrot.slane %v761_v31, 4  ;;  %v774_v21 = vrot.slane %v772_v41, 5  ;;  %v753_v44 = vsel %vm3852_vm6, %v748_v9, %v752_v33  ;;  %v780_v28 = vrot.slane %v778_v4, 5  ;;  %v3135_v33 = vld [vmem:[%s3755_s23 + $0x10] sm:$0xe] }
  0x40   : > { %3403 = vmatprep.subr.bf16.mxu1 %v3662_v63  ;;  %v4009_v26 = vcombine.low %v739_v27, %v753_v44  ;;  %v1283_v35 = vsel %vm3757_vm3, %v3011_v6, %v1282_v10  ;;  %v1287_v29 = vsel %vm3757_vm3, %v3012_v11, %v1286_v13  ;;  %v3013_v32 = vrot.slane %v3005_v7, 9  ;;  %v3136_v31 = vld [vmem:[%s3755_s23 + $0x18] sm:$0xe]  ;;  %v3137_v9 = vld [vmem:[%s3755_s23 + $0x20] sm:$0xe] }
  0x41   : > { %v775_v12 = vor.u32 %v774_v21, %v771_v0  ;;  %v1290_v34 = vrot.slane %v3934_v30, 5  ;;  %v767_v36 = vsel %vm3852_vm6, %v762_v18, %v766_v19  ;;  %v3014_v38 = vrot.slane %v3006_v14, 9  ;;  %v4051_v0 = vld [vmem:[%s3755_s23 + $0x1c] sm:$0x1]  ;;  %v4062_v10 = vld [vmem:[%s3755_s23 + $0x2c] sm:$0x1] }
  0x42   : > { %3397 = vmatprep.mubr.msk.bf16.mxu1 %vm336_vm2, %v4009_v26  ;;  %v1294_v42 = vrot.slane %v3942_v50, 5  ;;  %v3015_v45 = vrot.slane %v3007_v23, 9  ;;  %v1298_v30 = vrot.slane %v3951_v60, 5  ;;  %v3016_v46 = vrot.slane %v3008_v1, 9  ;;  %v4032_v50 = vld [vmem:[%s3755_s23 + $0x14] sm:$0x1] }
  0x43   : > { %v776_v37 = vrot.slane %v775_v12, 4  ;;  %3404 = vmatpush3.bf16.msra.mxu1 %v3662_v63  ;;  %v1302_v47 = vrot.slane %v3959_v8, 5  ;;  %v3023_v49 = vcombine.low %v1283_v35, %v1287_v29  ;;  %v3017_v60 = vrot.slane %v3009_v43, 9  ;;  %v4065_v11 = vld [vmem:[%s3755_s23 + $0x34] sm:$0x1]  ;;  %v3664_v12 = vld [vmem:[%s4639_s1 + $0xd8] sm:$0xff]  }
  0x44   : > { %3461 = vmatprep.subr.bf16.mxu1 %v4003_v22  ;;  %v1306_v56 = vrot.slane %v3967_v24, 5  ;;  %v3018_v8 = vrot.slane %v3010_v48, 9  ;;  %v1310_v57 = vrot.slane %v3974_v39, 5  ;;  %v1291_v27 = vsel %vm3757_vm3, %v3013_v32, %v1290_v34  ;;  %v4054_v39 = vld [vmem:[%s3755_s23 + $0x24] sm:$0x1] }
  0x45   : > { %v781_v16 = vsel %vm3852_vm6, %v776_v37, %v780_v28  ;;  %v1295_v59 = vsel %vm3757_vm3, %v3014_v38, %v1294_v42  ;;  %v1299_v63 = vsel %vm3757_vm3, %v3015_v45, %v1298_v30  ;;  %v1303_v24 = vsel %vm3757_vm3, %v3016_v46, %v1302_v47  ;;  %v3138_v13 = vld [vmem:[%s3755_s23 + $0x28] sm:$0xe]  ;;  %v3139_v23 = vld [vmem:[%s3755_s23 + $0x30] sm:$0xe]  ;;  %v4097_v37 = vld [vmem:[%s3755_s23 + $0x38] sm:$0xe] }
  0x46   : > { %v4034_v52 = vcombine.low %v767_v36, %v781_v16  ;;  %v3142_v41 = vrot.slane %v3134_v55, 9  ;;  %v2275_v4 = vrot.slane %v4029_v17, 5  ;;  %v3143_v6 = vrot.slane %v3135_v33, 9  ;;  %v4083_v29 = vld [vmem:[%s3755_s23 + $0x8] sm:$0xf]  ;;  %v4113_v55 = vld [vmem:[%s4639_s1 + $0xc0] sm:$0xff]  }
  0x47   : > { %v2279_v7 = vrot.slane %v4032_v50, 5  ;;  %v4070_v14 = vsel %vm3757_vm3, %v3017_v60, %v1306_v56  ;;  %v4074_v18 = vsel %vm3757_vm3, %v3018_v8, %v1310_v57  ;;  %v3144_v19 = vrot.slane %v3136_v31, 9  ;;  %v4086_v32 = vld [vmem:[%s3755_s23 + $0x10] sm:$0xf]  ;;  %v4124_v56 = vld [vmem:[%s3755_s23 + $0x3c] sm:$0x1] }
  0x48   : > { %3398 = vmatmul.mubr.msk.bf16.gmra.mrb[4].mxu1 %vm336_vm2, %v4034_v52  ;;  %v2283_v21 = vrot.slane %v4051_v0, 5  ;;  %v3024_v44 = vcombine.low %v1291_v27, %v1295_v59  ;;  %v3025_v1 = vcombine.low %v1299_v63, %v1303_v24  ;;  %v3145_v28 = vrot.slane %v3137_v9, 9  ;;  %v4128_v57 = vld [vmem:[%s3755_s23 + $0x18] sm:$0xf]  ;;  %v4133_v63 = vld [vmem:[%s3755_s23 + $0x20] sm:$0xf] }
  0x49   : > { %3405 = vmatprep.mubr.msk.bf16.mxu1 %vm336_vm2, %v3023_v49  ;;  %v2287_v35 = vrot.slane %v4054_v39, 5  ;;  %v4090_v34 = vsel %vm3757_vm3, %v3142_v41, %v2275_v4  ;;  %v4094_v36 = vsel %vm3757_vm3, %v3143_v6, %v2279_v7  ;;  %v1522_v38 = vshrl.u32 %v4083_v29, 16  ;;  %v4138_v41 = vld [vmem:[%s3755_s23 + $0x44] sm:$0x1] }
  0x4a   : > { %v1525_v42 = vshll.u32 %v4083_v29, 16  ;;  %v3026_v43 = vcombine.low %v4070_v14, %v4074_v18  ;;  %v3146_v45 = vrot.slane %v3138_v13, 9  ;;  %v1536_v30 = vshrl.u32 %v4086_v32, 16  ;;  %v3141_v18 = vld [vmem:[%s3755_s23 + $0x40] sm:$0xe] }
  0x4b   : > { %v2291_v46 = vrot.slane %v4062_v10, 5  ;;  %v3147_v47 = vrot.slane %v3139_v23, 9  ;;  %v2295_v48 = vrot.slane %v4065_v11, 5  ;;  %v1539_v16 = vshll.u32 %v4086_v32, 16 }
  0x4c   : > { %v3154_v49 = vcombine.low %v4090_v34, %v4094_v36  ;;  %v4117_v33 = vsel %vm3757_vm3, %v3144_v19, %v2283_v21  ;;  %v4121_v60 = vsel %vm3757_vm3, %v3145_v28, %v2287_v35  ;;  %v3148_v8 = vrot.slane %v4097_v37, 9  ;;  %v4155_v21 = vld [vmem:[%s3755_s23 + $0x28] sm:$0xf] }
  0x4d   : > { %v1524_v27 = vrot.slane %v1522_v38, 4  ;;  %v1527_v59 = vrot.slane %v1525_v42, 5  ;;  %v1550_v24 = vshrl.u32 %v4128_v57, 16  ;;  %v1553_v31 = vshll.u32 %v4128_v57, 16  ;;  %v4162_v42 = vld [vmem:[%s3755_s23 + $0x30] sm:$0xf] }
  0x4e   : > { %v1538_v4 = vrot.slane %v1536_v30, 4  ;;  %v1541_v6 = vrot.slane %v1539_v16, 5  ;;  %v1564_v7 = vshrl.u32 %v4133_v63, 16  ;;  %v3155_v9 = vcombine.low %v4117_v33, %v4121_v60  ;;  %v4182_v16 = vld [vmem:[%s3755_s23 + $0x38] sm:$0xf] }
  0x4f   : > { %v4146_v13 = vsel %vm3757_vm3, %v3146_v45, %v2291_v46  ;;  %v4150_v14 = vsel %vm3757_vm3, %v3147_v47, %v2295_v48  ;;  %v2299_v19 = vrot.slane %v4124_v56, 5  ;;  %v1552_v23 = vrot.slane %v1550_v24, 4 }
  0x50   : > { %3406 = vmatmul.mubr.msk.bf16.vlgmr.msra.gmra.mrb[0].mxu1 %vm336_vm2, %v3024_v44  ;;  %v1555_v44 = vrot.slane %v1553_v31, 5  ;;  %v1528_v35 = vor.u32 %v1527_v59, %v1524_v27  ;;  %v1531_v34 = vshll.u32 %v4029_v17, 16  ;;  %v1545_v36 = vshll.u32 %v4032_v50, 16  ;;  %v3679_v17 = vld [vmem:[%s4639_s1 + $0x28] sm:$0xff]  }
  0x51   : > { %3462 = vmatpush3.bf16.msra.mxu1 %v4003_v22  ;;  %3409 = vmatprep.mubr.msk.bf16.mxu1 %vm336_vm2, %v3025_v1  ;;  %v1567_v22 = vshll.u32 %v4133_v63, 16  ;;  %v1566_v1 = vrot.slane %v1564_v7, 4  ;;  %v2898_v38 = vcombine.low %v3812_v51, %v3818_v54  ;;  %v1542_v45 = vor.u32 %v1541_v6, %v1538_v4  ;;  %v4204_v7 = vld [vmem:[%s3755_s23 + $0x40] sm:$0xf] }
  0x52   : > { %3463 = vmatprep.subr.bf16.mxu1 %v3664_v12  ;;  %v1559_v30 = vshll.u32 %v4051_v0, 16  ;;  %v2899_v46 = vcombine.low %v3827_v61, %v3830_v62  ;;  %v3156_v51 = vcombine.low %v4146_v13, %v4150_v14  ;;  %v3149_v54 = vrot.slane %v3141_v18, 9 }
  0x53   : > { %v1569_v28 = vrot.slane %v1567_v22, 5  ;;  %v2303_v50 = vrot.slane %v4138_v41, 5  ;;  %3333 = vmatprep.mubr.msk.bf16.mxu0 %vm336_vm2, %v2898_v38  ;;  %v1581_v47 = vshll.u32 %v4155_v21, 16  ;;  %v1556_v0 = vor.u32 %v1555_v44, %v1552_v23  ;;  %v3668_v38 = vld [vmem:[%s4639_s1 + $0xc8] sm:$0xff]  }
  0x54   : > { %v1573_v62 = vshll.u32 %v4054_v39, 16  ;;  %3334 = vmatmul.mubr.msk.bf16.vlgmr.msra.gmra.mrb[0].mxu0 %vm336_vm2, %v2899_v46  ;;  %v1592_v48 = vshrl.u32 %v4162_v42, 16  ;;  %v4185_v27 = vrot.slane %v1528_v35, 4  ;;  %v4187_v59 = vrot.slane %v1531_v34, 5  ;;  %v4196_v39 = vld [vmem:[%s4639_s1 + $0x30] sm:$0xff]  }
  0x55   : > { %3464 = vmatpush3.bf16.msra.mxu1 %v3664_v12  ;;  %v1578_v12 = vshrl.u32 %v4155_v21, 16  ;;  %v1570_v61 = vor.u32 %v1569_v28, %v1566_v1  ;;  %v4189_v24 = vrot.slane %v1545_v36, 5  ;;  %3342 = vmatpush3.bf16.msra.mxu0 %v3930_v2  ;;  %v4198_v31 = vrot.slane %v1542_v45, 4  ;;  %v3099_v36 = vld [vmem:[%s3755_s23 + $0x10] sm:$0xf] }
  0x56   : > { %3473 = vmatprep.subr.bf16.mxu1 %v4113_v55  ;;  %v4200_v4 = vrot.slane %v1559_v30, 5  ;;  %v1587_v6 = vshll.u32 %v4062_v10, 16  ;;  %3343 = vmatprep.subr.bf16.mxu0 %v3679_v17  ;;  %v1583_v22 = vrot.slane %v1581_v47, 5  ;;  %v1594_v13 = vrot.slane %v1592_v48, 4 }
  0x57   : > { %v1606_v2 = vshrl.u32 %v4182_v16, 16  ;;  %v1557_v18 = vrot.slane %v1556_v0, 4  ;;  %v1571_v23 = vrot.slane %v1570_v61, 4  ;;  %v1575_v44 = vrot.slane %v1573_v62, 5  ;;  %v4259_v61 = vld [vmem:[%s3755_s23 + $0x14] sm:$0x1] }
  0x58   : > { %3410 = vmatmul.mubr.msk.bf16.gmra.mrb[4].mxu1 %vm336_vm2, %v3026_v43  ;;  %v1595_v43 = vshll.u32 %v4162_v42, 16  ;;  %v1609_v1 = vshll.u32 %v4182_v16, 16  ;;  %v4212_v28 = vsel %vm3757_vm3, %v3148_v8, %v2299_v19  ;;  %v4216_v10 = vsel %vm3757_vm3, %v3149_v54, %v2303_v50  ;;  %v3101_v54 = vld [vmem:[%s3755_s23 + $0x18] sm:$0xf]  ;;  %v4246_v50 = vld [vmem:[%s4639_s1 + $0xe0] sm:$0xff]  }
  0x59   : > { %3465 = vmatprep.mubr.msk.bf16.mxu1 %vm336_vm2, %v3154_v49  ;;  %v1580_v49 = vrot.slane %v1578_v12, 4  ;;  %v1620_v35 = vshrl.u32 %v4204_v7, 16  ;;  %v1623_v34 = vshll.u32 %v4204_v7, 16  ;;  %3344 = vmatpush3.bf16.msra.mxu0 %v3679_v17  ;;  %v1534_v37 = vsel %vm3852_vm6, %v4185_v27, %v4187_v59 }
  0x5a   : > { %v1597_v14 = vrot.slane %v1595_v43, 5  ;;  %v1548_v8 = vsel %vm3852_vm6, %v4198_v31, %v4189_v24  ;;  %v4232_v19 = vrot.slane %v1587_v6, 5  ;;  %v2900_v45 = vcombine.low %v3841_v5, %v3857_v20  ;;  %3353 = vmatprep.subr.bf16.mxu0 %v4196_v39  ;;  %v3680_v43 = vld [vmem:[%s3755_s23 + $0x8] ss:$8 sps:$4 sm:$0xff]   ;;  %v3103_v6 = vld [vmem:[%s3755_s23 + $0x20] sm:$0xf] }
  0x5b   : > { %v1584_v30 = vor.u32 %v1583_v22, %v1580_v49  ;;  %v1601_v12 = vshll.u32 %v4065_v11, 16  ;;  %v1608_v17 = vrot.slane %v1606_v2, 4  ;;  %v1611_v5 = vrot.slane %v1609_v1, 5  ;;  %v4274_v2 = vld [vmem:[%s3755_s23 + $0x24] sm:$0x1] }
  0x5c   : > { %v1598_v46 = vor.u32 %v1597_v14, %v1594_v13  ;;  %3337 = vmatprep.mubr.msk.bf16.mxu0 %vm336_vm2, %v2900_v45  ;;  %v2901_v20 = vcombine.low %v3872_v40, %v3886_v53  ;;  %v1996_v11 = vshrl.u32 %v3099_v36, 16  ;;  %v1999_v47 = vshll.u32 %v3099_v36, 16  ;;  %v4264_v53 = vld [vmem:[%s3755_s23 + $0x1c] sm:$0x1]  ;;  %v3105_v1 = vld [vmem:[%s3755_s23 + $0x28] sm:$0xf] }
  0x5d   : > { %v1562_v33 = vsel %vm3852_vm6, %v1557_v18, %v4200_v4  ;;  %v1576_v60 = vsel %vm3852_vm6, %v1571_v23, %v1575_v44  ;;  %v1625_v0 = vrot.slane %v1623_v34, 5  ;;  %v1615_v40 = vshll.u32 %v4124_v56, 16 }
  0x5e   : > { %3338 = vmatmul.mubr.msk.bf16.gmra.mrb[4].mxu0 %vm336_vm2, %v2901_v20  ;;  %v2010_v62 = vshrl.u32 %v3101_v54, 16  ;;  %v1585_v48 = vrot.slane %v1584_v30, 4  ;;  %v1603_v27 = vrot.slane %v1601_v12, 5  ;;  %v1629_v59 = vshll.u32 %v4138_v41, 16  ;;  %v3109_v12 = vld [vmem:[%s3755_s23 + $0x38] sm:$0xf] }
  0x5f   : > { %v2013_v24 = vshll.u32 %v3101_v54, 16  ;;  %v3157_v31 = vcombine.low %v4212_v28, %v4216_v10  ;;  %v1599_v4 = vrot.slane %v1598_v46, 4  ;;  %v1612_v56 = vor.u32 %v1611_v5, %v1608_v17  ;;  %3345 = vmatprep.mubr.msk.bf16.mxu0 %vm336_vm2, %v3680_v43  ;;  %v3681_v28 = vld [vmem:[%s3755_s23 + $0x18] ss:$8 sps:$4 sm:$0xff]   ;;  %v4301_v46 = vld [vmem:[%s3755_s23 + $0x2c] sm:$0x1] }
  0x60   : > { %3466 = vmatmul.mubr.msk.bf16.vlgmr.msra.gmra.mrb[8].mxu1 %vm336_vm2, %v3155_v9  ;;  %v1622_v9 = vrot.slane %v1620_v35, 4  ;;  %v2012_v49 = vrot.slane %v2010_v62, 4  ;;  %v4271_v22 = vcombine.low %v1534_v37, %v1548_v8  ;;  %v4278_v41 = vcombine.low %v1562_v33, %v1576_v60  ;;  %v3686_v37 = vld [vmem:[%s4639_s1 + $0x38] sm:$0xff]   ;;  %v4325_v43 = vld [vmem:[%s3755_s23 + $0x34] sm:$0x1] }
  0x61   : > { %3474 = vmatpush3.bf16.msra.mxu1 %v4113_v55  ;;  %3469 = vmatprep.mubr.msk.bf16.mxu1 %vm336_vm2, %v3156_v51  ;;  %v1998_v55 = vrot.slane %v1996_v11, 4  ;;  %v2001_v51 = vrot.slane %v1999_v47, 5  ;;  %v2015_v14 = vrot.slane %v2013_v24, 5  ;;  %v4280_v18 = vrot.slane %v1615_v40, 5 }
  0x62   : > { %3475 = vmatprep.subr.bf16.mxu1 %v3668_v38  ;;  %v1626_v13 = vor.u32 %v1625_v0, %v1622_v9  ;;  %v2005_v44 = vshll.u32 %v4259_v61, 16  ;;  %v1590_v10 = vsel %vm3852_vm6, %v1585_v48, %v4232_v19  ;;  %v4288_v35 = vrot.slane %v1629_v59, 5  ;;  %v4311_v9 = vld [vmem:[%s4639_s1 + $0x90] sm:$0xff]   ;;  %v3674_v48 = vld [vmem:[%s4639_s1 + $0xe8] sm:$0xff]  }
  0x63   : > { %v2002_v23 = vor.u32 %v2001_v51, %v1998_v55  ;;  %v2019_v34 = vshll.u32 %v4264_v53, 16  ;;  %v2024_v36 = vshrl.u32 %v3103_v6, 16  ;;  %v1604_v8 = vsel %vm3852_vm6, %v1599_v4, %v1603_v27 }
  0x64   : > { %v4298_v45 = vrot.slane %v1612_v56, 4  ;;  %v2016_v30 = vor.u32 %v2015_v14, %v2012_v49  ;;  %v2027_v19 = vshll.u32 %v3103_v6, 16  ;;  %v1627_v17 = vrot.slane %v1626_v13, 4  ;;  %v3113_v6 = vld [vmem:[%s3755_s23 + $0x48] sm:$0xf] }
  0x65   : > { %3476 = vmatpush3.bf16.msra.mxu1 %v3668_v38  ;;  %v3107_v38 = vld [vmem:[%s3755_s23 + $0x30] sm:$0xf]  ;;  %v2038_v54 = vshrl.u32 %v3105_v1, 16  ;;  %v2041_v5 = vshll.u32 %v3105_v1, 16  ;;  %v2003_v11 = vrot.slane %v2002_v23, 4  ;;  %v2007_v47 = vrot.slane %v2005_v44, 5 }
  0x66   : > { %3485 = vmatprep.subr.bf16.mxu1 %v4246_v50  ;;  %v2052_v20 = vshrl.u32 %v3107_v38, 16  ;;  %v2033_v33 = vshll.u32 %v4274_v2, 16  ;;  %3346 = vmatmul.mubr.msk.bf16.vlgmr.msra.gmra.mrb[0].mxu0 %vm336_vm2, %v3681_v28  ;;  %v2055_v60 = vshll.u32 %v3107_v38, 16  ;;  %v2021_v0 = vrot.slane %v2019_v34, 5  ;;  %v4330_v13 = vld [vmem:[%s3755_s23 + $0x3c] sm:$0x1] }
  0x67   : > { %v2026_v40 = vrot.slane %v2024_v36, 4  ;;  %v2047_v55 = vshll.u32 %v4301_v46, 16  ;;  %v2066_v51 = vshrl.u32 %v3109_v12, 16  ;;  %3354 = vmatpush3.bf16.msra.mxu0 %v4196_v39  ;;  %v4315_v62 = vcombine.low %v1590_v10, %v1604_v8  ;;  %v4342_v38 = vld [vmem:[%s4639_s1 + $0xf0] sm:$0xff]  }
  0x68   : > { %3470 = vmatmul.mubr.msk.bf16.gmra.mrb[12].mxu1 %vm336_vm2, %v3157_v31  ;;  %v1618_v27 = vsel %vm3852_vm6, %v4298_v45, %v4280_v18  ;;  %v2017_v59 = vrot.slane %v2016_v30, 4  ;;  %v2029_v24 = vrot.slane %v2027_v19, 5  ;;  %v3111_v31 = vld [vmem:[%s3755_s23 + $0x40] sm:$0xf]  ;;  %3355 = vmatprep.subr.bf16.mxu0 %v3686_v37  ;;  %v2040_v4 = vrot.slane %v2038_v54, 4 }
  0x69   : > { %3477 = vmatprep.mubr.msk.bf16.mxu1 %vm336_vm2, %v4271_v22  ;;  %v2043_v56 = vrot.slane %v2041_v5, 5  ;;  %v2054_v39 = vrot.slane %v2052_v20, 4  ;;  %v2069_v49 = vshll.u32 %v3109_v12, 16  ;;  %v2057_v14 = vrot.slane %v2055_v60, 5  ;;  %v3683_v54 = vld [vmem:[%s3755_s23 + $0x28] ss:$8 sps:$4 sm:$0xff]  }
  0x6a   : > { %v2068_v23 = vrot.slane %v2066_v51, 4  ;;  %v2080_v44 = vshrl.u32 %v3111_v31, 16  ;;  %v2083_v1 = vshll.u32 %v3111_v31, 16  ;;  %v1632_v18 = vsel %vm3852_vm6, %v1627_v17, %v4288_v35  ;;  %v4346_v35 = vld [vmem:[%s3755_s23 + $0x44] sm:$0x1]  ;;  %3349 = vmatprep.mubr.msk.bf16.mxu0 %vm336_vm2, %v3683_v54 }
  0x6b   : > { %v2035_v28 = vrot.slane %v2033_v33, 5  ;;  %v2049_v10 = vrot.slane %v2047_v55, 5  ;;  %v2071_v34 = vrot.slane %v2069_v49, 5  ;;  %3356 = vmatpush3.bf16.msra.mxu0 %v3686_v37  ;;  %v2008_v36 = vsel %vm3852_vm6, %v2003_v11, %v2007_v47  ;;  %v3684_v33 = vld [vmem:[%s3755_s23 + $0x38] ss:$8 sps:$4 sm:$0xff]  }
  0x6c   : > { %v2030_v8 = vor.u32 %v2029_v24, %v2026_v40  ;;  %v2061_v45 = vshll.u32 %v4325_v43, 16  ;;  %v2094_v30 = vshrl.u32 %v3113_v6, 16  ;;  %3413 = vmatprep.subr.bf16.mxu0 %v4311_v9  ;;  %v2022_v37 = vsel %vm3852_vm6, %v2017_v59, %v2021_v0  ;;  %v3183_v54 = vld [vmem:[%s3755_s23 + $0x28] sm:$0xe] }
  0x6d   : > { %v2044_v19 = vor.u32 %v2043_v56, %v2040_v4  ;;  %v2075_v12 = vshll.u32 %v4330_v13, 16  ;;  %v2082_v17 = vrot.slane %v2080_v44, 4  ;;  %v2058_v5 = vor.u32 %v2057_v14, %v2054_v39  ;;  %v3181_v44 = vld [vmem:[%s3755_s23 + $0x18] sm:$0xe] }
  0x6e   : > { %v2072_v20 = vor.u32 %v2071_v34, %v2068_v23  ;;  %v2085_v11 = vrot.slane %v2083_v1, 5  ;;  %v2097_v47 = vshll.u32 %v3113_v6, 16  ;;  %v4357_v60 = vcombine.low %v1618_v27, %v1632_v18  ;;  %3350 = vmatmul.mubr.msk.bf16.gmra.mrb[4].mxu0 %vm336_vm2, %v3684_v33  ;;  %v3180_v6 = vld [vmem:[%s3755_s23 + $0x10] sm:$0xe]  ;;  %v3688_v18 = vld [vmem:[%s4639_s1 + $0x98] sm:$0xff]  }
  0x6f   : > { %v4363_v40 = vcombine.low %v2008_v36, %v2022_v37  ;;  %v2031_v0 = vrot.slane %v2030_v8, 4  ;;  %v2096_v55 = vrot.slane %v2094_v30, 4  ;;  %v2045_v59 = vrot.slane %v2044_v19, 4  ;;  %3357 = vmatprep.mubr.msk.bf16.mxu0 %vm336_vm2, %v3969_v25 }
  0x70   : > { %3478 = vmatmul.mubr.msk.bf16.vlgmr.msra.gmra.mrb[8].mxu1 %vm336_vm2, %v4278_v41  ;;  %v2099_v51 = vrot.slane %v2097_v47, 5  ;;  %v2063_v24 = vrot.slane %v2061_v45, 5  ;;  %v2077_v31 = vrot.slane %v2075_v12, 5  ;;  %v2089_v27 = vshll.u32 %v4346_v35, 16 }
  0x71   : > { %3486 = vmatpush3.bf16.msra.mxu1 %v4246_v50  ;;  %3481 = vmatprep.mubr.msk.bf16.mxu1 %vm336_vm2, %v4315_v62  ;;  %v4360_v50 = vld [vmem:[%s3755_s23 + $0x4c] sm:$0x1]  ;;  %v2059_v4 = vrot.slane %v2058_v5, 4  ;;  %v2073_v56 = vrot.slane %v2072_v20, 4  ;;  %v2086_v39 = vor.u32 %v2085_v11, %v2082_v17  ;;  %v2036_v14 = vsel %vm3852_vm6, %v2031_v0, %v2035_v28  ;;  %v3182_v17 = vld [vmem:[%s3755_s23 + $0x20] sm:$0xe] }
  0x72   : > { %3487 = vmatprep.subr.bf16.mxu1 %v3674_v48  ;;  %v2103_v49 = vshll.u32 %v4360_v50, 16  ;;  %v2050_v25 = vsel %vm3852_vm6, %v2045_v59, %v2049_v10  ;;  %v2091_v23 = vrot.slane %v2089_v27, 5  ;;  %v2604_v1 = vrot.slane %v4259_v61, 5  ;;  %v3682_v61 = vld [vmem:[%s4639_s1 + $0xf8] sm:$0xff]   ;;  %v3187_v27 = vld [vmem:[%s3755_s23 + $0x48] sm:$0xe] }
  0x73   : > { %v2064_v34 = vsel %vm3852_vm6, %v2059_v4, %v2063_v24  ;;  %v2078_v36 = vsel %vm3852_vm6, %v2073_v56, %v2077_v31  ;;  %v2087_v8 = vrot.slane %v2086_v39, 4  ;;  %v3188_v45 = vrot.slane %v3180_v6, 9  ;;  %v3185_v11 = vld [vmem:[%s3755_s23 + $0x38] sm:$0xe]  ;;  %v3186_v31 = vld [vmem:[%s3755_s23 + $0x40] sm:$0xe] }
  0x74   : > { %v2105_v28 = vrot.slane %v2103_v49, 5  ;;  %v2608_v10 = vrot.slane %v4264_v53, 5  ;;  %v4390_v30 = vcombine.low %v2036_v14, %v2050_v25  ;;  %v3189_v19 = vrot.slane %v3181_v44, 9  ;;  %v3689_v53 = vld [vmem:[%s4639_s1 + $0x80] sm:$0xff]  }
  0x75   : > { %3488 = vmatpush3.bf16.msra.mxu1 %v3674_v48  ;;  %v2100_v48 = vor.u32 %v2099_v51, %v2096_v55  ;;  %v4397_v12 = vcombine.low %v2064_v34, %v2078_v36  ;;  %v2605_v5 = vsel %vm3757_vm3, %v3188_v45, %v2604_v1  ;;  %v2612_v47 = vrot.slane %v4274_v2, 5  ;;  %v3695_v14 = vld [vmem:[%s4639_s1 + $0xa0] sm:$0xff]  }
  0x76   : > { %3497 = vmatprep.subr.bf16.mxu1 %v4342_v38  ;;  %3358 = vmatmul.mubr.msk.bf16.vlgmr.msra.gmra.mrb[0].mxu0 %vm336_vm2, %v3985_v58  ;;  %v2092_v58 = vsel %vm3852_vm6, %v2087_v8, %v2091_v23  ;;  %v2609_v20 = vsel %vm3757_vm3, %v3189_v19, %v2608_v10  ;;  %v3190_v33 = vrot.slane %v3182_v17, 9  ;;  %v3191_v0 = vrot.slane %v3183_v54, 9 }
  0x77   : > { %v2101_v37 = vrot.slane %v2100_v48, 4  ;;  %3361 = vmatprep.mubr.msk.bf16.mxu0 %vm336_vm2, %v4009_v26  ;;  %3414 = vmatpush3.bf16.msra.mxu0 %v4311_v9  ;;  %v3184_v9 = vld [vmem:[%s3755_s23 + $0x30] sm:$0xe]  ;;  %v3200_v15 = vcombine.low %v2605_v5, %v2609_v20  ;;  %v2616_v55 = vrot.slane %v4301_v46, 5  ;;  %v2620_v59 = vrot.slane %v4325_v43, 5 }
  0x78   : > { %3482 = vmatmul.mubr.msk.bf16.gmra.mrb[12].mxu1 %vm336_vm2, %v4357_v60  ;;  %3415 = vmatprep.subr.bf16.mxu0 %v3688_v18  ;;  %v3192_v51 = vrot.slane %v3184_v9, 9  ;;  %v3193_v24 = vrot.slane %v3185_v11, 9  ;;  %v2624_v2 = vrot.slane %v4330_v13, 5  ;;  %v3690_v13 = vld [vmem:[%s4639_s1 + $0x88] sm:$0xff]   ;;  %v3194_v56 = vrot.slane %v3186_v31, 9 }
  0x79   : > { %3489 = vmatprep.mubr.msk.bf16.mxu1 %vm336_vm2, %v4363_v40  ;;  %v2106_v26 = vsel %vm3852_vm6, %v2101_v37, %v2105_v28  ;;  %v2617_v46 = vsel %vm3757_vm3, %v3191_v0, %v2616_v55  ;;  %v2628_v49 = vrot.slane %v4346_v35, 5  ;;  %v3195_v48 = vrot.slane %v3187_v27, 9 }
  0x7a   : > { %v2625_v43 = vsel %vm3757_vm3, %v3193_v24, %v2624_v2  ;;  %v2632_v6 = vrot.slane %v4360_v50, 5  ;;  %v3068_v3 = vcombine.low %v4128_v57, %v4133_v63  ;;  %v3069_v25 = vcombine.low %v4155_v21, %v4162_v42  ;;  %v3697_v63 = vld [vmem:[%s3755_s23 + $0x10] ss:$8 sps:$4 sm:$0xff]   ;;  %v3698_v21 = vld [vmem:[%s3755_s23 + $0x20] ss:$8 sps:$4 sm:$0xff]  }
  0x7b   : > { %3416 = vmatpush3.bf16.msra.mxu0 %v3688_v18  ;;  %v3070_v57 = vcombine.low %v4182_v16, %v4204_v7  ;;  %v3699_v42 = vld [vmem:[%s3755_s23 + $0x30] ss:$8 sps:$4 sm:$0xff]   ;;  %v3700_v16 = vld [vmem:[%s3755_s23 + $0x40] ss:$8 sps:$4 sm:$0xff]   ;;  %s3711_s23 = smov 16  }
  0x7c   : > { %3425 = vmatprep.subr.bf16.mxu0 %v3689_v53  ;;  %v2633_v35 = vsel %vm3757_vm3, %v3195_v48, %v2632_v6  ;;  %v4506_v7 = vld [vmem:[%s4640_s2] ss:$0 sm:$0xff] }
  0x7e   : > { %3362 = vmatmul.mubr.msk.bf16.gmra.mrb[4].mxu0 %vm336_vm2, %v4034_v52  ;;  %v2613_v52 = vsel %vm3757_vm3, %v3190_v33, %v2612_v47 }
  0x7f   : > { %3417 = vmatprep.mubr.msk.bf16.mxu0 %vm336_vm2, %v4271_v22  ;;  %v2621_v22 = vsel %vm3757_vm3, %v3192_v51, %v2620_v59  ;;  %v3201_v4 = vcombine.low %v2613_v52, %v2617_v46 }
  0x80   : > { %3490 = vmatmul.mubr.msk.bf16.vlgmr.msra.gmra.mrb[8].mxu1 %vm336_vm2, %v4390_v30  ;;  %v3202_v39 = vcombine.low %v2621_v22, %v2625_v43 }
  0x81   : > { %3498 = vmatpush3.bf16.msra.mxu1 %v4342_v38  ;;  %3493 = vmatprep.mubr.msk.bf16.mxu1 %vm336_vm2, %v4397_v12  ;;  %v4422_v38 = vcombine.low %v2092_v58, %v2106_v26 }
  0x82   : > { %3499 = vmatprep.subr.bf16.mxu1 %v3682_v61 }
  0x85   : > { %3500 = vmatpush3.bf16.msra.mxu1 %v3682_v61 }
  0x86   : > { %3418 = vmatmul.mubr.msk.bf16.vlgmr.msra.gmra.mrb[8].mxu0 %vm336_vm2, %v4278_v41  ;;  %v2629_v41 = vsel %vm3757_vm3, %v3194_v56, %v2628_v49 }
  0x87   : > { %3421 = vmatprep.mubr.msk.bf16.mxu0 %vm336_vm2, %v4315_v62  ;;  %3426 = vmatpush3.bf16.msra.mxu0 %v3689_v53  ;;  %v3067_v62 = vcombine.low %v4083_v29, %v4086_v32  ;;  %v3203_v50 = vcombine.low %v2629_v41, %v2633_v35  ;;  %v3696_v29 = vld [vmem:[%s4639_s1 + $0xa8] sm:$0xff]   ;;  %v3701_v32 = vld [vmem:[%s4639_s1 + $0xb0] sm:$0xff]  }
  0x88   : > { %3494 = vmatmul.mubr.msk.bf16.gmra.mrb[12].mxu1 %vm336_vm2, %v4422_v38  ;;  %3427 = vmatprep.subr.bf16.mxu0 %v3690_v13 }
  0x89   : > { %3501 = vmatprep.mubr.msk.bf16.mxu1 %vm336_vm2, %v3200_v15 }
  0x8b   : > { %3428 = vmatpush3.bf16.msra.mxu0 %v3690_v13 }
  0x8c   : > { %3437 = vmatprep.subr.bf16.mxu0 %v3695_v14 }
  0x8e   : > { %3422 = vmatmul.mubr.msk.bf16.gmra.mrb[12].mxu0 %vm336_vm2, %v4357_v60  ;;  %v3702_v60 = vld [vmem:[%s4639_s1 + $0xb8] sm:$0xff]  }
  0x8f   : > { %3429 = vmatprep.mubr.msk.bf16.mxu0 %vm336_vm2, %v3067_v62 }
  0x90   : > { %3502 = vmatmul.mubr.msk.bf16.vlgmr.msra.gmra.mrb[8].mxu1 %vm336_vm2, %v3201_v4 }
  0x91   : > { %3505 = vmatprep.mubr.msk.bf16.mxu1 %vm336_vm2, %v3202_v39 }
  0x96   : > { %3430 = vmatmul.mubr.msk.bf16.vlgmr.msra.gmra.mrb[8].mxu0 %vm336_vm2, %v3068_v3 }
  0x97   : > { %3433 = vmatprep.mubr.msk.bf16.mxu0 %vm336_vm2, %v3069_v25  ;;  %3438 = vmatpush3.bf16.msra.mxu0 %v3695_v14 }
  0x98   : > { %3506 = vmatmul.mubr.msk.bf16.gmra.mrb[12].mxu1 %vm336_vm2, %v3203_v50  ;;  %3439 = vmatprep.subr.bf16.mxu0 %v3696_v29 }
  0x9b   : > { %3440 = vmatpush3.bf16.msra.mxu0 %v3696_v29 }
  0x9c   : > { %3449 = vmatprep.subr.bf16.mxu0 %v3701_v32 }
  0x9e   : > { %3434 = vmatmul.mubr.msk.bf16.gmra.mrb[12].mxu0 %vm336_vm2, %v3070_v57 }
  0x9f   : > { %3441 = vmatprep.mubr.msk.bf16.mxu0 %vm336_vm2, %v3697_v63 }
  0xa6   : > { %3442 = vmatmul.mubr.msk.bf16.vlgmr.msra.gmra.mrb[8].mxu0 %vm336_vm2, %v3698_v21 }
  0xa7   : > { %3445 = vmatprep.mubr.msk.bf16.mxu0 %vm336_vm2, %v3699_v42  ;;  %3450 = vmatpush3.bf16.msra.mxu0 %v3701_v32 }
  0xa8   : > { %3451 = vmatprep.subr.bf16.mxu0 %v3702_v60 }
  0xab   : > { %3452 = vmatpush3.bf16.msra.mxu0 %v3702_v60 }
  0xae   : > { %3446 = vmatmul.mubr.msk.bf16.gmra.mrb[12].mxu0 %vm336_vm2, %v3700_v16 }
  0xaf   : > { %3453 = vmatprep.mubr.msk.bf16.mxu0 %vm336_vm2, %v4363_v40 }
  0xb6   : > { %3454 = vmatmul.mubr.msk.bf16.vlgmr.msra.gmra.mrb[8].mxu0 %vm336_vm2, %v4390_v30 }
  0xb7   : > { %3457 = vmatprep.mubr.msk.bf16.mxu0 %vm336_vm2, %v4397_v12 }
  0xbe   : > { %3458 = vmatmul.mubr.msk.bf16.gmra.mrb[12].mxu0 %vm336_vm2, %v4422_v38 }
 0x123   : > { %v3407_v23 = vpop.f32.mrb[0].mxu1 }
 0x124   : > { %v1428_v44 = vadd.f32 %v3407_v23, %v4506_v7  ;;  %v1387_v1 = vpop.f32.mrb[1].mxu1 }
 0x125   : > { %v1426_v40 = vadd.f32 %v4506_v7, %v1387_v1  ;;  %v3408_v18 = vpop.f32.mrb[2].mxu1 }
 0x126   : > { %v1429_v34 = vadd.f32 %v3408_v18, %v4506_v7  ;;  %v1390_v36 = vpop.f32.mrb[3].mxu1  ;;  %v1436_v28 = vmax.f32 %v1428_v44, 0.0 }
 0x127   : > { %v1427_v8 = vadd.f32 %v4506_v7, %v1390_v36  ;;  %v1434_v10 = vmax.f32 %v1426_v40, 0.0 }
 0x128   : > { %v1437_v45 = vmax.f32 %v1429_v34, 0.0 }
 0x129   : > { %v1435_v30 = vmax.f32 %v1427_v8, 0.0 }
 0x12a   : > { %v3615_v61 = vpack.i.bf16 %v1437_v45, %v1436_v28 }
 0x12b   : > { %v3620_v37 = vpack.i.bf16 %v1435_v30, %v1434_v10  ;;  %v3411_v19 = vpop.f32.mrb[4].mxu1 }
 0x12c   : > { %v1432_v12 = vadd.f32 %v3411_v19, %v4506_v7  ;;  %3616 = vrot.lane.b32.xlu0 %v3615_v61, %s3711_s23  ;;  %v1403_v53 = vpop.f32.mrb[5].mxu1 }
 0x12d   : > { %v1430_v17 = vadd.f32 %v4506_v7, %v1403_v53  ;;  %v3412_v54 = vpop.f32.mrb[6].mxu1 }
 0x12e   : > { %v1433_v58 = vadd.f32 %v3412_v54, %v4506_v7  ;;  %v1406_v26 = vpop.f32.mrb[7].mxu1  ;;  %v1440_v5 = vmax.f32 %v1432_v12, 0.0 }
 0x12f   : > { %v1431_v9 = vadd.f32 %v4506_v7, %v1406_v26  ;;  %v1438_v11 = vmax.f32 %v1430_v17, 0.0 }
 0x130   : > { %v1441_v20 = vmax.f32 %v1433_v58, 0.0  ;;  %3621 = vrot.lane.b32.xlu0 %v3620_v37, %s3711_s23 }
 0x131   : > { %v1439_v38 = vmax.f32 %v1431_v9, 0.0 }
 0x132   : > { %v3625_v47 = vpack.i.bf16 %v1441_v20, %v1440_v5 }
 0x133   : > { %v3630_v15 = vpack.i.bf16 %v1439_v38, %v1438_v11 }
 0x134   : > { %3626 = vrot.lane.b32.xlu1 %v3625_v47, %s3711_s23 }
 0x138   : > { %3631 = vrot.lane.b32.xlu1 %v3630_v15, %s3711_s23 }
 0x149   : > { %v3359_v33 = vpop.f32.mrb[0].mxu0 }
 0x14a   : > { %v857_v0 = vpop.f32.mrb[1].mxu0  ;;  %v905_v28 = vadd.f32 %v3359_v33, %v4506_v7 }
 0x14b   : > { %v3360_v55 = vpop.f32.mrb[2].mxu0  ;;  %v903_v61 = vadd.f32 %v4506_v7, %v857_v0 }
 0x14c   : > { %v860_v51 = vpop.f32.mrb[3].mxu0  ;;  %v906_v10 = vadd.f32 %v3360_v55, %v4506_v7  ;;  %v913_v30 = vmax.f32 %v905_v28, 0.0 }
 0x14d   : > { %v904_v12 = vadd.f32 %v4506_v7, %v860_v51  ;;  %v911_v26 = vmax.f32 %v903_v61, 0.0 }
 0x14e   : > { %v914_v19 = vmax.f32 %v906_v10, 0.0 }
 0x14f   : > { %v912_v38 = vmax.f32 %v904_v12, 0.0 }
 0x151   : > { %v3363_v59 = vpop.f32.mrb[4].mxu0 }
 0x152   : > { %v4520_v24 = vpop.f32.mrb[5].mxu0  ;;  %v909_v9 = vadd.f32 %v3363_v59, %v4506_v7 }
 0x153   : > { %v4522_v2 = vpop.f32.mrb[6].mxu0  ;;  %v907_v59 = vadd.f32 %v4506_v7, %v4520_v24 }
 0x154   : > { %v4524_v52 = vpop.f32.mrb[7].mxu0  ;;  %v910_v47 = vadd.f32 %v4522_v2, %v4506_v7  ;;  %v917_v51 = vmax.f32 %v909_v9, 0.0 }
 0x156   : > { %v918_v2 = vmax.f32 %v910_v47, 0.0 }
 0x163   : > { %v3503_v46 = vpop.f32.mrb[8].mxu1 }
 0x164   : > { %v2750_v31 = vadd.f32 %v3503_v46, %v4506_v7  ;;  %v2709_v22 = vpop.f32.mrb[9].mxu1 }
 0x165   : > { %v2748_v43 = vadd.f32 %v4506_v7, %v2709_v22  ;;  %v3504_v27 = vpop.f32.mrb[10].mxu1 }
 0x166   : > { %v2751_v13 = vadd.f32 %v3504_v27, %v4506_v7  ;;  %v2712_v4 = vpop.f32.mrb[11].mxu1  ;;  %v2758_v39 = vmax.f32 %v2750_v31, 0.0 }
 0x167   : > { %v2749_v56 = vadd.f32 %v4506_v7, %v2712_v4  ;;  %v2756_v48 = vmax.f32 %v2748_v43, 0.0  ;;  %v908_v43 = vadd.f32 %v4506_v7, %v4524_v52 }
 0x168   : > { %v2759_v49 = vmax.f32 %v2751_v13, 0.0 }
 0x169   : > { %v2757_v6 = vmax.f32 %v2749_v56, 0.0 }
 0x16a   : > { %v3635_v14 = vpack.i.bf16 %v2759_v49, %v2758_v39 }
 0x16b   : > { %v3640_v41 = vpack.i.bf16 %v2757_v6, %v2756_v48  ;;  %v3507_v35 = vpop.f32.mrb[12].mxu1  ;;  %v915_v48 = vmax.f32 %v907_v59, 0.0  ;;  %v916_v6 = vmax.f32 %v908_v43, 0.0 }
 0x16c   : > { %v2754_v62 = vadd.f32 %v3507_v35, %v4506_v7  ;;  %v2725_v50 = vpop.f32.mrb[13].mxu1  ;;  %3636 = vrot.lane.b32.xlu1 %v3635_v14, %s3711_s23 }
 0x16d   : > { %v2752_v3 = vadd.f32 %v4506_v7, %v2725_v50  ;;  %3641 = vrot.lane.b32.xlu0 %v3640_v41, %s3711_s23  ;;  %v3508_v25 = vpop.f32.mrb[14].mxu1 }
 0x16e   : > { %v2755_v29 = vadd.f32 %v3508_v25, %v4506_v7  ;;  %v2728_v32 = vpop.f32.mrb[15].mxu1  ;;  %v2762_v63 = vmax.f32 %v2754_v62, 0.0 }
 0x16f   : > { %v2753_v57 = vadd.f32 %v4506_v7, %v2728_v32  ;;  %v2760_v42 = vmax.f32 %v2752_v3, 0.0 }
 0x170   : > { %v2763_v21 = vmax.f32 %v2755_v29, 0.0 }
 0x171   : > { %v2761_v60 = vmax.f32 %v2753_v57, 0.0 }
 0x172   : > { %v3650_v16 = vpack.i.bf16 %v2763_v21, %v2762_v63 }
 0x173   : > { %v3645_v23 = vpack.i.bf16 %v2761_v60, %v2760_v42 }
 0x174   : > { %3651 = vrot.lane.b32.xlu1 %v3650_v16, %s3711_s23 }
 0x175   : > { %3646 = vrot.lane.b32.xlu0 %v3645_v23, %s3711_s23 }
 0x189   : > { %v4538_v44 = vpop.f32.mrb[8].mxu0 }
 0x18a   : > { %v4540_v1 = vpop.f32.mrb[9].mxu0  ;;  %v2230_v3 = vadd.f32 %v4538_v44, %v4506_v7 }
 0x18b   : > { %v4542_v40 = vpop.f32.mrb[10].mxu0  ;;  %v2228_v29 = vadd.f32 %v4506_v7, %v4540_v1 }
 0x18c   : > { %v4544_v18 = vpop.f32.mrb[11].mxu0  ;;  %v2231_v25 = vadd.f32 %v4542_v40, %v4506_v7  ;;  %v2238_v63 = vmax.f32 %v2230_v3, 0.0 }
 0x18d   : > { %v2229_v32 = vadd.f32 %v4506_v7, %v4544_v18  ;;  %v2236_v23 = vmax.f32 %v2228_v29, 0.0 }
 0x18e   : > { %v2239_v21 = vmax.f32 %v2231_v25, 0.0 }
 0x18f   : > { %v2237_v28 = vmax.f32 %v2229_v32, 0.0 }
 0x191   : > { %v4546_v34 = vpop.f32.mrb[12].mxu0 }
 0x192   : > { %v4548_v36 = vpop.f32.mrb[13].mxu0 }
 0x193   : > { %v4550_v8 = vpop.f32.mrb[14].mxu0 }
 0x194   : > { %v4553_v45 = vpop.f32.mrb[15].mxu0  ;;  %v2235_v12 = vadd.f32 %v4550_v8, %v4506_v7 }
 0x196   : > { %v2243_v9 = vmax.f32 %v2235_v12, 0.0 }
 0x19e   : > { %v3617_v37 = vpop.permute.xlu0 %3616 }
 0x19f   : > { %v3619_v53 = vunpack.i.h.bf16 %v3617_v37  ;;  %v3618_v17 = vunpack.i.l.bf16 %v3617_v37 }
 0x1a1   : > { %v1477_v54 = vsel %vm1474_vm7, %v913_v30, %v3618_v17  ;;  %v1478_v58 = vsel %vm1474_vm7, %v914_v19, %v3619_v53  ;;  %v2234_v19 = vadd.f32 %v4546_v34, %v4506_v7 }
 0x1a2   : > { %v1485_v5 = vpack.c.bf16 %v1477_v54, %v1477_v54  ;;  %v1486_v20 = vpack.c.bf16 %v1478_v58, %v1478_v58  ;;  %v3622_v11 = vpop.permute.xlu0 %3621  ;;  %v2232_v54 = vadd.f32 %v4506_v7, %v4548_v36  ;;  %v2233_v58 = vadd.f32 %v4506_v7, %v4553_v45 }
 0x1a3   : > { %v3624_v15 = vunpack.i.h.bf16 %v3622_v11  ;;  %v3623_v33 = vunpack.i.l.bf16 %v3622_v11 }
 0x1a4   : > { %1494 = vst.msk [vmem:[%s4562_s14 + $0x10] sm:$0xf] %vm1491_vm8, %v1485_v5  ;;  %1495 = vst.msk [vmem:[%s4562_s14 + $0x18] sm:$0xf] %vm1491_vm8, %v1486_v20  ;;  %v2240_v20 = vmax.f32 %v2232_v54, 0.0  ;;  %v2241_v7 = vmax.f32 %v2233_v58, 0.0 }
 0x1a5   : > { %v1475_v0 = vsel %vm1474_vm7, %v911_v26, %v3623_v33  ;;  %v1476_v55 = vsel %vm1474_vm7, %v912_v38, %v3624_v15  ;;  %v2242_v26 = vmax.f32 %v2234_v19, 0.0 }
 0x1a6   : > { %v1483_v46 = vpack.c.bf16 %v1475_v0, %v1475_v0  ;;  %v1484_v31 = vpack.c.bf16 %v1476_v55, %v1476_v55  ;;  %v3627_v22 = vpop.permute.xlu1 %3626 }
 0x1a7   : > { %v3629_v27 = vunpack.i.h.bf16 %v3627_v22  ;;  %v3628_v13 = vunpack.i.l.bf16 %v3627_v22 }
 0x1a8   : > { %1492 = vst.msk [vmem:[%s4562_s14] sm:$0xf] %vm1491_vm8, %v1483_v46  ;;  %1493 = vst.msk [vmem:[%s4562_s14 + $0x8] sm:$0xf] %vm1491_vm8, %v1484_v31 }
 0x1a9   : > { %v1481_v4 = vsel %vm1474_vm7, %v917_v51, %v3628_v13  ;;  %v1482_v24 = vsel %vm1474_vm7, %v918_v2, %v3629_v27 }
 0x1aa   : > { %v1489_v56 = vpack.c.bf16 %v1481_v4, %v1481_v4  ;;  %v1490_v39 = vpack.c.bf16 %v1482_v24, %v1482_v24  ;;  %v3632_v49 = vpop.permute.xlu1 %3631 }
 0x1ab   : > { %v3634_v14 = vunpack.i.h.bf16 %v3632_v49  ;;  %v3633_v41 = vunpack.i.l.bf16 %v3632_v49 }
 0x1ac   : > { %1498 = vst.msk [vmem:[%s4562_s14 + $0x30] sm:$0xf] %vm1491_vm8, %v1489_v56  ;;  %1499 = vst.msk [vmem:[%s4562_s14 + $0x38] sm:$0xf] %vm1491_vm8, %v1490_v39 }
 0x1ad   : > { %v1479_v52 = vsel %vm1474_vm7, %v915_v48, %v3633_v41  ;;  %v1480_v35 = vsel %vm1474_vm7, %v916_v6, %v3634_v14 }
 0x1ae   : > { %v1487_v62 = vpack.c.bf16 %v1479_v52, %v1479_v52  ;;  %v1488_v50 = vpack.c.bf16 %v1480_v35, %v1480_v35 }
 0x1b0   : > { %1496 = vst.msk [vmem:[%s4562_s14 + $0x20] sm:$0xf] %vm1491_vm8, %v1487_v62  ;;  %1497 = vst.msk [vmem:[%s4562_s14 + $0x28] sm:$0xf] %vm1491_vm8, %v1488_v50 }
 0x1de   : > { %v3637_v57 = vpop.permute.xlu1 %3636 }
 0x1df   : > { %v3639_v42 = vunpack.i.h.bf16 %v3637_v57  ;;  %v3638_v60 = vunpack.i.l.bf16 %v3637_v57  ;;  %v3642_v16 = vpop.permute.xlu0 %3641 }
 0x1e0   : > { %v3644_v44 = vunpack.i.h.bf16 %v3642_v16  ;;  %v3643_v10 = vunpack.i.l.bf16 %v3642_v16 }
 0x1e1   : > { %v2798_v40 = vsel %vm1474_vm7, %v2238_v63, %v3638_v60  ;;  %v2799_v1 = vsel %vm1474_vm7, %v2239_v21, %v3639_v42 }
 0x1e2   : > { %v2806_v30 = vpack.c.bf16 %v2798_v40, %v2798_v40  ;;  %v2807_v18 = vpack.c.bf16 %v2799_v1, %v2799_v1  ;;  %v2796_v61 = vsel %vm1474_vm7, %v2236_v23, %v3643_v10  ;;  %v2797_v37 = vsel %vm1474_vm7, %v2237_v28, %v3644_v44 }
 0x1e3   : > { %v2804_v53 = vpack.c.bf16 %v2796_v61, %v2796_v61  ;;  %v2805_v17 = vpack.c.bf16 %v2797_v37, %v2797_v37 }
 0x1e4   : > { %3212 = vst.msk [vmem:[%s4562_s14 + $0x14] sm:$0xf] %vm1491_vm8, %v2806_v30  ;;  %3213 = vst.msk [vmem:[%s4562_s14 + $0x1c] sm:$0xf] %vm1491_vm8, %v2807_v18 }
 0x1e5   : > { %3210 = vst.msk [vmem:[%s4562_s14 + $0x4] sm:$0xf] %vm1491_vm8, %v2804_v53  ;;  %3211 = vst.msk [vmem:[%s4562_s14 + $0xc] sm:$0xf] %vm1491_vm8, %v2805_v17 }
 0x1e6   : > { %v3652_v34 = vpop.permute.xlu1 %3651 }
 0x1e7   : > { %v3654_v8 = vunpack.i.h.bf16 %v3652_v34  ;;  %v3653_v5 = vunpack.i.l.bf16 %v3652_v34  ;;  %v3647_v36 = vpop.permute.xlu0 %3646 }
 0x1e8   : > { %v3649_v45 = vunpack.i.h.bf16 %v3647_v36  ;;  %v3648_v11 = vunpack.i.l.bf16 %v3647_v36 }
 0x1e9   : > { %v2802_v38 = vsel %vm1474_vm7, %v2242_v26, %v3653_v5  ;;  %v2803_v47 = vsel %vm1474_vm7, %v2243_v9, %v3654_v8 }
 0x1ea   : > { %v2810_v15 = vpack.c.bf16 %v2802_v38, %v2802_v38  ;;  %v2811_v33 = vpack.c.bf16 %v2803_v47, %v2803_v47  ;;  %v2800_v0 = vsel %vm1474_vm7, %v2240_v20, %v3648_v11  ;;  %v2801_v55 = vsel %vm1474_vm7, %v2241_v7, %v3649_v45 }
 0x1eb   : > { %v2808_v51 = vpack.c.bf16 %v2800_v0, %v2800_v0  ;;  %v2809_v59 = vpack.c.bf16 %v2801_v55, %v2801_v55 }
 0x1ec   : > { %3216 = vst.msk [vmem:[%s4562_s14 + $0x34] sm:$0xf] %vm1491_vm8, %v2810_v15  ;;  %3217 = vst.msk [vmem:[%s4562_s14 + $0x3c] sm:$0xf] %vm1491_vm8, %v2811_v33 }
 0x1ed   : > { %3214 = vst.msk [vmem:[%s4562_s14 + $0x24] sm:$0xf] %vm1491_vm8, %v2808_v51  ;;  %3215 = vst.msk [vmem:[%s4562_s14 + $0x2c] sm:$0xf] %vm1491_vm8, %v2809_v59 }
 0x1ee PF: > { %s13_s12 = sadd.s32 1, %s3709_s12  }
 0x1ef   : > { %p10_p4 = scmp.ge.s32.totalorder %s13_s12, 4  }
 0x1f1   :  { %12 = sbr.rel (!%p10_p4) target bundleno = 1 (0x1), region = 80 }

// kernel: decoder_forward.3
= control target key start
LH: loop header
LB: loop body
LE: loop exit
PB: predicated region body
PF: predicated region fallthrough
CT: control target
= control target key end

     0   :  { %s5980_s18 = smov 0   ;;  %s7208_s0 = inlined_call_operand.vmem [shape: bf16[2,10,10,4], index: 0, kind: input, shape index: {}]   ;;  %s7209_s1 = inlined_call_operand.vmem [shape: bf16[9,4,32], index: 1, kind: input, shape index: {}]   ;;  %s7210_s2 = inlined_call_operand.vmem [shape: f32[1,32], index: 2, kind: input, shape index: {}]   ;;  %s7211_s3 = inlined_call_operand.vmem [shape: bf16[2,9,32,8], index: 3, kind: input, shape index: {}]   ;;  %s7212_s4 = inlined_call_operand.vmem [shape: bf16[2,8,32], index: 4, kind: input, shape index: {}]   ;;  %s7213_s5 = inlined_call_operand.vmem [shape: bf16[2,10,10,32], index: 5, kind: output, shape index: {}]  }
   0x1 LB: > { %s4612_s19 = sadd.s32 4294967295, %s5947_s18   ;;  %p4616_p0 = scmp.ge.s32.totalorder %s5947_s18, 1  ;;  %s5947_s18 = sphi %s5980_s18, %s15_s18  }
   0x2   : > { %p187_p1 = scmp.lt.s32.totalorder %s5947_s18, 3 }
   0x4   : > { %p188_p2 = pnand %p4616_p0, %p187_p1 }
   0x5   : > { %v4619_v0 = vld [vmem:[%s7209_s1 + $0x2] sm:$0x3] (!%p188_p2)  ;;  %vm385_vm0 = vcmask (!%p188_p2), 1041408   ;;  %p215_p3 = scmp.lt.s32.totalorder (!%p188_p2), %s4612_s19, 1  ;;  %v234_v2 = vld [vmem:[%s7209_s1] sm:$0x3] (!%p188_p2) }
   0x6   : > { %191 = sbr.rel (%p188_p2) target bundleno = 1535 (0x5ff), region = 40  ;;  %5872 = vmatprep.subr.msk.bf16.mxu0 (!%p188_p2), %vm385_vm0, %v4619_v0  ;;  %v387_v1 = vsel (!%p188_p2), %vm385_vm0, %v4619_v0, 0  ;;  %vm243_vm1 = vsmask.f32 (!%p188_p2), 3328  ;;  %vm244_vm2 = vsmask.f32 (!%p188_p2), 7440 }
   0x7   : > { %5351 = vmatpush3.bf16.msra.mxu0 (!%p188_p2), %v387_v1  ;;  %vm6042_vm3 = vmor (!%p188_p2), %vm243_vm1, %vm244_vm2  ;;  %vm372_vm4 = vcmask (!%p188_p2), 31744   ;;  %v487_v40 = vsel (!%p188_p2), %vm385_vm0, %v234_v2, 0  ;;  %vm578_vm5 = vcmask (!%p188_p2), 1042432   ;;  %vm579_vm6 = vcmask (!%p188_p2), 1046532  }
   0x8   : > { %5873 = vmatprep.subr.msk.bf16.mxu0 (!%p188_p2), %vm385_vm0, %v234_v2  ;;  %vm6122_vm7 = vmor (!%p188_p2), %vm578_vm5, %vm579_vm6  ;;  %vm1744_vm8 = vcmask (!%p188_p2), 261120   ;;  %vm1746_vm9 = vcmask (!%p188_p2), 254976   ;;  %vm4535_vm10 = vcmask (!%p188_p2), 257024   ;;  %vm3002_vm11 = vcmask (!%p188_p2), 1043456  }
   0x9   : > { %vm2989_vm12 = vcmask (!%p188_p2), 64512   ;;  %vm4537_vm13 = vcmask (!%p188_p2), 253952  }
   0xd   : > { %s7219_s19 = smov (!%p215_p3, %s4612_s19), 1 }
   0xe   : > { %s5883_s24 = smul.u32 80, %s7219_s19 }
  0x10   : > { %s6005_s27 = scalar_lea.vmem %s7208_s0, %s5883_s24  ;;  %s6477_s9 = scalar_lea.vmem %s7213_s5, %s5883_s24 }
  0x11   : > { %v6008_v3 = vld [vmem:[%s6005_s27] sm:$0xf]  ;;  %v6011_v4 = vld [vmem:[%s6005_s27 + $0x8] sm:$0xf]  ;;  %v6014_v5 = vld [vmem:[%s6005_s27 + $0x4] sm:$0x1] }
  0x12   : > { %v6017_v6 = vld [vmem:[%s6005_s27 + $0xc] sm:$0x1]  ;;  %v247_v7 = vshrl.u32 %v6008_v3, 16  ;;  %v250_v8 = vshll.u32 %v6008_v3, 16  ;;  %v256_v9 = vshll.u32 %v6014_v5, 16  ;;  %v261_v10 = vshrl.u32 %v6011_v4, 16 }
  0x13   : > { %v264_v11 = vshll.u32 %v6011_v4, 16  ;;  %v270_v12 = vshll.u32 %v6017_v6, 16  ;;  %v6026_v13 = vld [vmem:[%s6005_s27 + $0x10] sm:$0xf]  ;;  %v6029_v18 = vld [vmem:[%s6005_s27 + $0x18] sm:$0xf] }
  0x14   : > { %v249_v14 = vrot.slane %v247_v7, 4  ;;  %v252_v15 = vrot.slane %v250_v8, 5  ;;  %v258_v16 = vrot.slane %v256_v9, 5  ;;  %v263_v17 = vrot.slane %v261_v10, 4  ;;  %v6032_v21 = vld [vmem:[%s6005_s27 + $0x14] sm:$0x1] }
  0x15   : > { %v266_v19 = vrot.slane %v264_v11, 5  ;;  %v272_v20 = vrot.slane %v270_v12, 5  ;;  %v6035_v22 = vld [vmem:[%s6005_s27 + $0x1c] sm:$0x1]  ;;  %v275_v24 = vshrl.u32 %v6026_v13, 16  ;;  %v278_v25 = vshll.u32 %v6026_v13, 16 }
  0x16   : > { %v253_v23 = vor.u32 %v252_v15, %v249_v14  ;;  %v284_v26 = vshll.u32 %v6032_v21, 16  ;;  %v289_v29 = vshrl.u32 %v6029_v18, 16  ;;  %v292_v30 = vshll.u32 %v6029_v18, 16  ;;  %v6050_v32 = vld [vmem:[%s6005_s27 + $0x20] sm:$0xf] }
  0x17   : > { %v267_v28 = vor.u32 %v266_v19, %v263_v17  ;;  %v298_v31 = vshll.u32 %v6035_v22, 16  ;;  %v277_v34 = vrot.slane %v275_v24, 4  ;;  %v280_v35 = vrot.slane %v278_v25, 5  ;;  %v6053_v36 = vld [vmem:[%s6005_s27 + $0x28] sm:$0xf] }
  0x18   : > { %v254_v33 = vrot.slane %v253_v23, 4  ;;  %v291_v38 = vrot.slane %v289_v29, 4  ;;  %v294_v39 = vrot.slane %v292_v30, 5  ;;  %v6057_v41 = vld [vmem:[%s6005_s27 + $0x24] sm:$0x1]  ;;  %v286_v44 = vrot.slane %v284_v26, 5 }
  0x19   : > { %v268_v37 = vrot.slane %v267_v28, 4  ;;  %v281_v43 = vor.u32 %v280_v35, %v277_v34  ;;  %v300_v45 = vrot.slane %v298_v31, 5  ;;  %v6064_v48 = vld [vmem:[%s6005_s27 + $0x2c] sm:$0x1]  ;;  %v303_v49 = vshrl.u32 %v6050_v32, 16 }
  0x1a   : > { %v259_v42 = vsel %vm6042_vm3, %v254_v33, %v258_v16  ;;  %v295_v47 = vor.u32 %v294_v39, %v291_v38  ;;  %v306_v50 = vshll.u32 %v6050_v32, 16  ;;  %v312_v53 = vshll.u32 %v6057_v41, 16  ;;  %v6071_v55 = vld [vmem:[%s6005_s27 + $0x30] sm:$0xf]  ;;  %v6075_v60 = vld [vmem:[%s6005_s27 + $0x34] sm:$0x1] }
  0x1b   : > { %v273_v46 = vsel %vm6042_vm3, %v268_v37, %v272_v20  ;;  %v282_v52 = vrot.slane %v281_v43, 4  ;;  %v317_v54 = vshrl.u32 %v6053_v36, 16  ;;  %v305_v57 = vrot.slane %v303_v49, 4  ;;  %v6082_v1 = vld [vmem:[%s6005_s27 + $0x38] sm:$0xf] }
  0x1c   : > { %v4620_v51 = vcombine.low %v259_v42, %v273_v46  ;;  %v296_v56 = vrot.slane %v295_v47, 4  ;;  %v308_v58 = vrot.slane %v306_v50, 5  ;;  %v320_v59 = vshll.u32 %v6053_v36, 16  ;;  %v6087_v9 = vld [vmem:[%s6005_s27 + $0x3c] sm:$0x1] }
  0x1d   : > { %v287_v61 = vsel %vm6042_vm3, %v282_v52, %v286_v44  ;;  %v314_v62 = vrot.slane %v312_v53, 5  ;;  %v319_v63 = vrot.slane %v317_v54, 4  ;;  %v326_v0 = vshll.u32 %v6064_v48, 16  ;;  %v4644_v23 = vld [vmem:[%s7209_s1 + $0x4] sm:$0x3] }
  0x1e   : > { %5352 = vmatprep.mubr.msk.bf16.mxu0 %vm372_vm4, %v4620_v51  ;;  %v301_v2 = vsel %vm6042_vm3, %v296_v56, %v300_v45  ;;  %v309_v7 = vor.u32 %v308_v58, %v305_v57  ;;  %v322_v8 = vrot.slane %v320_v59, 5  ;;  %v331_v10 = vshrl.u32 %v6071_v55, 16  ;;  %v554_v47 = vld [vmem:[%s6005_s27] sm:$0xe]  ;;  %v555_v49 = vld [vmem:[%s6005_s27 + $0x8] sm:$0xe] }
  0x1f   : > { %v4621_v11 = vcombine.low %v287_v61, %v301_v2  ;;  %v328_v12 = vrot.slane %v326_v0, 5  ;;  %v334_v14 = vshll.u32 %v6071_v55, 16  ;;  %v340_v15 = vshll.u32 %v6075_v60, 16  ;;  %v559_v57 = vld [vmem:[%s6005_s27 + $0x28] sm:$0xe] }
  0x20   : > { %v310_v16 = vrot.slane %v309_v7, 4  ;;  %v323_v17 = vor.u32 %v322_v8, %v319_v63  ;;  %v333_v19 = vrot.slane %v331_v10, 4  ;;  %v345_v20 = vshrl.u32 %v6082_v1, 16 }
  0x21   : > { %5353 = vmatmul.mubr.msk.bf16.vlgmr.msra.gmra.mrb[0].mxu0 %vm372_vm4, %v4621_v11  ;;  %v336_v24 = vrot.slane %v334_v14, 5  ;;  %v348_v25 = vshll.u32 %v6082_v1, 16  ;;  %v354_v26 = vshll.u32 %v6087_v9, 16  ;;  %v342_v33 = vrot.slane %v340_v15, 5  ;;  %v560_v11 = vld [vmem:[%s6005_s27 + $0x30] sm:$0xe] }
  0x22   : > { %5361 = vmatpush3.bf16.msra.mxu0 %v487_v40  ;;  %v315_v28 = vsel %vm6042_vm3, %v310_v16, %v314_v62  ;;  %v324_v29 = vrot.slane %v323_v17, 4  ;;  %v347_v30 = vrot.slane %v345_v20, 4  ;;  %v4628_v45 = vcombine.low %v6008_v3, %v6011_v4  ;;  %v4670_v14 = vld [vmem:[%s6005_s27 + $0x8] sm:$0xf]  ;;  %v4672_v20 = vld [vmem:[%s6005_s27 + $0x10] sm:$0xf] }
  0x23   : > { %v337_v31 = vor.u32 %v336_v24, %v333_v19  ;;  %v350_v34 = vrot.slane %v348_v25, 5  ;;  %5874 = vmatprep.subr.msk.bf16.mxu0 %vm385_vm0, %v4644_v23  ;;  %v356_v42 = vrot.slane %v354_v26, 5  ;;  %v4629_v50 = vcombine.low %v6026_v13, %v6029_v18  ;;  %v4661_v13 = vld [vmem:[%s7209_s1 + $0x6] sm:$0x3]  ;;  %v556_v18 = vld [vmem:[%s6005_s27 + $0x10] sm:$0xe] }
  0x24   : > { %v329_v35 = vsel %vm6042_vm3, %v324_v29, %v328_v12  ;;  %v640_v51 = vsel %vm385_vm0, %v4644_v23, 0  ;;  %v4630_v3 = vcombine.low %v6050_v32, %v6053_v36  ;;  %v583_v4 = vrot.slane %v6014_v5, 5  ;;  %v557_v32 = vld [vmem:[%s6005_s27 + $0x18] sm:$0xe]  ;;  %v558_v36 = vld [vmem:[%s6005_s27 + $0x20] sm:$0xe] }
  0x25   : > { %v4622_v37 = vcombine.low %v315_v28, %v329_v35  ;;  %v338_v38 = vrot.slane %v337_v31, 4  ;;  %v351_v39 = vor.u32 %v350_v34, %v347_v30  ;;  %v587_v52 = vrot.slane %v6017_v6, 5  ;;  %v6176_v30 = vld [vmem:[%s7209_s1 + $0xa] sm:$0x3]  ;;  %v4674_v31 = vld [vmem:[%s6005_s27 + $0x18] sm:$0xf] }
  0x26   : > { %v4636_v53 = vrot.slane %v554_v47, 9  ;;  %v4637_v54 = vrot.slane %v555_v49, 9  ;;  %v591_v58 = vrot.slane %v6032_v21, 5  ;;  %v4631_v59 = vcombine.low %v6071_v55, %v6082_v1  ;;  %v561_v55 = vld [vmem:[%s6005_s27 + $0x38] sm:$0xe] }
  0x27   : > { %5356 = vmatprep.mubr.msk.bf16.mxu0 %vm372_vm4, %v4622_v37  ;;  %v343_v40 = vsel %vm6042_vm3, %v338_v38, %v342_v33  ;;  %v352_v43 = vrot.slane %v351_v39, 4  ;;  %v595_v61 = vrot.slane %v6035_v22, 5  ;;  %v4638_v63 = vrot.slane %v556_v18, 9  ;;  %v4676_v33 = vld [vmem:[%s6005_s27 + $0x20] sm:$0xf] }
  0x28   : > { %v584_v5 = vsel %vm6122_vm7, %v4636_v53, %v583_v4  ;;  %v588_v6 = vsel %vm6122_vm7, %v4637_v54, %v587_v52  ;;  %v4639_v0 = vrot.slane %v557_v32, 9  ;;  %v4640_v2 = vrot.slane %v558_v36, 9  ;;  %v5897_v35 = vld [vmem:[%s6005_s27 + $0x8] ss:$8 sps:$4 sm:$0xff]   ;;  %v6182_v37 = vld [vmem:[%s6005_s27 + $0xc] sm:$0x1] }
  0x29   : > { %v357_v44 = vsel %vm6042_vm3, %v352_v43, %v356_v42  ;;  %v4645_v62 = vcombine.low %v584_v5, %v588_v6  ;;  %v599_v7 = vrot.slane %v6057_v41, 5  ;;  %v4641_v8 = vrot.slane %v559_v57, 9  ;;  %v6185_v38 = vld [vmem:[%s6005_s27 + $0x14] sm:$0x1]  ;;  %v6199_v18 = vld [vmem:[%s6005_s27 + $0x1c] sm:$0x1] }
  0x2a   : > { %v4623_v46 = vcombine.low %v343_v40, %v357_v44  ;;  %v603_v10 = vrot.slane %v6064_v48, 5  ;;  %v592_v21 = vsel %vm6122_vm7, %v4638_v63, %v591_v58  ;;  %v596_v22 = vsel %vm6122_vm7, %v4639_v0, %v595_v61  ;;  %v4678_v44 = vld [vmem:[%s6005_s27 + $0x28] sm:$0xf]  ;;  %v4684_v57 = vld [vmem:[%s6005_s27 + $0x40] sm:$0xf] }
  0x2b   : > { %v600_v1 = vsel %vm6122_vm7, %v4640_v2, %v599_v7  ;;  %v4642_v48 = vrot.slane %v560_v11, 9  ;;  %v607_v12 = vrot.slane %v6075_v60, 5  ;;  %v4646_v15 = vcombine.low %v592_v21, %v596_v22  ;;  %v4686_v60 = vld [vmem:[%s7209_s1 + $0x8] sm:$0x3]  ;;  %v6204_v58 = vld [vmem:[%s6005_s27 + $0x24] sm:$0x1] }
  0x2c   : > { %5357 = vmatmul.mubr.msk.bf16.gmra.mrb[4].mxu0 %vm372_vm4, %v4623_v46  ;;  %v604_v41 = vsel %vm6122_vm7, %v4641_v8, %v603_v10  ;;  %v4643_v16 = vrot.slane %v561_v55, 9  ;;  %v611_v17 = vrot.slane %v6087_v9, 5  ;;  %v759_v23 = vsel %vm385_vm0, %v4661_v13, 0  ;;  %v5898_v0 = vld [vmem:[%s6005_s27 + $0x18] ss:$8 sps:$4 sm:$0xff]  }
  0x2d   : > { %5362 = vmatprep.mubr.msk.bf16.mxu0 %vm372_vm4, %v4628_v45  ;;  %v4647_v19 = vcombine.low %v600_v1, %v604_v41  ;;  %v608_v24 = vsel %vm6122_vm7, %v4642_v48, %v607_v12  ;;  %v851_v25 = vshrl.u32 %v4670_v14, 16  ;;  %v854_v26 = vshll.u32 %v4670_v14, 16  ;;  %v6208_v8 = vld [vmem:[%s6005_s27 + $0x2c] sm:$0x1]  ;;  %v6211_v21 = vld [vmem:[%s6005_s27 + $0x34] sm:$0x1] }
  0x2e   : > { %v612_v9 = vsel %vm6122_vm7, %v4643_v16, %v611_v17  ;;  %v865_v28 = vshrl.u32 %v4672_v20, 16  ;;  %v868_v29 = vshll.u32 %v4672_v20, 16  ;;  %v879_v45 = vshrl.u32 %v4674_v31, 16  ;;  %v6216_v16 = vld [vmem:[%s6005_s27 + $0x3c] sm:$0x1] }
  0x2f   : > { %v4648_v34 = vcombine.low %v608_v24, %v612_v9  ;;  %v853_v39 = vrot.slane %v851_v25, 4  ;;  %v856_v42 = vrot.slane %v854_v26, 5  ;;  %v882_v46 = vshll.u32 %v4674_v31, 16  ;;  %v5899_v17 = vld [vmem:[%s6005_s27 + $0x28] ss:$8 sps:$4 sm:$0xff]  }
  0x30   : > { %v867_v40 = vrot.slane %v865_v28, 4  ;;  %v870_v43 = vrot.slane %v868_v29, 5  ;;  %v893_v47 = vshrl.u32 %v4676_v33, 16  ;;  %v896_v49 = vshll.u32 %v4676_v33, 16 }
  0x31   : > { %v989_v4 = vsel %vm385_vm0, %v4686_v60, 0  ;;  %v6194_v52 = vsel %vm385_vm0, %v6176_v30, 0  ;;  %v907_v53 = vshrl.u32 %v4678_v44, 16  ;;  %v910_v54 = vshll.u32 %v4678_v44, 16 }
  0x32   : > { %v857_v5 = vor.u32 %v856_v42, %v853_v39  ;;  %v871_v6 = vor.u32 %v870_v43, %v867_v40  ;;  %v884_v61 = vrot.slane %v882_v46, 5  ;;  %v898_v63 = vrot.slane %v896_v49, 5  ;;  %v4695_v46 = vld [vmem:[%s6005_s27 + $0x8] sm:$0xe]  ;;  %v5900_v49 = vld [vmem:[%s6005_s27 + $0x38] ss:$8 sps:$4 sm:$0xff]  }
  0x33   : > { %v909_v22 = vrot.slane %v907_v53, 4  ;;  %v912_v55 = vrot.slane %v910_v54, 5  ;;  %v949_v1 = vshrl.u32 %v4684_v57, 16  ;;  %v952_v41 = vshll.u32 %v4684_v57, 16  ;;  %v4697_v53 = vld [vmem:[%s6005_s27 + $0x18] sm:$0xe] }
  0x34   : > { %5363 = vmatmul.mubr.msk.bf16.vlgmr.msra.gmra.mrb[0].mxu0 %vm372_vm4, %v4629_v50  ;;  %v4680_v50 = vld [vmem:[%s6005_s27 + $0x30] sm:$0xf]  ;;  %v888_v48 = vshll.u32 %v6199_v18, 16  ;;  %v902_v12 = vshll.u32 %v6204_v58, 16  ;;  %v872_v20 = vrot.slane %v871_v6, 4  ;;  %v916_v25 = vshll.u32 %v6208_v8, 16 }
  0x35   : > { %5371 = vmatpush3.bf16.msra.mxu0 %v640_v51  ;;  %5366 = vmatprep.mubr.msk.bf16.mxu0 %vm372_vm4, %v4630_v3  ;;  %v860_v51 = vshll.u32 %v6182_v37, 16  ;;  %v874_v3 = vshll.u32 %v6185_v38, 16  ;;  %v921_v32 = vshrl.u32 %v4680_v50, 16  ;;  %v924_v36 = vshll.u32 %v4680_v50, 16  ;;  %v4698_v6 = vld [vmem:[%s6005_s27 + $0x20] sm:$0xe] }
  0x36   : > { %5875 = vmatprep.subr.msk.bf16.mxu0 %vm385_vm0, %v4661_v13  ;;  %v4682_v13 = vld [vmem:[%s6005_s27 + $0x38] sm:$0xf]  ;;  %v930_v9 = vshll.u32 %v6211_v21, 16  ;;  %v913_v29 = vor.u32 %v912_v55, %v909_v22  ;;  %v944_v31 = vshll.u32 %v6216_v16, 16  ;;  %v951_v33 = vrot.slane %v949_v1, 4 }
  0x37   : > { %v862_v2 = vrot.slane %v860_v51, 5  ;;  %v876_v7 = vrot.slane %v874_v3, 5  ;;  %v935_v10 = vshrl.u32 %v4682_v13, 16  ;;  %v938_v11 = vshll.u32 %v4682_v13, 16 }
  0x38   : > { %v923_v14 = vrot.slane %v921_v32, 4  ;;  %v904_v39 = vrot.slane %v902_v12, 5  ;;  %v918_v51 = vrot.slane %v916_v25, 5  ;;  %v932_v3 = vrot.slane %v930_v9, 5  ;;  %v4699_v32 = vld [vmem:[%s6005_s27 + $0x28] sm:$0xe] }
  0x39   : > { %v937_v26 = vrot.slane %v935_v10, 4  ;;  %v940_v28 = vrot.slane %v938_v11, 5  ;;  %v877_v50 = vsel %vm6042_vm3, %v872_v20, %v876_v7  ;;  %v914_v54 = vrot.slane %v913_v29, 4  ;;  %v4702_v11 = vld [vmem:[%s6005_s27 + $0x40] sm:$0xe] }
  0x3a   : > { %v946_v13 = vrot.slane %v944_v31, 5  ;;  %v4705_v10 = vrot.slane %v4697_v53, 9  ;;  %v1098_v55 = vrot.slane %v6199_v18, 5  ;;  %v4706_v1 = vrot.slane %v4698_v6, 9  ;;  %v4728_v25 = vld [vmem:[%s7209_s1 + $0xc] sm:$0x3] }
  0x3b   : > { %v919_v18 = vsel %vm6042_vm3, %v914_v54, %v918_v51  ;;  %v6300_v51 = vld [vmem:[%s6005_s27 + $0x14] sm:$0x1]  ;;  %v6303_v54 = vld [vmem:[%s6005_s27 + $0x1c] sm:$0x1]  ;;  %v4741_v6 = vld [vmem:[%s6005_s27 + $0x20] sm:$0xf] }
  0x3c   : > { %5367 = vmatmul.mubr.msk.bf16.gmra.mrb[4].mxu0 %vm372_vm4, %v4631_v59  ;;  %v881_v59 = vrot.slane %v879_v45, 4 }
  0x3d   : > { %5372 = vmatprep.mubr.msk.bf16.mxu0 %vm372_vm4, %v4645_v62  ;;  %v895_v62 = vrot.slane %v893_v47, 4  ;;  %v4696_v47 = vld [vmem:[%s6005_s27 + $0x10] sm:$0xe] }
  0x3f   : > { %v899_v24 = vor.u32 %v898_v63, %v895_v62  ;;  %v4700_v62 = vld [vmem:[%s6005_s27 + $0x30] sm:$0xe] }
  0x41   : > { %v900_v45 = vrot.slane %v899_v24, 4 }
  0x43   : > { %v905_v12 = vsel %vm6042_vm3, %v900_v45, %v904_v39 }
  0x44   : > { %5373 = vmatmul.mubr.msk.bf16.vlgmr.msra.gmra.mrb[0].mxu0 %vm372_vm4, %v4646_v15  ;;  %v926_v15 = vrot.slane %v924_v36, 5 }
  0x45   : > { %5381 = vmatpush3.bf16.msra.mxu0 %v759_v23  ;;  %5376 = vmatprep.mubr.msk.bf16.mxu0 %vm372_vm4, %v4647_v19  ;;  %v858_v19 = vrot.slane %v857_v5, 4  ;;  %v885_v23 = vor.u32 %v884_v61, %v881_v59  ;;  %v4703_v59 = vrot.slane %v4695_v46, 9  ;;  %v1090_v61 = vrot.slane %v6182_v37, 5 }
  0x46   : > { %5876 = vmatprep.subr.msk.bf16.mxu0 %vm385_vm0, %v4686_v60  ;;  %v6220_v60 = vld [vmem:[%s6005_s27 + $0x44] sm:$0x1]  ;;  %v927_v42 = vor.u32 %v926_v15, %v923_v14  ;;  %v1106_v37 = vrot.slane %v6208_v8, 5  ;;  %v4708_v14 = vrot.slane %v4700_v62, 9  ;;  %v1110_v15 = vrot.slane %v6211_v21, 5 }
  0x47   : > { %v958_v40 = vshll.u32 %v6220_v60, 16  ;;  %v863_v43 = vsel %vm6042_vm3, %v858_v19, %v862_v2  ;;  %v886_v44 = vrot.slane %v885_v23, 4  ;;  %v4701_v2 = vld [vmem:[%s6005_s27 + $0x38] sm:$0xe]  ;;  %v1114_v8 = vrot.slane %v6216_v16, 5 }
  0x48   : > { %v928_v36 = vrot.slane %v927_v42, 4  ;;  %v4687_v63 = vcombine.low %v863_v43, %v877_v50  ;;  %v4710_v19 = vrot.slane %v4702_v11, 9  ;;  %v1118_v20 = vrot.slane %v6220_v60, 5  ;;  %v4753_v43 = vld [vmem:[%s7209_s1 + $0xe] sm:$0x3] }
  0x49   : > { %v960_v57 = vrot.slane %v958_v40, 5  ;;  %v1091_v60 = vsel %vm6122_vm7, %v4703_v59, %v1090_v61  ;;  %v1266_v40 = vsel %vm385_vm0, %v4728_v25, 0  ;;  %v1381_v61 = vshll.u32 %v6303_v54, 16 }
  0x4a   : > { %v1119_v50 = vsel %vm6122_vm7, %v4710_v19, %v1118_v20  ;;  %v1386_v62 = vshrl.u32 %v4741_v6, 16  ;;  %v1496_v11 = vsel %vm385_vm0, %v4753_v43, 0  ;;  %v5903_v20 = vld [vmem:[%s6005_s27 + $0x30] ss:$8 sps:$4 sm:$0xff]  }
  0x4c   : > { %5377 = vmatmul.mubr.msk.bf16.gmra.mrb[4].mxu0 %vm372_vm4, %v4648_v34  ;;  %v954_v34 = vrot.slane %v952_v41, 5  ;;  %v1102_v41 = vrot.slane %v6204_v58, 5  ;;  %v933_v58 = vsel %vm6042_vm3, %v928_v36, %v932_v3  ;;  %v4743_v36 = vld [vmem:[%s6005_s27 + $0x28] sm:$0xf] }
  0x4d   : > { %5382 = vmatprep.mubr.msk.bf16.mxu0 %vm372_vm4, %v5897_v35  ;;  %v890_v35 = vrot.slane %v888_v48, 5  ;;  %v4707_v48 = vrot.slane %v4699_v32, 9  ;;  %v4689_v24 = vcombine.low %v919_v18, %v933_v58  ;;  %v5901_v32 = vld [vmem:[%s6005_s27 + $0x10] ss:$8 sps:$4 sm:$0xff]   ;;  %v6320_v58 = vld [vmem:[%s6005_s27 + $0x2c] sm:$0x1] }
  0x4e   : > { %v955_v5 = vor.u32 %v954_v34, %v951_v33  ;;  %v1103_v29 = vsel %vm6122_vm7, %v4706_v1, %v1102_v41  ;;  %v1111_v33 = vsel %vm6122_vm7, %v4708_v14, %v1110_v15  ;;  %v4737_v34 = vld [vmem:[%s6005_s27 + $0x10] sm:$0xf]  ;;  %v6317_v14 = vld [vmem:[%s6005_s27 + $0x24] sm:$0x1]  ;;  %v1388_v15 = vrot.slane %v1386_v62, 4 }
  0x4f   : > { %v1107_v31 = vsel %vm6122_vm7, %v4707_v48, %v1106_v37  ;;  %v1361_v45 = vshll.u32 %v4737_v34, 16 }
  0x50   : > { %v956_v22 = vrot.slane %v955_v5, 4  ;;  %v4714_v42 = vcombine.low %v1107_v31, %v1111_v33 }
  0x52   : > { %v961_v16 = vsel %vm6042_vm3, %v956_v22, %v960_v57  ;;  %v1367_v57 = vshll.u32 %v6300_v51, 16  ;;  %v5902_v22 = vld [vmem:[%s6005_s27 + $0x20] ss:$8 sps:$4 sm:$0xff]  }
  0x54   : > { %5383 = vmatmul.mubr.msk.bf16.vlgmr.msra.gmra.mrb[0].mxu0 %vm372_vm4, %v5898_v0  ;;  %v4704_v0 = vrot.slane %v4696_v47, 9 }
  0x55   : > { %5391 = vmatpush3.bf16.msra.mxu0 %v989_v4  ;;  %5386 = vmatprep.mubr.msk.bf16.mxu0 %vm372_vm4, %v5899_v17  ;;  %v941_v4 = vor.u32 %v940_v28, %v937_v26  ;;  %v4709_v17 = vrot.slane %v4701_v2, 9  ;;  %v1389_v2 = vshll.u32 %v4741_v6, 16 }
  0x56   : > { %5877 = vmatprep.subr.msk.bf16.mxu0 %vm385_vm0, %v6176_v30  ;;  %v1094_v30 = vrot.slane %v6185_v38, 5  ;;  %v891_v38 = vsel %vm6042_vm3, %v886_v44, %v890_v35  ;;  %v4739_v35 = vld [vmem:[%s6005_s27 + $0x18] sm:$0xf]  ;;  %v1358_v44 = vshrl.u32 %v4737_v34, 16 }
  0x57   : > { %v942_v7 = vrot.slane %v941_v4, 4  ;;  %v4688_v23 = vcombine.low %v891_v38, %v905_v12  ;;  %v1372_v46 = vshrl.u32 %v4739_v35, 16  ;;  %v1375_v47 = vshll.u32 %v4739_v35, 16 }
  0x58   : > { %v1095_v9 = vsel %vm6122_vm7, %v4704_v0, %v1094_v30  ;;  %v1360_v3 = vrot.slane %v1358_v44, 4  ;;  %v1363_v4 = vrot.slane %v1361_v45, 5  ;;  %v4747_v0 = vld [vmem:[%s6005_s27 + $0x38] sm:$0xf]  ;;  %v1369_v38 = vrot.slane %v1367_v57, 5 }
  0x59   : > { %v947_v21 = vsel %vm6042_vm3, %v942_v7, %v946_v13  ;;  %v4712_v28 = vcombine.low %v1091_v60, %v1095_v9  ;;  %v1374_v13 = vrot.slane %v1372_v46, 4  ;;  %v1377_v5 = vrot.slane %v1375_v47, 5  ;;  %v4751_v9 = vld [vmem:[%s6005_s27 + $0x48] sm:$0xf] }
  0x5a   : > { %v4690_v26 = vcombine.low %v947_v21, %v961_v16  ;;  %v1364_v59 = vor.u32 %v1363_v4, %v1360_v3  ;;  %v1400_v7 = vshrl.u32 %v4743_v36, 16  ;;  %v1428_v41 = vshrl.u32 %v4747_v0, 16 }
  0x5b   : > { %v1378_v30 = vor.u32 %v1377_v5, %v1374_v13  ;;  %v1431_v48 = vshll.u32 %v4747_v0, 16  ;;  %v1383_v12 = vrot.slane %v1381_v61, 5  ;;  %v6347_v5 = vld [vmem:[%s6005_s27 + $0x44] sm:$0x1]  ;;  %v6350_v0 = vld [vmem:[%s6005_s27 + $0x4c] sm:$0x1] }
  0x5c   : > { %5387 = vmatmul.mubr.msk.bf16.gmra.mrb[4].mxu0 %vm372_vm4, %v5900_v49  ;;  %v1115_v49 = vsel %vm6122_vm7, %v4709_v17, %v1114_v8  ;;  %v1365_v37 = vrot.slane %v1364_v59, 4  ;;  %v1391_v17 = vrot.slane %v1389_v2, 5  ;;  %v1402_v8 = vrot.slane %v1400_v7, 4 }
  0x5d   : > { %5392 = vmatprep.mubr.msk.bf16.mxu0 %vm372_vm4, %v4687_v63  ;;  %v4715_v53 = vcombine.low %v1115_v49, %v1119_v50  ;;  %v4745_v63 = vld [vmem:[%s6005_s27 + $0x30] sm:$0xf]  ;;  %v1379_v18 = vrot.slane %v1378_v30, 4  ;;  %v1430_v16 = vrot.slane %v1428_v41, 4  ;;  %v1433_v60 = vrot.slane %v1431_v48, 5 }
  0x5e   : > { %v1417_v1 = vshll.u32 %v4745_v63, 16  ;;  %v1370_v31 = vsel %vm6042_vm3, %v1365_v37, %v1369_v38  ;;  %v1392_v34 = vor.u32 %v1391_v17, %v1388_v15  ;;  %v5904_v50 = vld [vmem:[%s6005_s27 + $0x40] ss:$8 sps:$4 sm:$0xff]   ;;  %v1451_v2 = vshll.u32 %v6347_v5, 16  ;;  %v4762_v41 = vld [vmem:[%s6005_s27 + $0x10] sm:$0xe] }
  0x5f   : > { %v1384_v33 = vsel %vm6042_vm3, %v1379_v18, %v1383_v12  ;;  %v1434_v46 = vor.u32 %v1433_v60, %v1430_v16  ;;  %v4763_v48 = vld [vmem:[%s6005_s27 + $0x18] sm:$0xe]  ;;  %v4764_v16 = vld [vmem:[%s6005_s27 + $0x20] sm:$0xe] }
  0x60   : > { %v1419_v21 = vrot.slane %v1417_v1, 5  ;;  %v4754_v3 = vcombine.low %v1370_v31, %v1384_v33  ;;  %v1393_v4 = vrot.slane %v1392_v34, 4  ;;  %v1453_v12 = vrot.slane %v1451_v2, 5 }
  0x61   : > { %v1435_v62 = vrot.slane %v1434_v46, 4  ;;  %v4772_v31 = vrot.slane %v4764_v16, 9  ;;  %v1605_v34 = vrot.slane %v6317_v14, 5 }
  0x64   : > { %5393 = vmatmul.mubr.msk.bf16.vlgmr.msra.gmra.mrb[0].mxu0 %vm372_vm4, %v4688_v23  ;;  %v4778_v23 = vld [vmem:[%s7209_s1 + $0x10] sm:$0x3] }
  0x65   : > { %5401 = vmatpush3.bf16.msra.mxu0 %v6194_v52  ;;  %5396 = vmatprep.mubr.msk.bf16.mxu0 %vm372_vm4, %v4689_v24  ;;  %v1099_v52 = vsel %vm6122_vm7, %v4705_v10, %v1098_v55  ;;  %v1403_v10 = vshll.u32 %v4743_v36, 16  ;;  %v1414_v55 = vshrl.u32 %v4745_v63, 16  ;;  %v4749_v24 = vld [vmem:[%s6005_s27 + $0x40] sm:$0xf]  ;;  %v1654_v38 = vsel %vm385_vm0, %v4778_v23, 0 }
  0x66   : > { %5878 = vmatprep.subr.msk.bf16.mxu0 %vm385_vm0, %v4728_v25  ;;  %v4713_v39 = vcombine.low %v1099_v52, %v1103_v29  ;;  %v6331_v52 = vld [vmem:[%s6005_s27 + $0x34] sm:$0x1]  ;;  %v6334_v29 = vld [vmem:[%s6005_s27 + $0x3c] sm:$0x1] }
  0x67   : > { %v1405_v19 = vrot.slane %v1403_v10, 5  ;;  %v1416_v25 = vrot.slane %v1414_v55, 4  ;;  %v1423_v45 = vshll.u32 %v6331_v52, 16  ;;  %v1437_v47 = vshll.u32 %v6334_v29, 16 }
  0x69   : > { %v1406_v35 = vor.u32 %v1405_v19, %v1402_v8  ;;  %v1420_v44 = vor.u32 %v1419_v21, %v1416_v25  ;;  %v1425_v61 = vrot.slane %v1423_v45, 5  ;;  %v1439_v63 = vrot.slane %v1437_v47, 5  ;;  %v4769_v47 = vld [vmem:[%s6005_s27 + $0x48] sm:$0xe] }
  0x6a   : > { %v4770_v19 = vrot.slane %v4762_v41, 9  ;;  %v1601_v25 = vrot.slane %v6303_v54, 5  ;;  %v4766_v54 = vld [vmem:[%s6005_s27 + $0x30] sm:$0xe]  ;;  %v1606_v45 = vsel %vm6122_vm7, %v4772_v31, %v1605_v34  ;;  %v4787_v41 = vld [vmem:[%s7210_s2] ss:$0 sm:$0xff] }
  0x6b   : > { %v1421_v59 = vrot.slane %v1420_v44, 4  ;;  %v1440_v1 = vsel %vm6042_vm3, %v1435_v62, %v1439_v63  ;;  %v1617_v44 = vrot.slane %v6334_v29, 5  ;;  %v6451_v62 = vld [vmem:[%s7211_s3 + $0x40] sm:$0xff]  }
  0x6c   : > { %5397 = vmatmul.mubr.msk.bf16.gmra.mrb[4].mxu0 %vm372_vm4, %v4690_v26  ;;  %v1395_v26 = vshll.u32 %v6317_v14, 16  ;;  %v4768_v14 = vld [vmem:[%s6005_s27 + $0x40] sm:$0xe] }
  0x6d   : > { %5402 = vmatprep.mubr.msk.bf16.mxu0 %vm372_vm4, %v4712_v28  ;;  %v1409_v28 = vshll.u32 %v6320_v58, 16  ;;  %v1426_v55 = vsel %vm6042_vm3, %v1421_v59, %v1425_v61  ;;  %v4776_v29 = vrot.slane %v4768_v14, 9  ;;  %v6439_v59 = vld [vmem:[%s7211_s3 + $0x38] sm:$0xff]   ;;  %v6457_v63 = vld [vmem:[%s7211_s3] sm:$0xff]  }
  0x6e   : > { %v1397_v49 = vrot.slane %v1395_v26, 5  ;;  %v4756_v15 = vcombine.low %v1426_v55, %v1440_v1  ;;  %v4767_v26 = vld [vmem:[%s6005_s27 + $0x38] sm:$0xe] }
  0x6f   : > { %v1411_v13 = vrot.slane %v1409_v28, 5  ;;  %v5908_v61 = vld [vmem:[%s7211_s3 + $0x18] sm:$0xff]  }
  0x70   : > { %v1398_v30 = vsel %vm6042_vm3, %v1393_v4, %v1397_v49  ;;  %v4777_v4 = vrot.slane %v4769_v47, 9 }
  0x74   : > { %5403 = vmatmul.mubr.msk.bf16.vlgmr.msra.gmra.mrb[0].mxu0 %vm372_vm4, %v4713_v39  ;;  %v1442_v39 = vshrl.u32 %v4749_v24, 16 }
  0x75   : > { %5411 = vmatpush3.bf16.msra.mxu0 %v1266_v40  ;;  %5406 = vmatprep.mubr.msk.bf16.mxu0 %vm372_vm4, %v4714_v42  ;;  %v1445_v42 = vshll.u32 %v4749_v24, 16  ;;  %v1456_v40 = vshrl.u32 %v4751_v9, 16  ;;  %v4771_v24 = vrot.slane %v4763_v48, 9 }
  0x76   : > { %5879 = vmatprep.subr.msk.bf16.mxu0 %vm385_vm0, %v4753_v43  ;;  %v1459_v43 = vshll.u32 %v4751_v9, 16  ;;  %v1444_v6 = vrot.slane %v1442_v39, 4  ;;  %v4765_v9 = vld [vmem:[%s6005_s27 + $0x28] sm:$0xe]  ;;  %v1609_v39 = vrot.slane %v6320_v58, 5 }
  0x77   : > { %v1458_v36 = vrot.slane %v1456_v40, 4  ;;  %v1613_v40 = vrot.slane %v6331_v52, 5 }
  0x78   : > { %v1461_v57 = vrot.slane %v1459_v43, 5  ;;  %v4775_v43 = vrot.slane %v4767_v26, 9 }
  0x7a   : > { %v1618_v52 = vsel %vm6122_vm7, %v4775_v43, %v1617_v44 }
  0x7c   : > { %5407 = vmatmul.mubr.msk.bf16.gmra.mrb[4].mxu0 %vm372_vm4, %v4715_v53  ;;  %v1407_v53 = vrot.slane %v1406_v35, 4  ;;  %v4773_v35 = vrot.slane %v4765_v9, 9 }
  0x7d   : > { %5412 = vmatprep.mubr.msk.bf16.mxu0 %vm372_vm4, %v5901_v32  ;;  %v1447_v32 = vrot.slane %v1445_v42, 5  ;;  %v4774_v42 = vrot.slane %v4766_v54, 9 }
  0x7e   : > { %v1412_v7 = vsel %vm6042_vm3, %v1407_v53, %v1411_v13  ;;  %v1610_v46 = vsel %vm6122_vm7, %v4773_v35, %v1609_v39  ;;  %v1625_v53 = vrot.slane %v6350_v0, 5 }
  0x7f   : > { %v1448_v10 = vor.u32 %v1447_v32, %v1444_v6  ;;  %v4755_v37 = vcombine.low %v1398_v30, %v1412_v7  ;;  %v1614_v58 = vsel %vm6122_vm7, %v4774_v42, %v1613_v40  ;;  %v4780_v49 = vcombine.low %v1606_v45, %v1610_v46 }
  0x80   : > { %v1626_v6 = vsel %vm6122_vm7, %v4777_v4, %v1625_v53 }
  0x81   : > { %v1449_v18 = vrot.slane %v1448_v10, 4 }
  0x84   : > { %5413 = vmatmul.mubr.msk.bf16.vlgmr.msra.gmra.mrb[0].mxu0 %vm372_vm4, %v5902_v22  ;;  %v1465_v22 = vshll.u32 %v6350_v0, 16 }
  0x85   : > { %5421 = vmatpush3.bf16.msra.mxu0 %v1496_v11  ;;  %5416 = vmatprep.mubr.msk.bf16.mxu0 %vm372_vm4, %v5903_v20  ;;  %v1462_v11 = vor.u32 %v1461_v57, %v1458_v36  ;;  %v1597_v20 = vrot.slane %v6300_v51, 5  ;;  %v1602_v51 = vsel %vm6122_vm7, %v4771_v24, %v1601_v25  ;;  %v5949_v36 = vmov 0.0   ;;  %v5906_v57 = vld [vmem:[%s7211_s3 + $0x10] sm:$0xff]  }
  0x86   : > { %5880 = vmatprep.subr.msk.bf16.mxu0 %vm385_vm0, %v4778_v23  ;;  %v1467_v8 = vrot.slane %v1465_v22, 5  ;;  %v1454_v23 = vsel %vm6042_vm3, %v1449_v18, %v1453_v12  ;;  %1752 = vst.msk [vmem:[#allocation2 + $0x30] sm:$0xff] %vm1744_vm8, %v5949_v36  ;;  %1745 = vst.msk [vmem:[#allocation2] sm:$0xff] %vm1744_vm8, %v5949_v36 }
  0x87   : > { %v1463_v17 = vrot.slane %v1462_v11, 4  ;;  %v1598_v60 = vsel %vm6122_vm7, %v4770_v19, %v1597_v20  ;;  %1753 = vst.msk [vmem:[#allocation2 + $0x38] sm:$0x3] %vm1746_vm9, %v5949_v36  ;;  %1747 = vst.msk [vmem:[#allocation2 + $0x8] sm:$0x3] %vm1746_vm9, %v5949_v36 }
  0x88   : > { %v4779_v33 = vcombine.low %v1598_v60, %v1602_v51  ;;  %1748 = vst.msk [vmem:[#allocation2 + $0x10] sm:$0xff] %vm1744_vm8, %v5949_v36  ;;  %1750 = vst.msk [vmem:[#allocation2 + $0x20] sm:$0xff] %vm1744_vm8, %v5949_v36 }
  0x89   : > { %v1468_v21 = vsel %vm6042_vm3, %v1463_v17, %v1467_v8  ;;  %1749 = vst.msk [vmem:[#allocation2 + $0x18] sm:$0x3] %vm1746_vm9, %v5949_v36  ;;  %1751 = vst.msk [vmem:[#allocation2 + $0x28] sm:$0x3] %vm1746_vm9, %v5949_v36 }
  0x8a   : > { %v4757_v28 = vcombine.low %v1454_v23, %v1468_v21  ;;  %1754 = vst.msk [vmem:[#allocation2 + $0x40] sm:$0xff] %vm1744_vm8, %v5949_v36  ;;  %1756 = vst.msk [vmem:[#allocation2 + $0x50] sm:$0xff] %vm1744_vm8, %v5949_v36 }
  0x8b   : > { %1755 = vst.msk [vmem:[#allocation2 + $0x48] sm:$0x3] %vm1746_vm9, %v5949_v36  ;;  %1757 = vst.msk [vmem:[#allocation2 + $0x58] sm:$0x3] %vm1746_vm9, %v5949_v36 }
  0x8c   : > { %5417 = vmatmul.mubr.msk.bf16.gmra.mrb[4].mxu0 %vm372_vm4, %v5904_v50  ;;  %v4781_v50 = vcombine.low %v1614_v58, %v1618_v52  ;;  %1758 = vst.msk [vmem:[#allocation2 + $0x60] sm:$0xff] %vm1744_vm8, %v5949_v36  ;;  %1760 = vst.msk [vmem:[#allocation2 + $0x70] sm:$0xff] %vm1744_vm8, %v5949_v36 }
  0x8d   : > { %5422 = vmatprep.mubr.msk.bf16.mxu0 %vm372_vm4, %v4754_v3  ;;  %v1621_v3 = vrot.slane %v6347_v5, 5  ;;  %1759 = vst.msk [vmem:[#allocation2 + $0x68] sm:$0x3] %vm1746_vm9, %v5949_v36  ;;  %1761 = vst.msk [vmem:[#allocation2 + $0x78] sm:$0x3] %vm1746_vm9, %v5949_v36  ;;  %v6431_v5 = vld [vmem:[%s7211_s3 + $0x30] sm:$0xff]  }
  0x8e   : > { %1762 = vst.msk [vmem:[#allocation2 + $0x80] sm:$0xff] %vm1744_vm8, %v5949_v36  ;;  %1764 = vst.msk [vmem:[#allocation2 + $0x90] sm:$0xff] %vm1744_vm8, %v5949_v36  ;;  %5676 = vmatprep.subr.bf16.mxu1 %v6431_v5  ;;  %v1775_v0 = vld [vmem:[#allocation2] sm:$0xff]  ;;  %v1776_v22 = vld [vmem:[#allocation2 + $0x8] sm:$0x3] }
  0x8f   : > { %v1622_v13 = vsel %vm6122_vm7, %v4776_v29, %v1621_v3  ;;  %1763 = vst.msk [vmem:[#allocation2 + $0x88] sm:$0x3] %vm1746_vm9, %v5949_v36  ;;  %1765 = vst.msk [vmem:[#allocation2 + $0x98] sm:$0x3] %vm1746_vm9, %v5949_v36  ;;  %5678 = vmatpush3.bf16.msra.mxu1 %v6431_v5  ;;  %v6460_v2 = vmax.f32 %v1775_v0, 0.0  ;;  %v1796_v48 = vmax.f32 %v1776_v22, 0.0 }
  0x90   : > { %v4782_v32 = vcombine.low %v1622_v13, %v1626_v6  ;;  %5677 = vmatprep.subr.bf16.mxu1 %v6439_v59 }
  0x91   : > { %v6466_v10 = vpack.c.bf16 %v6460_v2, %v6460_v2  ;;  %v6491_v24 = vpack.c.bf16 %v1796_v48, %v1796_v48 }
  0x93   : > { %5679 = vmatpush3.bf16.msra.mxu1 %v6439_v59  ;;  %4536 = vst.msk [vmem:[%s6477_s9] sm:$0xf] %vm4535_vm10, %v6466_v10  ;;  %v1870_v55 = vshrl.u32 %v6466_v10, 16  ;;  %v1873_v1 = vshll.u32 %v6466_v10, 16  ;;  %v1879_v21 = vshll.u32 %v6491_v24, 16 }
  0x94   : > { %5423 = vmatmul.mubr.msk.bf16.vlgmr.msra.gmra.mrb[0].mxu0 %vm372_vm4, %v4755_v37  ;;  %5488 = vmatprep.subr.bf16.mxu1 %v6451_v62 }
  0x95   : > { %5431 = vmatpush3.bf16.msra.mxu0 %v1654_v38  ;;  %5426 = vmatprep.mubr.msk.bf16.mxu0 %vm372_vm4, %v4756_v15  ;;  %v1793_v30 = vld [vmem:[#allocation2 + $0x90] sm:$0xff]  ;;  %v1872_v15 = vrot.slane %v1870_v55, 4  ;;  %v1875_v18 = vrot.slane %v1873_v1, 5  ;;  %v6499_v54 = vrot.slane %v1879_v21, 5 }
  0x96   : > { %5440 = vmatprep.subr.bf16.mxu0 %v5906_v57  ;;  %v6462_v7 = vmax.f32 %v1793_v30, 0.0 }
  0x97   : > { %v1876_v23 = vor.u32 %v1875_v18, %v1872_v15 }
  0x98   : > { %v6470_v11 = vpack.c.bf16 %v6462_v7, %v6462_v7 }
  0x99   : > { %v6497_v9 = vrot.slane %v1876_v23, 4 }
  0x9a   : > { %4555 = vst.msk [vmem:[%s6477_s9 + $0x48] sm:$0xf] %vm4535_vm10, %v6470_v11 }
  0x9b   : > { %v1882_v52 = vsel %vm6042_vm3, %v6497_v9, %v6499_v54 }
  0x9c   : > { %5427 = vmatmul.mubr.msk.bf16.gmra.mrb[4].mxu0 %vm372_vm4, %v4757_v28 }
  0x9d   : > { %5432 = vmatprep.mubr.msk.bf16.mxu0 %vm372_vm4, %v4779_v33 }
  0xa4   : > { %5433 = vmatmul.mubr.msk.bf16.vlgmr.msra.gmra.mrb[0].mxu0 %vm372_vm4, %v4780_v49 }
  0xa5   : > { %5436 = vmatprep.mubr.msk.bf16.mxu0 %vm372_vm4, %v4781_v50  ;;  %5441 = vmatpush3.bf16.msra.mxu0 %v5906_v57 }
  0xa6   : > { %5442 = vmatprep.subr.bf16.mxu0 %v5908_v61 }
  0xa9   : > { %5443 = vmatpush3.bf16.msra.mxu0 %v5908_v61 }
  0xaa   : > { %5452 = vmatprep.subr.bf16.mxu0 %v6457_v63 }
  0xac   : > { %5437 = vmatmul.mubr.msk.bf16.gmra.mrb[4].mxu0 %vm372_vm4, %v4782_v32 }
 0x177   : > { %v5434_v37 = vpop.f32.mrb[0].mxu0 }
 0x178   : > { %v1738_v38 = vadd.f32 %v5434_v37, %v4787_v41  ;;  %v1690_v12 = vpop.f32.mrb[1].mxu0 }
 0x179   : > { %v1736_v17 = vadd.f32 %v4787_v41, %v1690_v12  ;;  %v5435_v8 = vpop.f32.mrb[2].mxu0 }
 0x17a   : > { %1769 = vst.msk [vmem:[#allocation2 + $0x31] sm:$0xff] %vm1744_vm8, %v1738_v38  ;;  %v1739_v19 = vadd.f32 %v5435_v8, %v4787_v41  ;;  %v1693_v20 = vpop.f32.mrb[3].mxu0 }
 0x17b   : > { %1767 = vst.msk [vmem:[#allocation2 + $0x11] sm:$0xff] %vm1744_vm8, %v1736_v17  ;;  %v1737_v25 = vadd.f32 %v4787_v41, %v1693_v20 }
 0x17c   : > { %1770 = vst.msk [vmem:[#allocation2 + $0x41] sm:$0xff] %vm1744_vm8, %v1739_v19 }
 0x17d   : > { %1768 = vst.msk [vmem:[#allocation2 + $0x21] sm:$0xff] %vm1744_vm8, %v1737_v25 }
 0x17f   : > { %v5438_v16 = vpop.f32.mrb[4].mxu0 }
 0x180   : > { %v1742_v60 = vadd.f32 %v5438_v16, %v4787_v41  ;;  %v1706_v51 = vpop.f32.mrb[5].mxu0 }
 0x181   : > { %v1740_v26 = vadd.f32 %v4787_v41, %v1706_v51  ;;  %v5439_v28 = vpop.f32.mrb[6].mxu0  ;;  %v1781_v31 = vld [vmem:[#allocation2 + $0x30] sm:$0xff]  ;;  %v1782_v33 = vld [vmem:[#allocation2 + $0x38] sm:$0x3] }
 0x182   : > { %1773 = vst.msk [vmem:[#allocation2 + $0x71] sm:$0xff] %vm1744_vm8, %v1742_v60  ;;  %v1743_v34 = vadd.f32 %v5439_v28, %v4787_v41  ;;  %v1709_v35 = vpop.f32.mrb[7].mxu0  ;;  %v1777_v39 = vld [vmem:[#allocation2 + $0x10] sm:$0xff]  ;;  %v1778_v42 = vld [vmem:[#allocation2 + $0x18] sm:$0x3]  ;;  %v6502_v40 = vmax.f32 %v1781_v31, 0.0 }
 0x183   : > { %v1802_v43 = vmax.f32 %v1782_v33, 0.0  ;;  %1771 = vst.msk [vmem:[#allocation2 + $0x51] sm:$0xff] %vm1744_vm8, %v1740_v26  ;;  %v1741_v44 = vadd.f32 %v4787_v41, %v1709_v35  ;;  %v6505_v45 = vmax.f32 %v1777_v39, 0.0  ;;  %v1798_v46 = vmax.f32 %v1778_v42, 0.0  ;;  %v1783_v14 = vld [vmem:[#allocation2 + $0x40] sm:$0xff] }
 0x184   : > { %v1784_v58 = vld [vmem:[#allocation2 + $0x48] sm:$0x3]  ;;  %1774 = vst.msk [vmem:[#allocation2 + $0x81] sm:$0xff] %vm1744_vm8, %v1743_v34  ;;  %v1779_v47 = vld [vmem:[#allocation2 + $0x20] sm:$0xff]  ;;  %v6514_v29 = vpack.c.bf16 %v6502_v40, %v6502_v40  ;;  %v6518_v3 = vmax.f32 %v1783_v14, 0.0 }
 0x185   : > { %v1780_v49 = vld [vmem:[#allocation2 + $0x28] sm:$0x3]  ;;  %v6516_v50 = vpack.c.bf16 %v1802_v43, %v1802_v43  ;;  %1772 = vst.msk [vmem:[#allocation2 + $0x61] sm:$0xff] %vm1744_vm8, %v1741_v44  ;;  %v6523_v4 = vpack.c.bf16 %v6505_v45, %v6505_v45  ;;  %v6525_v53 = vpack.c.bf16 %v1798_v46, %v1798_v46  ;;  %v6527_v13 = vmax.f32 %v1779_v47, 0.0 }
 0x186   : > { %v1800_v6 = vmax.f32 %v1780_v49, 0.0  ;;  %v1912_v32 = vshrl.u32 %v6514_v29, 16  ;;  %v1915_v36 = vshll.u32 %v6514_v29, 16  ;;  %v1804_v61 = vmax.f32 %v1784_v58, 0.0 }
 0x187   : > { %v1921_v57 = vshll.u32 %v6516_v50, 16  ;;  %v1884_v0 = vshrl.u32 %v6523_v4, 16  ;;  %v1887_v30 = vshll.u32 %v6523_v4, 16  ;;  %v1893_v22 = vshll.u32 %v6525_v53, 16 }
 0x188   : > { %v6537_v55 = vpack.c.bf16 %v6527_v13, %v6527_v13  ;;  %v6539_v1 = vpack.c.bf16 %v1800_v6, %v1800_v6  ;;  %v1914_v41 = vrot.slane %v1912_v32, 4  ;;  %v1917_v48 = vrot.slane %v1915_v36, 5 }
 0x189   : > { %v6543_v37 = vpack.c.bf16 %v6518_v3, %v6518_v3  ;;  %v1886_v38 = vrot.slane %v1884_v0, 4  ;;  %v1889_v12 = vrot.slane %v1887_v30, 5  ;;  %v1789_v15 = vld [vmem:[#allocation2 + $0x70] sm:$0xff]  ;;  %v1923_v17 = vrot.slane %v1921_v57, 5 }
 0x18a   : > { %v1898_v18 = vshrl.u32 %v6537_v55, 16  ;;  %v1785_v8 = vld [vmem:[#allocation2 + $0x50] sm:$0xff]  ;;  %v6546_v19 = vmax.f32 %v1789_v15, 0.0  ;;  %v1901_v20 = vshll.u32 %v6537_v55, 16  ;;  %v1907_v25 = vshll.u32 %v6539_v1, 16 }
 0x18b   : > { %v1918_v23 = vor.u32 %v1917_v48, %v1914_v41  ;;  %v1786_v21 = vld [vmem:[#allocation2 + $0x58] sm:$0x3]  ;;  %v6550_v16 = vmax.f32 %v1785_v8, 0.0  ;;  %v1890_v60 = vor.u32 %v1889_v12, %v1886_v38  ;;  %v1895_v51 = vrot.slane %v1893_v22, 5  ;;  %v1791_v26 = vld [vmem:[#allocation2 + $0x80] sm:$0xff]  ;;  %v5910_v22 = vld [vmem:[%s7211_s3 + $0x48] sm:$0xff]  }
 0x18c   : > { %v1900_v28 = vrot.slane %v1898_v18, 4  ;;  %v1787_v31 = vld [vmem:[#allocation2 + $0x60] sm:$0xff]  ;;  %v6552_v33 = vmax.f32 %v1791_v26, 0.0  ;;  %v6556_v34 = vpack.c.bf16 %v6546_v19, %v6546_v19  ;;  %v1903_v35 = vrot.slane %v1901_v20, 5  ;;  %v1788_v8 = vld [vmem:[#allocation2 + $0x68] sm:$0x3] }
 0x18d   : > { %v1806_v39 = vmax.f32 %v1786_v21, 0.0  ;;  %v6558_v42 = vmax.f32 %v1787_v31, 0.0  ;;  %v6562_v43 = vpack.c.bf16 %v6550_v16, %v6550_v16  ;;  %v1891_v44 = vrot.slane %v1890_v60, 4  ;;  %v1790_v21 = vld [vmem:[#allocation2 + $0x78] sm:$0x3]  ;;  %v5913_v26 = vld [vmem:[%s7211_s3 + $0x8] sm:$0xff]  }
 0x18e   : > { %v1909_v46 = vrot.slane %v1907_v25, 5  ;;  %v5132_v14 = vpack.c.bf16 %v6552_v33, %v6546_v19  ;;  %v6568_v58 = vpack.c.bf16 %v6552_v33, %v6552_v33  ;;  %v1904_v47 = vor.u32 %v1903_v35, %v1900_v28 }
 0x18f   : > { %v1919_v49 = vrot.slane %v1918_v23, 4  ;;  %v6572_v6 = vpack.c.bf16 %v6558_v42, %v6558_v42  ;;  %v1940_v32 = vshrl.u32 %v6562_v43, 16  ;;  %v1943_v36 = vshll.u32 %v6562_v43, 16 }
 0x190   : > { %v5131_v57 = vpack.c.bf16 %v6558_v42, %v6550_v16  ;;  %v1896_v0 = vsel %vm6042_vm3, %v1891_v44, %v1895_v51  ;;  %v1905_v30 = vrot.slane %v1904_v47, 4  ;;  %v6583_v41 = vpack.c.bf16 %v1804_v61, %v1804_v61 }
 0x191   : > { %v6585_v48 = vpack.c.bf16 %v1806_v39, %v1806_v39  ;;  %v1954_v38 = vshrl.u32 %v6572_v6, 16  ;;  %v1957_v12 = vshll.u32 %v6572_v6, 16  ;;  %v4808_v15 = vcombine.low %v1882_v52, %v1896_v0 }
 0x192   : > { %5484 = vmatprep.mubr.msk.bf16.mxu1 %vm1744_vm8, %v5131_v57  ;;  %v1926_v18 = vshrl.u32 %v6543_v37, 16  ;;  %v1910_v61 = vsel %vm6042_vm3, %v1905_v30, %v1909_v46  ;;  %v1924_v20 = vsel %vm6042_vm3, %v1919_v49, %v1923_v17  ;;  %v1929_v25 = vshll.u32 %v6543_v37, 16  ;;  %v5911_v17 = vld [vmem:[%s7211_s3 + $0x50] sm:$0xff]  }
 0x193   : > { %5485 = vmatmul.mubr.msk.bf16.vlgmr.msra.gmra.mrb[0].mxu1 %vm1744_vm8, %v5132_v14  ;;  %v1942_v23 = vrot.slane %v1940_v32, 4  ;;  %5444 = vmatprep.mubr.msk.bf16.mxu0 %vm1744_vm8, %v4808_v15  ;;  %v6604_v54 = vcombine.low %v1910_v61, %v1924_v20  ;;  %v4870_v52 = vcombine.low %v1896_v0, %v1910_v61  ;;  %v1945_v51 = vrot.slane %v1943_v36, 5 }
 0x194   : > { %5489 = vmatpush3.bf16.msra.mxu1 %v6451_v62  ;;  %v1928_v60 = vrot.slane %v1926_v18, 4  ;;  %v1931_v28 = vrot.slane %v1929_v25, 5  ;;  %v1935_v31 = vshll.u32 %v6583_v41, 16  ;;  %v1949_v35 = vshll.u32 %v6585_v48, 16  ;;  %v1792_v18 = vld [vmem:[#allocation2 + $0x88] sm:$0x3] }
 0x195   : > { %5490 = vmatprep.subr.bf16.mxu1 %v5910_v22  ;;  %v1808_v62 = vmax.f32 %v1788_v8, 0.0  ;;  %5445 = vmatmul.mubr.msk.bf16.vlgmr.msra.gmra.mrb[8].mxu0 %vm1744_vm8, %v6604_v54  ;;  %v1946_v39 = vor.u32 %v1945_v51, %v1942_v23  ;;  %v1810_v44 = vmax.f32 %v1790_v21, 0.0  ;;  %v1956_v46 = vrot.slane %v1954_v38, 4  ;;  %v6627_v38 = vld [vmem:[%s7211_s3 + $0x20] sm:$0xff]  }
 0x196   : > { %5492 = vmatprep.mubr.msk.bf16.mxu1 %vm1744_vm8, %v4870_v52  ;;  %v1959_v14 = vrot.slane %v1957_v12, 5  ;;  %v1932_v47 = vor.u32 %v1931_v28, %v1928_v60  ;;  %v1951_v49 = vrot.slane %v1949_v35, 5  ;;  %v1968_v36 = vshrl.u32 %v6556_v34, 16  ;;  %5453 = vmatpush3.bf16.msra.mxu0 %v6457_v63 }
 0x197   : > { %v6617_v32 = vpack.c.bf16 %v1808_v62, %v1808_v62  ;;  %v1947_v57 = vrot.slane %v1946_v39, 4  ;;  %v6621_v0 = vpack.c.bf16 %v1810_v44, %v1810_v44  ;;  %v1971_v15 = vshll.u32 %v6556_v34, 16  ;;  %5454 = vmatprep.subr.bf16.mxu0 %v5913_v26  ;;  %v5914_v39 = vld [vmem:[%s7211_s3 + $0x58] sm:$0xff]  }
 0x198   : > { %5491 = vmatpush3.bf16.msra.mxu1 %v5910_v22  ;;  %v1960_v30 = vor.u32 %v1959_v14, %v1956_v46  ;;  %v1933_v12 = vrot.slane %v1932_v47, 4  ;;  %v1937_v8 = vrot.slane %v1935_v31, 5  ;;  %v1970_v63 = vrot.slane %v1968_v36, 4 }
 0x199   : > { %5500 = vmatprep.subr.bf16.mxu1 %v5911_v17  ;;  %v1963_v61 = vshll.u32 %v6617_v32, 16  ;;  %v1952_v22 = vsel %vm6042_vm3, %v1947_v57, %v1951_v49  ;;  %v1973_v23 = vrot.slane %v1971_v15, 5  ;;  %v1977_v21 = vshll.u32 %v6621_v0, 16 }
 0x19a   : > { %v1961_v25 = vrot.slane %v1960_v30, 4  ;;  %v1938_v52 = vsel %vm6042_vm3, %v1933_v12, %v1937_v8  ;;  %5455 = vmatpush3.bf16.msra.mxu0 %v5913_v26  ;;  %v1812_v51 = vmax.f32 %v1792_v18, 0.0  ;;  %v2438_v28 = vshrl.u32 %v6568_v58, 16  ;;  %v5915_v12 = vld [vmem:[%s7211_s3 + $0x60] sm:$0xff]  }
 0x19b   : > { %v1965_v60 = vrot.slane %v1963_v61, 5  ;;  %v6636_v35 = vcombine.low %v1938_v52, %v1952_v22  ;;  %v4871_v31 = vcombine.low %v1924_v20, %v1938_v52  ;;  %v1974_v62 = vor.u32 %v1973_v23, %v1970_v63  ;;  %5464 = vmatprep.subr.bf16.mxu0 %v6627_v38 }
 0x19c   : > { %v6644_v46 = vpack.c.bf16 %v1812_v51, %v1812_v51  ;;  %v2440_v14 = vrot.slane %v2438_v28, 4  ;;  %v2441_v26 = vshll.u32 %v6568_v58, 16  ;;  %v1979_v47 = vrot.slane %v1977_v21, 5 }
 0x19d   : > { %v1966_v44 = vsel %vm6042_vm3, %v1961_v25, %v1965_v60  ;;  %5448 = vmatprep.mubr.msk.bf16.mxu0 %vm1744_vm8, %v6636_v35  ;;  %5493 = vmatmul.mubr.msk.bf16.vlgmr.msra.gmra.mrb[4].mxu1 %vm1744_vm8, %v4871_v31  ;;  %v1975_v20 = vrot.slane %v1974_v62, 4  ;;  %v4830_v15 = vrot.slane %v6537_v55, 9  ;;  %v2190_v18 = vrot.slane %v6539_v1, 5 }
 0x19e   : > { %v4872_v49 = vcombine.low %v1952_v22, %v1966_v44  ;;  %5501 = vmatpush3.bf16.msra.mxu1 %v5911_v17  ;;  %v2443_v36 = vrot.slane %v2441_v26, 5  ;;  %v2447_v57 = vshll.u32 %v6644_v46, 16  ;;  %v5125_v61 = vpack.c.bf16 %v6505_v45, %v6460_v2  ;;  %v5918_v26 = vld [vmem:[%s7211_s3 + $0x68] sm:$0xff]  }
 0x19f   : > { %v1980_v30 = vsel %vm6042_vm3, %v1975_v20, %v1979_v47  ;;  %5502 = vmatprep.subr.bf16.mxu1 %v5914_v39  ;;  %v4829_v63 = vrot.slane %v6523_v4, 9  ;;  %v2186_v22 = vrot.slane %v6525_v53, 5  ;;  %v2191_v1 = vsel %vm6122_vm7, %v4830_v15, %v2190_v18  ;;  %v5920_v15 = vld [vmem:[%s7211_s3 + $0x78] sm:$0xff]  }
 0x1a0   : > { %5496 = vmatprep.mubr.msk.bf16.mxu1 %vm1744_vm8, %v4872_v49  ;;  %v6659_v8 = vcombine.low %v1966_v44, %v1980_v30  ;;  %v2444_v17 = vor.u32 %v2443_v36, %v2440_v14  ;;  %v2449_v25 = vrot.slane %v2447_v57, 5  ;;  %v4832_v21 = vrot.slane %v6543_v37, 9  ;;  %v5917_v37 = vld [vmem:[%s7211_s3 + $0x28] sm:$0xff]  }
 0x1a1   : > { %v2187_v53 = vsel %vm6122_vm7, %v4829_v63, %v2186_v22  ;;  %v2198_v52 = vrot.slane %v6583_v41, 5  ;;  %v4834_v51 = vrot.slane %v6572_v6, 9  ;;  %v2206_v28 = vrot.slane %v6617_v32, 5 }
 0x1a2   : > { %5449 = vmatmul.mubr.msk.bf16.gmra.mrb[12].mxu0 %vm1744_vm8, %v6659_v8  ;;  %v2445_v55 = vrot.slane %v2444_v17, 4  ;;  %5503 = vmatpush3.bf16.msra.mxu1 %v5914_v39  ;;  %v4885_v60 = vcombine.low %v2187_v53, %v2191_v1  ;;  %v4831_v31 = vrot.slane %v6514_v29, 9  ;;  %v2194_v62 = vrot.slane %v6516_v50, 5  ;;  %v1794_v17 = vld [vmem:[#allocation2 + $0x98] sm:$0x3] }
 0x1a3   : > { %5456 = vmatprep.mubr.msk.bf16.mxu0 %vm1744_vm8, %v5125_v61  ;;  %5512 = vmatprep.subr.bf16.mxu1 %v5915_v12  ;;  %v5126_v39 = vpack.c.bf16 %v6502_v40, %v6527_v13  ;;  %v5127_v41 = vpack.c.bf16 %v6550_v16, %v6518_v3  ;;  %v4833_v6 = vrot.slane %v6562_v43, 9  ;;  %v2202_v32 = vrot.slane %v6585_v48, 5 }
 0x1a4   : > { %v6672_v23 = vsel %vm6042_vm3, %v2445_v55, %v2449_v25  ;;  %v2199_v29 = vsel %vm6122_vm7, %v4832_v21, %v2198_v52  ;;  %v4828_v50 = vrot.slane %v6466_v10, 9  ;;  %v2182_v44 = vrot.slane %v6491_v24, 5 }
 0x1a5   : > { %v4873_v4 = vcombine.low %v1980_v30, %v6672_v23  ;;  %v2207_v14 = vsel %vm6122_vm7, %v4834_v51, %v2206_v28  ;;  %v2195_v16 = vsel %vm6122_vm7, %v4831_v31, %v2194_v62  ;;  %v2203_v48 = vsel %vm6122_vm7, %v4833_v6, %v2202_v32 }
 0x1a6   : > { %v4886_v43 = vcombine.low %v2195_v16, %v2199_v29  ;;  %v4887_v24 = vcombine.low %v2203_v48, %v2207_v14  ;;  %v2183_v20 = vsel %vm6122_vm7, %v4828_v50, %v2182_v44  ;;  %v2560_v47 = vrot.slane %v6644_v46, 5 }
 0x1a7   : > { %5497 = vmatmul.mubr.msk.bf16.gmra.mrb[0].mxu1 %vm1744_vm8, %v4873_v4  ;;  %v5128_v49 = vpack.c.bf16 %v6546_v19, %v6558_v42  ;;  %v4835_v36 = vrot.slane %v6556_v34, 9  ;;  %v2210_v57 = vrot.slane %v6621_v0, 5  ;;  %v4840_v30 = vcombine.low %v2183_v20, %v2187_v53 }
 0x1a8   : > { %5504 = vmatprep.mubr.msk.bf16.mxu1 %vm1744_vm8, %v4885_v60  ;;  %v4841_v42 = vcombine.low %v2191_v1, %v2195_v16  ;;  %v4842_v0 = vcombine.low %v2199_v29, %v2203_v48  ;;  %v2769_v61 = vshrl.u32 %v6470_v11, 16  ;;  %v2772_v63 = vshll.u32 %v6470_v11, 16 }
 0x1a9   : > { %v2211_v19 = vsel %vm6122_vm7, %v4835_v36, %v2210_v57  ;;  %v5135_v22 = vpack.c.bf16 %v6462_v7, %v6552_v33  ;;  %v5130_v55 = vpack.c.bf16 %v6518_v3, %v6502_v40  ;;  %v5922_v33 = vld [vmem:[%s7211_s3 + $0x88] sm:$0xff]  }
 0x1aa   : > { %5457 = vmatmul.mubr.msk.bf16.vlgmr.msra.gmra.mrb[8].mxu0 %vm1744_vm8, %v5126_v39  ;;  %v4843_v18 = vcombine.low %v2207_v14, %v2211_v19 }
 0x1ab   : > { %5460 = vmatprep.mubr.msk.bf16.mxu0 %vm1744_vm8, %v5127_v41  ;;  %5465 = vmatpush3.bf16.msra.mxu0 %v6627_v38  ;;  %v4880_v38 = vrot.slane %v6568_v58, 9  ;;  %v5919_v58 = vld [vmem:[%s7211_s3 + $0x70] sm:$0xff]  }
 0x1ac   : > { %5466 = vmatprep.subr.bf16.mxu0 %v5917_v37 }
 0x1ad   : > { %v2561_v46 = vsel %vm6122_vm7, %v4880_v38, %v2560_v47 }
 0x1ae   : > { %v4888_v34 = vcombine.low %v2211_v19, %v2561_v46 }
 0x1af   : > { %5505 = vmatmul.mubr.msk.bf16.vlgmr.msra.gmra.mrb[4].mxu1 %vm1744_vm8, %v4886_v43  ;;  %5467 = vmatpush3.bf16.msra.mxu0 %v5917_v37 }
 0x1b0   : > { %5513 = vmatpush3.bf16.msra.mxu1 %v5915_v12  ;;  %5508 = vmatprep.mubr.msk.bf16.mxu1 %vm1744_vm8, %v4887_v24  ;;  %v5129_v12 = vpack.c.bf16 %v6527_v13, %v6505_v45  ;;  %v2771_v45 = vrot.slane %v2769_v61, 4  ;;  %v2774_v13 = vrot.slane %v2772_v63, 5  ;;  %v5923_v63 = vld [vmem:[%s7211_s3 + $0xa0] sm:$0xff]  }
 0x1b1   : > { %5514 = vmatprep.subr.bf16.mxu1 %v5918_v26  ;;  %5476 = vmatprep.subr.bf16.mxu0 %v6431_v5 }
 0x1b2   : > { %5461 = vmatmul.mubr.msk.bf16.gmra.mrb[12].mxu0 %vm1744_vm8, %v5128_v49  ;;  %v2775_v1 = vor.u32 %v2774_v13, %v2771_v45  ;;  %v3096_v45 = vld [vmem:[#allocation2 + $0x8] sm:$0x3] }
 0x1b3   : > { %5468 = vmatprep.mubr.msk.bf16.mxu0 %vm1744_vm8, %v4840_v30  ;;  %v3116_v13 = vmax.f32 %v3096_v45, 0.0 }
 0x1b4   : > { %5515 = vmatpush3.bf16.msra.mxu1 %v5918_v26  ;;  %v6764_v53 = vrot.slane %v2775_v1, 4 }
 0x1b5   : > { %5524 = vmatprep.subr.bf16.mxu1 %v5919_v58 }
 0x1b7   : > { %5509 = vmatmul.mubr.msk.bf16.gmra.mrb[0].mxu1 %vm1744_vm8, %v4888_v34 }
 0x1b8   : > { %5516 = vmatprep.mubr.msk.bf16.mxu1 %vm1744_vm8, %v5126_v39 }
 0x1ba   : > { %5469 = vmatmul.mubr.msk.bf16.vlgmr.msra.gmra.mrb[8].mxu0 %vm1744_vm8, %v4841_v42 }
 0x1bb   : > { %5472 = vmatprep.mubr.msk.bf16.mxu0 %vm1744_vm8, %v4842_v0  ;;  %5477 = vmatpush3.bf16.msra.mxu0 %v6431_v5  ;;  %v5921_v5 = vld [vmem:[%s7211_s3 + $0x80] sm:$0xff]  }
 0x1bc   : > { %5478 = vmatprep.subr.bf16.mxu0 %v6439_v59 }
 0x1bf   : > { %5517 = vmatmul.mubr.msk.bf16.vlgmr.msra.gmra.mrb[4].mxu1 %vm1744_vm8, %v5127_v41  ;;  %5479 = vmatpush3.bf16.msra.mxu0 %v6439_v59  ;;  %v1814_v59 = vmax.f32 %v1794_v17, 0.0 }
 0x1c0   : > { %5525 = vmatpush3.bf16.msra.mxu1 %v5919_v58  ;;  %5520 = vmatprep.mubr.msk.bf16.mxu1 %vm1744_vm8, %v5128_v49 }
 0x1c1   : > { %5526 = vmatprep.subr.bf16.mxu1 %v5920_v15  ;;  %v5137_v25 = vpack.c.bf16 %v1814_v59, %v1814_v59  ;;  %v5924_v59 = vld [vmem:[%s7211_s3 + $0xa8] sm:$0xff]  }
 0x1c2   : > { %5473 = vmatmul.mubr.msk.bf16.gmra.mrb[12].mxu0 %vm1744_vm8, %v4843_v18 }
 0x1c3   : > { %5480 = vmatprep.mubr.msk.bf16.mxu0 %vm1744_vm8, %v5129_v12  ;;  %v2778_v4 = vshll.u32 %v5137_v25, 16  ;;  %v2879_v52 = vrot.slane %v5137_v25, 5  ;;  %v3073_v25 = vld [vmem:[#allocation2 + $0x31] sm:$0xff] }
 0x1c4   : > { %5527 = vmatpush3.bf16.msra.mxu1 %v5920_v15 }
 0x1c5   : > { %5536 = vmatprep.subr.bf16.mxu1 %v5921_v5  ;;  %v2780_v21 = vrot.slane %v2778_v4, 5 }
 0x1c7   : > { %5521 = vmatmul.mubr.msk.bf16.gmra.mrb[0].mxu1 %vm1744_vm8, %v5135_v22  ;;  %v2781_v40 = vsel %vm6042_vm3, %v6764_v53, %v2780_v21  ;;  %v6802_v22 = vld [vmem:[%s7211_s3 + $0x90] sm:$0xff]  }
 0x1c8   : > { %5528 = vmatprep.mubr.msk.bf16.mxu1 %vm1744_vm8, %v6604_v54  ;;  %v4912_v3 = vcombine.low %v6672_v23, %v2781_v40  ;;  %v4919_v54 = vrot.slane %v6470_v11, 9  ;;  %v2988_v23 = vld [vmem:[%s7212_s4] sm:$0xf] }
 0x1c9   : > { %5881 = vmatprep.subr.msk.bf16.mxu0 %vm3002_vm11, %v2988_v23  ;;  %v3004_v60 = vsel %vm3002_vm11, %v2988_v23, 0  ;;  %v6806_v23 = vpack.c.bf16 %v3116_v13, %v3116_v13 }
 0x1ca   : > { %5481 = vmatmul.mubr.msk.bf16.vlgmr.msra.gmra.mrb[8].mxu0 %vm1744_vm8, %v5130_v55 }
 0x1cb   : > { %5549 = vmatpush3.bf16.msra.mxu0 %v3004_v60 }
 0x1cf   : > { %5529 = vmatmul.mubr.msk.bf16.vlgmr.msra.gmra.mrb[4].mxu1 %vm1744_vm8, %v6636_v35  ;;  %v2880_v35 = vsel %vm6122_vm7, %v4919_v54, %v2879_v52 }
 0x1d0   : > { %5537 = vmatpush3.bf16.msra.mxu1 %v5921_v5  ;;  %5532 = vmatprep.mubr.msk.bf16.mxu1 %vm1744_vm8, %v6659_v8  ;;  %v4924_v8 = vcombine.low %v2561_v46, %v2880_v35 }
 0x1d1   : > { %5538 = vmatprep.subr.bf16.mxu1 %v5922_v33 }
 0x1d4   : > { %5539 = vmatpush3.bf16.msra.mxu1 %v5922_v33  ;;  %v3071_v33 = vld [vmem:[#allocation2 + $0x11] sm:$0xff] }
 0x1d5   : > { %5558 = vmatprep.subr.bf16.mxu1 %v5923_v63 }
 0x1d7   : > { %5533 = vmatmul.mubr.msk.bf16.gmra.mrb[0].mxu1 %vm1744_vm8, %v4912_v3  ;;  %v3074_v3 = vld [vmem:[#allocation2 + $0x41] sm:$0xff] }
 0x1d8   : > { %5540 = vmatprep.mubr.msk.bf16.mxu1 %vm1744_vm8, %v4841_v42 }
 0x1df   : > { %5541 = vmatmul.mubr.msk.bf16.vlgmr.msra.gmra.mrb[4].mxu1 %vm1744_vm8, %v4842_v0 }
 0x1e0   : > { %5544 = vmatprep.mubr.msk.bf16.mxu1 %vm1744_vm8, %v4843_v18  ;;  %5559 = vmatpush3.bf16.msra.mxu1 %v5923_v63 }
 0x1e1   : > { %5560 = vmatprep.subr.bf16.mxu1 %v5924_v59 }
 0x1e4   : > { %5561 = vmatpush3.bf16.msra.mxu1 %v5924_v59 }
 0x1e5   : > { %5570 = vmatprep.subr.bf16.mxu1 %v6802_v22 }
 0x1e7   : > { %5545 = vmatmul.mubr.msk.bf16.gmra.mrb[0].mxu1 %vm1744_vm8, %v4924_v8  ;;  %v3072_v8 = vld [vmem:[#allocation2 + $0x21] sm:$0xff] }
 0x295   : > { %v5474_v51 = vpop.f32.mrb[12].mxu0 }
 0x296   : > { %v2303_v28 = vpop.f32.mrb[13].mxu0 }
 0x297   : > { %v5475_v31 = vpop.f32.mrb[14].mxu0 }
 0x298   : > { %v2306_v62 = vpop.f32.mrb[15].mxu0 }
 0x29d   : > { %v5482_v39 = vpop.f32.mrb[8].mxu0 }
 0x29e   : > { %v2395_v37 = vpop.f32.mrb[9].mxu0 }
 0x29f   : > { %v5483_v41 = vpop.f32.mrb[10].mxu0 }
 0x2a0   : > { %v2398_v6 = vpop.f32.mrb[11].mxu0 }
 0x2b2   : > { %v5542_v32 = vpop.f32.mrb[4].mxu1 }
 0x2b3   : > { %v5680_v29 = vadd.f32 %v5542_v32, %v5482_v39  ;;  %v2937_v44 = vpop.f32.mrb[5].mxu1 }
 0x2b4   : > { %v5681_v14 = vadd.f32 %v2937_v44, %v2395_v37  ;;  %v5543_v16 = vpop.f32.mrb[6].mxu1  ;;  %v3075_v37 = vld [vmem:[#allocation2 + $0x51] sm:$0xff]  ;;  %v3076_v44 = vld [vmem:[#allocation2 + $0x61] sm:$0xff] }
 0x2b5   : > { %v5682_v43 = vadd.f32 %v5543_v16, %v5483_v41  ;;  %v2940_v48 = vpop.f32.mrb[7].mxu1  ;;  %v2978_v24 = vmax.f32 %v5680_v29, 0.0  ;;  %v3078_v41 = vld [vmem:[#allocation2 + $0x81] sm:$0xff] }
 0x2b6   : > { %v5683_v26 = vadd.f32 %v2940_v48, %v2398_v6  ;;  %v2976_v38 = vmax.f32 %v5681_v14, 0.0 }
 0x2b7   : > { %v2979_v20 = vmax.f32 %v5682_v43, 0.0 }
 0x2b8   : > { %v2977_v47 = vmax.f32 %v5683_v26, 0.0 }
 0x2b9   : > { %v2985_v49 = vpack.c.bf16 %v2979_v20, %v2978_v24 }
 0x2ba   : > { %v2984_v36 = vpack.c.bf16 %v2977_v47, %v2976_v38  ;;  %v5546_v57 = vpop.f32.mrb[0].mxu1 }
 0x2bb   : > { %v5684_v30 = vadd.f32 %v5546_v57, %v5474_v51  ;;  %v2953_v58 = vpop.f32.mrb[1].mxu1  ;;  %v3200_v51 = vshll.u32 %v6806_v23, 16 }
 0x2bc   : > { %v5685_v46 = vadd.f32 %v2953_v58, %v2303_v28  ;;  %v5547_v19 = vpop.f32.mrb[2].mxu1  ;;  %5550 = vmatprep.mubr.msk.bf16.mxu0 %vm2989_vm12, %v2984_v36 }
 0x2bd   : > { %v5686_v34 = vadd.f32 %v5547_v19, %v5475_v31  ;;  %v2956_v42 = vpop.f32.mrb[3].mxu1  ;;  %5551 = vmatmul.mubr.msk.bf16.vlgmr.msra.gmra.mrb[16].mxu0 %vm2989_vm12, %v2985_v49  ;;  %v2982_v15 = vmax.f32 %v5684_v30, 0.0  ;;  %v3077_v31 = vld [vmem:[#allocation2 + $0x71] sm:$0xff]  ;;  %v6812_v6 = vrot.slane %v3200_v51, 5 }
 0x2be   : > { %v5687_v0 = vadd.f32 %v2956_v42, %v2306_v62  ;;  %v2980_v12 = vmax.f32 %v5685_v46, 0.0 }
 0x2bf   : > { %v2983_v18 = vmax.f32 %v5686_v34, 0.0  ;;  %v3203_v58 = vsel %vm6042_vm3, %v6497_v9, %v6812_v6 }
 0x2c0   : > { %v2981_v5 = vmax.f32 %v5687_v0, 0.0 }
 0x2c1   : > { %v2987_v17 = vpack.c.bf16 %v2983_v18, %v2982_v15 }
 0x2c2   : > { %v2986_v61 = vpack.c.bf16 %v2981_v5, %v2980_v12 }
 0x2c4   : > { %5554 = vmatprep.mubr.msk.bf16.mxu0 %vm2989_vm12, %v2986_v61 }
 0x2c5   : > { %5555 = vmatmul.mubr.msk.bf16.gmra.mrb[20].mxu0 %vm2989_vm12, %v2987_v17 }
 0x390   : > { %v5552_v55 = vpop.f32.mrb[16].mxu0 }
 0x391   : > { %v3081_v1 = vadd.f32 %v5552_v55, %v3073_v25  ;;  %v3040_v4 = vpop.f32.mrb[17].mxu0 }
 0x392   : > { %v3079_v21 = vadd.f32 %v3071_v33, %v3040_v4  ;;  %v5553_v40 = vpop.f32.mrb[18].mxu0 }
 0x393   : > { %3089 = vst.msk [vmem:[#allocation2 + $0x31] sm:$0xff] %vm1744_vm8, %v3081_v1  ;;  %v3082_v52 = vadd.f32 %v5553_v40, %v3074_v3  ;;  %v3043_v35 = vpop.f32.mrb[19].mxu0 }
 0x394   : > { %3087 = vst.msk [vmem:[#allocation2 + $0x11] sm:$0xff] %vm1744_vm8, %v3079_v21  ;;  %v3080_v60 = vadd.f32 %v3072_v8, %v3043_v35 }
 0x395   : > { %3090 = vst.msk [vmem:[#allocation2 + $0x41] sm:$0xff] %vm1744_vm8, %v3082_v52 }
 0x396   : > { %3088 = vst.msk [vmem:[#allocation2 + $0x21] sm:$0xff] %vm1744_vm8, %v3080_v60 }
 0x398   : > { %v5556_v28 = vpop.f32.mrb[20].mxu0 }
 0x399   : > { %v3085_v62 = vadd.f32 %v5556_v28, %v3077_v31  ;;  %v3056_v39 = vpop.f32.mrb[21].mxu0 }
 0x39a   : > { %v3083_v32 = vadd.f32 %v3075_v37, %v3056_v39  ;;  %v5557_v29 = vpop.f32.mrb[22].mxu0  ;;  %v3101_v14 = vld [vmem:[#allocation2 + $0x30] sm:$0xff]  ;;  %v3102_v16 = vld [vmem:[#allocation2 + $0x38] sm:$0x3] }
 0x39b   : > { %3093 = vst.msk [vmem:[#allocation2 + $0x71] sm:$0xff] %vm1744_vm8, %v3085_v62  ;;  %v3086_v43 = vadd.f32 %v5557_v29, %v3078_v41  ;;  %v3059_v48 = vpop.f32.mrb[23].mxu0  ;;  %v3097_v26 = vld [vmem:[#allocation2 + $0x10] sm:$0xff]  ;;  %v3098_v24 = vld [vmem:[#allocation2 + $0x18] sm:$0x3]  ;;  %v6815_v20 = vmax.f32 %v3101_v14, 0.0 }
 0x39c   : > { %v3122_v38 = vmax.f32 %v3102_v16, 0.0  ;;  %3091 = vst.msk [vmem:[#allocation2 + $0x51] sm:$0xff] %vm1744_vm8, %v3083_v32  ;;  %v3084_v47 = vadd.f32 %v3076_v44, %v3059_v48  ;;  %v6818_v49 = vmax.f32 %v3097_v26, 0.0  ;;  %v3118_v36 = vmax.f32 %v3098_v24, 0.0  ;;  %v3103_v57 = vld [vmem:[#allocation2 + $0x40] sm:$0xff] }
 0x39d   : > { %v3104_v30 = vld [vmem:[#allocation2 + $0x48] sm:$0x3]  ;;  %3094 = vst.msk [vmem:[#allocation2 + $0x81] sm:$0xff] %vm1744_vm8, %v3086_v43  ;;  %v3099_v46 = vld [vmem:[#allocation2 + $0x20] sm:$0xff]  ;;  %v6827_v34 = vpack.c.bf16 %v6815_v20, %v6815_v20  ;;  %v6831_v0 = vmax.f32 %v3103_v57, 0.0 }
 0x39e   : > { %v3100_v19 = vld [vmem:[#allocation2 + $0x28] sm:$0x3]  ;;  %v6829_v42 = vpack.c.bf16 %v3122_v38, %v3122_v38  ;;  %3092 = vst.msk [vmem:[#allocation2 + $0x61] sm:$0xff] %vm1744_vm8, %v3084_v47  ;;  %v6836_v15 = vpack.c.bf16 %v6818_v49, %v6818_v49  ;;  %v6838_v18 = vpack.c.bf16 %v3118_v36, %v3118_v36  ;;  %v6840_v12 = vmax.f32 %v3099_v46, 0.0 }
 0x39f   : > { %v3120_v9 = vmax.f32 %v3100_v19, 0.0  ;;  %v3233_v5 = vshrl.u32 %v6827_v34, 16  ;;  %v3236_v17 = vshll.u32 %v6827_v34, 16  ;;  %v3124_v63 = vmax.f32 %v3104_v30, 0.0 }
 0x3a0   : > { %v3242_v61 = vshll.u32 %v6829_v42, 16  ;;  %v3205_v59 = vshrl.u32 %v6836_v15, 16  ;;  %v3208_v45 = vshll.u32 %v6836_v15, 16  ;;  %v6849_v13 = vpack.c.bf16 %v6840_v12, %v6840_v12 }
 0x3a1   : > { %v6853_v55 = vpack.c.bf16 %v6831_v0, %v6831_v0  ;;  %v3214_v25 = vshll.u32 %v6838_v18, 16  ;;  %v6856_v1 = vpack.c.bf16 %v3120_v9, %v3120_v9  ;;  %v3235_v4 = vrot.slane %v3233_v5, 4 }
 0x3a2   : > { %v3238_v33 = vrot.slane %v3236_v17, 5  ;;  %v3207_v21 = vrot.slane %v3205_v59, 4  ;;  %v3210_v40 = vrot.slane %v3208_v45, 5  ;;  %v3219_v3 = vshrl.u32 %v6849_v13, 16  ;;  %v3109_v5 = vld [vmem:[#allocation2 + $0x70] sm:$0xff] }
 0x3a3   : > { %v3244_v52 = vrot.slane %v3242_v61, 5  ;;  %v3222_v35 = vshll.u32 %v6849_v13, 16  ;;  %v3228_v8 = vshll.u32 %v6856_v1, 16  ;;  %v3105_v51 = vld [vmem:[#allocation2 + $0x50] sm:$0xff]  ;;  %v3106_v28 = vld [vmem:[#allocation2 + $0x58] sm:$0x3]  ;;  %v6861_v31 = vpack.c.bf16 %v3124_v63, %v3124_v63 }
 0x3a4   : > { %v3239_v60 = vor.u32 %v3238_v33, %v3235_v4  ;;  %v3211_v62 = vor.u32 %v3210_v40, %v3207_v21  ;;  %v3221_v39 = vrot.slane %v3219_v3, 4  ;;  %v6863_v37 = vmax.f32 %v3105_v51, 0.0  ;;  %v3110_v45 = vld [vmem:[#allocation2 + $0x78] sm:$0x3] }
 0x3a5   : > { %v3126_v41 = vmax.f32 %v3106_v28, 0.0  ;;  %v3216_v6 = vrot.slane %v3214_v25, 5  ;;  %v3224_v32 = vrot.slane %v3222_v35, 5  ;;  %v3247_v44 = vshrl.u32 %v6853_v55, 16  ;;  %v3107_v36 = vld [vmem:[#allocation2 + $0x60] sm:$0xff]  ;;  %v5926_v51 = vld [vmem:[%s7211_s3 + $0x98] sm:$0xff]  }
 0x3a6   : > { %v3240_v29 = vrot.slane %v3239_v60, 4  ;;  %v3212_v14 = vrot.slane %v3211_v62, 4  ;;  %v6868_v16 = vpack.c.bf16 %v6863_v37, %v6863_v37  ;;  %v3250_v48 = vshll.u32 %v6853_v55, 16  ;;  %v3108_v9 = vld [vmem:[#allocation2 + $0x68] sm:$0x3] }
 0x3a7   : > { %v6870_v43 = vpack.c.bf16 %v3126_v41, %v3126_v41  ;;  %v3225_v26 = vor.u32 %v3224_v32, %v3221_v39  ;;  %v3230_v24 = vrot.slane %v3228_v8, 5  ;;  %v3249_v38 = vrot.slane %v3247_v44, 4 }
 0x3a8   : > { %v3256_v47 = vshll.u32 %v6861_v31, 16  ;;  %v6876_v57 = vsel %vm6042_vm3, %v3212_v14, %v3216_v6  ;;  %v3252_v30 = vrot.slane %v3250_v48, 5  ;;  %v3261_v46 = vshrl.u32 %v6868_v16, 16 }
 0x3a9   : > { %v3264_v19 = vshll.u32 %v6868_v16, 16  ;;  %v4959_v17 = vcombine.low %v3203_v58, %v6876_v57  ;;  %v3226_v61 = vrot.slane %v3225_v26, 4  ;;  %v6883_v63 = vsel %vm6042_vm3, %v3240_v29, %v3244_v52 }
 0x3aa   : > { %v3270_v59 = vshll.u32 %v6870_v43, 16  ;;  %v3253_v25 = vor.u32 %v3252_v30, %v3249_v38  ;;  %v3263_v4 = vrot.slane %v3261_v46, 4  ;;  %v6886_v21 = vmax.f32 %v3107_v36, 0.0 }
 0x3ab   : > { %v3266_v33 = vrot.slane %v3264_v19, 5  ;;  %5562 = vmatprep.mubr.msk.bf16.mxu1 %vm1744_vm8, %v4959_v17  ;;  %v6891_v40 = vsel %vm6042_vm3, %v3226_v61, %v3230_v24  ;;  %v3258_v58 = vrot.slane %v3256_v47, 5  ;;  %v3128_v3 = vmax.f32 %v3108_v9, 0.0 }
 0x3ac   : > { %v6893_v35 = vmax.f32 %v3109_v5, 0.0  ;;  %v6897_v52 = vcombine.low %v6891_v40, %v6883_v63  ;;  %v3254_v8 = vrot.slane %v3253_v25, 4  ;;  %v3130_v28 = vmax.f32 %v3110_v45, 0.0 }
 0x3ad   : > { %v3267_v60 = vor.u32 %v3266_v33, %v3263_v4  ;;  %v6904_v62 = vpack.c.bf16 %v6886_v21, %v6886_v21  ;;  %v6906_v39 = vpack.c.bf16 %v3128_v3, %v3128_v3  ;;  %v3272_v29 = vrot.slane %v3270_v59, 5 }
 0x3ae   : > { %v6910_v41 = vpack.c.bf16 %v6893_v35, %v6893_v35  ;;  %5563 = vmatmul.mubr.msk.bf16.vlgmr.msra.gmra.mrb[8].mxu1 %vm1744_vm8, %v6897_v52  ;;  %v6916_v6 = vsel %vm6042_vm3, %v3254_v8, %v3258_v58  ;;  %v6918_v44 = vpack.c.bf16 %v3130_v28, %v3130_v28  ;;  %v4984_v10 = vrot.slane %v6868_v16, 9 }
 0x3af   : > { %v3268_v32 = vrot.slane %v3267_v60, 4  ;;  %5571 = vmatpush3.bf16.msra.mxu1 %v6802_v22  ;;  %v5022_v14 = vcombine.low %v6883_v63, %v6916_v6  ;;  %v3275_v48 = vshrl.u32 %v6904_v62, 16  ;;  %v3278_v26 = vshll.u32 %v6904_v62, 16  ;;  %v5927_v22 = vld [vmem:[%s7211_s3 + $0xb0] sm:$0xff]  }
 0x3b0   : > { %5572 = vmatprep.subr.bf16.mxu1 %v5926_v51  ;;  %v3289_v38 = vshrl.u32 %v6910_v41, 16  ;;  %v3292_v47 = vshll.u32 %v6910_v41, 16  ;;  %v3284_v19 = vshll.u32 %v6906_v39, 16  ;;  %v3298_v17 = vshll.u32 %v6918_v44, 16 }
 0x3b1   : > { %v6927_v24 = vsel %vm6042_vm3, %v3268_v32, %v3272_v29  ;;  %v3277_v30 = vrot.slane %v3275_v48, 4  ;;  %v3280_v46 = vrot.slane %v3278_v26, 5  ;;  %v5154_v60 = vpack.c.bf16 %v6818_v49, %v6460_v2  ;;  %v5928_v2 = vld [vmem:[%s7211_s3 + $0xb8] sm:$0xff]  }
 0x3b2   : > { %v6936_v36 = vcombine.low %v6916_v6, %v6927_v24  ;;  %v3291_v9 = vrot.slane %v3289_v38, 4  ;;  %v3294_v5 = vrot.slane %v3292_v47, 5  ;;  %v3286_v25 = vrot.slane %v3284_v19, 5  ;;  %v5929_v47 = vld [vmem:[%s7211_s3 + $0xc0] sm:$0xff]  }
 0x3b3   : > { %v3281_v61 = vor.u32 %v3280_v46, %v3277_v30  ;;  %5573 = vmatpush3.bf16.msra.mxu1 %v5926_v51  ;;  %v3300_v33 = vrot.slane %v3298_v17, 5  ;;  %v5082_v51 = vld [vmem:[%s7212_s4 + $0x4] sm:$0xf]  ;;  %v6966_v32 = vpack.c.bf16 %v6815_v20, %v6840_v12  ;;  %v6973_v29 = vpack.c.bf16 %v6863_v37, %v6831_v0 }
 0x3b4   : > { %5566 = vmatprep.mubr.msk.bf16.mxu1 %vm1744_vm8, %v6936_v36  ;;  %v3295_v59 = vor.u32 %v3294_v5, %v3291_v9  ;;  %5582 = vmatprep.subr.bf16.mxu1 %v5927_v22  ;;  %v4324_v28 = vsel %vm3002_vm11, %v5082_v51, 0  ;;  %v3503_v48 = vrot.slane %v6806_v23, 5  ;;  %v4980_v26 = vrot.slane %v6836_v15, 9 }
 0x3b5   : > { %v3282_v45 = vrot.slane %v3281_v61, 4  ;;  %5882 = vmatprep.subr.msk.bf16.mxu0 %vm3002_vm11, %v5082_v51  ;;  %v3507_v38 = vrot.slane %v6838_v18, 5  ;;  %v6995_v15 = vpack.c.bf16 %v6893_v35, %v6886_v21  ;;  %v3511_v46 = vrot.slane %v6856_v1, 5  ;;  %v5932_v51 = vld [vmem:[%s7211_s3 + $0xd8] sm:$0xff]  }
 0x3b6   : > { %v3296_v4 = vrot.slane %v3295_v59, 4  ;;  %5667 = vmatpush3.bf16.msra.mxu0 %v4324_v28  ;;  %v3504_v30 = vsel %vm6122_vm7, %v4828_v50, %v3503_v48  ;;  %v3523_v50 = vrot.slane %v6870_v43, 5  ;;  %v4982_v19 = vrot.slane %v6827_v34, 9 }
 0x3b7   : > { %v6944_v58 = vsel %vm6042_vm3, %v3282_v45, %v3286_v25  ;;  %v6991_v23 = vsel %vm6122_vm7, %v4980_v26, %v3507_v38  ;;  %v3515_v9 = vrot.slane %v6829_v42, 5  ;;  %v4983_v5 = vrot.slane %v6853_v55, 9  ;;  %v5930_v55 = vld [vmem:[%s7211_s3 + $0xc8] sm:$0xff]   ;;  %v5931_v25 = vld [vmem:[%s7211_s3 + $0xd0] sm:$0xff]  }
 0x3b8   : > { %v6948_v3 = vsel %vm6042_vm3, %v3296_v4, %v3300_v33  ;;  %v4991_v18 = vcombine.low %v3504_v30, %v6991_v23  ;;  %v3519_v17 = vrot.slane %v6861_v31, 5  ;;  %v7015_v1 = vsel %vm6122_vm7, %v4984_v10, %v3523_v50 }
 0x3b9   : > { %v6952_v8 = vcombine.low %v6944_v58, %v6948_v3  ;;  %v7019_v16 = vsel %vm6122_vm7, %v4982_v19, %v3515_v9  ;;  %v4985_v43 = vrot.slane %v6904_v62, 9  ;;  %v3527_v61 = vrot.slane %v6906_v39, 5 }
 0x3ba   : > { %v7027_v42 = vsel %vm6122_vm7, %v4983_v5, %v3519_v17  ;;  %v4986_v59 = vrot.slane %v6910_v41, 9  ;;  %v3531_v45 = vrot.slane %v6918_v44, 5  ;;  %v5158_v41 = vpack.c.bf16 %v6840_v12, %v6818_v49  ;;  %v3111_v44 = vld [vmem:[#allocation2 + $0x80] sm:$0xff]  ;;  %v5938_v5 = vld [vmem:[%s7211_s3 + $0x108] sm:$0xff]   ;;  %v5939_v17 = vld [vmem:[%s7211_s3 + $0x110] sm:$0xff]  }
 0x3bb   : > { %5567 = vmatmul.mubr.msk.bf16.gmra.mrb[12].mxu1 %vm1744_vm8, %v6952_v8  ;;  %v7034_v31 = vcombine.low %v7027_v42, %v7015_v1  ;;  %v3528_v62 = vsel %vm6122_vm7, %v4985_v43, %v3527_v61  ;;  %v7061_v33 = vmax.f32 %v3111_v44, 0.0  ;;  %v5160_v28 = vpack.c.bf16 %v6886_v21, %v6863_v37 }
 0x3bc   : > { %5574 = vmatprep.mubr.msk.bf16.mxu1 %vm1744_vm8, %v5154_v60  ;;  %v7051_v39 = vsel %vm6122_vm7, %v4986_v59, %v3531_v45  ;;  %v5159_v60 = vpack.c.bf16 %v6831_v0, %v6815_v20  ;;  %v5933_v20 = vld [vmem:[%s7211_s3 + $0xe0] sm:$0xff]   ;;  %v3112_v0 = vld [vmem:[#allocation2 + $0x88] sm:$0x3]  ;;  %v5021_v21 = vcombine.low %v6876_v57, %v6891_v40  ;;  %v5935_v40 = vld [vmem:[%s7211_s3 + $0xf0] sm:$0xff]   ;;  %v5037_v6 = vcombine.low %v7019_v16, %v7027_v42 }
 0x3bd   : > { %v7054_v4 = vcombine.low %v3528_v62, %v7051_v39  ;;  %v5162_v49 = vpack.c.bf16 %v7061_v33, %v7061_v33  ;;  %v3132_v48 = vmax.f32 %v3112_v0, 0.0  ;;  %v5161_v37 = vpack.c.bf16 %v7061_v33, %v6893_v35 }
 0x3be   : > { %v5023_v35 = vcombine.low %v6927_v24, %v6944_v58  ;;  %v5038_v58 = vcombine.low %v7015_v1, %v3528_v62 }
 0x3bf   : > { %v3759_v12 = vshrl.u32 %v5162_v49, 16  ;;  %v5031_v50 = vrot.slane %v5162_v49, 9 }
 0x3c1   : > { %v3761_v26 = vrot.slane %v3759_v12, 4 }
 0x3c3   : > { %5575 = vmatmul.mubr.msk.bf16.vlgmr.msra.gmra.mrb[8].mxu1 %vm1744_vm8, %v6966_v32 }
 0x3c4   : > { %5583 = vmatpush3.bf16.msra.mxu1 %v5927_v22  ;;  %5578 = vmatprep.mubr.msk.bf16.mxu1 %vm1744_vm8, %v6973_v29  ;;  %v4981_v22 = vrot.slane %v6849_v13, 9 }
 0x3c5   : > { %5584 = vmatprep.subr.bf16.mxu1 %v5928_v2 }
 0x3c6   : > { %v7011_v13 = vsel %vm6122_vm7, %v4981_v22, %v3511_v46  ;;  %v5934_v22 = vld [vmem:[%s7211_s3 + $0xe8] sm:$0xff]  }
 0x3c7   : > { %v7023_v34 = vcombine.low %v7011_v13, %v7019_v16  ;;  %v5036_v63 = vcombine.low %v6991_v23, %v7011_v13  ;;  %v3114_v13 = vld [vmem:[#allocation2 + $0x98] sm:$0x3] }
 0x3c8   : > { %5585 = vmatpush3.bf16.msra.mxu1 %v5928_v2  ;;  %v3762_v2 = vshll.u32 %v5162_v49, 16  ;;  %v3134_v1 = vmax.f32 %v3114_v13, 0.0  ;;  %v4434_v49 = vld [vmem:[#allocation2 + $0x98] sm:$0x3] }
 0x3c9   : > { %5594 = vmatprep.subr.bf16.mxu1 %v5929_v47  ;;  %v4454_v0 = vmax.f32 %v4434_v49, 0.0 }
 0x3ca   : > { %v3764_v38 = vrot.slane %v3762_v2, 5 }
 0x3cb   : > { %5579 = vmatmul.mubr.msk.bf16.gmra.mrb[12].mxu1 %vm1744_vm8, %v6995_v15  ;;  %v5186_v2 = vpack.c.bf16 %v4454_v0, %v4454_v0 }
 0x3cc   : > { %5586 = vmatprep.mubr.msk.bf16.mxu1 %vm1744_vm8, %v4991_v18  ;;  %v3765_v30 = vor.u32 %v3764_v38, %v3761_v26  ;;  %v4391_v38 = vld [vmem:[#allocation2 + $0x11] sm:$0xff] }
 0x3cd   : > { %4556 = vst.msk [vmem:[%s6477_s9 + $0x4c] sm:$0x1] %vm4537_vm13, %v5186_v2 }
 0x3ce   : > { %v3766_v46 = vrot.slane %v3765_v30, 4 }
 0x3d3   : > { %5587 = vmatmul.mubr.msk.bf16.vlgmr.msra.gmra.mrb[8].mxu1 %vm1744_vm8, %v7023_v34 }
 0x3d4   : > { %5595 = vmatpush3.bf16.msra.mxu1 %v5929_v47  ;;  %5590 = vmatprep.mubr.msk.bf16.mxu1 %vm1744_vm8, %v7034_v31  ;;  %v5163_v47 = vpack.c.bf16 %v3132_v48, %v3132_v48 }
 0x3d5   : > { %5596 = vmatprep.subr.bf16.mxu1 %v5930_v55 }
 0x3d6   : > { %v3768_v18 = vshll.u32 %v5163_v47, 16  ;;  %v3881_v19 = vrot.slane %v5163_v47, 5 }
 0x3d8   : > { %5597 = vmatpush3.bf16.msra.mxu1 %v5930_v55  ;;  %v3770_v57 = vrot.slane %v3768_v18, 5  ;;  %v3882_v23 = vsel %vm6122_vm7, %v5031_v50, %v3881_v19  ;;  %v4394_v18 = vld [vmem:[#allocation2 + $0x41] sm:$0xff] }
 0x3d9   : > { %5606 = vmatprep.subr.bf16.mxu1 %v5931_v25  ;;  %v5039_v9 = vcombine.low %v7051_v39, %v3882_v23 }
 0x3da   : > { %v3771_v10 = vsel %vm6042_vm3, %v3766_v46, %v3770_v57  ;;  %v4392_v46 = vld [vmem:[#allocation2 + $0x21] sm:$0xff] }
 0x3db   : > { %5591 = vmatmul.mubr.msk.bf16.gmra.mrb[12].mxu1 %vm1744_vm8, %v7054_v4  ;;  %v5024_v24 = vcombine.low %v6948_v3, %v3771_v10  ;;  %v5937_v3 = vld [vmem:[%s7211_s3 + $0x100] sm:$0xff]  }
 0x3dc   : > { %5598 = vmatprep.mubr.msk.bf16.mxu1 %vm1744_vm8, %v5158_v41 }
 0x3e3   : > { %5599 = vmatmul.mubr.msk.bf16.vlgmr.msra.gmra.mrb[8].mxu1 %vm1744_vm8, %v5159_v60 }
 0x3e4   : > { %5607 = vmatpush3.bf16.msra.mxu1 %v5931_v25  ;;  %5602 = vmatprep.mubr.msk.bf16.mxu1 %vm1744_vm8, %v5160_v28  ;;  %v4416_v28 = vld [vmem:[#allocation2 + $0x8] sm:$0x3] }
 0x3e5   : > { %5608 = vmatprep.subr.bf16.mxu1 %v5932_v51 }
 0x3e8   : > { %5609 = vmatpush3.bf16.msra.mxu1 %v5932_v51 }
 0x3e9   : > { %5618 = vmatprep.subr.bf16.mxu1 %v5933_v20 }
 0x3eb   : > { %5603 = vmatmul.mubr.msk.bf16.gmra.mrb[12].mxu1 %vm1744_vm8, %v5161_v37  ;;  %v4393_v37 = vld [vmem:[#allocation2 + $0x31] sm:$0xff] }
 0x3ec   : > { %5610 = vmatprep.mubr.msk.bf16.mxu1 %vm1744_vm8, %v5021_v21 }
 0x3f3   : > { %5611 = vmatmul.mubr.msk.bf16.vlgmr.msra.gmra.mrb[8].mxu1 %vm1744_vm8, %v5022_v14  ;;  %v5936_v14 = vld [vmem:[%s7211_s3 + $0xf8] sm:$0xff]  }
 0x3f4   : > { %5619 = vmatpush3.bf16.msra.mxu1 %v5933_v20  ;;  %5614 = vmatprep.mubr.msk.bf16.mxu1 %vm1744_vm8, %v5023_v35  ;;  %v4436_v20 = vmax.f32 %v4416_v28, 0.0 }
 0x3f5   : > { %5620 = vmatprep.subr.bf16.mxu1 %v5934_v22 }
 0x3f6   : > { %v5168_v12 = vpack.c.bf16 %v4436_v20, %v4436_v20 }
 0x3f8   : > { %5621 = vmatpush3.bf16.msra.mxu1 %v5934_v22  ;;  %4538 = vst.msk [vmem:[%s6477_s9 + $0x4] sm:$0x1] %vm4537_vm13, %v5168_v12 }
 0x3f9   : > { %5630 = vmatprep.subr.bf16.mxu1 %v5935_v40 }
 0x3fb   : > { %5615 = vmatmul.mubr.msk.bf16.gmra.mrb[12].mxu1 %vm1744_vm8, %v5024_v24 }
 0x3fc   : > { %5622 = vmatprep.mubr.msk.bf16.mxu1 %vm1744_vm8, %v5036_v63 }
 0x403   : > { %5623 = vmatmul.mubr.msk.bf16.vlgmr.msra.gmra.mrb[8].mxu1 %vm1744_vm8, %v5037_v6  ;;  %v4395_v6 = vld [vmem:[#allocation2 + $0x51] sm:$0xff] }
 0x404   : > { %5631 = vmatpush3.bf16.msra.mxu1 %v5935_v40  ;;  %5626 = vmatprep.mubr.msk.bf16.mxu1 %vm1744_vm8, %v5038_v58 }
 0x405   : > { %5632 = vmatprep.subr.bf16.mxu1 %v5936_v14 }
 0x408   : > { %5633 = vmatpush3.bf16.msra.mxu1 %v5936_v14  ;;  %v4398_v14 = vld [vmem:[#allocation2 + $0x81] sm:$0xff] }
 0x409   : > { %5642 = vmatprep.subr.bf16.mxu1 %v5937_v3 }
 0x40b   : > { %5627 = vmatmul.mubr.msk.bf16.gmra.mrb[12].mxu1 %vm1744_vm8, %v5039_v9 }
 0x40c   : > { %5634 = vmatprep.mubr.msk.bf16.mxu1 %vm1744_vm8, %v6966_v32  ;;  %v5164_v32 = vpack.c.bf16 %v6462_v7, %v7061_v33 }
 0x413   : > { %5635 = vmatmul.mubr.msk.bf16.vlgmr.msra.gmra.mrb[8].mxu1 %vm1744_vm8, %v6973_v29  ;;  %v5166_v29 = vpack.c.bf16 %v3134_v1, %v3134_v1 }
 0x414   : > { %5643 = vmatpush3.bf16.msra.mxu1 %v5937_v3  ;;  %5638 = vmatprep.mubr.msk.bf16.mxu1 %vm1744_vm8, %v6995_v15  ;;  %v5940_v15 = vld [vmem:[%s7211_s3 + $0x118] sm:$0xff]  }
 0x415   : > { %5644 = vmatprep.subr.bf16.mxu1 %v5938_v5  ;;  %v4099_v16 = vshll.u32 %v5166_v29, 16  ;;  %v4200_v55 = vrot.slane %v5166_v29, 5 }
 0x417   : > { %v4101_v42 = vrot.slane %v4099_v16, 5  ;;  %v4201_v27 = vsel %vm6122_vm7, %v4919_v54, %v4200_v55 }
 0x418   : > { %5645 = vmatpush3.bf16.msra.mxu1 %v5938_v5 }
 0x419   : > { %5654 = vmatprep.subr.bf16.mxu1 %v5939_v17  ;;  %v4102_v7 = vsel %vm6042_vm3, %v6764_v53, %v4101_v42  ;;  %v5075_v53 = vcombine.low %v3882_v23, %v4201_v27  ;;  %v4396_v23 = vld [vmem:[#allocation2 + $0x61] sm:$0xff] }
 0x41b   : > { %5639 = vmatmul.mubr.msk.bf16.gmra.mrb[12].mxu1 %vm1744_vm8, %v5164_v32 }
 0x41c   : > { %5646 = vmatprep.mubr.msk.bf16.mxu1 %vm1744_vm8, %v6897_v52  ;;  %v5063_v52 = vcombine.low %v3771_v10, %v4102_v7  ;;  %v4397_v10 = vld [vmem:[#allocation2 + $0x71] sm:$0xff] }
 0x423   : > { %5647 = vmatmul.mubr.msk.bf16.vlgmr.msra.gmra.mrb[8].mxu1 %vm1744_vm8, %v6936_v36 }
 0x424   : > { %5655 = vmatpush3.bf16.msra.mxu1 %v5939_v17  ;;  %5650 = vmatprep.mubr.msk.bf16.mxu1 %vm1744_vm8, %v6952_v8 }
 0x425   : > { %5656 = vmatprep.subr.bf16.mxu1 %v5940_v15 }
 0x428   : > { %5657 = vmatpush3.bf16.msra.mxu1 %v5940_v15 }
 0x42b   : > { %5651 = vmatmul.mubr.msk.bf16.gmra.mrb[12].mxu1 %vm1744_vm8, %v5063_v52 }
 0x42c   : > { %5658 = vmatprep.mubr.msk.bf16.mxu1 %vm1744_vm8, %v7023_v34 }
 0x433   : > { %5659 = vmatmul.mubr.msk.bf16.vlgmr.msra.gmra.mrb[8].mxu1 %vm1744_vm8, %v7034_v31 }
 0x434   : > { %5662 = vmatprep.mubr.msk.bf16.mxu1 %vm1744_vm8, %v7054_v4 }
 0x43b   : > { %5663 = vmatmul.mubr.msk.bf16.gmra.mrb[12].mxu1 %vm1744_vm8, %v5075_v53 }
 0x506   : > { %v5660_v36 = vpop.f32.mrb[8].mxu1 }
 0x507   : > { %v4258_v8 = vpop.f32.mrb[9].mxu1  ;;  %v4299_v61 = vmax.f32 %v5660_v36, 0.0 }
 0x508   : > { %v5661_v43 = vpop.f32.mrb[10].mxu1  ;;  %v4297_v45 = vmax.f32 %v4258_v8, 0.0 }
 0x509   : > { %v4300_v34 = vmax.f32 %v5661_v43, 0.0  ;;  %v4261_v59 = vpop.f32.mrb[11].mxu1 }
 0x50a   : > { %v4298_v25 = vmax.f32 %v4261_v59, 0.0 }
 0x50b   : > { %v4306_v31 = vpack.c.bf16 %v4300_v34, %v4299_v61 }
 0x50c   : > { %v4305_v62 = vpack.c.bf16 %v4298_v25, %v4297_v45 }
 0x50e   : > { %v5664_v39 = vpop.f32.mrb[12].mxu1  ;;  %5668 = vmatprep.mubr.msk.bf16.mxu0 %vm2989_vm12, %v4305_v62 }
 0x50f   : > { %v4274_v11 = vpop.f32.mrb[13].mxu1  ;;  %5669 = vmatmul.mubr.msk.bf16.vlgmr.msra.gmra.mrb[24].mxu0 %vm2989_vm12, %v4306_v31  ;;  %v4303_v54 = vmax.f32 %v5664_v39, 0.0 }
 0x510   : > { %v5665_v56 = vpop.f32.mrb[14].mxu1  ;;  %v4301_v44 = vmax.f32 %v4274_v11, 0.0 }
 0x511   : > { %v4304_v4 = vmax.f32 %v5665_v56, 0.0  ;;  %v4277_v41 = vpop.f32.mrb[15].mxu1 }
 0x512   : > { %v4302_v33 = vmax.f32 %v4277_v41, 0.0 }
 0x513   : > { %v4308_v60 = vpack.c.bf16 %v4304_v4, %v4303_v54 }
 0x514   : > { %v4307_v51 = vpack.c.bf16 %v4302_v33, %v4301_v44 }
 0x516   : > { %5672 = vmatprep.mubr.msk.bf16.mxu0 %vm2989_vm12, %v4307_v51 }
 0x517   : > { %5673 = vmatmul.mubr.msk.bf16.gmra.mrb[28].mxu0 %vm2989_vm12, %v4308_v60 }
 0x5e2   : > { %v5670_v48 = vpop.f32.mrb[24].mxu0 }
 0x5e3   : > { %v4401_v21 = vadd.f32 %v5670_v48, %v4393_v37  ;;  %v4360_v26 = vpop.f32.mrb[25].mxu0 }
 0x5e4   : > { %v4399_v47 = vadd.f32 %v4391_v38, %v4360_v26  ;;  %v5671_v30 = vpop.f32.mrb[26].mxu0 }
 0x5e5   : > { %4409 = vst.msk [vmem:[#allocation2 + $0x31] sm:$0xff] %vm1744_vm8, %v4401_v21  ;;  %v4402_v22 = vadd.f32 %v5671_v30, %v4394_v18  ;;  %v4363_v35 = vpop.f32.mrb[27].mxu0 }
 0x5e6   : > { %4407 = vst.msk [vmem:[#allocation2 + $0x11] sm:$0xff] %vm1744_vm8, %v4399_v47  ;;  %v4400_v57 = vadd.f32 %v4392_v46, %v4363_v35 }
 0x5e7   : > { %4410 = vst.msk [vmem:[#allocation2 + $0x41] sm:$0xff] %vm1744_vm8, %v4402_v22 }
 0x5e8   : > { %4408 = vst.msk [vmem:[#allocation2 + $0x21] sm:$0xff] %vm1744_vm8, %v4400_v57 }
 0x5ea   : > { %v5674_v40 = vpop.f32.mrb[28].mxu0 }
 0x5eb   : > { %v4405_v24 = vadd.f32 %v5674_v40, %v4397_v10  ;;  %v4376_v63 = vpop.f32.mrb[29].mxu0 }
 0x5ec   : > { %v4421_v58 = vld [vmem:[#allocation2 + $0x30] sm:$0xff]  ;;  %v4422_v50 = vld [vmem:[#allocation2 + $0x38] sm:$0x3]  ;;  %v4403_v19 = vadd.f32 %v4395_v6, %v4376_v63  ;;  %v5675_v3 = vpop.f32.mrb[30].mxu0 }
 0x5ed   : > { %v4441_v9 = vmax.f32 %v4421_v58, 0.0  ;;  %v4442_v5 = vmax.f32 %v4422_v50, 0.0  ;;  %v4417_v17 = vld [vmem:[#allocation2 + $0x10] sm:$0xff]  ;;  %v4418_v13 = vld [vmem:[#allocation2 + $0x18] sm:$0x3]  ;;  %4413 = vst.msk [vmem:[#allocation2 + $0x71] sm:$0xff] %vm1744_vm8, %v4405_v24  ;;  %v4406_v1 = vadd.f32 %v5675_v3, %v4398_v14 }
 0x5ee   : > { %v4379_v32 = vpop.f32.mrb[31].mxu0  ;;  %v4437_v29 = vmax.f32 %v4417_v17, 0.0  ;;  %v4438_v16 = vmax.f32 %v4418_v13, 0.0  ;;  %v4423_v15 = vld [vmem:[#allocation2 + $0x40] sm:$0xff]  ;;  %v4424_v42 = vld [vmem:[#allocation2 + $0x48] sm:$0x3] }
 0x5ef   : > { %4411 = vst.msk [vmem:[#allocation2 + $0x51] sm:$0xff] %vm1744_vm8, %v4403_v19  ;;  %v4404_v7 = vadd.f32 %v4396_v23, %v4379_v32  ;;  %v5173_v52 = vpack.c.bf16 %v4441_v9, %v4441_v9  ;;  %v5174_v55 = vpack.c.bf16 %v4442_v5, %v4442_v5  ;;  %v4443_v27 = vmax.f32 %v4423_v15, 0.0  ;;  %v4419_v36 = vld [vmem:[#allocation2 + $0x20] sm:$0xff]  ;;  %v4420_v8 = vld [vmem:[#allocation2 + $0x28] sm:$0x3]  ;;  %4414 = vst.msk [vmem:[#allocation2 + $0x81] sm:$0xff] %vm1744_vm8, %v4406_v1 }
 0x5f0   : > { %v4444_v53 = vmax.f32 %v4424_v42, 0.0  ;;  %v5169_v43 = vpack.c.bf16 %v4437_v29, %v4437_v29  ;;  %v5170_v61 = vpack.c.bf16 %v4438_v16, %v4438_v16  ;;  %v4439_v34 = vmax.f32 %v4419_v36, 0.0 }
 0x5f1   : > { %v4440_v59 = vmax.f32 %v4420_v8, 0.0  ;;  %4412 = vst.msk [vmem:[#allocation2 + $0x61] sm:$0xff] %vm1744_vm8, %v4404_v7  ;;  %v5175_v45 = vpack.c.bf16 %v4443_v27, %v4443_v27 }
 0x5f2   : > { %4543 = vst.msk [vmem:[%s6477_s9 + $0x18] sm:$0xf] %vm4535_vm10, %v5173_v52  ;;  %v5176_v25 = vpack.c.bf16 %v4444_v53, %v4444_v53  ;;  %4539 = vst.msk [vmem:[%s6477_s9 + $0x8] sm:$0xf] %vm4535_vm10, %v5169_v43  ;;  %v5171_v31 = vpack.c.bf16 %v4439_v34, %v4439_v34 }
 0x5f3   : > { %4544 = vst.msk [vmem:[%s6477_s9 + $0x1c] sm:$0x1] %vm4537_vm13, %v5174_v55  ;;  %4540 = vst.msk [vmem:[%s6477_s9 + $0xc] sm:$0x1] %vm4537_vm13, %v5170_v61  ;;  %v5172_v62 = vpack.c.bf16 %v4440_v59, %v4440_v59 }
 0x5f4   : > { %4545 = vst.msk [vmem:[%s6477_s9 + $0x20] sm:$0xf] %vm4535_vm10, %v5175_v45  ;;  %4541 = vst.msk [vmem:[%s6477_s9 + $0x10] sm:$0xf] %vm4535_vm10, %v5171_v31  ;;  %v4429_v39 = vld [vmem:[#allocation2 + $0x70] sm:$0xff] }
 0x5f5   : > { %4546 = vst.msk [vmem:[%s6477_s9 + $0x24] sm:$0x1] %vm4537_vm13, %v5176_v25  ;;  %4542 = vst.msk [vmem:[%s6477_s9 + $0x14] sm:$0x1] %vm4537_vm13, %v5172_v62  ;;  %v4430_v11 = vld [vmem:[#allocation2 + $0x78] sm:$0x3] }
 0x5f6   : > { %v4449_v56 = vmax.f32 %v4429_v39, 0.0  ;;  %v4450_v54 = vmax.f32 %v4430_v11, 0.0  ;;  %v4425_v4 = vld [vmem:[#allocation2 + $0x50] sm:$0xff]  ;;  %v4426_v41 = vld [vmem:[#allocation2 + $0x58] sm:$0x3]  ;;  %v4431_v60 = vld [vmem:[#allocation2 + $0x80] sm:$0xff] }
 0x5f7   : > { %v4445_v44 = vmax.f32 %v4425_v4, 0.0  ;;  %v4446_v33 = vmax.f32 %v4426_v41, 0.0  ;;  %v4432_v51 = vld [vmem:[#allocation2 + $0x88] sm:$0x3]  ;;  %v4451_v20 = vmax.f32 %v4431_v60, 0.0 }
 0x5f8   : > { %v5181_v28 = vpack.c.bf16 %v4449_v56, %v4449_v56  ;;  %v5182_v49 = vpack.c.bf16 %v4450_v54, %v4450_v54  ;;  %v4452_v0 = vmax.f32 %v4432_v51, 0.0  ;;  %v4427_v12 = vld [vmem:[#allocation2 + $0x60] sm:$0xff]  ;;  %v4428_v2 = vld [vmem:[#allocation2 + $0x68] sm:$0x3] }
 0x5f9   : > { %v5177_v48 = vpack.c.bf16 %v4445_v44, %v4445_v44  ;;  %v5178_v37 = vpack.c.bf16 %v4446_v33, %v4446_v33  ;;  %v4447_v21 = vmax.f32 %v4427_v12, 0.0  ;;  %v4448_v26 = vmax.f32 %v4428_v2, 0.0 }
 0x5fa   : > { %4551 = vst.msk [vmem:[%s6477_s9 + $0x38] sm:$0xf] %vm4535_vm10, %v5181_v28  ;;  %v5183_v38 = vpack.c.bf16 %v4451_v20, %v4451_v20  ;;  %v5184_v47 = vpack.c.bf16 %v4452_v0, %v4452_v0 }
 0x5fb   : > { %4552 = vst.msk [vmem:[%s6477_s9 + $0x3c] sm:$0x1] %vm4537_vm13, %v5182_v49  ;;  %4548 = vst.msk [vmem:[%s6477_s9 + $0x2c] sm:$0x1] %vm4537_vm13, %v5178_v37  ;;  %v5179_v30 = vpack.c.bf16 %v4447_v21, %v4447_v21  ;;  %v5180_v18 = vpack.c.bf16 %v4448_v26, %v4448_v26 }
 0x5fc   : > { %4547 = vst.msk [vmem:[%s6477_s9 + $0x28] sm:$0xf] %vm4535_vm10, %v5177_v48  ;;  %4553 = vst.msk [vmem:[%s6477_s9 + $0x40] sm:$0xf] %vm4535_vm10, %v5183_v38 }
 0x5fd   : > { %4554 = vst.msk [vmem:[%s6477_s9 + $0x44] sm:$0x1] %vm4537_vm13, %v5184_v47  ;;  %4550 = vst.msk [vmem:[%s6477_s9 + $0x34] sm:$0x1] %vm4537_vm13, %v5180_v18 }
 0x5fe   : > { %4549 = vst.msk [vmem:[%s6477_s9 + $0x30] sm:$0xf] %vm4535_vm10, %v5179_v30 }
 0x5ff PF: > { %s15_s18 = sadd.s32 1, %s5947_s18  }
 0x600   : > { %p12_p4 = scmp.ge.s32.totalorder %s15_s18, 4  }
 0x602   :  { %14 = sbr.rel (!%p12_p4) target bundleno = 1 (0x1), region = 99 }

// kernel: decoder_forward.5
= control target key start
LH: loop header
LB: loop body
LE: loop exit
PB: predicated region body
PF: predicated region fallthrough
CT: control target
= control target key end

     0   :  { %s9683_s12 = smov 0   ;;  %s13156_s0 = inlined_call_operand.vmem [shape: bf16[2,18,18,16], index: 0, kind: input, shape index: {}]   ;;  %s13157_s1 = inlined_call_operand.vmem [shape: bf16[16,16,3], index: 1, kind: input, shape index: {}]   ;;  %s13158_s2 = inlined_call_operand.vmem [shape: f32[1,3], index: 2, kind: input, shape index: {}]   ;;  %s13159_s3 = inlined_call_operand.vmem [shape: f32[2,16,2,16,6], index: 3, kind: output, shape index: {}]  }
   0x1 LB: > { %s7484_s13 = sadd.s32 4294967295, %s9660_s12   ;;  %p7488_p0 = scmp.ge.s32.totalorder %s9660_s12, 1  ;;  %s9660_s12 = sphi %s9683_s12, %s13_s12  }
   0x2   : > { %p137_p1 = scmp.lt.s32.totalorder %s9660_s12, 3 }
   0x4   : > { %p138_p2 = pnand %p7488_p0, %p137_p1 }
   0x6   : > { %141 = sbr.rel (%p138_p2) target bundleno = 897 (0x381), region = 32 }
   0xd   : > { %v9553_v0 = vld [vmem:[%s13157_s1 + $0x28] sm:$0xff]   ;;  %p161_p3 = scmp.lt.s32.totalorder %s7484_s13, 1  ;;  %vm2354_vm0 = vcmask 1042432   ;;  %v9697_v1 = vld [vmem:[%s13157_s1 + $0x20] sm:$0xff]   ;;  %vm2355_vm1 = vcmask 1046532   ;;  %vm666_vm2 = vcmask 130048  }
   0xe   : > { %8751 = vmatprep.subr.bf16.mxu1 %v9553_v0  ;;  %v9555_v2 = vld [vmem:[%s13157_s1 + $0x8] sm:$0xff]   ;;  %vm222_vm3 = vsmask.f32 3328  ;;  %v9709_v3 = vld [vmem:[%s13157_s1] sm:$0xff]   ;;  %vm9711_vm4 = vmor %vm2354_vm0, %vm2355_vm1  ;;  %v13224_v4 = vmov 0  ;;  %s9662_s28 = smov 3  }
   0xf   : > { %s13417_s13 = smov (!%p161_p3, %s7484_s13), 1  ;;  %8752 = vmatpush3.bf16.msra.mxu1 %v9553_v0  ;;  %v13225_v4 = vsel %vm9711_vm4, 4294967295, %v13224_v4  ;;  %8615 = vmatprep.subr.bf16.mxu0 %v9555_v2  ;;  %vm223_vm5 = vsmask.f32 7440  ;;  %v9745_v36 = vld [vmem:[%s13157_s1 + $0x30] sm:$0xff]   ;;  %vm3738_vm7 = vcmask 23552  }
  0x10   : > { %s9543_s20 = smul.u32 216, %s13417_s13  ;;  %8785 = vmatprep.subr.bf16.mxu1 %v9697_v1  ;;  %13226 = vst [vmem:[#allocation2_spill] sm:$0xff] %v13225_v4  ;;  %8616 = vmatpush3.bf16.msra.mxu0 %v9555_v2  ;;  %vm9756_vm6 = vmor %vm222_vm3, %vm223_vm5  ;;  %vm3771_vm8 = vcmask 48128  }
  0x11   : > { %8649 = vmatprep.subr.bf16.mxu0 %v9709_v3 }
  0x12   : > { %s9718_s25 = scalar_lea.vmem %s13156_s0, %s9543_s20 }
  0x13   : > { %v173_v5 = vld [vmem:[%s9718_s25 + $0x4] sm:$0xf]  ;;  %v206_v6 = vld [vmem:[%s9718_s25 + $0x8] sm:$0x1]  ;;  %v2306_v7 = vld [vmem:[%s9718_s25] sm:$0xe] }
  0x14   : > { %v7713_v8 = vrot.slane %v2306_v7, 9  ;;  %v2359_v9 = vrot.slane %v173_v5, 5  ;;  %v2362_v10 = vrot.slane %v206_v6, 5  ;;  %v175_v11 = vld [vmem:[%s9718_s25 + $0x10] sm:$0xf]  ;;  %v235_v12 = vshll.u32 %v173_v5, 16 }
  0x15   : > { %v207_v13 = vld [vmem:[%s9718_s25 + $0x14] sm:$0x1]  ;;  %v2307_v14 = vld [vmem:[%s9718_s25 + $0xc] sm:$0xe]  ;;  %v2366_v15 = vrot.slane %v175_v11, 5  ;;  %v239_v16 = vshrl.u32 %v173_v5, 16 }
  0x16   : > { %v2360_v17 = vsel %vm9711_vm4, %v7713_v8, %v2359_v9  ;;  %v2361_v18 = vrot.slane %v2359_v9, 4  ;;  %v7714_v19 = vrot.slane %v2307_v14, 9  ;;  %v2369_v20 = vrot.slane %v207_v13, 5  ;;  %v9730_v21 = vld [vmem:[%s9718_s25] sm:$0xf] }
  0x17   : > { %v2368_v22 = vrot.slane %v2366_v15, 4  ;;  %v226_v23 = vshrl.u32 %v9730_v21, 16  ;;  %v229_v24 = vshll.u32 %v9730_v21, 16  ;;  %v237_v25 = vrot.slane %v235_v12, 5  ;;  %v174_v26 = vld [vmem:[%s9718_s25 + $0xc] sm:$0xf] }
  0x18   : > { %v2363_v27 = vsel %vm9711_vm4, %v2361_v18, %v2362_v10  ;;  %v2367_v28 = vsel %vm9711_vm4, %v7714_v19, %v2366_v15  ;;  %v241_v29 = vrot.slane %v239_v16, 4  ;;  %v245_v30 = vshll.u32 %v206_v6, 16  ;;  %v2308_v35 = vld [vmem:[%s9718_s25 + $0x18] sm:$0xe]  ;;  %v9748_v41 = vld [vmem:[%s9718_s25 + $0x1c] sm:$0xf] }
  0x19   : > { %v7731_v31 = vcombine.low %v2360_v17, %v2363_v27  ;;  %v2370_v32 = vsel %vm9711_vm4, %v2368_v22, %v2369_v20  ;;  %v228_v33 = vrot.slane %v226_v23, 4  ;;  %v231_v34 = vrot.slane %v229_v24, 5  ;;  %v9751_v42 = vld [vmem:[%s9718_s25 + $0x20] sm:$0x1]  ;;  %v9761_v48 = vld [vmem:[%s9718_s25 + $0x28] sm:$0xf] }
  0x1a   : > { %v7732_v37 = vcombine.low %v2367_v28, %v2370_v32  ;;  %v242_v38 = vor.u32 %v241_v29, %v237_v25  ;;  %v247_v39 = vrot.slane %v245_v30, 5  ;;  %v250_v40 = vshrl.u32 %v174_v26, 16  ;;  %v2309_v53 = vld [vmem:[%s9718_s25 + $0x24] sm:$0xe]  ;;  %v9767_v58 = vld [vmem:[%s9718_s25 + $0x2c] sm:$0x1] }
  0x1b   : > { %8753 = vmatprep.mubr.msk.bf16.mxu1 %vm666_vm2, %v7731_v31  ;;  %v232_v44 = vor.u32 %v231_v34, %v228_v33  ;;  %v253_v45 = vshll.u32 %v174_v26, 16  ;;  %v259_v46 = vshll.u32 %v175_v11, 16  ;;  %v263_v47 = vshrl.u32 %v175_v11, 16  ;;  %v9774_v63 = vld [vmem:[%s9718_s25 + $0x18] sm:$0xf] }
  0x1c   : > { %8754 = vmatmul.mubr.msk.bf16.vlgmr.msra.gmra.mrb[0].mxu1 %vm666_vm2, %v7732_v37  ;;  %v243_v49 = vrot.slane %v242_v38, 4  ;;  %v252_v50 = vrot.slane %v250_v40, 4  ;;  %v269_v51 = vshll.u32 %v207_v13, 16  ;;  %v7715_v52 = vrot.slane %v2308_v35, 9  ;;  %v9794_v18 = vld [vmem:[%s9718_s25 + $0x24] sm:$0xf] }
  0x1d   : > { %8786 = vmatpush3.bf16.msra.mxu1 %v9697_v1  ;;  %v233_v54 = vrot.slane %v232_v44, 4  ;;  %v255_v55 = vrot.slane %v253_v45, 5  ;;  %v261_v56 = vrot.slane %v259_v46, 5  ;;  %v265_v57 = vrot.slane %v263_v47, 4  ;;  %v9806_v28 = vld [vmem:[%s9718_s25 + $0x34] sm:$0xf] }
  0x1e   : > { %v248_v59 = vsel %vm9756_vm6, %v243_v49, %v247_v39  ;;  %v271_v60 = vrot.slane %v269_v51, 5  ;;  %v2373_v61 = vrot.slane %v9748_v41, 5  ;;  %v2376_v62 = vrot.slane %v9751_v42, 5  ;;  %8819 = vmatprep.subr.bf16.mxu1 %v9745_v36  ;;  %v9813_v33 = vld [vmem:[%s9718_s25 + $0x38] sm:$0x1] }
  0x1f   : > { %v238_v0 = vsel %vm9756_vm6, %v233_v54, %v237_v25  ;;  %v256_v1 = vor.u32 %v255_v55, %v252_v50  ;;  %v266_v2 = vor.u32 %v265_v57, %v261_v56  ;;  %v7716_v5 = vrot.slane %v2309_v53, 9  ;;  %v2310_v39 = vld [vmem:[%s9718_s25 + $0x30] sm:$0xe]  ;;  %v9823_v45 = vld [vmem:[%s9718_s25 + $0x40] sm:$0xf] }
  0x20   : > { %v9779_v6 = vcombine.low %v238_v0, %v248_v59  ;;  %v2374_v7 = vsel %vm9711_vm4, %v7715_v52, %v2373_v61  ;;  %v2375_v8 = vrot.slane %v2373_v61, 4  ;;  %v2380_v9 = vrot.slane %v9761_v48, 5  ;;  %v9828_v51 = vld [vmem:[%s9718_s25 + $0x44] sm:$0x1] }
  0x21   : > { %v257_v10 = vrot.slane %v256_v1, 4  ;;  %v267_v11 = vrot.slane %v266_v2, 4  ;;  %v2383_v12 = vrot.slane %v9767_v58, 5  ;;  %v274_v13 = vshrl.u32 %v9774_v63, 16 }
  0x22   : > { %8617 = vmatprep.mubr.msk.bf16.mxu0 %vm666_vm2, %v9779_v6  ;;  %v2377_v14 = vsel %vm9711_vm4, %v2375_v8, %v2376_v62  ;;  %v2381_v15 = vsel %vm9711_vm4, %v7716_v5, %v2380_v9  ;;  %v2382_v16 = vrot.slane %v2380_v9, 4  ;;  %v277_v17 = vshll.u32 %v9774_v63, 16 }
  0x23   : > { %v262_v19 = vsel %vm9756_vm6, %v257_v10, %v261_v56  ;;  %v272_v20 = vsel %vm9756_vm6, %v267_v11, %v271_v60  ;;  %v7733_v22 = vcombine.low %v2374_v7, %v2377_v14  ;;  %v276_v23 = vrot.slane %v274_v13, 4  ;;  %v2311_v56 = vld [vmem:[%s9718_s25 + $0x3c] sm:$0xe]  ;;  %v9836_v60 = vld [vmem:[%s9718_s25 + $0x30] sm:$0xf] }
  0x24   : > { %v9800_v24 = vcombine.low %v262_v19, %v272_v20  ;;  %v2384_v25 = vsel %vm9711_vm4, %v2382_v16, %v2383_v12  ;;  %v279_v26 = vrot.slane %v277_v17, 5  ;;  %v283_v27 = vshll.u32 %v9748_v41, 16  ;;  %v9854_v16 = vld [vmem:[%s9718_s25 + $0x3c] sm:$0xf] }
  0x25   : > { %8757 = vmatprep.mubr.msk.bf16.mxu1 %vm666_vm2, %v7733_v22  ;;  %v7734_v29 = vcombine.low %v2381_v15, %v2384_v25  ;;  %v287_v30 = vshrl.u32 %v9748_v41, 16  ;;  %v293_v31 = vshll.u32 %v9751_v42, 16  ;;  %v298_v32 = vshrl.u32 %v9794_v18, 16 }
  0x26   : > { %8618 = vmatmul.mubr.msk.bf16.vlgmr.msra.gmra.mrb[0].mxu0 %vm666_vm2, %v9800_v24  ;;  %v280_v34 = vor.u32 %v279_v26, %v276_v23  ;;  %v285_v35 = vrot.slane %v283_v27, 5  ;;  %v301_v37 = vshll.u32 %v9794_v18, 16  ;;  %v307_v38 = vshll.u32 %v9761_v48, 16 }
  0x27   : > { %8758 = vmatmul.mubr.msk.bf16.gmra.mrb[4].mxu1 %vm666_vm2, %v7734_v29  ;;  %v289_v40 = vrot.slane %v287_v30, 4  ;;  %v295_v41 = vrot.slane %v293_v31, 5  ;;  %v300_v42 = vrot.slane %v298_v32, 4  ;;  %v311_v44 = vshrl.u32 %v9761_v48, 16  ;;  %8650 = vmatpush3.bf16.msra.mxu0 %v9709_v3 }
  0x28   : > { %v281_v46 = vrot.slane %v280_v34, 4  ;;  %v303_v47 = vrot.slane %v301_v37, 5  ;;  %v309_v49 = vrot.slane %v307_v38, 5  ;;  %v317_v50 = vshll.u32 %v9767_v58, 16  ;;  %v2312_v34 = vld [vmem:[%s9718_s25 + $0x48] sm:$0xe] }
  0x29   : > { %v290_v52 = vor.u32 %v289_v40, %v285_v35  ;;  %v313_v53 = vrot.slane %v311_v44, 4  ;;  %v7717_v54 = vrot.slane %v2310_v39, 9  ;;  %v2387_v55 = vrot.slane %v9806_v28, 5  ;;  %v9875_v40 = vld [vmem:[%s9718_s25 + $0x4c] sm:$0xf] }
  0x2a   : > { %v286_v48 = vsel %vm9756_vm6, %v281_v46, %v285_v35  ;;  %v304_v57 = vor.u32 %v303_v47, %v300_v42  ;;  %v319_v59 = vrot.slane %v317_v50, 5  ;;  %v2390_v3 = vrot.slane %v9813_v33, 5  ;;  %v212_v46 = vld [vmem:[%s9718_s25 + $0x50] sm:$0x1] }
  0x2b   : > { %v291_v61 = vrot.slane %v290_v52, 4  ;;  %v314_v58 = vor.u32 %v313_v53, %v309_v49  ;;  %v2388_v62 = vsel %vm9711_vm4, %v7717_v54, %v2387_v55  ;;  %v2389_v0 = vrot.slane %v2387_v55, 4  ;;  %v9883_v53 = vld [vmem:[%s9718_s25 + $0x58] sm:$0xf] }
  0x2c   : > { %v305_v1 = vrot.slane %v304_v57, 4  ;;  %v7718_v2 = vrot.slane %v2311_v56, 9  ;;  %v2394_v5 = vrot.slane %v9823_v45, 5  ;;  %v2397_v7 = vrot.slane %v9828_v51, 5  ;;  %v2313_v57 = vld [vmem:[%s9718_s25 + $0x54] sm:$0xe] }
  0x2d   : > { %v296_v8 = vsel %vm9756_vm6, %v291_v61, %v295_v41  ;;  %v315_v9 = vrot.slane %v314_v58, 4  ;;  %v2391_v10 = vsel %vm9711_vm4, %v2389_v0, %v2390_v3  ;;  %v322_v11 = vshrl.u32 %v9836_v60, 16 }
  0x2e   : > { %v9847_v12 = vcombine.low %v286_v48, %v296_v8  ;;  %v310_v13 = vsel %vm9756_vm6, %v305_v1, %v309_v49  ;;  %v7735_v14 = vcombine.low %v2388_v62, %v2391_v10  ;;  %v2395_v15 = vsel %vm9711_vm4, %v7718_v2, %v2394_v5  ;;  %v213_v62 = vld [vmem:[%s9718_s25 + $0x5c] sm:$0x1] }
  0x2f   : > { %v320_v17 = vsel %vm9756_vm6, %v315_v9, %v319_v59  ;;  %v2396_v19 = vrot.slane %v2394_v5, 4  ;;  %v324_v20 = vrot.slane %v322_v11, 4  ;;  %v325_v22 = vshll.u32 %v9836_v60, 16  ;;  %v9896_v9 = vld [vmem:[%s9718_s25 + $0x48] sm:$0xf] }
  0x30   : > { %8621 = vmatprep.mubr.msk.bf16.mxu0 %vm666_vm2, %v9847_v12  ;;  %v9861_v23 = vcombine.low %v310_v13, %v320_v17  ;;  %8761 = vmatprep.mubr.msk.bf16.mxu1 %vm666_vm2, %v7735_v14  ;;  %v331_v25 = vshll.u32 %v9806_v28, 16  ;;  %v335_v26 = vshrl.u32 %v9806_v28, 16  ;;  %v341_v27 = vshll.u32 %v9813_v33, 16 }
  0x31   : > { %v2398_v29 = vsel %vm9711_vm4, %v2396_v19, %v2397_v7  ;;  %v327_v30 = vrot.slane %v325_v22, 5  ;;  %v346_v31 = vshrl.u32 %v9854_v16, 16  ;;  %v349_v32 = vshll.u32 %v9854_v16, 16 }
  0x32   : > { %8622 = vmatmul.mubr.msk.bf16.gmra.mrb[4].mxu0 %vm666_vm2, %v9861_v23  ;;  %v7736_v35 = vcombine.low %v2395_v15, %v2398_v29  ;;  %v333_v37 = vrot.slane %v331_v25, 5  ;;  %v337_v38 = vrot.slane %v335_v26, 4  ;;  %v343_v39 = vrot.slane %v341_v27, 5  ;;  %v9905_v15 = vld [vmem:[%s9718_s25 + $0x54] sm:$0xf] }
  0x33   : > { %v328_v33 = vor.u32 %v327_v30, %v324_v20  ;;  %v348_v41 = vrot.slane %v346_v31, 4  ;;  %v351_v42 = vrot.slane %v349_v32, 5  ;;  %v355_v44 = vshll.u32 %v9823_v45, 16 }
  0x34   : > { %8762 = vmatmul.mubr.msk.bf16.gmra.mrb[8].mxu1 %vm666_vm2, %v7736_v35  ;;  %v338_v47 = vor.u32 %v337_v38, %v333_v37  ;;  %v359_v49 = vshrl.u32 %v9823_v45, 16  ;;  %v365_v50 = vshll.u32 %v9828_v51, 16  ;;  %v7719_v52 = vrot.slane %v2312_v34, 9 }
  0x35   : > { %v329_v54 = vrot.slane %v328_v33, 4  ;;  %v352_v55 = vor.u32 %v351_v42, %v348_v41  ;;  %v357_v56 = vrot.slane %v355_v44, 5  ;;  %v2401_v48 = vrot.slane %v9875_v40, 5  ;;  %v9924_v33 = vld [vmem:[%s9718_s25 + $0x64] sm:$0xf] }
  0x36   : > { %v339_v59 = vrot.slane %v338_v47, 4  ;;  %v361_v3 = vrot.slane %v359_v49, 4  ;;  %v367_v61 = vrot.slane %v365_v50, 5  ;;  %v2404_v58 = vrot.slane %v212_v46, 5  ;;  %v2314_v41 = vld [vmem:[%s9718_s25 + $0x60] sm:$0xe] }
  0x37   : > { %v334_v45 = vsel %vm9756_vm6, %v329_v54, %v333_v37  ;;  %v353_v51 = vrot.slane %v352_v55, 4  ;;  %v2402_v0 = vsel %vm9711_vm4, %v7719_v52, %v2401_v48  ;;  %v2403_v1 = vrot.slane %v2401_v48, 4  ;;  %v9928_v50 = vld [vmem:[%s9718_s25 + $0x68] sm:$0x1]  ;;  %v9940_v48 = vld [vmem:[%s9718_s25 + $0x74] sm:$0x1] }
  0x38   : > { %v344_v2 = vsel %vm9756_vm6, %v339_v59, %v343_v39  ;;  %v362_v5 = vor.u32 %v361_v3, %v357_v56  ;;  %v7720_v7 = vrot.slane %v2313_v57, 9  ;;  %v2408_v8 = vrot.slane %v9883_v53, 5  ;;  %v2315_v57 = vld [vmem:[%s9718_s25 + $0x6c] sm:$0xe] }
  0x39   : > { %v9898_v10 = vcombine.low %v334_v45, %v344_v2  ;;  %v358_v11 = vsel %vm9756_vm6, %v353_v51, %v357_v56  ;;  %v2405_v13 = vsel %vm9711_vm4, %v2403_v1, %v2404_v58  ;;  %v2411_v14 = vrot.slane %v213_v62, 5  ;;  %v9937_v56 = vld [vmem:[%s9718_s25 + $0x70] sm:$0xf] }
  0x3a   : > { %v363_v17 = vrot.slane %v362_v5, 4  ;;  %v7737_v19 = vcombine.low %v2402_v0, %v2405_v13  ;;  %v2409_v20 = vsel %vm9711_vm4, %v7720_v7, %v2408_v8  ;;  %v2410_v22 = vrot.slane %v2408_v8, 4  ;;  %v9947_v45 = vld [vmem:[%s13157_s1 + $0x10] sm:$0xff]  }
  0x3b   : > { %8625 = vmatprep.mubr.msk.bf16.mxu0 %vm666_vm2, %v9898_v10  ;;  %v370_v25 = vshrl.u32 %v9896_v9, 16  ;;  %v373_v26 = vshll.u32 %v9896_v9, 16  ;;  %v379_v27 = vshll.u32 %v9875_v40, 16  ;;  %v383_v29 = vshrl.u32 %v9875_v40, 16  ;;  %8683 = vmatprep.subr.bf16.mxu0 %v9947_v45 }
  0x3c   : > { %v368_v30 = vsel %vm9756_vm6, %v363_v17, %v367_v61  ;;  %8765 = vmatprep.mubr.msk.bf16.mxu1 %vm666_vm2, %v7737_v19  ;;  %v2412_v31 = vsel %vm9711_vm4, %v2410_v22, %v2411_v14  ;;  %v389_v32 = vshll.u32 %v212_v46, 16  ;;  %v394_v34 = vshrl.u32 %v9905_v15, 16  ;;  %v9956_v19 = vld [vmem:[%s9718_s25 + $0x60] sm:$0xf] }
  0x3d   : > { %v9921_v35 = vcombine.low %v358_v11, %v368_v30  ;;  %v7738_v37 = vcombine.low %v2409_v20, %v2412_v31  ;;  %v372_v38 = vrot.slane %v370_v25, 4  ;;  %v375_v39 = vrot.slane %v373_v26, 5 }
  0x3e   : > { %v381_v42 = vrot.slane %v379_v27, 5  ;;  %v385_v44 = vrot.slane %v383_v29, 4  ;;  %v391_v47 = vrot.slane %v389_v32, 5  ;;  %v396_v49 = vrot.slane %v394_v34, 4 }
  0x3f   : > { %8626 = vmatmul.mubr.msk.bf16.gmra.mrb[8].mxu0 %vm666_vm2, %v9921_v35  ;;  %8766 = vmatmul.mubr.msk.bf16.gmra.mrb[12].mxu1 %vm666_vm2, %v7738_v37  ;;  %v376_v46 = vor.u32 %v375_v39, %v372_v38  ;;  %v397_v52 = vshll.u32 %v9905_v15, 16  ;;  %v403_v54 = vshll.u32 %v9883_v53, 16  ;;  %v407_v55 = vshrl.u32 %v9883_v53, 16 }
  0x40   : > { %v386_v59 = vor.u32 %v385_v44, %v381_v42  ;;  %v413_v3 = vshll.u32 %v213_v62, 16  ;;  %v7721_v61 = vrot.slane %v2314_v41, 9  ;;  %v2415_v58 = vrot.slane %v9924_v33, 5 }
  0x41   : > { %v377_v51 = vrot.slane %v376_v46, 4  ;;  %v399_v0 = vrot.slane %v397_v52, 5  ;;  %v405_v1 = vrot.slane %v403_v54, 5  ;;  %v409_v2 = vrot.slane %v407_v55, 4 }
  0x42   : > { %v387_v5 = vrot.slane %v386_v59, 4  ;;  %v415_v7 = vrot.slane %v413_v3, 5  ;;  %v2416_v8 = vsel %vm9711_vm4, %v7721_v61, %v2415_v58  ;;  %v2417_v11 = vrot.slane %v2415_v58, 4  ;;  %v9988_v61 = vld [vmem:[%s9718_s25 + $0x7c] sm:$0xf] }
  0x43   : > { %v382_v62 = vsel %vm9756_vm6, %v377_v51, %v381_v42  ;;  %v400_v13 = vor.u32 %v399_v0, %v396_v49  ;;  %v410_v14 = vor.u32 %v409_v2, %v405_v1  ;;  %v2418_v17 = vrot.slane %v9928_v50, 5  ;;  %v9991_v58 = vld [vmem:[%s9718_s25 + $0x80] sm:$0x1]  ;;  %v2316_v51 = vld [vmem:[%s9718_s25 + $0x78] sm:$0xe] }
  0x44   : > { %v392_v20 = vsel %vm9756_vm6, %v387_v5, %v391_v47  ;;  %v7722_v22 = vrot.slane %v2315_v57, 9  ;;  %v2422_v25 = vrot.slane %v9937_v56, 5  ;;  %v2425_v26 = vrot.slane %v9940_v48, 5  ;;  %v9978_v47 = vld [vmem:[%s9718_s25 + $0x6c] sm:$0xf] }
  0x45   : > { %v9962_v27 = vcombine.low %v382_v62, %v392_v20  ;;  %v401_v29 = vrot.slane %v400_v13, 4  ;;  %v411_v30 = vrot.slane %v410_v14, 4  ;;  %v2419_v31 = vsel %vm9711_vm4, %v2417_v11, %v2418_v17 }
  0x46   : > { %v7739_v32 = vcombine.low %v2416_v8, %v2419_v31  ;;  %v2423_v34 = vsel %vm9711_vm4, %v7722_v22, %v2422_v25  ;;  %v2424_v37 = vrot.slane %v2422_v25, 4  ;;  %v418_v38 = vshrl.u32 %v9956_v19, 16  ;;  %v2317_v8 = vld [vmem:[%s9718_s25 + $0x84] sm:$0xe] }
  0x47   : > { %8629 = vmatprep.mubr.msk.bf16.mxu0 %vm666_vm2, %v9962_v27  ;;  %v406_v39 = vsel %vm9756_vm6, %v401_v29, %v405_v1  ;;  %v416_v41 = vsel %vm9756_vm6, %v411_v30, %v415_v7  ;;  %v421_v42 = vshll.u32 %v9956_v19, 16  ;;  %v427_v44 = vshll.u32 %v9924_v33, 16  ;;  %v10000_v7 = vld [vmem:[%s9718_s25 + $0x88] sm:$0xf] }
  0x48   : > { %v9980_v49 = vcombine.low %v406_v39, %v416_v41  ;;  %8769 = vmatprep.mubr.msk.bf16.mxu1 %vm666_vm2, %v7739_v32  ;;  %v2426_v46 = vsel %vm9711_vm4, %v2424_v37, %v2425_v26  ;;  %v420_v52 = vrot.slane %v418_v38, 4  ;;  %v431_v54 = vshrl.u32 %v9924_v33, 16 }
  0x49   : > { %v7740_v55 = vcombine.low %v2423_v34, %v2426_v46  ;;  %v423_v57 = vrot.slane %v421_v42, 5  ;;  %v429_v59 = vrot.slane %v427_v44, 5  ;;  %v437_v3 = vshll.u32 %v9928_v50, 16  ;;  %v10013_v44 = vld [vmem:[%s9718_s25 + $0x78] sm:$0xf] }
  0x4a   : > { %8630 = vmatmul.mubr.msk.bf16.gmra.mrb[12].mxu0 %vm666_vm2, %v9980_v49  ;;  %v433_v0 = vrot.slane %v431_v54, 4  ;;  %v442_v1 = vshrl.u32 %v9978_v47, 16  ;;  %v445_v2 = vshll.u32 %v9978_v47, 16  ;;  %v451_v5 = vshll.u32 %v9937_v56, 16 }
  0x4b   : > { %8770 = vmatmul.mubr.msk.bf16.gmra.mrb[16].mxu1 %vm666_vm2, %v7740_v55  ;;  %v424_v50 = vor.u32 %v423_v57, %v420_v52  ;;  %v439_v11 = vrot.slane %v437_v3, 5  ;;  %v455_v62 = vshrl.u32 %v9937_v56, 16  ;;  %v461_v13 = vshll.u32 %v9940_v48, 16  ;;  %v217_v48 = vld [vmem:[%s9718_s25 + $0x8c] sm:$0x1] }
  0x4c   : > { %v434_v14 = vor.u32 %v433_v0, %v429_v59  ;;  %v444_v17 = vrot.slane %v442_v1, 4  ;;  %v447_v20 = vrot.slane %v445_v2, 5  ;;  %v453_v22 = vrot.slane %v451_v5, 5 }
  0x4d   : > { %v425_v25 = vrot.slane %v424_v50, 4  ;;  %v457_v26 = vrot.slane %v455_v62, 4  ;;  %v463_v29 = vrot.slane %v461_v13, 5  ;;  %v7723_v30 = vrot.slane %v2316_v51, 9  ;;  %v10035_v13 = vld [vmem:[%s9718_s25 + $0x84] sm:$0xf] }
  0x4e   : > { %v435_v31 = vrot.slane %v434_v14, 4  ;;  %v448_v32 = vor.u32 %v447_v20, %v444_v17  ;;  %v2429_v34 = vrot.slane %v9988_v61, 5  ;;  %v2432_v37 = vrot.slane %v9991_v58, 5 }
  0x4f   : > { %v430_v38 = vsel %vm9756_vm6, %v425_v25, %v429_v59  ;;  %v458_v39 = vor.u32 %v457_v26, %v453_v22  ;;  %v7724_v41 = vrot.slane %v2317_v8, 9  ;;  %v2436_v42 = vrot.slane %v10000_v7, 5 }
  0x50   : > { %v440_v46 = vsel %vm9756_vm6, %v435_v31, %v439_v11  ;;  %v449_v52 = vrot.slane %v448_v32, 4  ;;  %v2430_v54 = vsel %vm9711_vm4, %v7723_v30, %v2429_v34  ;;  %v2431_v55 = vrot.slane %v2429_v34, 4  ;;  %v10045_v31 = vld [vmem:[%s9718_s25 + $0x94] sm:$0xf]  ;;  %v10048_v32 = vld [vmem:[%s9718_s25 + $0x98] sm:$0x1] }
  0x51   : > { %v10019_v57 = vcombine.low %v430_v38, %v440_v46  ;;  %v459_v3 = vrot.slane %v458_v39, 4  ;;  %v2437_v59 = vsel %vm9711_vm4, %v7724_v41, %v2436_v42  ;;  %v2438_v51 = vrot.slane %v2436_v42, 4  ;;  %v2318_v34 = vld [vmem:[%s9718_s25 + $0x90] sm:$0xe]  ;;  %v10057_v42 = vld [vmem:[%s9718_s25 + $0xa0] sm:$0xf] }
  0x52   : > { %v454_v0 = vsel %vm9756_vm6, %v449_v52, %v453_v22  ;;  %v2433_v1 = vsel %vm9711_vm4, %v2431_v55, %v2432_v37  ;;  %v2439_v2 = vrot.slane %v217_v48, 5  ;;  %v466_v5 = vshrl.u32 %v10013_v44, 16  ;;  %v2319_v55 = vld [vmem:[%s9718_s25 + $0x9c] sm:$0xe] }
  0x53   : > { %8633 = vmatprep.mubr.msk.bf16.mxu0 %vm666_vm2, %v10019_v57  ;;  %v464_v8 = vsel %vm9756_vm6, %v459_v3, %v463_v29  ;;  %v7741_v50 = vcombine.low %v2430_v54, %v2433_v1  ;;  %v469_v11 = vshll.u32 %v10013_v44, 16  ;;  %v475_v62 = vshll.u32 %v9988_v61, 16 }
  0x54   : > { %v10037_v14 = vcombine.low %v454_v0, %v464_v8  ;;  %v2440_v17 = vsel %vm9711_vm4, %v2438_v51, %v2439_v2  ;;  %v468_v20 = vrot.slane %v466_v5, 4  ;;  %v479_v22 = vshrl.u32 %v9988_v61, 16 }
  0x55   : > { %8773 = vmatprep.mubr.msk.bf16.mxu1 %vm666_vm2, %v7741_v50  ;;  %v7742_v25 = vcombine.low %v2437_v59, %v2440_v17  ;;  %v471_v26 = vrot.slane %v469_v11, 5  ;;  %v477_v29 = vrot.slane %v475_v62, 5  ;;  %v485_v30 = vshll.u32 %v9991_v58, 16  ;;  %v219_v50 = vld [vmem:[%s9718_s25 + $0xa4] sm:$0x1] }
  0x56   : > { %13229 = vst [vmem:[#allocation3_spill] sm:$0xff] %v10037_v14  ;;  %8634 = vmatmul.mubr.msk.bf16.gmra.mrb[16].mxu0 %vm666_vm2, %v10037_v14  ;;  %v481_v37 = vrot.slane %v479_v22, 4  ;;  %v490_v38 = vshrl.u32 %v10035_v13, 16  ;;  %v493_v39 = vshll.u32 %v10035_v13, 16  ;;  %v499_v41 = vshll.u32 %v10000_v7, 16 }
  0x57   : > { %8774 = vmatmul.mubr.msk.bf16.gmra.mrb[20].mxu1 %vm666_vm2, %v7742_v25  ;;  %v472_v58 = vor.u32 %v471_v26, %v468_v20  ;;  %v487_v46 = vrot.slane %v485_v30, 5  ;;  %v503_v52 = vshrl.u32 %v10000_v7, 16  ;;  %v509_v54 = vshll.u32 %v217_v48, 16  ;;  %v10069_v30 = vld [vmem:[%s9718_s25 + $0x90] sm:$0xf] }
  0x58   : > { %v482_v3 = vor.u32 %v481_v37, %v477_v29  ;;  %v492_v59 = vrot.slane %v490_v38, 4  ;;  %v495_v51 = vrot.slane %v493_v39, 5  ;;  %v501_v0 = vrot.slane %v499_v41, 5 }
  0x59   : > { %v473_v1 = vrot.slane %v472_v58, 4  ;;  %v505_v2 = vrot.slane %v503_v52, 4  ;;  %v511_v5 = vrot.slane %v509_v54, 5  ;;  %v7725_v8 = vrot.slane %v2318_v34, 9 }
  0x5a   : > { %v483_v11 = vrot.slane %v482_v3, 4  ;;  %v496_v62 = vor.u32 %v495_v51, %v492_v59  ;;  %v2443_v17 = vrot.slane %v10045_v31, 5  ;;  %v2446_v20 = vrot.slane %v10048_v32, 5  ;;  %v10085_v59 = vld [vmem:[%s9718_s25 + $0x9c] sm:$0xf] }
  0x5b   : > { %v478_v48 = vsel %vm9756_vm6, %v473_v1, %v477_v29  ;;  %v506_v22 = vor.u32 %v505_v2, %v501_v0  ;;  %v7726_v25 = vrot.slane %v2319_v55, 9  ;;  %v2450_v26 = vrot.slane %v10057_v42, 5 }
  0x5c   : > { %v488_v34 = vsel %vm9756_vm6, %v483_v11, %v487_v46  ;;  %v497_v37 = vrot.slane %v496_v62, 4  ;;  %v2444_v38 = vsel %vm9711_vm4, %v7725_v8, %v2443_v17  ;;  %v2445_v39 = vrot.slane %v2443_v17, 4 }
  0x5d   : > { %v10075_v41 = vcombine.low %v478_v48, %v488_v34  ;;  %v507_v58 = vrot.slane %v506_v22, 4  ;;  %v2451_v29 = vsel %vm9711_vm4, %v7726_v25, %v2450_v26  ;;  %v2452_v52 = vrot.slane %v2450_v26, 4  ;;  %v10101_v25 = vld [vmem:[%s9718_s25 + $0xac] sm:$0xf]  ;;  %v10104_v26 = vld [vmem:[%s9718_s25 + $0xb0] sm:$0x1] }
  0x5e   : > { %v502_v54 = vsel %vm9756_vm6, %v497_v37, %v501_v0  ;;  %v2447_v55 = vsel %vm9711_vm4, %v2445_v39, %v2446_v20  ;;  %v2453_v3 = vrot.slane %v219_v50, 5  ;;  %v514_v46 = vshrl.u32 %v10069_v30, 16 }
  0x5f   : > { %13230 = vst [vmem:[#allocation4_spill] sm:$0xff] %v10075_v41  ;;  %8637 = vmatprep.mubr.msk.bf16.mxu0 %vm666_vm2, %v10075_v41  ;;  %v512_v51 = vsel %vm9756_vm6, %v507_v58, %v511_v5  ;;  %v7743_v1 = vcombine.low %v2444_v38, %v2447_v55  ;;  %v517_v2 = vshll.u32 %v10069_v30, 16  ;;  %v523_v0 = vshll.u32 %v10045_v31, 16  ;;  %v2320_v58 = vld [vmem:[%s9718_s25 + $0xa8] sm:$0xe] }
  0x60   : > { %v10093_v8 = vcombine.low %v502_v54, %v512_v51  ;;  %v2454_v11 = vsel %vm9711_vm4, %v2452_v52, %v2453_v3  ;;  %v516_v62 = vrot.slane %v514_v46, 4  ;;  %v527_v17 = vshrl.u32 %v10045_v31, 16  ;;  %v10115_v55 = vld [vmem:[%s9718_s25 + $0xb8] sm:$0xf]  ;;  %v221_v41 = vld [vmem:[%s9718_s25 + $0xbc] sm:$0x1] }
  0x61   : > { %8777 = vmatprep.mubr.msk.bf16.mxu1 %vm666_vm2, %v7743_v1  ;;  %v7744_v20 = vcombine.low %v2451_v29, %v2454_v11  ;;  %v519_v48 = vrot.slane %v517_v2, 5  ;;  %v525_v5 = vrot.slane %v523_v0, 5  ;;  %v533_v22 = vshll.u32 %v10048_v32, 16  ;;  %13232 = vst [vmem:[#allocation6_spill] sm:$0xff] %v10115_v55  ;;  %v2321_v2 = vld [vmem:[%s9718_s25 + $0xb4] sm:$0xe] }
  0x62   : > { %13231 = vst [vmem:[#allocation5_spill] sm:$0xff] %v10093_v8  ;;  %8638 = vmatmul.mubr.msk.bf16.gmra.mrb[20].mxu0 %vm666_vm2, %v10093_v8  ;;  %v529_v34 = vrot.slane %v527_v17, 4  ;;  %v538_v37 = vshrl.u32 %v10085_v59, 16  ;;  %v541_v38 = vshll.u32 %v10085_v59, 16  ;;  %v547_v39 = vshll.u32 %v10057_v42, 16 }
  0x63   : > { %8778 = vmatmul.mubr.msk.bf16.gmra.mrb[24].mxu1 %vm666_vm2, %v7744_v20  ;;  %v520_v32 = vor.u32 %v519_v48, %v516_v62  ;;  %v535_v29 = vrot.slane %v533_v22, 5  ;;  %v551_v52 = vshrl.u32 %v10057_v42, 16  ;;  %v557_v54 = vshll.u32 %v219_v50, 16  ;;  %v10122_v50 = vld [vmem:[%s9718_s25 + $0xa8] sm:$0xf] }
  0x64   : > { %v530_v3 = vor.u32 %v529_v34, %v525_v5  ;;  %v540_v46 = vrot.slane %v538_v37, 4  ;;  %v543_v51 = vrot.slane %v541_v38, 5  ;;  %v549_v1 = vrot.slane %v547_v39, 5 }
  0x65   : > { %v521_v0 = vrot.slane %v520_v32, 4  ;;  %v553_v11 = vrot.slane %v551_v52, 4  ;;  %v559_v17 = vrot.slane %v557_v54, 5  ;;  %v7727_v8 = vrot.slane %v2320_v58, 9 }
  0x66   : > { %v531_v14 = vrot.slane %v530_v3, 4  ;;  %v544_v20 = vor.u32 %v543_v51, %v540_v46  ;;  %v2457_v62 = vrot.slane %v10101_v25, 5  ;;  %v2460_v48 = vrot.slane %v10104_v26, 5 }
  0x67   : > { %v526_v22 = vsel %vm9756_vm6, %v521_v0, %v525_v5  ;;  %v554_v34 = vor.u32 %v553_v11, %v549_v1  ;;  %v7728_v37 = vrot.slane %v2321_v2, 9  ;;  %v2464_v38 = vrot.slane %v10115_v55, 5 }
  0x68   : > { %v536_v39 = vsel %vm9756_vm6, %v531_v14, %v535_v29  ;;  %v545_v58 = vrot.slane %v544_v20, 4  ;;  %v2458_v32 = vsel %vm9711_vm4, %v7727_v8, %v2457_v62  ;;  %v2459_v52 = vrot.slane %v2457_v62, 4  ;;  %v10147_v62 = vld [vmem:[%s9718_s25 + $0xb4] sm:$0xf] }
  0x69   : > { %v10131_v54 = vcombine.low %v526_v22, %v536_v39  ;;  %v555_v3 = vrot.slane %v554_v34, 4  ;;  %v2465_v46 = vsel %vm9711_vm4, %v7728_v37, %v2464_v38  ;;  %v2466_v5 = vrot.slane %v2464_v38, 4  ;;  %13233 = vst [vmem:[#allocation7_spill] sm:$0xff] %v10147_v62 }
  0x6a   : > { %v550_v51 = vsel %vm9756_vm6, %v545_v58, %v549_v1  ;;  %v2461_v2 = vsel %vm9711_vm4, %v2459_v52, %v2460_v48  ;;  %v2467_v14 = vrot.slane %v221_v41, 5  ;;  %v562_v29 = vshrl.u32 %v10122_v50, 16 }
  0x6b   : > { %8641 = vmatprep.mubr.msk.bf16.mxu0 %vm666_vm2, %v10131_v54  ;;  %v560_v8 = vsel %vm9756_vm6, %v555_v3, %v559_v17  ;;  %v7745_v0 = vcombine.low %v2458_v32, %v2461_v2  ;;  %v565_v11 = vshll.u32 %v10122_v50, 16  ;;  %v571_v20 = vshll.u32 %v10101_v25, 16 }
  0x6c   : > { %v10149_v1 = vcombine.low %v550_v51, %v560_v8  ;;  %v2468_v48 = vsel %vm9711_vm4, %v2466_v5, %v2467_v14  ;;  %v564_v22 = vrot.slane %v562_v29, 4  ;;  %v575_v34 = vshrl.u32 %v10101_v25, 16 }
  0x6d   : > { %8781 = vmatprep.mubr.msk.bf16.mxu1 %vm666_vm2, %v7745_v0  ;;  %v7746_v37 = vcombine.low %v2465_v46, %v2468_v48  ;;  %v567_v38 = vrot.slane %v565_v11, 5  ;;  %v573_v17 = vrot.slane %v571_v20, 5  ;;  %v581_v39 = vshll.u32 %v10104_v26, 16 }
  0x6e   : > { %8642 = vmatmul.mubr.msk.bf16.gmra.mrb[24].mxu0 %vm666_vm2, %v10149_v1  ;;  %v577_v58 = vrot.slane %v575_v34, 4  ;;  %v586_v32 = vshrl.u32 %v10147_v62, 16  ;;  %v589_v52 = vshll.u32 %v10147_v62, 16  ;;  %v595_v3 = vshll.u32 %v10115_v55, 16 }
  0x6f   : > { %8782 = vmatmul.mubr.msk.bf16.gmra.mrb[28].mxu1 %vm666_vm2, %v7746_v37  ;;  %v568_v5 = vor.u32 %v567_v38, %v564_v22  ;;  %v583_v51 = vrot.slane %v581_v39, 5  ;;  %v599_v46 = vshrl.u32 %v10115_v55, 16  ;;  %v605_v2 = vshll.u32 %v221_v41, 16  ;;  %v9633_v39 = vld [vmem:[%s9718_s25 + $0x4] sm:$0xf] }
  0x70   : > { %v578_v14 = vor.u32 %v577_v58, %v573_v17  ;;  %v588_v26 = vrot.slane %v586_v32, 4  ;;  %v591_v29 = vrot.slane %v589_v52, 5  ;;  %v597_v8 = vrot.slane %v595_v3, 5  ;;  %8787 = vmatprep.mubr.msk.bf16.mxu1 %vm666_vm2, %v9779_v6 }
  0x71   : > { %v569_v0 = vrot.slane %v568_v5, 4  ;;  %v601_v11 = vrot.slane %v599_v46, 4  ;;  %v607_v37 = vrot.slane %v605_v2, 5  ;;  %v7527_v58 = vcombine.low %v9730_v21, %v9633_v39  ;;  %v10182_v5 = vld [vmem:[%s13157_s1 + $0x38] sm:$0xff]  }
  0x72   : > { %v579_v20 = vrot.slane %v578_v14, 4  ;;  %v592_v48 = vor.u32 %v591_v29, %v588_v26  ;;  %13234 = vst [vmem:[#allocation8_spill] sm:$0xff] %v10182_v5  ;;  %v7633_v29 = vld [vmem:[%s9718_s25 + $0x24] sm:$0xf] }
  0x73   : > { %v574_v34 = vsel %vm9756_vm6, %v569_v0, %v573_v17  ;;  %v602_v22 = vor.u32 %v601_v11, %v597_v8  ;;  %v7627_v11 = vld [vmem:[%s9718_s25 + $0xc] sm:$0xf] }
  0x74   : > { %v584_v38 = vsel %vm9756_vm6, %v579_v20, %v583_v51  ;;  %v593_v41 = vrot.slane %v592_v48, 4  ;;  %v1583_v20 = vshrl.u32 %v7627_v11, 16  ;;  %v7630_v48 = vld [vmem:[%s9718_s25 + $0x18] sm:$0xf] }
  0x75   : > { %v10173_v6 = vcombine.low %v574_v34, %v584_v38  ;;  %v603_v52 = vrot.slane %v602_v22, 4  ;;  %v9635_v34 = vld [vmem:[%s9718_s25 + $0xc] sm:$0xf]  ;;  %v9636_v38 = vld [vmem:[%s9718_s25 + $0x1c] sm:$0xf] }
  0x76   : > { %v598_v21 = vsel %vm9756_vm6, %v593_v41, %v597_v8  ;;  %v7529_v41 = vcombine.low %v9774_v63, %v9636_v38 }
  0x77   : > { %8645 = vmatprep.mubr.msk.bf16.mxu0 %vm666_vm2, %v10173_v6  ;;  %v608_v14 = vsel %vm9756_vm6, %v603_v52, %v607_v37  ;;  %8788 = vmatmul.mubr.msk.bf16.vlgmr.msra.gmra.mrb[0].mxu1 %vm666_vm2, %v9800_v24  ;;  %v1586_v37 = vshll.u32 %v7627_v11, 16  ;;  %v7629_v11 = vld [vmem:[%s9718_s25 + $0x14] sm:$0x1] }
  0x78   : > { %v10202_v8 = vcombine.low %v598_v21, %v608_v14  ;;  %8820 = vmatpush3.bf16.msra.mxu1 %v9745_v36  ;;  %8791 = vmatprep.mubr.msk.bf16.mxu1 %vm666_vm2, %v9847_v12  ;;  %v7628_v36 = vld [vmem:[%s9718_s25 + $0x10] sm:$0xf]  ;;  %v7631_v21 = vld [vmem:[%s9718_s25 + $0x1c] sm:$0xf]  ;;  %v1610_v14 = vshll.u32 %v7630_v48, 16 }
  0x79   : > { %8853 = vmatprep.subr.bf16.mxu1 %v10182_v5  ;;  %v9634_v12 = vld [vmem:[%s9718_s25 + $0x10] sm:$0xf]  ;;  %v1592_v39 = vshll.u32 %v7628_v36, 16  ;;  %v1596_v52 = vshrl.u32 %v7628_v36, 16  ;;  %v1588_v63 = vrot.slane %v1586_v37, 5 }
  0x7a   : > { %8646 = vmatmul.mubr.msk.bf16.gmra.mrb[28].mxu0 %vm666_vm2, %v10202_v8  ;;  %v7528_v22 = vcombine.low %v9635_v34, %v9634_v12  ;;  %v10230_v12 = vld [vmem:[%s13157_s1 + $0x18] sm:$0xff]   ;;  %v7632_v36 = vld [vmem:[%s9718_s25 + $0x20] sm:$0x1]  ;;  %v1616_v34 = vshll.u32 %v7631_v21, 16  ;;  %v1612_v0 = vrot.slane %v1610_v14, 5 }
  0x7b   : > { %8651 = vmatprep.mubr.msk.bf16.mxu0 %vm666_vm2, %v7527_v58  ;;  %v1607_v58 = vshrl.u32 %v7630_v48, 16  ;;  %13235 = vst [vmem:[#allocation9_spill] sm:$0xff] %v10230_v12  ;;  %v1598_v38 = vrot.slane %v1596_v52, 4  ;;  %v1620_v48 = vshrl.u32 %v7631_v21, 16  ;;  %v7634_v37 = vld [vmem:[%s9718_s25 + $0x28] sm:$0xf] }
  0x7c   : > { %v1602_v52 = vshll.u32 %v7629_v11, 16  ;;  %v10246_v21 = vrot.slane %v1616_v34, 5  ;;  %v1626_v14 = vshll.u32 %v7632_v36, 16  ;;  %v7636_v11 = vld [vmem:[%s9718_s25 + $0x30] sm:$0xf] }
  0x7d   : > { %v1609_v24 = vrot.slane %v1607_v58, 4  ;;  %v1622_v58 = vrot.slane %v1620_v48, 4  ;;  %v10264_v36 = vld [vmem:[%s9718_s25 + $0x40] sm:$0xf]  ;;  %v7642_v48 = vld [vmem:[%s9718_s25 + $0x48] sm:$0xf] }
  0x7e   : > { %13237 = vst [vmem:[#allocation11_spill] sm:$0xff] %v10264_v36  ;;  %v1655_v2 = vshrl.u32 %v7636_v11, 16  ;;  %v1658_v51 = vshll.u32 %v7636_v11, 16  ;;  %v1706_v11 = vshll.u32 %v7642_v48, 16  ;;  %v10346_v5 = vld [vmem:[%s9718_s25 + $0x64] sm:$0xf] }
  0x7f   : > { %8792 = vmatmul.mubr.msk.bf16.gmra.mrb[4].mxu1 %vm666_vm2, %v9861_v23  ;;  %v1585_v23 = vrot.slane %v1583_v20, 4  ;;  %v9637_v20 = vld [vmem:[%s9718_s25 + $0x28] sm:$0xf] }
  0x80   : > { %8795 = vmatprep.mubr.msk.bf16.mxu1 %vm666_vm2, %v9898_v10  ;;  %v10236_v10 = vrot.slane %v1592_v39, 5 }
  0x81   : > { %v1589_v39 = vor.u32 %v1588_v63, %v1585_v23  ;;  %v10255_v23 = vld [vmem:[%s9718_s25 + $0x34] sm:$0xf]  ;;  %v1644_v63 = vshrl.u32 %v7634_v37, 16 }
  0x82   : > { %8652 = vmatmul.mubr.msk.bf16.vlgmr.msra.gmra.mrb[0].mxu0 %vm666_vm2, %v7528_v22  ;;  %v7530_v22 = vcombine.low %v9794_v18, %v9637_v20  ;;  %v1631_v18 = vshrl.u32 %v7633_v29, 16  ;;  %v1613_v20 = vor.u32 %v1612_v0, %v1609_v24  ;;  %13236 = vst [vmem:[#allocation10_spill] sm:$0xff] %v10255_v23  ;;  %v10271_v0 = vrot.slane %v1626_v14, 5  ;;  %v10274_v24 = vld [vmem:[%s9718_s25 + $0x2c] sm:$0x1] }
  0x83   : > { %8655 = vmatprep.mubr.msk.bf16.mxu0 %vm666_vm2, %v7529_v41  ;;  %8684 = vmatpush3.bf16.msra.mxu0 %v9947_v45  ;;  %v7531_v41 = vcombine.low %v9836_v60, %v9806_v28  ;;  %v1599_v45 = vor.u32 %v1598_v38, %v10236_v10  ;;  %v1634_v28 = vshll.u32 %v7633_v29, 16  ;;  %v1640_v60 = vshll.u32 %v7634_v37, 16  ;;  %13238 = vst [vmem:[#allocation12_spill] sm:$0xff] %v10274_v24 }
  0x84   : > { %8717 = vmatprep.subr.bf16.mxu0 %v10230_v12  ;;  %v10259_v34 = vrot.slane %v1589_v39, 4  ;;  %v10261_v38 = vrot.slane %v1602_v52, 5  ;;  %v1623_v29 = vor.u32 %v1622_v58, %v10246_v21  ;;  %v1633_v37 = vrot.slane %v1631_v18, 4  ;;  %v9638_v58 = vld [vmem:[%s9718_s25 + $0x40] sm:$0xf] }
  0x85   : > { %v10279_v39 = vrot.slane %v1613_v20, 4  ;;  %v1636_v52 = vrot.slane %v1634_v28, 5  ;;  %v10281_v26 = vrot.slane %v1640_v60, 5  ;;  %v1646_v46 = vrot.slane %v1644_v63, 4  ;;  %v10301_v12 = vld [vmem:[%s9718_s25 + $0x38] sm:$0x1] }
  0x86   : > { %v7532_v14 = vcombine.low %v9854_v16, %v9638_v58  ;;  %v1688_v20 = vshll.u32 %v10264_v36, 16  ;;  %v1692_v28 = vshrl.u32 %v10264_v36, 16  ;;  %v1703_v60 = vshrl.u32 %v7642_v48, 16  ;;  %13240 = vst [vmem:[#allocation14_spill] sm:$0xff] %v10301_v12 }
  0x87   : > { %8796 = vmatmul.mubr.msk.bf16.gmra.mrb[8].mxu1 %vm666_vm2, %v9921_v35  ;;  %v7639_v35 = vld [vmem:[%s9718_s25 + $0x3c] sm:$0xf]  ;;  %v10293_v63 = vrot.slane %v1623_v29, 4  ;;  %v1650_v16 = vshll.u32 %v10274_v24, 16  ;;  %v1637_v3 = vor.u32 %v1636_v52, %v1633_v37  ;;  %v1647_v32 = vor.u32 %v1646_v46, %v10281_v26  ;;  %v10314_v37 = vld [vmem:[%s9718_s25 + $0x44] sm:$0x1] }
  0x88   : > { %8799 = vmatprep.mubr.msk.bf16.mxu1 %vm666_vm2, %v9962_v27  ;;  %v10268_v27 = vrot.slane %v1599_v45, 4  ;;  %v1668_v45 = vshrl.u32 %v10255_v23, 16  ;;  %v1679_v18 = vshrl.u32 %v7639_v35, 16  ;;  %v1682_v17 = vshll.u32 %v7639_v35, 16  ;;  %13243 = vst [vmem:[#allocation16_spill] sm:$0xff] %v10314_v37 }
  0x89   : > { %v1657_v48 = vrot.slane %v1655_v2, 4  ;;  %v1660_v36 = vrot.slane %v1658_v51, 5  ;;  %v10316_v46 = vrot.slane %v1688_v20, 5  ;;  %v1694_v2 = vrot.slane %v1692_v28, 4  ;;  %v10319_v51 = vld [vmem:[%s9718_s25 + $0x50] sm:$0x1] }
  0x8a   : > { %8656 = vmatmul.mubr.msk.bf16.gmra.mrb[4].mxu0 %vm666_vm2, %v7530_v22  ;;  %v10277_v22 = vld [vmem:[%s9718_s25 + $0x4c] sm:$0xf]  ;;  %v1670_v29 = vrot.slane %v1668_v45, 4  ;;  %v1681_v24 = vrot.slane %v1679_v18, 4  ;;  %v1684_v4 = vrot.slane %v1682_v17, 5  ;;  %13244 = vst [vmem:[#allocation17_spill] sm:$0xff] %v10319_v51 }
  0x8b   : > { %8659 = vmatprep.mubr.msk.bf16.mxu0 %vm666_vm2, %v7531_v41  ;;  %13239 = vst [vmem:[#allocation13_spill] sm:$0xff] %v10277_v22  ;;  %v1664_v41 = vshll.u32 %v10255_v23, 16  ;;  %v1712_v35 = vshll.u32 %v10277_v22, 16  ;;  %v1716_v58 = vshrl.u32 %v10277_v22, 16  ;;  %v10307_v23 = vld [vmem:[%s9718_s25 + $0x58] sm:$0xf]  ;;  %v13242_v22 = vcombine.low %v9896_v9, %v9875_v40 }
  0x8c   : > { %13241 = vst [vmem:[#allocation15_spill] sm:$0xff] %v10307_v23  ;;  %v1705_v52 = vrot.slane %v1703_v60, 4  ;;  %v10323_v55 = vrot.slane %v1637_v3, 4  ;;  %v10325_v40 = vrot.slane %v1647_v32, 4  ;;  %v10327_v9 = vrot.slane %v1650_v16, 5  ;;  %v13245_v20 = vld [vmem:[#allocation3_spill] sm:$0xff] }
  0x8d   : > { %v10321_v45 = vrot.slane %v1712_v35, 5  ;;  %v1718_v17 = vrot.slane %v1716_v58, 4  ;;  %v1661_v28 = vor.u32 %v1660_v36, %v1657_v48  ;;  %v1740_v35 = vshrl.u32 %v10307_v23, 16  ;;  %v7648_v58 = vld [vmem:[%s9718_s25 + $0x60] sm:$0xf]  ;;  %v13246_v3 = vld [vmem:[#allocation4_spill] sm:$0xff] }
  0x8e   : > { %v1685_v32 = vor.u32 %v1684_v4, %v1681_v24  ;;  %v1695_v16 = vor.u32 %v1694_v2, %v10316_v46  ;;  %v1595_v4 = vsel %vm9756_vm6, %v10259_v34, %v10236_v10  ;;  %v1605_v24 = vsel %vm9756_vm6, %v10268_v27, %v10261_v38 }
  0x8f   : > { %8800 = vmatmul.mubr.msk.bf16.gmra.mrb[12].mxu1 %vm666_vm2, %v9980_v49  ;;  %v7645_v49 = vld [vmem:[%s9718_s25 + $0x54] sm:$0xf]  ;;  %v1719_v48 = vor.u32 %v1718_v17, %v10321_v45  ;;  %v1751_v2 = vshrl.u32 %v7648_v58, 16  ;;  %v1742_v17 = vrot.slane %v1740_v35, 4 }
  0x90   : > { %8803 = vmatprep.mubr.msk.bf16.mxu1 %vm666_vm2, %v10019_v57  ;;  %v10304_v57 = vrot.slane %v1664_v41, 5  ;;  %v1708_v41 = vrot.slane %v1706_v11, 5  ;;  %v1730_v18 = vshll.u32 %v7645_v49, 16  ;;  %v1736_v11 = vshll.u32 %v10307_v23, 16 }
  0x91   : > { %v13247_v23 = vcombine.low %v9905_v15, %v9883_v53  ;;  %v1662_v53 = vrot.slane %v1661_v28, 4  ;;  %v1696_v10 = vrot.slane %v1695_v16, 4  ;;  %v13249_v28 = vld [vmem:[#allocation5_spill] sm:$0xff] }
  0x92   : > { %8660 = vmatmul.mubr.msk.bf16.gmra.mrb[8].mxu0 %vm666_vm2, %v7532_v14  ;;  %v1727_v14 = vshrl.u32 %v7645_v49, 16  ;;  %v1671_v60 = vor.u32 %v1670_v29, %v10304_v57  ;;  %v1698_v49 = vshll.u32 %v10314_v37, 16  ;;  %v1709_v36 = vor.u32 %v1708_v41, %v1705_v52 }
  0x93   : > { %8663 = vmatprep.mubr.msk.bf16.mxu0 %vm666_vm2, %v13242_v22  ;;  %v1674_v22 = vshll.u32 %v10301_v12, 16  ;;  %v1722_v12 = vshll.u32 %v10319_v51, 16  ;;  %v1732_v62 = vrot.slane %v1730_v18, 5  ;;  %v1754_v52 = vshll.u32 %v7648_v58, 16 }
  0x94   : > { %v1729_v29 = vrot.slane %v1727_v14, 4  ;;  %v13248_v41 = vcombine.low %v9956_v19, %v9924_v33  ;;  %v1672_v14 = vrot.slane %v1671_v60, 4  ;;  %v1686_v18 = vrot.slane %v1685_v32, 4 }
  0x95   : > { %v1676_v15 = vrot.slane %v1674_v22, 5  ;;  %v1700_v34 = vrot.slane %v1698_v49, 5  ;;  %v1720_v51 = vrot.slane %v1719_v48, 4  ;;  %v1724_v37 = vrot.slane %v1722_v12, 5  ;;  %v10416_v49 = vld [vmem:[%s9718_s25 + $0x70] sm:$0xf] }
  0x96   : > { %v1733_v27 = vor.u32 %v1732_v62, %v1729_v29  ;;  %v1753_v58 = vrot.slane %v1751_v2, 4  ;;  %v1756_v33 = vrot.slane %v1754_v52, 5  ;;  %v1760_v19 = vshll.u32 %v10346_v5, 16 }
  0x97   : > { %8804 = vmatmul.mubr.msk.bf16.gmra.mrb[16].mxu1 %vm666_vm2, %v13245_v20  ;;  %v10342_v20 = vld [vmem:[%s9718_s25 + $0x5c] sm:$0x1]  ;;  %v1619_v22 = vsel %vm9756_vm6, %v10279_v39, %v10246_v21  ;;  %v1629_v12 = vsel %vm9756_vm6, %v10293_v63, %v10271_v0  ;;  %v1764_v60 = vshrl.u32 %v10346_v5, 16  ;;  %v1653_v21 = vsel %vm9756_vm6, %v10325_v40, %v10327_v9  ;;  %v7651_v63 = vld [vmem:[%s9718_s25 + $0x6c] sm:$0xf] }
  0x98   : > { %8807 = vmatprep.mubr.msk.bf16.mxu1 %vm666_vm2, %v13246_v3  ;;  %v1710_v3 = vrot.slane %v1709_v36, 4  ;;  %v1746_v38 = vshll.u32 %v10342_v20, 16  ;;  %v1667_v0 = vsel %vm9756_vm6, %v1662_v53, %v10304_v57  ;;  %v1677_v39 = vsel %vm9756_vm6, %v1672_v14, %v1676_v15  ;;  %v10405_v9 = vld [vmem:[%s9718_s25 + $0x68] sm:$0x1]  ;;  %v10439_v53 = vld [vmem:[%s9718_s25 + $0x7c] sm:$0xf] }
  0x99   : > { %v13250_v57 = vcombine.low %v9978_v47, %v9937_v56  ;;  %v1725_v35 = vsel %vm9756_vm6, %v1720_v51, %v1724_v37  ;;  %v1757_v32 = vor.u32 %v1756_v33, %v1753_v58  ;;  %v10413_v16 = vrot.slane %v1760_v19, 5  ;;  %v7657_v14 = vld [vmem:[%s9718_s25 + $0x84] sm:$0xf]  ;;  %v10463_v58 = vld [vmem:[%s9718_s25 + $0x88] sm:$0xf] }
  0x9a   : > { %8664 = vmatmul.mubr.msk.bf16.gmra.mrb[12].mxu0 %vm666_vm2, %v13247_v23  ;;  %v10364_v23 = vrot.slane %v1736_v11, 5  ;;  %v1643_v11 = vsel %vm9756_vm6, %v10323_v55, %v10281_v26  ;;  %v1701_v55 = vsel %vm9756_vm6, %v1696_v10, %v1700_v34  ;;  %v1715_v26 = vsel %vm9756_vm6, %v1710_v3, %v10321_v45 }
  0x9b   : > { %8667 = vmatprep.mubr.msk.bf16.mxu0 %vm666_vm2, %v13248_v41  ;;  %v1748_v40 = vrot.slane %v1746_v38, 5  ;;  %v13251_v45 = vcombine.low %v10013_v44, %v9988_v61  ;;  %v1766_v47 = vrot.slane %v1764_v60, 4  ;;  %v1775_v36 = vshrl.u32 %v7651_v63, 16  ;;  %v10435_v61 = vld [vmem:[%s9718_s25 + $0x74] sm:$0x1] }
  0x9c   : > { %v1743_v62 = vor.u32 %v1742_v17, %v10364_v23  ;;  %v1778_v48 = vshll.u32 %v7651_v63, 16  ;;  %v10422_v37 = vcombine.low %v1595_v4, %v1605_v24  ;;  %v10424_v51 = vcombine.low %v1619_v22, %v1629_v12  ;;  %v7654_v44 = vld [vmem:[%s9718_s25 + $0x78] sm:$0xf] }
  0x9d   : > { %v10426_v29 = vcombine.low %v1643_v11, %v1653_v21  ;;  %v10428_v2 = vcombine.low %v1667_v0, %v1677_v39  ;;  %v10432_v41 = vcombine.low %v1715_v26, %v1725_v35  ;;  %v10444_v24 = vrot.slane %v1757_v32, 4  ;;  %v7660_v21 = vld [vmem:[%s9718_s25 + $0x90] sm:$0xf]  ;;  %v10491_v39 = vld [vmem:[%s9718_s25 + $0x80] sm:$0x1] }
  0x9e   : > { %v1744_v56 = vrot.slane %v1743_v62, 4  ;;  %v1770_v15 = vshll.u32 %v10405_v9, 16  ;;  %v1784_v17 = vshll.u32 %v10416_v49, 16  ;;  %v1767_v10 = vor.u32 %v1766_v47, %v10413_v16  ;;  %v10507_v47 = vld [vmem:[%s9718_s25 + $0x8c] sm:$0x1] }
  0x9f   : > { %8808 = vmatmul.mubr.msk.bf16.gmra.mrb[20].mxu1 %vm666_vm2, %v13249_v28  ;;  %13252 = vst [vmem:[#allocation3_spill] sm:$0xff] %v10426_v29  ;;  %13253 = vst [vmem:[#allocation4_spill] sm:$0xff] %v10428_v2  ;;  %v10454_v34 = vrot.slane %v1775_v36, 4  ;;  %v10456_v3 = vrot.slane %v1778_v48, 5  ;;  %v1794_v38 = vshll.u32 %v10435_v61, 16  ;;  %v1808_v33 = vshll.u32 %v10439_v53, 16 }
  0xa0   : > { %8811 = vmatprep.mubr.msk.bf16.mxu1 %vm666_vm2, %v10131_v54  ;;  %v1691_v54 = vsel %vm9756_vm6, %v1686_v18, %v10316_v46  ;;  %v1734_v46 = vrot.slane %v1733_v27, 4  ;;  %v1749_v18 = vsel %vm9756_vm6, %v1744_v56, %v1748_v40  ;;  %v1799_v27 = vshrl.u32 %v7654_v44, 16  ;;  %v10504_v56 = vld [vmem:[%s9718_s25 + $0xa0] sm:$0xf] }
  0xa1   : > { %v10430_v52 = vcombine.low %v1691_v54, %v1701_v55  ;;  %v1812_v19 = vshrl.u32 %v10439_v53, 16  ;;  %v1823_v28 = vshrl.u32 %v7657_v14, 16  ;;  %v1826_v22 = vshll.u32 %v7657_v14, 16  ;;  %v10496_v55 = vld [vmem:[%s9718_s25 + $0x94] sm:$0xf] }
  0xa2   : > { %8668 = vmatmul.mubr.msk.bf16.gmra.mrb[16].mxu0 %vm666_vm2, %v13250_v57  ;;  %v1739_v4 = vsel %vm9756_vm6, %v1734_v46, %v10364_v23  ;;  %v1788_v23 = vshrl.u32 %v10416_v49, 16  ;;  %v13255_v12 = vcombine.low %v10035_v13, %v10000_v7  ;;  %v1763_v62 = vsel %vm9756_vm6, %v10444_v24, %v10413_v16  ;;  %v7663_v57 = vld [vmem:[%s9718_s25 + $0x9c] sm:$0xf]  ;;  %v7803_v24 = vld [vmem:[%s9718_s25 + $0x30] sm:$0xe] }
  0xa3   : > { %8671 = vmatprep.mubr.msk.bf16.mxu0 %vm666_vm2, %v13251_v45  ;;  %13254 = vst [vmem:[#allocation5_spill] sm:$0xff] %v10430_v52  ;;  %v10477_v60 = vrot.slane %v1770_v15, 5  ;;  %v10479_v11 = vrot.slane %v1784_v17, 5  ;;  %v13257_v0 = vcombine.low %v10069_v30, %v10045_v31  ;;  %v10486_v7 = vrot.slane %v1767_v10, 4 }
  0xa4   : > { %v1781_v13 = vor.u32 %v10456_v3, %v10454_v34  ;;  %v1832_v63 = vshll.u32 %v10463_v58, 16  ;;  %v1836_v54 = vshrl.u32 %v10463_v58, 16  ;;  %v1790_v26 = vrot.slane %v1788_v23, 4 }
  0xa5   : > { %v10498_v40 = vrot.slane %v1794_v38, 5  ;;  %v1801_v31 = vrot.slane %v1799_v27, 4  ;;  %v10501_v35 = vrot.slane %v1808_v33, 5  ;;  %v1814_v46 = vrot.slane %v1812_v19, 4 }
  0xa6   : > { %v1825_v32 = vrot.slane %v1823_v28, 4  ;;  %v1828_v45 = vrot.slane %v1826_v22, 5  ;;  %v1847_v36 = vshrl.u32 %v7660_v21, 16  ;;  %v1850_v48 = vshll.u32 %v7660_v21, 16 }
  0xa7   : > { %8812 = vmatmul.mubr.msk.bf16.gmra.mrb[24].mxu1 %vm666_vm2, %v10149_v1  ;;  %v1802_v1 = vshll.u32 %v7654_v44, 16  ;;  %v1856_v44 = vshll.u32 %v10496_v55, 16  ;;  %v10513_v15 = vrot.slane %v1832_v63, 5  ;;  %v1838_v17 = vrot.slane %v1836_v54, 4  ;;  %v10542_v63 = vld [vmem:[%s9718_s25 + $0xa4] sm:$0x1] }
  0xa8   : > { %8815 = vmatprep.mubr.msk.bf16.mxu1 %vm666_vm2, %v10173_v6  ;;  %v10471_v6 = vcombine.low %v1739_v4, %v1749_v18  ;;  %v1860_v4 = vshrl.u32 %v10496_v55, 16  ;;  %v1871_v14 = vshrl.u32 %v7663_v57, 16  ;;  %v1874_v18 = vshll.u32 %v7663_v57, 16  ;;  %v7666_v57 = vld [vmem:[%s9718_s25 + $0xa8] sm:$0xf] }
  0xa9   : > { %v1804_v30 = vrot.slane %v1802_v1, 5  ;;  %v1791_v10 = vor.u32 %v1790_v26, %v10479_v11  ;;  %v1818_v34 = vshll.u32 %v10491_v39, 16  ;;  %v1880_v3 = vshll.u32 %v10504_v56, 16 }
  0xaa   : > { %8672 = vmatmul.mubr.msk.bf16.gmra.mrb[20].mxu0 %vm666_vm2, %v13255_v12  ;;  %13256 = vst [vmem:[#allocation18_spill] sm:$0xff] %v10471_v6  ;;  %v1884_v23 = vshrl.u32 %v10504_v56, 16  ;;  %v1829_v27 = vor.u32 %v1828_v45, %v1825_v32  ;;  %v1842_v1 = vshll.u32 %v10507_v47, 16  ;;  %v13258_v33 = vcombine.low %v10085_v59, %v10057_v42  ;;  %v10539_v59 = vld [vmem:[%s9718_s25 + $0x98] sm:$0x1] }
  0xab   : > { %8675 = vmatprep.mubr.msk.bf16.mxu0 %vm666_vm2, %v13257_v0  ;;  %v1805_v38 = vor.u32 %v1804_v30, %v1801_v31  ;;  %v1849_v19 = vrot.slane %v1847_v36, 4  ;;  %v1852_v28 = vrot.slane %v1850_v48, 5  ;;  %v10527_v22 = vrot.slane %v1856_v44, 5 }
  0xac   : > { %v1862_v12 = vrot.slane %v1860_v4, 4  ;;  %v13259_v21 = vcombine.low %v10122_v50, %v10101_v25  ;;  %v1773_v0 = vsel %vm9756_vm6, %v10486_v7, %v10477_v60  ;;  %v1839_v42 = vor.u32 %v1838_v17, %v10513_v15  ;;  %v10550_v7 = vld [vmem:[%s13157_s1 + $0x68] sm:$0xff]  }
  0xad   : > { %v1873_v54 = vrot.slane %v1871_v14, 4  ;;  %v1876_v26 = vrot.slane %v1874_v18, 5  ;;  %v1782_v31 = vrot.slane %v1781_v13, 4  ;;  %v1792_v30 = vrot.slane %v1791_v10, 4  ;;  %v10555_v4 = vld [vmem:[%s9718_s25 + $0xac] sm:$0xf] }
  0xae   : > { %v10544_v25 = vrot.slane %v1880_v3, 5  ;;  %v1886_v50 = vrot.slane %v1884_v23, 4  ;;  %v1820_v45 = vrot.slane %v1818_v34, 5  ;;  %v1844_v60 = vrot.slane %v1842_v1, 5  ;;  %v9576_v17 = vld [vmem:[%s9718_s25 + $0xc] sm:$0xff]  }
  0xaf   : > { %8816 = vmatmul.mubr.msk.bf16.gmra.mrb[28].mxu1 %vm666_vm2, %v10202_v8  ;;  %v1815_v8 = vor.u32 %v1814_v46, %v10501_v35  ;;  %v1806_v46 = vrot.slane %v1805_v38, 4  ;;  %v1830_v36 = vrot.slane %v1829_v27, 4  ;;  %v1853_v48 = vor.u32 %v1852_v28, %v1849_v19  ;;  %v13260_v3 = vld [vmem:[#allocation8_spill] sm:$0xff] }
  0xb0   : > { %8821 = vmatprep.mubr.msk.bf16.mxu1 %vm666_vm2, %v10422_v37  ;;  %v1863_v44 = vor.u32 %v1862_v12, %v10527_v22  ;;  %v1866_v13 = vshll.u32 %v10539_v59, 16  ;;  %v1840_v14 = vrot.slane %v1839_v42, 4  ;;  %v1877_v18 = vor.u32 %v1876_v26, %v1873_v54  ;;  %v13262_v12 = vld [vmem:[#allocation6_spill] sm:$0xff]  ;;  %v7669_v26 = vld [vmem:[%s9718_s25 + $0xb4] sm:$0xf] }
  0xb1   : > { %v1816_v32 = vrot.slane %v1815_v8, 4  ;;  %v1895_v10 = vshrl.u32 %v7666_v57, 16  ;;  %v1898_v34 = vshll.u32 %v7666_v57, 16  ;;  %v1787_v23 = vsel %vm9756_vm6, %v1782_v31, %v10479_v11  ;;  %v13261_v11 = vld [vmem:[#allocation7_spill] sm:$0xff] }
  0xb2   : > { %8676 = vmatmul.mubr.msk.bf16.gmra.mrb[24].mxu0 %vm666_vm2, %v13258_v33  ;;  %v1797_v38 = vsel %vm9756_vm6, %v1792_v30, %v10498_v40  ;;  %v1887_v8 = vor.u32 %v1886_v50, %v10544_v25  ;;  %v1890_v27 = vshll.u32 %v10542_v63, 16  ;;  %v1811_v1 = vsel %vm9756_vm6, %v1806_v46, %v10501_v35 }
  0xb3   : > { %8679 = vmatprep.mubr.msk.bf16.mxu0 %vm666_vm2, %v13259_v21  ;;  %v1821_v33 = vsel %vm9756_vm6, %v1816_v32, %v1820_v45  ;;  %v1904_v19 = vshll.u32 %v10555_v4, 16  ;;  %v1908_v28 = vshrl.u32 %v10555_v4, 16  ;;  %v13263_v40 = vcombine.low %v13261_v11, %v13262_v12  ;;  %v7805_v11 = vld [vmem:[%s9718_s25 + $0x48] sm:$0xe] }
  0xb4   : > { %v1835_v35 = vsel %vm9756_vm6, %v1830_v36, %v10513_v15  ;;  %v10586_v21 = vrot.slane %v1853_v48, 4  ;;  %v10588_v42 = vrot.slane %v1863_v44, 4  ;;  %v10590_v54 = vrot.slane %v1866_v13, 5  ;;  %v10619_v36 = vld [vmem:[%s9718_s25 + $0xb8] sm:$0xf]  ;;  %v10663_v12 = vld [vmem:[%s13157_s1 + $0x48] sm:$0xff]  }
  0xb5   : > { %v1845_v31 = vsel %vm9756_vm6, %v1840_v14, %v1844_v60  ;;  %v10596_v30 = vrot.slane %v1877_v18, 4  ;;  %v10598_v50 = vrot.slane %v1895_v10, 4  ;;  %v10600_v57 = vrot.slane %v1898_v34, 5  ;;  %v10616_v60 = vld [vmem:[%s9718_s25 + $0xb0] sm:$0x1]  ;;  %v9578_v10 = vld [vmem:[%s9718_s25 + $0x24] sm:$0xff]  }
  0xb6   : > { %v10607_v15 = vcombine.low %v1763_v62, %v1773_v0  ;;  %v10609_v46 = vcombine.low %v1787_v23, %v1797_v38  ;;  %v10611_v32 = vrot.slane %v1887_v8, 4  ;;  %v10613_v45 = vrot.slane %v1890_v27, 5  ;;  %v9577_v62 = vld [vmem:[%s9718_s25 + $0x18] sm:$0xff]   ;;  %13267 = vst [vmem:[#allocation6_spill] sm:$0xff] %v10663_v12  ;;  %v13270_v27 = vld [vmem:[#allocation11_spill] sm:$0xff] }
  0xb7   : > { %8822 = vmatmul.mubr.msk.bf16.vlgmr.msra.gmra.mrb[0].mxu1 %vm666_vm2, %v10424_v51  ;;  %v10621_v48 = vrot.slane %v1904_v19, 5  ;;  %v10623_v44 = vrot.slane %v1908_v28, 4  ;;  %v1919_v13 = vshrl.u32 %v7669_v26, 16  ;;  %v1922_v16 = vshll.u32 %v7669_v26, 16  ;;  %v7804_v8 = vld [vmem:[%s9718_s25 + $0x3c] sm:$0xe] }
  0xb8   : > { %8854 = vmatpush3.bf16.msra.mxu1 %v13260_v3  ;;  %8825 = vmatprep.mubr.msk.bf16.mxu1 %vm666_vm2, %v10426_v29  ;;  %13264 = vst [vmem:[#allocation8_spill] sm:$0xff] %v10607_v15  ;;  %13265 = vst [vmem:[#allocation7_spill] sm:$0xff] %v10609_v46  ;;  %v10627_v0 = vcombine.low %v1811_v1, %v1821_v33  ;;  %v1928_v38 = vshll.u32 %v10619_v36, 16  ;;  %v1932_v1 = vshrl.u32 %v10619_v36, 16  ;;  %v7819_v33 = vrot.slane %v7803_v24, 9  ;;  %v13266_v19 = vld [vmem:[#allocation10_spill] sm:$0xff] }
  0xb9   : > { %9023 = vmatprep.subr.bf16.mxu1 %v10550_v7  ;;  %v3191_v28 = vrot.slane %v13266_v19, 5  ;;  %v10669_v26 = vrot.slane %v1922_v16, 5  ;;  %v7820_v34 = vrot.slane %v7804_v8, 9  ;;  %v3198_v14 = vrot.slane %v13270_v27, 5  ;;  %v13272_v16 = vld [vmem:[#allocation16_spill] sm:$0xff] }
  0xba   : > { %8680 = vmatmul.mubr.msk.bf16.gmra.mrb[28].mxu0 %vm666_vm2, %v13263_v40  ;;  %v10679_v40 = vrot.slane %v1928_v38, 5  ;;  %v7821_v18 = vrot.slane %v7805_v11, 9  ;;  %v7807_v27 = vld [vmem:[%s9718_s25 + $0x60] sm:$0xe]  ;;  %v7808_v29 = vld [vmem:[%s9718_s25 + $0x6c] sm:$0xe] }
  0xbb   : > { %8685 = vmatprep.mubr.msk.bf16.mxu0 %vm666_vm2, %v9576_v17  ;;  %v10629_v17 = vcombine.low %v1835_v35, %v1845_v31  ;;  %v10667_v35 = vrot.slane %v1919_v13, 4  ;;  %v13268_v31 = vld [vmem:[#allocation14_spill] sm:$0xff]  ;;  %v10675_v19 = vsel %vm9711_vm4, %v7819_v33, %v3191_v28  ;;  %v3193_v3 = vrot.slane %v3191_v28, 4  ;;  %v13271_v13 = vld [vmem:[#allocation9_spill] sm:$0xff] }
  0xbc   : > { %v3194_v23 = vrot.slane %v13268_v31, 5  ;;  %v3201_v31 = vrot.slane %v13272_v16, 5  ;;  %v10685_v33 = vrot.slane %v1932_v1, 4  ;;  %v3200_v38 = vrot.slane %v3198_v14, 4  ;;  %v13275_v16 = vld [vmem:[#allocation15_spill] sm:$0xff]  ;;  %v9580_v28 = vld [vmem:[%s9718_s25 + $0x3c] sm:$0xff]  }
  0xbe   : > { %v10689_v8 = vsel %vm9711_vm4, %v3193_v3, %v3194_v23  ;;  %v13274_v3 = vld [vmem:[#allocation17_spill] sm:$0xff] }
  0xbf   : > { %8826 = vmatmul.mubr.msk.bf16.gmra.mrb[4].mxu1 %vm666_vm2, %v10428_v2  ;;  %v7806_v2 = vld [vmem:[%s9718_s25 + $0x54] sm:$0xe]  ;;  %v3208_v23 = vrot.slane %v13274_v3, 5  ;;  %v7823_v3 = vrot.slane %v7807_v27, 9 }
  0xc0   : > { %8829 = vmatprep.mubr.msk.bf16.mxu1 %vm666_vm2, %v10430_v52 }
  0xc2   : > { %8686 = vmatmul.mubr.msk.bf16.vlgmr.msra.gmra.mrb[0].mxu0 %vm666_vm2, %v9577_v62  ;;  %v13273_v62 = vld [vmem:[#allocation13_spill] sm:$0xff] }
  0xc3   : > { %8689 = vmatprep.mubr.msk.bf16.mxu0 %vm666_vm2, %v9578_v10  ;;  %8718 = vmatpush3.bf16.msra.mxu0 %v13271_v13  ;;  %v3205_v52 = vrot.slane %v13273_v62, 5  ;;  %v10693_v10 = vsel %vm9711_vm4, %v7820_v34, %v3198_v14  ;;  %v9579_v13 = vld [vmem:[%s9718_s25 + $0x30] sm:$0xff]   ;;  %v10707_v34 = vsel %vm9711_vm4, %v3200_v38, %v3201_v31  ;;  %v7822_v14 = vrot.slane %v7806_v2, 9  ;;  %v7809_v2 = vld [vmem:[%s9718_s25 + $0x78] sm:$0xe] }
  0xc4   : > { %8887 = vmatprep.subr.bf16.mxu0 %v10663_v12  ;;  %v3212_v62 = vrot.slane %v13275_v16, 5  ;;  %v3215_v12 = vrot.slane %v10342_v20, 5  ;;  %v3219_v31 = vrot.slane %v10346_v5, 5 }
  0xc5   : > { %v10701_v1 = vsel %vm9711_vm4, %v7821_v18, %v3205_v52  ;;  %v3207_v11 = vrot.slane %v3205_v52, 4  ;;  %v3222_v52 = vrot.slane %v10405_v9, 5  ;;  %v3233_v9 = vrot.slane %v10439_v53, 5  ;;  %v7814_v53 = vld [vmem:[%s9718_s25 + $0xb4] sm:$0xe] }
  0xc6   : > { %v10729_v38 = vsel %vm9711_vm4, %v7822_v14, %v3212_v62  ;;  %v3214_v16 = vrot.slane %v3212_v62, 4  ;;  %v10734_v27 = vsel %vm9711_vm4, %v7823_v3, %v3219_v31  ;;  %v3221_v5 = vrot.slane %v3219_v31, 4 }
  0xc7   : > { %8830 = vmatmul.mubr.msk.bf16.gmra.mrb[8].mxu1 %vm666_vm2, %v10432_v41  ;;  %v10719_v18 = vsel %vm9711_vm4, %v3207_v11, %v3208_v23  ;;  %v7824_v11 = vrot.slane %v7808_v29, 9  ;;  %v3226_v23 = vrot.slane %v10416_v49, 5  ;;  %v3229_v14 = vrot.slane %v10435_v61, 5  ;;  %v7813_v29 = vld [vmem:[%s9718_s25 + $0xa8] sm:$0xe] }
  0xc8   : > { %8833 = vmatprep.mubr.msk.bf16.mxu1 %vm666_vm2, %v10471_v6  ;;  %v10740_v20 = vsel %vm9711_vm4, %v3214_v16, %v3215_v12  ;;  %v7825_v62 = vrot.slane %v7809_v2, 9  ;;  %v7810_v6 = vld [vmem:[%s9718_s25 + $0x84] sm:$0xe]  ;;  %v10750_v49 = vsel %vm9711_vm4, %v3221_v5, %v3222_v52  ;;  %v3235_v3 = vrot.slane %v3233_v9, 4 }
  0xc9   : > { %v10754_v12 = vsel %vm9711_vm4, %v7824_v11, %v3226_v23  ;;  %v3228_v61 = vrot.slane %v3226_v23, 4  ;;  %v3236_v31 = vrot.slane %v10491_v39, 5  ;;  %v7826_v2 = vrot.slane %v7810_v6, 9  ;;  %v7812_v11 = vld [vmem:[%s9718_s25 + $0x9c] sm:$0xe]  ;;  %v9581_v23 = vld [vmem:[%s9718_s25 + $0x48] sm:$0xff]  }
  0xca   : > { %8690 = vmatmul.mubr.msk.bf16.gmra.mrb[4].mxu0 %vm666_vm2, %v9579_v13  ;;  %v7811_v13 = vld [vmem:[%s9718_s25 + $0x90] sm:$0xe]  ;;  %v3240_v16 = vrot.slane %v10463_v58, 5  ;;  %v3243_v5 = vrot.slane %v10507_v47, 5  ;;  %v3247_v39 = vrot.slane %v10496_v55, 5  ;;  %v9582_v58 = vld [vmem:[%s9718_s25 + $0x54] sm:$0xff]  }
  0xcb   : > { %8693 = vmatprep.mubr.msk.bf16.mxu0 %vm666_vm2, %v9580_v28  ;;  %v10761_v28 = vsel %vm9711_vm4, %v7825_v62, %v3233_v9  ;;  %v10766_v52 = vsel %vm9711_vm4, %v3228_v61, %v3229_v14  ;;  %v10776_v62 = vsel %vm9711_vm4, %v3235_v3, %v3236_v31  ;;  %v7827_v9 = vrot.slane %v7811_v13, 9 }
  0xcc   : > { %v10787_v47 = vsel %vm9711_vm4, %v7826_v2, %v3240_v16  ;;  %v3242_v14 = vrot.slane %v3240_v16, 4  ;;  %v3250_v61 = vrot.slane %v10539_v59, 5  ;;  %v3249_v13 = vrot.slane %v3247_v39, 4 }
  0xcd   : > { %v10794_v55 = vsel %vm9711_vm4, %v7827_v9, %v3247_v39  ;;  %v7828_v3 = vrot.slane %v7812_v11, 9  ;;  %v3254_v31 = vrot.slane %v10504_v56, 5  ;;  %v3257_v59 = vrot.slane %v10542_v63, 5 }
  0xce   : > { %13276 = vst [vmem:[#allocation10_spill] sm:$0xff] %v10794_v55  ;;  %v10799_v2 = vsel %vm9711_vm4, %v3242_v14, %v3243_v5  ;;  %v7829_v16 = vrot.slane %v7813_v29, 9  ;;  %v3261_v6 = vrot.slane %v10555_v4, 5  ;;  %v10809_v11 = vsel %vm9711_vm4, %v3249_v13, %v3250_v61  ;;  %v7815_v29 = vld [vmem:[%s9718_s25 + $0xc0] sm:$0xe] }
  0xcf   : > { %8834 = vmatmul.mubr.msk.bf16.gmra.mrb[12].mxu1 %vm666_vm2, %v10607_v15  ;;  %13277 = vst [vmem:[#allocation14_spill] sm:$0xff] %v10809_v11  ;;  %v10813_v56 = vsel %vm9711_vm4, %v7828_v3, %v3254_v31  ;;  %v3256_v63 = vrot.slane %v3254_v31, 4  ;;  %v7671_v4 = vld [vmem:[%s9718_s25 + $0xbc] sm:$0x1]  ;;  %v7672_v5 = vld [vmem:[%s9718_s25 + $0xc0] sm:$0xf] }
  0xd0   : > { %8837 = vmatprep.mubr.msk.bf16.mxu1 %vm666_vm2, %v10609_v46  ;;  %v10823_v39 = vsel %vm9711_vm4, %v7829_v16, %v3261_v6  ;;  %v3263_v14 = vrot.slane %v3261_v6, 4  ;;  %v3264_v61 = vrot.slane %v10616_v60, 5  ;;  %v7673_v13 = vld [vmem:[%s9718_s25 + $0xc4] sm:$0xf]  ;;  %v3268_v31 = vrot.slane %v10619_v36, 5 }
  0xd1   : > { %v10829_v3 = vsel %vm9711_vm4, %v3256_v63, %v3257_v59  ;;  %v3271_v9 = vrot.slane %v7671_v4, 5  ;;  %v7674_v46 = vld [vmem:[%s9718_s25 + $0xc8] sm:$0x1]  ;;  %v7831_v6 = vrot.slane %v7815_v29, 9  ;;  %v3275_v11 = vrot.slane %v7673_v13, 5  ;;  %v9583_v55 = vld [vmem:[%s9718_s25 + $0x60] sm:$0xff]  }
  0xd2   : > { %8694 = vmatmul.mubr.msk.bf16.gmra.mrb[8].mxu0 %vm666_vm2, %v9581_v23  ;;  %13278 = vst [vmem:[#allocation2_spill] sm:$0xff] %v10829_v3  ;;  %v10837_v16 = vsel %vm9711_vm4, %v3263_v14, %v3264_v61  ;;  %v3270_v36 = vrot.slane %v3268_v31, 4  ;;  %v3278_v59 = vrot.slane %v7674_v46, 5  ;;  %v9584_v63 = vld [vmem:[%s9718_s25 + $0x6c] sm:$0xff]   ;;  %v1938_v23 = vshll.u32 %v7671_v4, 16 }
  0xd3   : > { %8697 = vmatprep.mubr.msk.bf16.mxu0 %vm666_vm2, %v9582_v58  ;;  %v7830_v58 = vrot.slane %v7814_v53, 9  ;;  %13279 = vst [vmem:[#allocation11_spill] sm:$0xff] %v10837_v16  ;;  %v1943_v3 = vshrl.u32 %v7672_v5, 16  ;;  %v10851_v29 = vsel %vm9711_vm4, %v7831_v6, %v3275_v11  ;;  %v3277_v14 = vrot.slane %v3275_v11, 4  ;;  %v11205_v6 = vld [vmem:[%s9718_s25 + $0x54] sm:$0xf] }
  0xd4   : > { %v1946_v61 = vshll.u32 %v7672_v5, 16  ;;  %v1952_v15 = vshll.u32 %v7673_v13, 16  ;;  %v1925_v16 = vor.u32 %v10669_v26, %v10667_v35  ;;  %v1935_v4 = vor.u32 %v10685_v33, %v10679_v40 }
  0xd5   : > { %v10844_v53 = vsel %vm9711_vm4, %v7830_v58, %v3268_v31  ;;  %v1956_v58 = vshrl.u32 %v7673_v13, 16  ;;  %v10857_v31 = vsel %vm9711_vm4, %v3270_v36, %v3271_v9  ;;  %v10867_v11 = vsel %vm9711_vm4, %v3277_v14, %v3278_v59 }
  0xd6   : > { %v13280_v9 = vsel %vm9756_vm6, %v10588_v42, %v10590_v54  ;;  %v13281_v35 = vsel %vm9756_vm6, %v10586_v21, %v10527_v22  ;;  %v13283_v42 = vsel %vm9756_vm6, %v10596_v30, %v10544_v25  ;;  %v13284_v22 = vor.u32 %v10600_v57, %v10598_v50  ;;  %v9586_v50 = vld [vmem:[%s9718_s25 + $0x84] sm:$0xff]  }
  0xd7   : > { %8838 = vmatmul.mubr.msk.bf16.gmra.mrb[16].mxu1 %vm666_vm2, %v10627_v0  ;;  %v10880_v26 = vcombine.low %v13281_v35, %v13280_v9  ;;  %v13285_v5 = vor.u32 %v10623_v44, %v10621_v48  ;;  %v13286_v36 = vshll.u32 %v10616_v60, 16  ;;  %v1958_v14 = vrot.slane %v1956_v58, 4  ;;  %v9585_v35 = vld [vmem:[%s9718_s25 + $0x78] sm:$0xff]   ;;  %v7800_v58 = vld [vmem:[%s9718_s25 + $0xc] sm:$0xe] }
  0xd8   : > { %8841 = vmatprep.mubr.msk.bf16.mxu1 %vm666_vm2, %v10629_v17  ;;  %v1902_v21 = vrot.slane %v13284_v22, 4  ;;  %v1926_v9 = vrot.slane %v1925_v16, 4  ;;  %v1936_v25 = vrot.slane %v1935_v4, 4  ;;  %v1940_v30 = vrot.slane %v1938_v23, 5 }
  0xd9   : > { %v1912_v13 = vrot.slane %v13285_v5, 4  ;;  %v1916_v59 = vrot.slane %v13286_v36, 5  ;;  %v7816_v22 = vrot.slane %v7800_v58, 9  ;;  %v9640_v5 = vld [vmem:[%s9718_s25 + $0x14] sm:$0x1] }
  0xda   : > { %8698 = vmatmul.mubr.msk.bf16.gmra.mrb[12].mxu0 %vm666_vm2, %v9583_v55  ;;  %v13282_v55 = vsel %vm9756_vm6, %v10611_v32, %v10613_v45  ;;  %v1948_v32 = vrot.slane %v1946_v61, 5  ;;  %v1954_v45 = vrot.slane %v1952_v15, 5  ;;  %v1907_v57 = vsel %vm9756_vm6, %v1902_v21, %v10621_v48  ;;  %v9639_v61 = vld [vmem:[%s9718_s25 + $0x10] sm:$0xf] }
  0xdb   : > { %8701 = vmatprep.mubr.msk.bf16.mxu0 %vm666_vm2, %v9584_v63  ;;  %v10895_v54 = vcombine.low %v13283_v42, %v13282_v55  ;;  %v1945_v63 = vrot.slane %v1943_v3, 4  ;;  %v1917_v15 = vsel %vm9756_vm6, %v1912_v13, %v1916_v59  ;;  %v1962_v3 = vshll.u32 %v7674_v46, 16  ;;  %v9587_v36 = vld [vmem:[%s9718_s25 + $0x90] sm:$0xff]   ;;  %v9588_v59 = vld [vmem:[%s9718_s25 + $0x9c] sm:$0xff]  }
  0xdc   : > { %v1959_v44 = vor.u32 %v1958_v14, %v1954_v45  ;;  %v1931_v23 = vsel %vm9756_vm6, %v1926_v9, %v10679_v40  ;;  %v1941_v16 = vsel %vm9756_vm6, %v1936_v25, %v1940_v30  ;;  %v3170_v48 = vrot.slane %v9639_v61, 5  ;;  %v9641_v14 = vld [vmem:[%s9718_s25 + $0x1c] sm:$0xf]  ;;  %v13287_v58 = vld [vmem:[#allocation12_spill] sm:$0xff] }
  0xdd   : > { %v1949_v60 = vor.u32 %v1948_v32, %v1945_v63  ;;  %v10925_v4 = vcombine.low %v1907_v57, %v1917_v15  ;;  %v10927_v46 = vcombine.low %v1931_v23, %v1941_v16  ;;  %v1964_v40 = vrot.slane %v1962_v3, 5  ;;  %v9643_v23 = vld [vmem:[%s9718_s25 + $0x20] sm:$0x1]  ;;  %13313 = vst [vmem:[#allocation12_spill] sm:$0xff] %v11205_v6 }
  0xde   : > { %v1960_v42 = vrot.slane %v1959_v44, 4  ;;  %v3172_v21 = vrot.slane %v3170_v48, 4  ;;  %v3173_v13 = vrot.slane %v9640_v5, 5  ;;  %v3177_v9 = vrot.slane %v9641_v14, 5 }
  0xdf   : > { %8842 = vmatmul.mubr.msk.bf16.gmra.mrb[20].mxu1 %vm666_vm2, %v10880_v26  ;;  %v1950_v55 = vrot.slane %v1949_v60, 4  ;;  %v3171_v25 = vsel %vm9711_vm4, %v7816_v22, %v3170_v48  ;;  %v3180_v16 = vrot.slane %v9643_v23, 5  ;;  %v13288_v14 = vcombine.low %v10675_v19, %v10689_v8  ;;  %v13291_v19 = vld [vmem:[#allocation6_spill] sm:$0xff]  ;;  %v7868_v8 = vld [vmem:[%s9718_s25 + $0x10] sm:$0xf] }
  0xe0   : > { %8845 = vmatprep.mubr.msk.bf16.mxu1 %vm666_vm2, %v10895_v54  ;;  %v1965_v32 = vsel %vm9756_vm6, %v1960_v42, %v1964_v40  ;;  %v3174_v30 = vsel %vm9711_vm4, %v3172_v21, %v3173_v13  ;;  %v3179_v3 = vrot.slane %v3177_v9, 4  ;;  %v9589_v42 = vld [vmem:[%s9718_s25 + $0xa8] sm:$0xff]   ;;  %v9590_v40 = vld [vmem:[%s9718_s25 + $0xb4] sm:$0xff]   ;;  %v3869_v23 = vshrl.u32 %v7868_v8, 16 }
  0xe1   : > { %v1955_v63 = vsel %vm9756_vm6, %v1950_v55, %v1954_v45  ;;  %v7802_v45 = vld [vmem:[%s9718_s25 + $0x24] sm:$0xe]  ;;  %v7834_v60 = vcombine.low %v3171_v25, %v3174_v30  ;;  %v3187_v55 = vrot.slane %v13287_v58, 5  ;;  %v13292_v25 = vcombine.low %v10701_v1, %v10719_v18  ;;  %v13295_v58 = vld [vmem:[#allocation5_spill] sm:$0xff] }
  0xe2   : > { %8702 = vmatmul.mubr.msk.bf16.gmra.mrb[16].mxu0 %vm666_vm2, %v9585_v35  ;;  %v7801_v35 = vld [vmem:[%s9718_s25 + $0x18] sm:$0xe]  ;;  %v10950_v15 = vcombine.low %v1955_v63, %v1965_v32  ;;  %v7818_v61 = vrot.slane %v7802_v45, 9  ;;  %v3181_v21 = vsel %vm9711_vm4, %v3179_v3, %v3180_v16  ;;  %v10972_v63 = vld [vmem:[%s13157_s1 + $0x60] sm:$0xff]   ;;  %v5985_v30 = vrot.slane %v7868_v8, 5 }
  0xe3   : > { %8705 = vmatprep.mubr.msk.bf16.mxu0 %vm666_vm2, %v9586_v50  ;;  %v9642_v50 = vld [vmem:[%s9718_s25 + $0x28] sm:$0xf]  ;;  %v7817_v44 = vrot.slane %v7801_v35, 9  ;;  %v9591_v32 = vld [vmem:[%s9718_s25 + $0xc0] sm:$0xff]   ;;  %v7870_v35 = vld [vmem:[%s9718_s25 + $0x1c] sm:$0xf] }
  0xe4   : > { %v3184_v57 = vrot.slane %v9642_v50, 5  ;;  %v7901_v50 = vld [vmem:[%s9718_s25 + $0x14] sm:$0x1]  ;;  %v3865_v3 = vshll.u32 %v7868_v8, 16  ;;  %v3889_v1 = vshll.u32 %v7870_v35, 16  ;;  %v3893_v18 = vshrl.u32 %v7870_v35, 16 }
  0xe5   : > { %v3178_v22 = vsel %vm9711_vm4, %v7817_v44, %v3177_v9  ;;  %v10993_v9 = vld [vmem:[%s13157_s1 + $0x40] sm:$0xff]   ;;  %v8139_v44 = vld [vmem:[%s9718_s25 + $0x18] sm:$0xe] }
  0xe6   : > { %v3186_v48 = vrot.slane %v3184_v57, 4  ;;  %v3185_v5 = vsel %vm9711_vm4, %v7818_v61, %v3184_v57  ;;  %v8138_v57 = vld [vmem:[%s9718_s25 + $0xc] sm:$0xe] }
  0xe7   : > { %8846 = vmatmul.mubr.msk.bf16.gmra.mrb[24].mxu1 %vm666_vm2, %v10925_v4 }
  0xe8   : > { %8849 = vmatprep.mubr.msk.bf16.mxu1 %vm666_vm2, %v10927_v46  ;;  %v3188_v13 = vsel %vm9711_vm4, %v3186_v48, %v3187_v55  ;;  %v13294_v48 = vld [vmem:[#allocation4_spill] sm:$0xff]  ;;  %v5988_v55 = vrot.slane %v7901_v50, 5 }
  0xea   : > { %8706 = vmatmul.mubr.msk.bf16.gmra.mrb[20].mxu0 %vm666_vm2, %v9587_v36  ;;  %v7835_v36 = vcombine.low %v3178_v22, %v3181_v21 }
  0xeb   : > { %8709 = vmatprep.mubr.msk.bf16.mxu0 %vm666_vm2, %v9588_v59  ;;  %v7836_v59 = vcombine.low %v3185_v5, %v3188_v13  ;;  %v11020_v5 = vrot.slane %v3865_v3, 5  ;;  %v3871_v13 = vrot.slane %v3869_v23, 4  ;;  %v8140_v3 = vld [vmem:[%s9718_s25 + $0x24] sm:$0xe]  ;;  %v7903_v23 = vld [vmem:[%s9718_s25 + $0x2c] sm:$0x1] }
  0xef   : > { %8850 = vmatmul.mubr.msk.bf16.gmra.mrb[28].mxu1 %vm666_vm2, %v10950_v15 }
  0xf0   : > { %8855 = vmatprep.mubr.msk.bf16.mxu1 %vm666_vm2, %v7834_v60 }
  0xf2   : > { %8710 = vmatmul.mubr.msk.bf16.gmra.mrb[24].mxu0 %vm666_vm2, %v9589_v42  ;;  %v8155_v42 = vrot.slane %v8139_v44, 9 }
  0xf3   : > { %8713 = vmatprep.mubr.msk.bf16.mxu0 %vm666_vm2, %v9590_v40  ;;  %v5992_v40 = vrot.slane %v7870_v35, 5 }
  0xf7   : > { %8856 = vmatmul.mubr.msk.bf16.vlgmr.msra.gmra.mrb[0].mxu1 %vm666_vm2, %v7835_v36 }
  0xf8   : > { %9024 = vmatpush3.bf16.msra.mxu1 %v10550_v7  ;;  %8859 = vmatprep.mubr.msk.bf16.mxu1 %vm666_vm2, %v7836_v59  ;;  %v13289_v7 = vcombine.low %v10693_v10, %v10707_v34  ;;  %v7867_v10 = vld [vmem:[%s9718_s25 + $0xc] sm:$0xf]  ;;  %v7869_v34 = vld [vmem:[%s9718_s25 + $0x18] sm:$0xf] }
  0xf9   : > { %9057 = vmatprep.subr.bf16.mxu1 %v10972_v63  ;;  %v3856_v45 = vshrl.u32 %v7867_v10, 16  ;;  %v3859_v60 = vshll.u32 %v7867_v10, 16  ;;  %v3880_v16 = vshrl.u32 %v7869_v34, 16  ;;  %v3883_v61 = vshll.u32 %v7869_v34, 16  ;;  %v11038_v10 = vld [vmem:[%s9718_s25 + $0x28] sm:$0xf] }
  0xfa   : > { %8714 = vmatmul.mubr.msk.bf16.gmra.mrb[28].mxu0 %vm666_vm2, %v9591_v32  ;;  %v7902_v32 = vld [vmem:[%s9718_s25 + $0x20] sm:$0x1]  ;;  %v11041_v34 = vld [vmem:[%s9718_s25 + $0x34] sm:$0xf] }
  0xfb   : > { %8719 = vmatprep.mubr.msk.bf16.mxu0 %vm666_vm2, %v10422_v37  ;;  %v13290_v37 = vld [vmem:[#allocation3_spill] sm:$0xff]  ;;  %v3858_v22 = vrot.slane %v3856_v45, 4  ;;  %v3861_v21 = vrot.slane %v3859_v60, 5  ;;  %v3882_v36 = vrot.slane %v3880_v16, 4  ;;  %v3885_v59 = vrot.slane %v3883_v61, 5 }
  0xfc   : > { %v3899_v35 = vshll.u32 %v7902_v32, 16  ;;  %v5995_v45 = vrot.slane %v7902_v32, 5  ;;  %v3872_v60 = vor.u32 %v3871_v13, %v11020_v5  ;;  %v8141_v16 = vld [vmem:[%s9718_s25 + $0x30] sm:$0xe]  ;;  %v6006_v61 = vrot.slane %v11041_v34, 5 }
  0xfd   : > { %v3886_v44 = vor.u32 %v3885_v59, %v3882_v36  ;;  %v6002_v13 = vrot.slane %v7903_v23, 5  ;;  %v8157_v36 = vrot.slane %v8141_v16, 9  ;;  %v11075_v59 = vld [vmem:[%s9718_s25 + $0x30] sm:$0xf] }
  0xff   : > { %8860 = vmatmul.mubr.msk.bf16.gmra.mrb[4].mxu1 %vm666_vm2, %v13288_v14  ;;  %v11023_v14 = vrot.slane %v3889_v1, 5  ;;  %v11068_v1 = vld [vmem:[%s9718_s25 + $0x38] sm:$0x1] }
 0x100   : > { %8863 = vmatprep.mubr.msk.bf16.mxu1 %vm666_vm2, %v13289_v7  ;;  %v3895_v7 = vrot.slane %v3893_v18, 4 }
 0x102   : > { %8720 = vmatmul.mubr.msk.bf16.vlgmr.msra.gmra.mrb[0].mxu0 %vm666_vm2, %v10424_v51  ;;  %v13293_v51 = vcombine.low %v10729_v38, %v10740_v20  ;;  %v8154_v20 = vrot.slane %v8138_v57, 9  ;;  %v5987_v38 = vrot.slane %v5985_v30, 4  ;;  %v5994_v57 = vrot.slane %v5992_v40, 4 }
 0x103   : > { %8723 = vmatprep.mubr.msk.bf16.mxu0 %vm666_vm2, %v13290_v37  ;;  %8888 = vmatpush3.bf16.msra.mxu0 %v13291_v19  ;;  %v13296_v37 = vcombine.low %v10734_v27, %v10750_v49  ;;  %v11049_v27 = vsel %vm9711_vm4, %v8155_v42, %v5992_v40  ;;  %v3862_v49 = vor.u32 %v3861_v21, %v3858_v22  ;;  %v3901_v42 = vrot.slane %v3899_v35, 5 }
 0x104   : > { %8921 = vmatprep.subr.bf16.mxu0 %v10993_v9  ;;  %v11031_v19 = vsel %vm9711_vm4, %v8154_v20, %v5985_v30  ;;  %v11035_v8 = vsel %vm9711_vm4, %v5987_v38, %v5988_v55  ;;  %v3875_v30 = vshll.u32 %v7901_v50, 16  ;;  %v5999_v50 = vrot.slane %v11038_v10, 5 }
 0x105   : > { %v3917_v20 = vshrl.u32 %v11038_v10, 16  ;;  %v3863_v38 = vrot.slane %v3862_v49, 4  ;;  %v8156_v40 = vrot.slane %v8140_v3, 9  ;;  %v3873_v22 = vrot.slane %v3872_v60, 4 }
 0x106   : > { %v3877_v55 = vrot.slane %v3875_v30, 5  ;;  %v3887_v21 = vrot.slane %v3886_v44, 4  ;;  %v13300_v44 = vcombine.low %v10787_v47, %v10799_v2  ;;  %v11090_v3 = vsel %vm9711_vm4, %v5994_v57, %v5995_v45  ;;  %v13301_v45 = vld [vmem:[#allocation8_spill] sm:$0xff] }
 0x107   : > { %8864 = vmatmul.mubr.msk.bf16.gmra.mrb[8].mxu1 %vm666_vm2, %v13292_v25  ;;  %v13297_v25 = vcombine.low %v10754_v12, %v10766_v52  ;;  %v3896_v52 = vor.u32 %v3895_v7, %v11023_v14  ;;  %v6001_v7 = vrot.slane %v5999_v50, 4  ;;  %v3919_v60 = vrot.slane %v3917_v20, 4 }
 0x108   : > { %8867 = vmatprep.mubr.msk.bf16.mxu1 %vm666_vm2, %v13293_v51  ;;  %v11052_v51 = vld [vmem:[%s9718_s25 + $0x24] sm:$0xf]  ;;  %v3878_v16 = vsel %vm9756_vm6, %v3873_v22, %v3877_v55  ;;  %v11101_v47 = vsel %vm9711_vm4, %v8156_v40, %v5999_v50  ;;  %v3937_v2 = vshll.u32 %v11041_v34, 16  ;;  %v3941_v57 = vshrl.u32 %v11041_v34, 16  ;;  %v13303_v34 = vld [vmem:[#allocation7_spill] sm:$0xff] }
 0x109   : > { %v3904_v18 = vshrl.u32 %v11052_v51, 16  ;;  %v3897_v32 = vrot.slane %v3896_v52, 4  ;;  %v3931_v52 = vshll.u32 %v11075_v59, 16  ;;  %v11116_v50 = vsel %vm9711_vm4, %v8157_v36, %v6006_v61  ;;  %v11138_v36 = vld [vmem:[%s9718_s25 + $0x40] sm:$0xf] }
 0x10a   : > { %8724 = vmatmul.mubr.msk.bf16.gmra.mrb[4].mxu0 %vm666_vm2, %v13294_v48  ;;  %v13298_v48 = vld [vmem:[#allocation18_spill] sm:$0xff]  ;;  %13304 = vst [vmem:[#allocation16_spill] sm:$0xff] %v11138_v36 }
 0x10b   : > { %8727 = vmatprep.mubr.msk.bf16.mxu0 %vm666_vm2, %v13295_v58  ;;  %v3913_v58 = vshll.u32 %v11038_v10, 16  ;;  %v3906_v49 = vrot.slane %v3904_v18, 4  ;;  %v11112_v18 = vsel %vm9711_vm4, %v6001_v7, %v6002_v13  ;;  %v3902_v20 = vsel %vm9756_vm6, %v3897_v32, %v3901_v42 }
 0x10c   : > { %v3933_v22 = vrot.slane %v3931_v52, 5  ;;  %v11135_v13 = vrot.slane %v3937_v2, 5  ;;  %v3943_v42 = vrot.slane %v3941_v57, 4  ;;  %v3947_v2 = vshll.u32 %v11068_v1, 16 }
 0x10d   : > { %v11082_v35 = vrot.slane %v3913_v58, 5  ;;  %v11119_v58 = vld [vmem:[%s9718_s25 + $0x3c] sm:$0xf] }
 0x10e   : > { %13302 = vst [vmem:[#allocation9_spill] sm:$0xff] %v11119_v58  ;;  %v3952_v32 = vshrl.u32 %v11119_v58, 16  ;;  %v3955_v7 = vshll.u32 %v11119_v58, 16 }
 0x10f   : > { %8868 = vmatmul.mubr.msk.bf16.gmra.mrb[12].mxu1 %vm666_vm2, %v13296_v37  ;;  %v6008_v37 = vrot.slane %v6006_v61, 4  ;;  %v3920_v55 = vor.u32 %v3919_v60, %v11082_v35  ;;  %v11152_v60 = vld [vmem:[%s9718_s25 + $0x4c] sm:$0xf] }
 0x110   : > { %8871 = vmatprep.mubr.msk.bf16.mxu1 %vm666_vm2, %v13297_v25  ;;  %v6009_v25 = vrot.slane %v11068_v1, 5  ;;  %13305 = vst [vmem:[#allocation13_spill] sm:$0xff] %v11152_v60 }
 0x112   : > { %8728 = vmatmul.mubr.msk.bf16.gmra.mrb[8].mxu0 %vm666_vm2, %v10432_v41  ;;  %v3907_v41 = vshll.u32 %v11052_v51, 16 }
 0x113   : > { %8731 = vmatprep.mubr.msk.bf16.mxu0 %vm666_vm2, %v13298_v48  ;;  %v13299_v48 = vcombine.low %v10761_v28, %v10776_v62  ;;  %v3868_v28 = vsel %vm9756_vm6, %v3863_v38, %v11020_v5  ;;  %v3928_v62 = vshrl.u32 %v11075_v59, 16  ;;  %v3892_v5 = vsel %vm9756_vm6, %v3887_v21, %v11023_v14  ;;  %v8142_v21 = vld [vmem:[%s9718_s25 + $0x3c] sm:$0xe] }
 0x114   : > { %v3909_v30 = vrot.slane %v3907_v41, 5  ;;  %v3923_v41 = vshll.u32 %v7903_v23, 16  ;;  %v11127_v14 = vsel %vm9711_vm4, %v6008_v37, %v6009_v25  ;;  %v11132_v61 = vcombine.low %v3868_v28, %v3878_v16  ;;  %v13307_v28 = vld [vmem:[#allocation14_spill] sm:$0xff]  ;;  %v7906_v25 = vld [vmem:[%s9718_s25 + $0x50] sm:$0x1] }
 0x115   : > { %v3930_v40 = vrot.slane %v3928_v62, 4  ;;  %v11142_v37 = vcombine.low %v3892_v5, %v3902_v20  ;;  %v3921_v16 = vrot.slane %v3920_v55, 4  ;;  %v8158_v57 = vrot.slane %v8142_v21, 9  ;;  %v13310_v5 = vld [vmem:[#allocation2_spill] sm:$0xff] }
 0x116   : > { %v3910_v38 = vor.u32 %v3909_v30, %v3906_v49  ;;  %v3925_v49 = vrot.slane %v3923_v41, 5  ;;  %v11149_v30 = vld [vmem:[%s9718_s25 + $0x44] sm:$0x1]  ;;  %v6013_v20 = vrot.slane %v11138_v36, 5  ;;  %v3954_v55 = vrot.slane %v3952_v32, 4 }
 0x117   : > { %8872 = vmatmul.mubr.msk.bf16.gmra.mrb[16].mxu1 %vm666_vm2, %v13299_v48  ;;  %v3934_v41 = vor.u32 %v3933_v22, %v3930_v40  ;;  %v8143_v48 = vld [vmem:[%s9718_s25 + $0x48] sm:$0xe]  ;;  %v6016_v1 = vrot.slane %v11149_v30, 5  ;;  %v3957_v21 = vrot.slane %v3955_v7, 5  ;;  %v3985_v22 = vshll.u32 %v11152_v60, 16 }
 0x118   : > { %8875 = vmatprep.mubr.msk.bf16.mxu1 %vm666_vm2, %v13300_v44  ;;  %v13306_v44 = vld [vmem:[#allocation10_spill] sm:$0xff]  ;;  %v3911_v52 = vrot.slane %v3910_v38, 4  ;;  %v3944_v38 = vor.u32 %v3943_v42, %v11135_v13  ;;  %v3926_v32 = vsel %vm9756_vm6, %v3921_v16, %v3925_v49  ;;  %v6020_v7 = vrot.slane %v11152_v60, 5 }
 0x119   : > { %v13308_v62 = vcombine.low %v13306_v44, %v13307_v28  ;;  %v3961_v44 = vshll.u32 %v11138_v36, 16  ;;  %v3965_v28 = vshrl.u32 %v11138_v36, 16  ;;  %v3958_v49 = vor.u32 %v3957_v21, %v3954_v55 }
 0x11a   : > { %8732 = vmatmul.mubr.msk.bf16.gmra.mrb[12].mxu0 %vm666_vm2, %v13301_v45  ;;  %v11160_v45 = vld [vmem:[%s9718_s25 + $0x48] sm:$0xf]  ;;  %v3916_v42 = vsel %vm9756_vm6, %v3911_v52, %v11082_v35  ;;  %v11191_v33 = vrot.slane %v3944_v38, 4  ;;  %v11197_v35 = vsel %vm9711_vm4, %v8158_v57, %v6013_v20  ;;  %v6023_v55 = vrot.slane %v7906_v25, 5 }
 0x11b   : > { %8735 = vmatprep.mubr.msk.bf16.mxu0 %vm666_vm2, %v13303_v34  ;;  %13309 = vst [vmem:[#allocation17_spill] sm:$0xff] %v11160_v45  ;;  %v13311_v34 = vcombine.low %v10813_v56, %v13310_v5  ;;  %v3976_v56 = vshrl.u32 %v11160_v45, 16  ;;  %v3979_v40 = vshll.u32 %v11160_v45, 16  ;;  %v11186_v5 = vrot.slane %v3934_v41, 4 }
 0x11c   : > { %v11189_v23 = vrot.slane %v3961_v44, 5  ;;  %v3967_v12 = vrot.slane %v3965_v28, 4  ;;  %v11202_v41 = vrot.slane %v3985_v22, 5  ;;  %v13314_v28 = vld [vmem:[#allocation11_spill] sm:$0xff]  ;;  %v11211_v38 = vcombine.low %v3916_v42, %v3926_v32 }
 0x11d   : > { %v3978_v52 = vrot.slane %v3976_v56, 4  ;;  %v3981_v16 = vrot.slane %v3979_v40, 5  ;;  %v13316_v21 = vcombine.low %v10844_v53, %v10857_v31  ;;  %v3971_v22 = vshll.u32 %v11149_v30, 16  ;;  %v8144_v31 = vld [vmem:[%s9718_s25 + $0x54] sm:$0xe] }
 0x11e   : > { %v3968_v40 = vor.u32 %v3967_v12, %v11189_v23  ;;  %v4003_v32 = vshll.u32 %v11205_v6, 16  ;;  %v3959_v12 = vrot.slane %v3958_v49, 4 }
 0x11f   : > { %8876 = vmatmul.mubr.msk.bf16.gmra.mrb[20].mxu1 %vm666_vm2, %v13308_v62  ;;  %v3989_v62 = vshrl.u32 %v11152_v60, 16  ;;  %v3982_v30 = vor.u32 %v3981_v16, %v3978_v52  ;;  %v3973_v49 = vrot.slane %v3971_v22, 5  ;;  %v8160_v52 = vrot.slane %v8144_v31, 9  ;;  %v11258_v16 = vld [vmem:[%s9718_s25 + $0x60] sm:$0xf] }
 0x120   : > { %8879 = vmatprep.mubr.msk.bf16.mxu1 %vm666_vm2, %v13311_v34  ;;  %v6015_v34 = vrot.slane %v6013_v20, 4  ;;  %v6022_v20 = vrot.slane %v6020_v7, 4  ;;  %13318 = vst [vmem:[#allocation6_spill] sm:$0xff] %v11258_v16  ;;  %v11265_v60 = vld [vmem:[%s9718_s25 + $0x68] sm:$0x1] }
 0x121   : > { %v3991_v44 = vrot.slane %v3989_v62, 4  ;;  %v11232_v62 = vld [vmem:[%s9718_s25 + $0x64] sm:$0xf] }
 0x122   : > { %8736 = vmatmul.mubr.msk.bf16.gmra.mrb[16].mxu0 %vm666_vm2, %v10627_v0  ;;  %v8159_v0 = vrot.slane %v8143_v48, 9  ;;  %v11200_v48 = vld [vmem:[%s9718_s25 + $0x58] sm:$0xf]  ;;  %v11227_v56 = vsel %vm9711_vm4, %v6015_v34, %v6016_v1  ;;  %13317 = vst [vmem:[#allocation3_spill] sm:$0xff] %v11232_v62 }
 0x123   : > { %8739 = vmatprep.mubr.msk.bf16.mxu0 %vm666_vm2, %v10629_v17  ;;  %v11193_v17 = vrot.slane %v3947_v2, 5  ;;  %13312 = vst [vmem:[#allocation15_spill] sm:$0xff] %v11200_v48  ;;  %v13315_v2 = vcombine.low %v10823_v39, %v13314_v28  ;;  %v3940_v39 = vsel %vm9756_vm6, %v11186_v5, %v11135_v13  ;;  %v6027_v42 = vrot.slane %v11200_v48, 5  ;;  %v8145_v28 = vld [vmem:[%s9718_s25 + $0x60] sm:$0xe] }
 0x124   : > { %v11215_v57 = vsel %vm9711_vm4, %v8159_v0, %v6020_v7  ;;  %v4000_v13 = vshrl.u32 %v11205_v6, 16  ;;  %v3992_v1 = vor.u32 %v3991_v44, %v11202_v41  ;;  %v3995_v0 = vshll.u32 %v7906_v25, 16  ;;  %v7907_v7 = vld [vmem:[%s9718_s25 + $0x5c] sm:$0x1]  ;;  %v8147_v6 = vld [vmem:[%s9718_s25 + $0x78] sm:$0xe] }
 0x125   : > { %v3950_v53 = vsel %vm9756_vm6, %v11191_v33, %v11193_v17  ;;  %v11252_v5 = vsel %vm9711_vm4, %v6022_v20, %v6023_v55  ;;  %v4009_v34 = vshll.u32 %v11200_v48, 16  ;;  %v3969_v17 = vrot.slane %v3968_v40, 4 }
 0x126   : > { %v6034_v25 = vrot.slane %v11232_v62, 5  ;;  %v6030_v44 = vrot.slane %v7907_v7, 5  ;;  %v3964_v20 = vsel %vm9756_vm6, %v3959_v12, %v11189_v23  ;;  %v3983_v55 = vrot.slane %v3982_v30, 4 }
 0x127   : > { %8880 = vmatmul.mubr.msk.bf16.gmra.mrb[24].mxu1 %vm666_vm2, %v13315_v2  ;;  %v4002_v2 = vrot.slane %v4000_v13, 4  ;;  %v3993_v33 = vrot.slane %v3992_v1, 4  ;;  %v3997_v45 = vrot.slane %v3995_v0, 5  ;;  %v13319_v40 = vcombine.low %v10851_v29, %v10867_v11 }
 0x128   : > { %8883 = vmatprep.mubr.msk.bf16.mxu1 %vm666_vm2, %v13316_v21  ;;  %v4005_v21 = vrot.slane %v4003_v32, 5  ;;  %v11271_v22 = vrot.slane %v4009_v34, 5  ;;  %v4024_v13 = vshrl.u32 %v11258_v16, 16  ;;  %v4027_v32 = vshll.u32 %v11258_v16, 16 }
 0x129   : > { %v13320_v23 = vcombine.low %v11031_v19, %v11035_v8  ;;  %v3974_v12 = vsel %vm9756_vm6, %v3969_v17, %v3973_v49  ;;  %v11283_v29 = vsel %vm9711_vm4, %v8160_v52, %v6027_v42  ;;  %v8161_v11 = vrot.slane %v8145_v28, 9 }
 0x12a   : > { %8740 = vmatmul.mubr.msk.bf16.gmra.mrb[20].mxu0 %vm666_vm2, %v10880_v26  ;;  %v4013_v26 = vshrl.u32 %v11200_v48, 16  ;;  %v6036_v30 = vrot.slane %v6034_v25, 4  ;;  %v6037_v0 = vrot.slane %v11265_v60, 5  ;;  %v4006_v34 = vor.u32 %v4005_v21, %v4002_v2 }
 0x12b   : > { %8743 = vmatprep.mubr.msk.bf16.mxu0 %vm666_vm2, %v10895_v54  ;;  %v6029_v54 = vrot.slane %v6027_v42, 4  ;;  %v4019_v19 = vshll.u32 %v7907_v7, 16  ;;  %v3988_v8 = vsel %vm9756_vm6, %v3983_v55, %v11202_v41  ;;  %v3998_v42 = vsel %vm9756_vm6, %v3993_v33, %v3997_v45  ;;  %v11309_v41 = vld [vmem:[%s9718_s25 + $0x6c] sm:$0xe]  ;;  %v11430_v45 = vld [vmem:[%s9718_s25 + $0xc0] sm:$0xf] }
 0x12c   : > { %v4015_v31 = vrot.slane %v4013_v26, 4  ;;  %v4033_v26 = vshll.u32 %v11232_v62, 16  ;;  %v4037_v17 = vshrl.u32 %v11232_v62, 16  ;;  %v11301_v7 = vcombine.low %v3940_v39, %v3950_v53  ;;  %v11322_v39 = vld [vmem:[%s9718_s25 + $0x70] sm:$0xf] }
 0x12d   : > { %v11287_v1 = vsel %vm9711_vm4, %v6029_v54, %v6030_v44  ;;  %v11306_v52 = vrot.slane %v4027_v32, 5  ;;  %v11313_v33 = vcombine.low %v3964_v20, %v3974_v12  ;;  %13321 = vst [vmem:[#allocation4_spill] sm:$0xff] %v11322_v39  ;;  %v11325_v53 = vld [vmem:[%s9718_s25 + $0x6c] sm:$0xf]  ;;  %v11327_v44 = vcombine.low %v3988_v8, %v3998_v42 }
 0x12e   : > { %v4016_v49 = vor.u32 %v4015_v31, %v11271_v22  ;;  %13322 = vst [vmem:[#allocation5_spill] sm:$0xff] %v11325_v53  ;;  %v11331_v28 = vsel %vm9711_vm4, %v6036_v30, %v6037_v0  ;;  %v11333_v2 = vrot.slane %v4006_v34, 4  ;;  %v11335_v21 = vrot.slane %v4019_v19, 5  ;;  %v11346_v31 = vld [vmem:[%s9718_s25 + $0x74] sm:$0x1] }
 0x12f   : > { %8884 = vmatmul.mubr.msk.bf16.gmra.mrb[28].mxu1 %vm666_vm2, %v13319_v40  ;;  %v11342_v20 = vrot.slane %v4033_v26, 5  ;;  %v4039_v55 = vrot.slane %v4037_v17, 4  ;;  %v4043_v40 = vshll.u32 %v11265_v60, 16  ;;  %v13323_v32 = vcombine.low %v11049_v27, %v11090_v3  ;;  %v11359_v30 = vld [vmem:[%s9718_s25 + $0x7c] sm:$0xf] }
 0x130   : > { %9025 = vmatprep.mubr.msk.bf16.mxu1 %vm666_vm2, %v13320_v23  ;;  %v11353_v23 = vrot.slane %v4016_v49, 4  ;;  %13324 = vst [vmem:[#allocation18_spill] sm:$0xff] %v11359_v30  ;;  %v4048_v60 = vshrl.u32 %v11325_v53, 16  ;;  %v11363_v0 = vld [vmem:[%s9718_s25 + $0x78] sm:$0xf]  ;;  %v13326_v8 = vcombine.low %v11101_v47, %v11112_v18  ;;  %v4051_v42 = vshll.u32 %v11325_v53, 16 }
 0x131   : > { %13325 = vst [vmem:[#allocation8_spill] sm:$0xff] %v11363_v0  ;;  %v11366_v34 = vld [vmem:[%s9718_s25 + $0x88] sm:$0xf]  ;;  %v11369_v27 = vld [vmem:[%s9718_s25 + $0x94] sm:$0xf]  ;;  %v4057_v26 = vshll.u32 %v11322_v39, 16  ;;  %v13332_v36 = vcombine.low %v11197_v35, %v11227_v56 }
 0x132   : > { %8744 = vmatmul.mubr.msk.bf16.gmra.mrb[24].mxu0 %vm666_vm2, %v10925_v4  ;;  %v11304_v4 = vrot.slane %v4024_v13, 4  ;;  %v8162_v13 = vrot.slane %v11309_v41, 9  ;;  %v11372_v3 = vld [vmem:[%s9718_s25 + $0x84] sm:$0xf]  ;;  %v11375_v19 = vld [vmem:[%s9718_s25 + $0x90] sm:$0xf]  ;;  %v4022_v16 = vsel %vm9756_vm6, %v11353_v23, %v11335_v21  ;;  %v13333_v21 = vcombine.low %v11215_v57, %v11252_v5 }
 0x133   : > { %8747 = vmatprep.mubr.msk.bf16.mxu0 %vm666_vm2, %v10927_v46  ;;  %v11319_v46 = vsel %vm9711_vm4, %v8161_v11, %v6034_v25  ;;  %v11340_v25 = vld [vmem:[%s13157_s1 + $0x70] sm:$0xff]   ;;  %v6041_v11 = vrot.slane %v11322_v39, 5  ;;  %v4061_v17 = vshrl.u32 %v11322_v39, 16  ;;  %v11386_v49 = vld [vmem:[%s9718_s25 + $0xa0] sm:$0xf]  ;;  %v6044_v47 = vrot.slane %v11346_v31, 5 }
 0x134   : > { %v4030_v12 = vor.u32 %v11306_v52, %v11304_v4  ;;  %13327 = vst [vmem:[#allocation7_spill] sm:$0xff] %v11386_v49  ;;  %v11396_v18 = vld [vmem:[%s9718_s25 + $0xac] sm:$0xf]  ;;  %v11399_v52 = vld [vmem:[%s9718_s25 + $0x9c] sm:$0xf]  ;;  %v4053_v53 = vrot.slane %v4051_v42, 5 }
 0x135   : > { %v11416_v4 = vld [vmem:[%s9718_s25 + $0xb4] sm:$0xf]  ;;  %v11438_v62 = vrot.slane %v4057_v26, 5  ;;  %v6043_v48 = vrot.slane %v6041_v11, 4  ;;  %v6048_v54 = vrot.slane %v11359_v30, 5  ;;  %v4072_v41 = vshrl.u32 %v11363_v0, 16 }
 0x136   : > { %13329 = vst [vmem:[#allocation14_spill] sm:$0xff] %v11416_v4  ;;  %v4031_v39 = vrot.slane %v4030_v12, 4  ;;  %v4075_v42 = vshll.u32 %v11363_v0, 16  ;;  %v4081_v26 = vshll.u32 %v11359_v30, 16  ;;  %v4045_v12 = vrot.slane %v4043_v40, 5  ;;  %v11472_v40 = vld [vmem:[%s13157_s1 + $0x50] sm:$0xff]  }
 0x137   : > { %9026 = vmatmul.mubr.msk.bf16.vlgmr.msra.gmra.mrb[32].mxu1 %vm666_vm2, %v13323_v32  ;;  %v4063_v32 = vrot.slane %v4061_v17, 4  ;;  %v4085_v17 = vshrl.u32 %v11359_v30, 16  ;;  %v4067_v58 = vshll.u32 %v11346_v31, 16  ;;  %v11465_v30 = vsel %vm9711_vm4, %v8162_v13, %v6041_v11  ;;  %v7910_v0 = vld [vmem:[%s9718_s25 + $0x80] sm:$0x1] }
 0x138   : > { %9058 = vmatpush3.bf16.msra.mxu1 %v10972_v63  ;;  %9029 = vmatprep.mubr.msk.bf16.mxu1 %vm666_vm2, %v13326_v8  ;;  %v4012_v63 = vsel %vm9756_vm6, %v11333_v2, %v11271_v22  ;;  %v4040_v22 = vor.u32 %v4039_v55, %v11342_v20  ;;  %v11410_v2 = vld [vmem:[%s9718_s25 + $0xa8] sm:$0xf]  ;;  %v11413_v8 = vld [vmem:[%s9718_s25 + $0xb8] sm:$0xf]  ;;  %v11427_v55 = vld [vmem:[%s9718_s25 + $0xc4] sm:$0xf]  ;;  %v11481_v35 = vsel %vm9711_vm4, %v6043_v48, %v6044_v47 }
 0x139   : > { %9091 = vmatprep.subr.bf16.mxu1 %v11340_v25  ;;  %13328 = vst [vmem:[#allocation10_spill] sm:$0xff] %v11413_v8  ;;  %13330 = vst [vmem:[#allocation2_spill] sm:$0xff] %v11427_v55  ;;  %v11474_v31 = vcombine.low %v4012_v63, %v4022_v16  ;;  %v4074_v56 = vrot.slane %v4072_v41, 4  ;;  %v11485_v13 = vrot.slane %v4081_v26, 5  ;;  %v4087_v11 = vrot.slane %v4085_v17, 4 }
 0x13a   : > { %8748 = vmatmul.mubr.msk.bf16.gmra.mrb[28].mxu0 %vm666_vm2, %v10950_v15  ;;  %v4050_v15 = vrot.slane %v4048_v60, 4  ;;  %v13331_v60 = vcombine.low %v11116_v50, %v11127_v14  ;;  %v4041_v23 = vrot.slane %v4040_v22, 4  ;;  %v8163_v50 = vrot.slane %v8147_v6, 9  ;;  %v11492_v48 = vld [vmem:[%s9718_s25 + $0x8c] sm:$0x1] }
 0x13b   : > { %8889 = vmatprep.mubr.msk.bf16.mxu0 %vm666_vm2, %v11132_v61  ;;  %v6050_v6 = vrot.slane %v6048_v54, 4  ;;  %v6055_v63 = vrot.slane %v11366_v34, 5  ;;  %v4096_v22 = vshrl.u32 %v11372_v3, 16  ;;  %v4105_v26 = vshll.u32 %v11366_v34, 16 }
 0x13c   : > { %v4054_v14 = vor.u32 %v4053_v53, %v4050_v15  ;;  %v4077_v53 = vrot.slane %v4075_v42, 5  ;;  %v4046_v16 = vsel %vm9756_vm6, %v4041_v23, %v4045_v12  ;;  %v4099_v15 = vshll.u32 %v11372_v3, 16 }
 0x13d   : > { %v8180_v42 = vcombine.low %v11465_v30, %v11481_v35  ;;  %v4088_v12 = vor.u32 %v4087_v11, %v11485_v13  ;;  %v6058_v35 = vrot.slane %v11492_v48, 5  ;;  %v4098_v5 = vrot.slane %v4096_v22, 4 }
 0x13e   : > { %v4055_v47 = vrot.slane %v4054_v14, 4  ;;  %v4078_v23 = vor.u32 %v4077_v53, %v4074_v56  ;;  %v4091_v14 = vshll.u32 %v7910_v0, 16  ;;  %v6062_v56 = vrot.slane %v11369_v27, 5 }
 0x13f   : > { %9030 = vmatmul.mubr.msk.bf16.gmra.mrb[36].mxu1 %vm666_vm2, %v13331_v60  ;;  %v4064_v60 = vor.u32 %v4063_v32, %v11438_v62  ;;  %v8148_v32 = vld [vmem:[%s9718_s25 + $0x84] sm:$0xe]  ;;  %v11531_v53 = vrot.slane %v4105_v26, 5  ;;  %v4133_v26 = vshrl.u32 %v11369_v27, 16 }
 0x140   : > { %9033 = vmatprep.mubr.msk.bf16.mxu1 %vm666_vm2, %v13332_v36  ;;  %v4036_v36 = vsel %vm9756_vm6, %v4031_v39, %v11342_v20  ;;  %v6051_v39 = vrot.slane %v7910_v0, 5  ;;  %v4069_v20 = vrot.slane %v4067_v58, 5  ;;  %v11504_v58 = vsel %vm9711_vm4, %v8163_v50, %v6048_v54 }
 0x141   : > { %v4065_v41 = vrot.slane %v4064_v60, 4  ;;  %v11508_v17 = vcombine.low %v4036_v36, %v4046_v16  ;;  %v8149_v60 = vld [vmem:[%s9718_s25 + $0x90] sm:$0xe]  ;;  %v8164_v30 = vrot.slane %v8148_v32, 9  ;;  %v6057_v50 = vrot.slane %v6055_v63, 4 }
 0x142   : > { %8890 = vmatmul.mubr.msk.bf16.vlgmr.msra.gmra.mrb[32].mxu0 %vm666_vm2, %v11142_v37  ;;  %v11518_v54 = vsel %vm9711_vm4, %v6050_v6, %v6051_v39  ;;  %v13334_v36 = vcombine.low %v11283_v29, %v11287_v1  ;;  %v4060_v0 = vsel %vm9756_vm6, %v4055_v47, %v11438_v62  ;;  %v8165_v6 = vrot.slane %v8149_v60, 9 }
 0x143   : > { %8893 = vmatprep.mubr.msk.bf16.mxu0 %vm666_vm2, %v11211_v38  ;;  %8922 = vmatpush3.bf16.msra.mxu0 %v10993_v9  ;;  %v4109_v9 = vshrl.u32 %v11366_v34, 16  ;;  %v4070_v57 = vsel %vm9756_vm6, %v4065_v41, %v4069_v20  ;;  %v8181_v29 = vcombine.low %v11504_v58, %v11518_v54  ;;  %v4079_v1 = vrot.slane %v4078_v23, 4  ;;  %v11546_v41 = vld [vmem:[%s9718_s25 + $0x98] sm:$0x1] }
 0x144   : > { %8955 = vmatprep.subr.bf16.mxu0 %v11472_v40  ;;  %v4089_v62 = vrot.slane %v4088_v12, 4  ;;  %v4093_v16 = vrot.slane %v4091_v14, 5  ;;  %v11539_v39 = vcombine.low %v4060_v0, %v4070_v57  ;;  %v6056_v20 = vsel %vm9711_vm4, %v8164_v30, %v6055_v63  ;;  %v8150_v30 = vld [vmem:[%s9718_s25 + $0x9c] sm:$0xe] }
 0x145   : > { %v4111_v11 = vrot.slane %v4109_v9, 4  ;;  %v6059_v47 = vsel %vm9711_vm4, %v6057_v50, %v6058_v35  ;;  %v4120_v32 = vshrl.u32 %v11375_v19, 16  ;;  %v4129_v58 = vshll.u32 %v11369_v27, 16 }
 0x146   : > { %v11554_v9 = vsel %vm9711_vm4, %v8165_v6, %v6062_v56  ;;  %v6064_v63 = vrot.slane %v6062_v56, 4  ;;  %v4115_v12 = vshll.u32 %v11492_v48, 16  ;;  %v4084_v14 = vsel %vm9756_vm6, %v4079_v1, %v11485_v13  ;;  %v11571_v48 = vld [vmem:[%s9718_s25 + $0xa4] sm:$0x1] }
 0x147   : > { %9034 = vmatmul.mubr.msk.bf16.gmra.mrb[40].mxu1 %vm666_vm2, %v13333_v21  ;;  %v4101_v21 = vrot.slane %v4099_v15, 5  ;;  %v4123_v15 = vshll.u32 %v11375_v19, 16  ;;  %v4112_v23 = vor.u32 %v4111_v11, %v11531_v53  ;;  %v4094_v60 = vsel %vm9756_vm6, %v4089_v62, %v4093_v16 }
 0x148   : > { %9037 = vmatprep.mubr.msk.bf16.mxu1 %vm666_vm2, %v13334_v36  ;;  %v6065_v54 = vrot.slane %v11546_v41, 5  ;;  %v6069_v50 = vrot.slane %v11386_v49, 5  ;;  %v13335_v35 = vcombine.low %v11319_v46, %v11331_v28  ;;  %v8182_v36 = vcombine.low %v6056_v20, %v6059_v47  ;;  %v8151_v20 = vld [vmem:[%s9718_s25 + $0xa8] sm:$0xe] }
 0x149   : > { %v4102_v22 = vor.u32 %v4101_v21, %v4098_v5  ;;  %v4122_v0 = vrot.slane %v4120_v32, 4  ;;  %v4144_v13 = vshrl.u32 %v11399_v52, 16  ;;  %v4147_v57 = vshll.u32 %v11399_v52, 16 }
 0x14a   : > { %8894 = vmatmul.mubr.msk.bf16.gmra.mrb[36].mxu0 %vm666_vm2, %v11301_v7  ;;  %v4125_v21 = vrot.slane %v4123_v15, 5  ;;  %v11576_v6 = vrot.slane %v4129_v58, 5  ;;  %v4135_v56 = vrot.slane %v4133_v26, 4  ;;  %v4113_v46 = vrot.slane %v4112_v23, 4  ;;  %v11592_v15 = vld [vmem:[%s9718_s25 + $0xb0] sm:$0x1] }
 0x14b   : > { %8897 = vmatprep.mubr.msk.bf16.mxu0 %vm666_vm2, %v11313_v33  ;;  %v4103_v5 = vrot.slane %v4102_v22, 4  ;;  %v4117_v28 = vrot.slane %v4115_v12, 5  ;;  %v8166_v11 = vrot.slane %v8150_v30, 9  ;;  %v6076_v1 = vrot.slane %v11396_v18, 5 }
 0x14c   : > { %v6071_v62 = vrot.slane %v6069_v50, 4  ;;  %v6072_v16 = vrot.slane %v11571_v48, 5  ;;  %v4157_v47 = vshrl.u32 %v11386_v49, 16  ;;  %v11587_v32 = vcombine.low %v4084_v14, %v4094_v60 }
 0x14d   : > { %v6066_v22 = vsel %vm9711_vm4, %v6064_v63, %v6065_v54  ;;  %v4146_v58 = vrot.slane %v4144_v13, 4  ;;  %v4149_v26 = vrot.slane %v4147_v57, 5  ;;  %v4108_v23 = vsel %vm9756_vm6, %v4103_v5, %v11531_v53 }
 0x14e   : > { %v4126_v12 = vor.u32 %v4125_v21, %v4122_v0  ;;  %v4136_v30 = vor.u32 %v4135_v56, %v11576_v6  ;;  %v4118_v14 = vsel %vm9756_vm6, %v4113_v46, %v4117_v28  ;;  %v6070_v60 = vsel %vm9711_vm4, %v8166_v11, %v6069_v50 }
 0x14f   : > { %9038 = vmatmul.mubr.msk.bf16.gmra.mrb[44].mxu1 %vm666_vm2, %v13335_v35  ;;  %v4139_v35 = vshll.u32 %v11546_v41, 16  ;;  %v8167_v63 = vrot.slane %v8151_v20, 9  ;;  %v6078_v54 = vrot.slane %v6076_v1, 4  ;;  %v6073_v13 = vsel %vm9711_vm4, %v6071_v62, %v6072_v16 }
 0x150   : > { %9041 = vmatprep.mubr.msk.bf16.mxu1 %vm666_vm2, %v8180_v42  ;;  %v4153_v42 = vshll.u32 %v11386_v49, 16  ;;  %v6079_v57 = vrot.slane %v11592_v15, 5  ;;  %v4159_v53 = vrot.slane %v4157_v47, 4  ;;  %v4150_v0 = vor.u32 %v4149_v26, %v4146_v58  ;;  %v11629_v47 = vld [vmem:[%s9718_s25 + $0xbc] sm:$0x1] }
 0x151   : > { %v4168_v41 = vshrl.u32 %v11410_v2, 16  ;;  %v4171_v5 = vshll.u32 %v11410_v2, 16  ;;  %v4177_v50 = vshll.u32 %v11396_v18, 16  ;;  %v8183_v21 = vcombine.low %v11554_v9, %v6066_v22  ;;  %v8152_v22 = vld [vmem:[%s9718_s25 + $0xb4] sm:$0xe] }
 0x152   : > { %8898 = vmatmul.mubr.msk.bf16.gmra.mrb[40].mxu0 %vm666_vm2, %v11327_v44  ;;  %v11606_v49 = vrot.slane %v4153_v42, 5  ;;  %v11614_v56 = vcombine.low %v4108_v23, %v4118_v14  ;;  %v4127_v46 = vrot.slane %v4126_v12, 4  ;;  %v4141_v28 = vrot.slane %v4139_v35, 5 }
 0x153   : > { %8901 = vmatprep.mubr.msk.bf16.mxu0 %vm666_vm2, %v11474_v31  ;;  %v4137_v11 = vrot.slane %v4136_v30, 4  ;;  %v4181_v62 = vshrl.u32 %v11396_v18, 16  ;;  %v6083_v16 = vrot.slane %v11413_v8, 5  ;;  %v8184_v20 = vcombine.low %v6070_v60, %v6073_v13 }
 0x154   : > { %v6080_v9 = vsel %vm9711_vm4, %v6078_v54, %v6079_v57  ;;  %v4163_v42 = vshll.u32 %v11571_v48, 16  ;;  %v4170_v58 = vrot.slane %v4168_v41, 4  ;;  %v4173_v26 = vrot.slane %v4171_v5, 5 }
 0x155   : > { %v11634_v23 = vrot.slane %v4177_v50, 5  ;;  %v4192_v12 = vshrl.u32 %v11416_v4, 16  ;;  %v4195_v30 = vshll.u32 %v11416_v4, 16  ;;  %v4201_v35 = vshll.u32 %v11413_v8, 16 }
 0x156   : > { %v4205_v48 = vshrl.u32 %v11413_v8, 16  ;;  %v4183_v14 = vrot.slane %v4181_v62, 4  ;;  %v8168_v60 = vrot.slane %v8152_v22, 9  ;;  %v6086_v54 = vrot.slane %v11629_v47, 5  ;;  %v7916_v22 = vld [vmem:[%s9718_s25 + $0xc8] sm:$0x1] }
 0x157   : > { %9042 = vmatmul.mubr.msk.bf16.gmra.mrb[48].mxu1 %vm666_vm2, %v8181_v29  ;;  %v11618_v29 = vsel %vm9711_vm4, %v8167_v63, %v6076_v1  ;;  %v4151_v1 = vrot.slane %v4150_v0, 4  ;;  %v6085_v63 = vrot.slane %v6083_v16, 4  ;;  %v4132_v13 = vsel %vm9756_vm6, %v4127_v46, %v11576_v6  ;;  %v8153_v8 = vld [vmem:[%s9718_s25 + $0xc0] sm:$0xe] }
 0x158   : > { %9045 = vmatprep.mubr.msk.bf16.mxu1 %vm666_vm2, %v8182_v36  ;;  %v4160_v36 = vor.u32 %v4159_v53, %v11606_v49  ;;  %v4165_v53 = vrot.slane %v4163_v42, 5  ;;  %v6090_v0 = vrot.slane %v11427_v55, 5  ;;  %v4142_v41 = vsel %vm9756_vm6, %v4137_v11, %v4141_v28 }
 0x159   : > { %v8185_v5 = vcombine.low %v11618_v29, %v6080_v9  ;;  %v4174_v50 = vor.u32 %v4173_v26, %v4170_v58  ;;  %v4187_v62 = vshll.u32 %v11592_v15, 16  ;;  %v4194_v4 = vrot.slane %v4192_v12, 4 }
 0x15a   : > { %8902 = vmatmul.mubr.msk.bf16.gmra.mrb[44].mxu0 %vm666_vm2, %v11508_v17  ;;  %v4161_v57 = vrot.slane %v4160_v36, 4  ;;  %v4197_v6 = vrot.slane %v4195_v30, 5  ;;  %v4203_v46 = vrot.slane %v4201_v35, 5  ;;  %v4207_v36 = vrot.slane %v4205_v48, 4 }
 0x15b   : > { %8905 = vmatprep.mubr.msk.bf16.mxu0 %vm666_vm2, %v11539_v39  ;;  %v4184_v42 = vor.u32 %v4183_v14, %v11634_v23  ;;  %v6084_v28 = vsel %vm9711_vm4, %v8168_v60, %v6083_v16  ;;  %v6087_v15 = vsel %vm9711_vm4, %v6085_v63, %v6086_v54  ;;  %v8169_v29 = vrot.slane %v8153_v8, 9 }
 0x15c   : > { %v4166_v11 = vsel %vm9756_vm6, %v4161_v57, %v4165_v53  ;;  %v6093_v9 = vrot.slane %v7916_v22, 5  ;;  %v4225_v16 = vshll.u32 %v11427_v55, 16  ;;  %v4229_v58 = vshrl.u32 %v11427_v55, 16 }
 0x15d   : > { %v8186_v26 = vcombine.low %v6084_v28, %v6087_v15  ;;  %v4198_v12 = vor.u32 %v4197_v6, %v4194_v4  ;;  %v4208_v30 = vor.u32 %v4207_v36, %v4203_v46  ;;  %v4211_v35 = vshll.u32 %v11629_v47, 16 }
 0x15e   : > { %v11672_v48 = vcombine.low %v4132_v13, %v4142_v41  ;;  %v4189_v8 = vrot.slane %v4187_v62, 5  ;;  %v4175_v60 = vrot.slane %v4174_v50, 4  ;;  %v4185_v63 = vrot.slane %v4184_v42, 4 }
 0x15f   : > { %9046 = vmatmul.mubr.msk.bf16.gmra.mrb[52].mxu1 %vm666_vm2, %v8183_v21  ;;  %v4156_v21 = vsel %vm9756_vm6, %v4151_v1, %v11606_v49  ;;  %v4216_v49 = vshrl.u32 %v11430_v45, 16  ;;  %v4219_v1 = vshll.u32 %v11430_v45, 16  ;;  %v6091_v54 = vsel %vm9711_vm4, %v8169_v29, %v6090_v0 }
 0x160   : > { %9049 = vmatprep.mubr.msk.bf16.mxu1 %vm666_vm2, %v8184_v20  ;;  %v6092_v20 = vrot.slane %v6090_v0, 4  ;;  %v11674_v14 = vcombine.low %v4156_v21, %v4166_v11  ;;  %v4227_v55 = vrot.slane %v4225_v16, 5  ;;  %v4231_v28 = vrot.slane %v4229_v58, 4  ;;  %v8053_v58 = vld [vmem:[%s9718_s25 + $0x1c] sm:$0xf] }
 0x161   : > { %v4218_v57 = vrot.slane %v4216_v49, 4  ;;  %v4221_v53 = vrot.slane %v4219_v1, 5  ;;  %v4199_v47 = vrot.slane %v4198_v12, 4  ;;  %v4209_v13 = vrot.slane %v4208_v30, 4  ;;  %v9644_v49 = vld [vmem:[%s9718_s25 + $0x10] sm:$0xf] }
 0x162   : > { %8906 = vmatmul.mubr.msk.bf16.gmra.mrb[48].mxu0 %vm666_vm2, %v11587_v32  ;;  %v6094_v4 = vsel %vm9711_vm4, %v6092_v20, %v6093_v9  ;;  %v4213_v41 = vrot.slane %v4211_v35, 5  ;;  %v4180_v0 = vsel %vm9756_vm6, %v4175_v60, %v11634_v23  ;;  %v4232_v6 = vor.u32 %v4231_v28, %v4227_v55  ;;  %v9645_v1 = vld [vmem:[%s9718_s25 + $0xc] sm:$0xf]  ;;  %v8054_v30 = vld [vmem:[%s9718_s25 + $0x20] sm:$0x1] }
 0x163   : > { %8909 = vmatprep.mubr.msk.bf16.mxu0 %vm666_vm2, %v11614_v56  ;;  %v8187_v50 = vcombine.low %v6091_v54, %v6094_v4  ;;  %v4222_v62 = vor.u32 %v4221_v53, %v4218_v57  ;;  %v4235_v36 = vshll.u32 %v7916_v22, 16  ;;  %v4204_v21 = vsel %vm9756_vm6, %v4199_v47, %v4203_v46  ;;  %v11743_v54 = vld [vmem:[%s13157_s1 + $0x58] sm:$0xff]   ;;  %v8057_v4 = vld [vmem:[%s9718_s25 + $0x2c] sm:$0x1] }
 0x164   : > { %v4214_v42 = vsel %vm9756_vm6, %v4209_v13, %v4213_v41  ;;  %v4233_v29 = vrot.slane %v4232_v6, 4  ;;  %v7952_v16 = vcombine.low %v9645_v1, %v9644_v49  ;;  %v5221_v60 = vshll.u32 %v8053_v58, 16  ;;  %13336 = vst [vmem:[#allocation11_spill] sm:$0xff] %v11743_v54  ;;  %v8244_v28 = vld [vmem:[%s9718_s25 + $0x3c] sm:$0xe]  ;;  %v13337_v13 = vld [vmem:[#allocation16_spill] sm:$0xff] }
 0x165   : > { %v11698_v23 = vcombine.low %v4204_v21, %v4214_v42  ;;  %v4223_v11 = vrot.slane %v4222_v62, 4  ;;  %v4237_v20 = vrot.slane %v4235_v36, 5  ;;  %v5231_v57 = vshll.u32 %v8054_v30, 16  ;;  %v13338_v41 = vld [vmem:[#allocation9_spill] sm:$0xff]  ;;  %v11759_v62 = vld [vmem:[%s9718_s25 + $0x40] sm:$0xf] }
 0x166   : > { %v11761_v6 = vrot.slane %v5221_v60, 5  ;;  %v11764_v21 = vld [vmem:[%s9718_s25 + $0x44] sm:$0x1]  ;;  %v6817_v42 = vrot.slane %v11759_v62, 5  ;;  %v11777_v49 = vld [vmem:[%s9718_s25 + $0x58] sm:$0xf] }
 0x167   : > { %9050 = vmatmul.mubr.msk.bf16.gmra.mrb[56].mxu1 %vm666_vm2, %v8185_v5  ;;  %v4190_v5 = vsel %vm9756_vm6, %v4185_v63, %v4189_v8  ;;  %v4228_v22 = vsel %vm9756_vm6, %v4223_v11, %v4227_v55  ;;  %v4238_v46 = vsel %vm9756_vm6, %v4233_v29, %v4237_v20  ;;  %v8052_v55 = vld [vmem:[%s9718_s25 + $0x18] sm:$0xf]  ;;  %v8055_v8 = vld [vmem:[%s9718_s25 + $0x24] sm:$0xf]  ;;  %v5225_v63 = vshrl.u32 %v8053_v58, 16 }
 0x168   : > { %9053 = vmatprep.mubr.msk.bf16.mxu1 %vm666_vm2, %v8186_v26  ;;  %v11695_v15 = vcombine.low %v4180_v0, %v4190_v5  ;;  %v11715_v9 = vcombine.low %v4228_v22, %v4238_v46  ;;  %v9647_v26 = vld [vmem:[%s9718_s25 + $0x1c] sm:$0xf]  ;;  %v5212_v35 = vshrl.u32 %v8052_v55, 16  ;;  %v5236_v53 = vshrl.u32 %v8055_v8, 16  ;;  %v11773_v20 = vld [vmem:[%s9718_s25 + $0x4c] sm:$0xf] }
 0x169   : > { %v7956_v0 = vcombine.low %v13338_v41, %v13337_v13  ;;  %v5239_v5 = vshll.u32 %v8055_v8, 16  ;;  %v5227_v36 = vrot.slane %v5225_v63, 4  ;;  %v11768_v11 = vrot.slane %v5231_v57, 5  ;;  %v8245_v30 = vld [vmem:[%s9718_s25 + $0x48] sm:$0xe] }
 0x16a   : > { %8910 = vmatmul.mubr.msk.bf16.gmra.mrb[52].mxu0 %vm666_vm2, %v11672_v48  ;;  %v11770_v29 = vrot.slane %v5236_v53, 4  ;;  %v6820_v22 = vrot.slane %v11764_v21, 5  ;;  %v11796_v8 = vld [vmem:[%s9718_s25 + $0x50] sm:$0x1]  ;;  %v8246_v63 = vld [vmem:[%s9718_s25 + $0x54] sm:$0xe] }
 0x16b   : > { %8913 = vmatprep.mubr.msk.bf16.mxu0 %vm666_vm2, %v11674_v14  ;;  %v11804_v57 = vld [vmem:[%s9718_s25 + $0x5c] sm:$0x1] }
 0x16f   : > { %9054 = vmatmul.mubr.msk.bf16.gmra.mrb[60].mxu1 %vm666_vm2, %v8187_v50  ;;  %v11756_v50 = vld [vmem:[%s9718_s25 + $0x30] sm:$0xf] }
 0x170   : > { %9059 = vmatprep.mubr.msk.bf16.mxu1 %vm666_vm2, %v11132_v61  ;;  %v11713_v61 = vld [vmem:[%s13157_s1 + $0x78] sm:$0xff]   ;;  %v5263_v41 = vshll.u32 %v11756_v50, 16 }
 0x172   : > { %8914 = vmatmul.mubr.msk.bf16.gmra.mrb[56].mxu0 %vm666_vm2, %v11695_v15 }
 0x173   : > { %8917 = vmatprep.mubr.msk.bf16.mxu0 %vm666_vm2, %v11698_v23 }
 0x177   : > { %9060 = vmatmul.mubr.msk.bf16.vlgmr.msra.gmra.mrb[32].mxu1 %vm666_vm2, %v11142_v37  ;;  %v9646_v37 = vld [vmem:[%s9718_s25 + $0x18] sm:$0xf] }
 0x178   : > { %9092 = vmatpush3.bf16.msra.mxu1 %v11340_v25  ;;  %9063 = vmatprep.mubr.msk.bf16.mxu1 %vm666_vm2, %v11211_v38  ;;  %v7953_v12 = vcombine.low %v9646_v37, %v9647_v26  ;;  %v5215_v25 = vshll.u32 %v8052_v55, 16  ;;  %v7954_v38 = vcombine.low %v11052_v51, %v11038_v10  ;;  %v8056_v51 = vld [vmem:[%s9718_s25 + $0x28] sm:$0xf]  ;;  %v6824_v55 = vrot.slane %v11773_v20, 5  ;;  %v11787_v26 = vld [vmem:[%s9718_s25 + $0x34] sm:$0xf] }
 0x179   : > { %9125 = vmatprep.subr.bf16.mxu1 %v11713_v61  ;;  %v5249_v58 = vshrl.u32 %v8056_v51, 16  ;;  %v5255_v37 = vshll.u32 %v8057_v4, 16 }
 0x17a   : > { %8918 = vmatmul.mubr.msk.bf16.gmra.mrb[60].mxu0 %vm666_vm2, %v11715_v9  ;;  %v5217_v10 = vrot.slane %v5215_v25, 5  ;;  %v5228_v25 = vor.u32 %v5227_v36, %v11761_v6  ;;  %v6826_v60 = vrot.slane %v6824_v55, 4 }
 0x17b   : > { %8923 = vmatprep.mubr.msk.bf16.mxu0 %vm666_vm2, %v7952_v16  ;;  %v6819_v16 = vrot.slane %v6817_v42, 4  ;;  %v5251_v13 = vrot.slane %v5249_v58, 4  ;;  %v13345_v58 = vld [vmem:[#allocation13_spill] sm:$0xff] }
 0x17f   : > { %9064 = vmatmul.mubr.msk.bf16.gmra.mrb[36].mxu1 %vm666_vm2, %v11301_v7  ;;  %v5214_v7 = vrot.slane %v5212_v35, 4  ;;  %v6831_v35 = vrot.slane %v11777_v49, 5 }
 0x180   : > { %9067 = vmatprep.mubr.msk.bf16.mxu1 %vm666_vm2, %v11313_v33  ;;  %v9648_v33 = vld [vmem:[%s9718_s25 + $0x34] sm:$0xf] }
 0x181   : > { %v7955_v47 = vcombine.low %v11075_v59, %v9648_v33  ;;  %v8260_v59 = vrot.slane %v8244_v28, 9  ;;  %v5218_v46 = vor.u32 %v5217_v10, %v5214_v7  ;;  %v6827_v28 = vrot.slane %v11796_v8, 5 }
 0x182   : > { %8924 = vmatmul.mubr.msk.bf16.vlgmr.msra.gmra.mrb[32].mxu0 %vm666_vm2, %v7953_v12  ;;  %v5260_v12 = vshrl.u32 %v11756_v50, 16  ;;  %v6833_v7 = vrot.slane %v6831_v35, 4  ;;  %v5241_v10 = vrot.slane %v5239_v5, 5  ;;  %v6834_v33 = vrot.slane %v11804_v57, 5 }
 0x183   : > { %8927 = vmatprep.mubr.msk.bf16.mxu0 %vm666_vm2, %v7954_v38  ;;  %8956 = vmatpush3.bf16.msra.mxu0 %v11472_v40  ;;  %v5245_v40 = vshll.u32 %v8056_v51, 16  ;;  %v11781_v1 = vsel %vm9711_vm4, %v8260_v59, %v6817_v42  ;;  %v11800_v38 = vsel %vm9711_vm4, %v6819_v16, %v6820_v22  ;;  %v11821_v36 = vsel %vm9711_vm4, %v6826_v60, %v6827_v28  ;;  %v8061_v42 = vld [vmem:[%s9718_s25 + $0x3c] sm:$0xf] }
 0x184   : > { %8989 = vmatprep.subr.bf16.mxu0 %v11743_v54  ;;  %13339 = vst [vmem:[#allocation16_spill] sm:$0xff] %v11781_v1  ;;  %13340 = vst [vmem:[#allocation9_spill] sm:$0xff] %v11800_v38  ;;  %v11827_v5 = vrot.slane %v5218_v46, 4  ;;  %v5269_v59 = vshll.u32 %v11787_v26, 16  ;;  %v11835_v50 = vsel %vm9711_vm4, %v6833_v7, %v6834_v33  ;;  %v11839_v22 = vrot.slane %v5255_v37, 5  ;;  %v13358_v1 = vld [vmem:[#allocation3_spill] sm:$0xff] }
 0x185   : > { %v11810_v51 = vrot.slane %v5245_v40, 5  ;;  %13342 = vst [vmem:[#allocation20_spill] sm:$0xff] %v11821_v36  ;;  %13344 = vst [vmem:[#allocation22_spill] sm:$0xff] %v11835_v50  ;;  %v11837_v40 = vrot.slane %v5228_v25, 4  ;;  %v11841_v16 = vrot.slane %v5260_v12, 4  ;;  %v5273_v60 = vshrl.u32 %v11787_v26, 16 }
 0x186   : > { %v11844_v46 = vld [vmem:[%s9718_s25 + $0x64] sm:$0xf]  ;;  %v11853_v25 = vld [vmem:[%s9718_s25 + $0x68] sm:$0x1]  ;;  %v11856_v37 = vld [vmem:[%s9718_s25 + $0x70] sm:$0xf] }
 0x187   : > { %9068 = vmatmul.mubr.msk.bf16.gmra.mrb[40].mxu1 %vm666_vm2, %v11327_v44  ;;  %v8261_v44 = vrot.slane %v8245_v30, 9  ;;  %v13346_v30 = vld [vmem:[#allocation17_spill] sm:$0xff]  ;;  %v6838_v12 = vrot.slane %v11844_v46, 5  ;;  %v5284_v28 = vshrl.u32 %v8061_v42, 16  ;;  %v8247_v7 = vld [vmem:[%s9718_s25 + $0x60] sm:$0xe] }
 0x188   : > { %9071 = vmatprep.mubr.msk.bf16.mxu1 %vm666_vm2, %v11474_v31  ;;  %v8262_v31 = vrot.slane %v8246_v63, 9  ;;  %v5252_v63 = vor.u32 %v5251_v13, %v11810_v51  ;;  %v5287_v26 = vshll.u32 %v8061_v42, 16  ;;  %v13351_v36 = vld [vmem:[#allocation15_spill] sm:$0xff]  ;;  %v13360_v54 = vld [vmem:[#allocation5_spill] sm:$0xff] }
 0x189   : > { %v11814_v4 = vsel %vm9711_vm4, %v8261_v44, %v6824_v55  ;;  %v5242_v44 = vor.u32 %v5241_v10, %v11770_v29  ;;  %v6845_v29 = vrot.slane %v11856_v37, 5  ;;  %v8263_v10 = vrot.slane %v8247_v7, 9  ;;  %v11872_v55 = vld [vmem:[%s9718_s25 + $0x38] sm:$0x1] }
 0x18a   : > { %8928 = vmatmul.mubr.msk.bf16.gmra.mrb[36].mxu0 %vm666_vm2, %v7955_v47  ;;  %13341 = vst [vmem:[#allocation19_spill] sm:$0xff] %v11814_v4  ;;  %v11825_v47 = vsel %vm9711_vm4, %v8262_v31, %v6831_v35  ;;  %v7957_v35 = vcombine.low %v13346_v30, %v13345_v58  ;;  %v11863_v31 = vld [vmem:[%s9718_s25 + $0x74] sm:$0x1]  ;;  %v6840_v33 = vrot.slane %v6838_v12, 4  ;;  %v6841_v58 = vrot.slane %v11853_v25, 5  ;;  %13347 = vst [vmem:[#allocation13_spill] sm:$0xff] %v11872_v55 }
 0x18b   : > { %8931 = vmatprep.mubr.msk.bf16.mxu0 %vm666_vm2, %v7956_v0  ;;  %13343 = vst [vmem:[#allocation21_spill] sm:$0xff] %v11825_v47  ;;  %v8248_v30 = vld [vmem:[%s9718_s25 + $0x6c] sm:$0xe]  ;;  %v6847_v0 = vrot.slane %v6845_v29, 4  ;;  %v6848_v53 = vrot.slane %v11863_v31, 5  ;;  %v11877_v50 = vrot.slane %v5242_v44, 4  ;;  %v11881_v42 = vsel %vm9711_vm4, %v8263_v10, %v6838_v12 }
 0x18c   : > { %v8264_v13 = vrot.slane %v8248_v30, 9  ;;  %13348 = vst [vmem:[#allocation17_spill] sm:$0xff] %v11881_v42  ;;  %v11885_v7 = vsel %vm9711_vm4, %v6840_v33, %v6841_v58  ;;  %v13350_v47 = vld [vmem:[#allocation12_spill] sm:$0xff]  ;;  %v11891_v4 = vrot.slane %v5269_v59, 5  ;;  %v11904_v10 = vrot.slane %v5252_v63, 4 }
 0x18d   : > { %13349 = vst [vmem:[#allocation23_spill] sm:$0xff] %v11885_v7  ;;  %v13352_v30 = vcombine.low %v13350_v47, %v13351_v36  ;;  %v11902_v12 = vsel %vm9711_vm4, %v6847_v0, %v6848_v53  ;;  %v5279_v36 = vshll.u32 %v11872_v55, 16  ;;  %v5297_v47 = vshrl.u32 %v11759_v62, 16  ;;  %v11919_v53 = vld [vmem:[%s9718_s25 + $0x7c] sm:$0xf] }
 0x18e   : > { %v11898_v44 = vsel %vm9711_vm4, %v8264_v13, %v6845_v29  ;;  %13354 = vst [vmem:[#allocation15_spill] sm:$0xff] %v11902_v12  ;;  %v11910_v33 = vrot.slane %v5273_v60, 4  ;;  %v11912_v58 = vrot.slane %v5284_v28, 4  ;;  %v11914_v29 = vrot.slane %v5287_v26, 5  ;;  %v11922_v63 = vld [vmem:[%s9718_s25 + $0x80] sm:$0x1] }
 0x18f   : > { %9072 = vmatmul.mubr.msk.bf16.gmra.mrb[44].mxu1 %vm666_vm2, %v11508_v17  ;;  %v5293_v17 = vshll.u32 %v11759_v62, 16  ;;  %13353 = vst [vmem:[#allocation12_spill] sm:$0xff] %v11898_v44  ;;  %13355 = vst [vmem:[#allocation24_spill] sm:$0xff] %v11922_v63  ;;  %v6852_v62 = vrot.slane %v11919_v53, 5  ;;  %v8249_v59 = vld [vmem:[%s9718_s25 + $0x78] sm:$0xe] }
 0x190   : > { %9075 = vmatprep.mubr.msk.bf16.mxu1 %vm666_vm2, %v11539_v39  ;;  %v5265_v39 = vrot.slane %v5263_v41, 5  ;;  %v11942_v12 = vrot.slane %v5297_v47, 4  ;;  %v8265_v44 = vrot.slane %v8249_v59, 9  ;;  %v6855_v7 = vrot.slane %v11922_v63, 5  ;;  %v8250_v42 = vld [vmem:[%s9718_s25 + $0x84] sm:$0xe] }
 0x191   : > { %v11916_v13 = vrot.slane %v5293_v17, 5  ;;  %v11936_v17 = vld [vmem:[%s9718_s25 + $0x8c] sm:$0x1]  ;;  %v5317_v60 = vshll.u32 %v11773_v20, 16  ;;  %v8266_v38 = vrot.slane %v8250_v42, 9  ;;  %v5321_v47 = vshrl.u32 %v11773_v20, 16 }
 0x192   : > { %8932 = vmatmul.mubr.msk.bf16.gmra.mrb[40].mxu0 %vm666_vm2, %v7957_v35  ;;  %v8064_v35 = vld [vmem:[%s9718_s25 + $0x48] sm:$0xf]  ;;  %v5266_v28 = vor.u32 %v5265_v39, %v11841_v16  ;;  %13356 = vst [vmem:[#allocation25_spill] sm:$0xff] %v11936_v17  ;;  %v6862_v39 = vrot.slane %v11936_v17, 5  ;;  %v11955_v59 = vsel %vm9711_vm4, %v8265_v44, %v6852_v62  ;;  %v13361_v63 = vld [vmem:[#allocation4_spill] sm:$0xff] }
 0x193   : > { %8935 = vmatprep.mubr.msk.bf16.mxu0 %vm666_vm2, %v13352_v30  ;;  %v5308_v0 = vshrl.u32 %v8064_v35, 16  ;;  %v11925_v30 = vld [vmem:[%s9718_s25 + $0x88] sm:$0xf]  ;;  %v5311_v26 = vshll.u32 %v8064_v35, 16  ;;  %v13357_v35 = vld [vmem:[#allocation6_spill] sm:$0xff]  ;;  %v13362_v17 = vcombine.low %v13360_v54, %v13361_v63  ;;  %v5234_v54 = vsel %vm9756_vm6, %v11837_v40, %v11768_v11 }
 0x194   : > { %v6859_v41 = vrot.slane %v11925_v30, 5  ;;  %v13359_v55 = vcombine.low %v13357_v35, %v13358_v1  ;;  %v8067_v63 = vld [vmem:[%s9718_s25 + $0x54] sm:$0xf]  ;;  %v5303_v11 = vshll.u32 %v11764_v21, 16  ;;  %v11995_v40 = vrot.slane %v5317_v60, 5 }
 0x195   : > { %v5313_v1 = vrot.slane %v5311_v26, 5  ;;  %v5323_v26 = vrot.slane %v5321_v47, 4  ;;  %v5300_v21 = vor.u32 %v11942_v12, %v11916_v13  ;;  %v12017_v60 = vld [vmem:[%s9718_s25 + $0xa4] sm:$0x1]  ;;  %v5335_v47 = vshll.u32 %v8067_v63, 16 }
 0x196   : > { %v6861_v16 = vrot.slane %v6859_v41, 4  ;;  %v11969_v20 = vsel %vm9711_vm4, %v8266_v38, %v6859_v41  ;;  %v5258_v41 = vsel %vm9756_vm6, %v11904_v10, %v11839_v22  ;;  %v12008_v22 = vld [vmem:[%s9718_s25 + $0xa0] sm:$0xf] }
 0x197   : > { %9076 = vmatmul.mubr.msk.bf16.gmra.mrb[48].mxu1 %vm666_vm2, %v11587_v32  ;;  %v6854_v32 = vrot.slane %v6852_v62, 4  ;;  %v11992_v62 = vrot.slane %v5279_v36, 5 }
 0x198   : > { %9079 = vmatprep.mubr.msk.bf16.mxu1 %vm666_vm2, %v11614_v56  ;;  %v5310_v56 = vrot.slane %v5308_v0, 4  ;;  %v11973_v44 = vsel %vm9711_vm4, %v6861_v16, %v6862_v39  ;;  %v11983_v0 = vrot.slane %v5266_v28, 4  ;;  %v5290_v28 = vor.u32 %v11914_v29, %v11912_v58  ;;  %v8251_v58 = vld [vmem:[%s9718_s25 + $0x90] sm:$0xe] }
 0x199   : > { %v11959_v42 = vsel %vm9711_vm4, %v6854_v32, %v6855_v7  ;;  %13363 = vst [vmem:[#allocation6_spill] sm:$0xff] %v11973_v44  ;;  %v5248_v7 = vsel %vm9756_vm6, %v11877_v50, %v11810_v51  ;;  %v11998_v51 = vld [vmem:[%s9718_s25 + $0x94] sm:$0xf]  ;;  %v5276_v50 = vor.u32 %v11910_v33, %v11891_v4  ;;  %v5327_v33 = vshll.u32 %v11796_v8, 16 }
 0x19a   : > { %8936 = vmatmul.mubr.msk.bf16.gmra.mrb[44].mxu0 %vm666_vm2, %v13359_v55  ;;  %v6866_v10 = vrot.slane %v11998_v51, 5  ;;  %v5314_v36 = vor.u32 %v5313_v1, %v5310_v56  ;;  %v6873_v29 = vrot.slane %v12008_v22, 5  ;;  %v5332_v32 = vshrl.u32 %v8067_v63, 16  ;;  %v13364_v56 = vld [vmem:[#allocation8_spill] sm:$0xff]  ;;  %v13365_v1 = vld [vmem:[#allocation18_spill] sm:$0xff] }
 0x19b   : > { %8939 = vmatprep.mubr.msk.bf16.mxu0 %vm666_vm2, %v13362_v17  ;;  %v12005_v17 = vld [vmem:[%s9718_s25 + $0x98] sm:$0x1]  ;;  %v8267_v16 = vrot.slane %v8251_v58, 9  ;;  %v6876_v8 = vrot.slane %v12017_v60, 5  ;;  %v13366_v55 = vcombine.low %v13364_v56, %v13365_v1  ;;  %v5277_v44 = vrot.slane %v5276_v50, 4 }
 0x19c   : > { %v6868_v39 = vrot.slane %v6866_v10, 4  ;;  %v6869_v35 = vrot.slane %v12005_v17, 5  ;;  %v6875_v12 = vrot.slane %v6873_v29, 4  ;;  %v12043_v56 = vrot.slane %v5303_v11, 5  ;;  %v8070_v11 = vld [vmem:[%s9718_s25 + $0x60] sm:$0xf] }
 0x19d   : > { %v12033_v58 = vsel %vm9711_vm4, %v8267_v16, %v6866_v10  ;;  %v12055_v10 = vrot.slane %v5290_v28, 4  ;;  %v12072_v28 = vld [vmem:[%s9718_s25 + $0xac] sm:$0xf] }
 0x19e   : > { %v12037_v63 = vsel %vm9711_vm4, %v6868_v39, %v6869_v35  ;;  %v12064_v39 = vrot.slane %v5314_v36, 4  ;;  %v5341_v35 = vshll.u32 %v11777_v49, 16 }
 0x19f   : > { %9080 = vmatmul.mubr.msk.bf16.gmra.mrb[52].mxu1 %vm666_vm2, %v11672_v48  ;;  %v8252_v48 = vld [vmem:[%s9718_s25 + $0x9c] sm:$0xe] }
 0x1a0   : > { %9083 = vmatprep.mubr.msk.bf16.mxu1 %vm666_vm2, %v11674_v14  ;;  %v8268_v38 = vrot.slane %v8252_v48, 9  ;;  %v5324_v14 = vor.u32 %v5323_v26, %v11995_v40  ;;  %v13367_v48 = vcombine.low %v11372_v3, %v11366_v34  ;;  %v12053_v26 = vsel %vm9711_vm4, %v6875_v12, %v6876_v8 }
 0x1a1   : > { %13368 = vst [vmem:[#allocation3_spill] sm:$0xff] %v12053_v26  ;;  %v12057_v34 = vrot.slane %v5300_v21, 4  ;;  %v12059_v3 = vrot.slane %v5327_v33, 5  ;;  %v13369_v21 = vsel %vm9756_vm6, %v11827_v5, %v11761_v6  ;;  %v12081_v12 = vcombine.low %v5248_v7, %v5258_v41  ;;  %v12103_v7 = vld [vmem:[%s9718_s25 + $0xbc] sm:$0x1] }
 0x1a2   : > { %8940 = vmatmul.mubr.msk.bf16.gmra.mrb[48].mxu0 %vm666_vm2, %v13366_v55  ;;  %v12049_v50 = vsel %vm9711_vm4, %v8268_v38, %v6873_v29  ;;  %v12066_v38 = vrot.slane %v5332_v32, 4  ;;  %v12068_v29 = vrot.slane %v5335_v47, 5  ;;  %v12079_v33 = vcombine.low %v13369_v21, %v5234_v54  ;;  %v12086_v32 = vld [vmem:[%s9718_s25 + $0xb0] sm:$0x1]  ;;  %v12089_v47 = vld [vmem:[%s9718_s25 + $0xb8] sm:$0xf] }
 0x1a3   : > { %8943 = vmatprep.mubr.msk.bf16.mxu0 %vm666_vm2, %v13367_v48  ;;  %v12083_v36 = vrot.slane %v5324_v14, 4  ;;  %v6880_v8 = vrot.slane %v12072_v28, 5  ;;  %v5272_v6 = vsel %vm9756_vm6, %v11983_v0, %v11891_v4  ;;  %v5282_v5 = vsel %vm9756_vm6, %v5277_v44, %v11992_v62  ;;  %v8253_v41 = vld [vmem:[%s9718_s25 + $0xa8] sm:$0xe]  ;;  %v8254_v4 = vld [vmem:[%s9718_s25 + $0xb4] sm:$0xe] }
 0x1a4   : > { %v5345_v54 = vshrl.u32 %v11777_v49, 16  ;;  %v6887_v1 = vrot.slane %v12089_v47, 5  ;;  %v8269_v14 = vrot.slane %v8253_v41, 9  ;;  %v6883_v21 = vrot.slane %v12086_v32, 5 }
 0x1a5   : > { %v6882_v48 = vrot.slane %v6880_v8, 4  ;;  %v5359_v0 = vshll.u32 %v8070_v11, 16  ;;  %v8270_v16 = vrot.slane %v8254_v4, 9  ;;  %v6890_v49 = vrot.slane %v12103_v7, 5  ;;  %v13371_v4 = vld [vmem:[#allocation7_spill] sm:$0xff] }
 0x1a6   : > { %v6889_v44 = vrot.slane %v6887_v1, 4  ;;  %v13370_v62 = vcombine.low %v11375_v19, %v11369_v27  ;;  %v12116_v55 = vrot.slane %v5341_v35, 5  ;;  %v12121_v41 = vsel %vm9711_vm4, %v8269_v14, %v6880_v8 }
 0x1a7   : > { %9084 = vmatmul.mubr.msk.bf16.gmra.mrb[56].mxu1 %vm666_vm2, %v11695_v15  ;;  %v5356_v15 = vshrl.u32 %v8070_v11, 16  ;;  %v12125_v11 = vsel %vm9711_vm4, %v6882_v48, %v6883_v21  ;;  %v13372_v26 = vcombine.low %v11399_v52, %v13371_v4  ;;  %v5347_v27 = vrot.slane %v5345_v54, 4  ;;  %v8073_v54 = vld [vmem:[%s9718_s25 + $0x6c] sm:$0xf]  ;;  %v12157_v21 = vld [vmem:[%s9718_s25 + $0xc4] sm:$0xf] }
 0x1a8   : > { %9087 = vmatprep.mubr.msk.bf16.mxu1 %vm666_vm2, %v11698_v23  ;;  %v5365_v23 = vshll.u32 %v11844_v46, 16  ;;  %v12135_v35 = vsel %vm9711_vm4, %v8270_v16, %v6887_v1  ;;  %v12139_v8 = vsel %vm9711_vm4, %v6889_v44, %v6890_v49  ;;  %v12141_v14 = vcombine.low %v5272_v6, %v5282_v5 }
 0x1a9   : > { %13373 = vst [vmem:[#allocation5_spill] sm:$0xff] %v12135_v35  ;;  %13374 = vst [vmem:[#allocation4_spill] sm:$0xff] %v12139_v8  ;;  %v5296_v52 = vsel %vm9756_vm6, %v12055_v10, %v11916_v13  ;;  %v5351_v1 = vshll.u32 %v11804_v57, 16  ;;  %v5358_v6 = vrot.slane %v5356_v15, 4  ;;  %v5361_v5 = vrot.slane %v5359_v0, 5 }
 0x1aa   : > { %8944 = vmatmul.mubr.msk.bf16.gmra.mrb[52].mxu0 %vm666_vm2, %v13370_v62  ;;  %v5369_v48 = vshrl.u32 %v11844_v46, 16  ;;  %v5320_v13 = vsel %vm9756_vm6, %v12064_v39, %v11995_v40  ;;  %v12165_v10 = vrot.slane %v5365_v23, 5  ;;  %v12171_v57 = vld [vmem:[%s9718_s25 + $0xd0] sm:$0xf]  ;;  %v6894_v15 = vrot.slane %v12157_v21, 5 }
 0x1ab   : > { %8947 = vmatprep.mubr.msk.bf16.mxu0 %vm666_vm2, %v13372_v26  ;;  %v5306_v26 = vsel %vm9756_vm6, %v12057_v34, %v12043_v56  ;;  %v5338_v56 = vor.u32 %v12068_v29, %v12066_v38  ;;  %v12168_v34 = vld [vmem:[%s9718_s25 + $0xc8] sm:$0x1]  ;;  %v5330_v46 = vsel %vm9756_vm6, %v12083_v36, %v12059_v3  ;;  %v5348_v40 = vor.u32 %v5347_v27, %v12116_v55  ;;  %v12182_v38 = vld [vmem:[%s9718_s25 + $0xd4] sm:$0x1]  ;;  %v8255_v29 = vld [vmem:[%s9718_s25 + $0xc0] sm:$0xe] }
 0x1ac   : > { %v5380_v39 = vshrl.u32 %v8073_v54, 16  ;;  %v6901_v0 = vrot.slane %v12171_v57, 5  ;;  %v5383_v44 = vshll.u32 %v8073_v54, 16  ;;  %v8271_v49 = vrot.slane %v8255_v29, 9  ;;  %v8256_v23 = vld [vmem:[%s9718_s25 + $0xcc] sm:$0xe] }
 0x1ad   : > { %v6896_v62 = vrot.slane %v6894_v15, 4  ;;  %v5371_v4 = vrot.slane %v5369_v48, 4  ;;  %v8272_v16 = vrot.slane %v8256_v23, 9  ;;  %v6904_v36 = vrot.slane %v12182_v38, 5  ;;  %v13376_v29 = vld [vmem:[#allocation14_spill] sm:$0xff] }
 0x1ae   : > { %v6903_v3 = vrot.slane %v6901_v0, 4  ;;  %v13375_v27 = vcombine.low %v11410_v2, %v11396_v18  ;;  %v12195_v19 = vrot.slane %v5338_v56, 4  ;;  %v12197_v8 = vrot.slane %v5351_v1, 5  ;;  %v13377_v23 = vld [vmem:[#allocation10_spill] sm:$0xff] }
 0x1af   : > { %9088 = vmatmul.mubr.msk.bf16.gmra.mrb[60].mxu1 %vm666_vm2, %v11715_v9  ;;  %v6897_v9 = vrot.slane %v12168_v34, 5  ;;  %v12201_v54 = vsel %vm9711_vm4, %v8271_v49, %v6894_v15  ;;  %v13378_v35 = vcombine.low %v13376_v29, %v13377_v23  ;;  %v5375_v18 = vshll.u32 %v11853_v25, 16 }
 0x1b0   : > { %9093 = vmatprep.mubr.msk.bf16.mxu1 %vm666_vm2, %v12079_v33  ;;  %v12216_v1 = vsel %vm9711_vm4, %v8272_v16, %v6901_v0  ;;  %v12220_v56 = vsel %vm9711_vm4, %v6903_v3, %v6904_v36  ;;  %v12222_v15 = vrot.slane %v5348_v40, 4  ;;  %v5362_v49 = vor.u32 %v5361_v5, %v5358_v6  ;;  %v9616_v0 = vld [vmem:[%s9718_s25 + $0x18] sm:$0xff]  }
 0x1b1   : > { %v12205_v48 = vsel %vm9711_vm4, %v6896_v62, %v6897_v9  ;;  %13379 = vst [vmem:[#allocation8_spill] sm:$0xff] %v12216_v1  ;;  %13380 = vst [vmem:[#allocation18_spill] sm:$0xff] %v12220_v56  ;;  %v5389_v62 = vshll.u32 %v11856_v37, 16  ;;  %v5372_v9 = vor.u32 %v5371_v4, %v12165_v10  ;;  %v5385_v29 = vrot.slane %v5383_v44, 5  ;;  %v8079_v4 = vld [vmem:[%s9718_s25 + $0x84] sm:$0xf] }
 0x1b2   : > { %8948 = vmatmul.mubr.msk.bf16.gmra.mrb[56].mxu0 %vm666_vm2, %v13375_v27  ;;  %v5382_v27 = vrot.slane %v5380_v39, 4  ;;  %v5393_v16 = vshrl.u32 %v11856_v37, 16  ;;  %v12231_v23 = vcombine.low %v5296_v52, %v5306_v26  ;;  %v12233_v3 = vcombine.low %v5320_v13, %v5330_v46  ;;  %v8082_v44 = vld [vmem:[%s9718_s25 + $0x90] sm:$0xf] }
 0x1b3   : > { %8951 = vmatprep.mubr.msk.bf16.mxu0 %vm666_vm2, %v13378_v35  ;;  %v8076_v35 = vld [vmem:[%s9718_s25 + $0x78] sm:$0xf]  ;;  %v5413_v40 = vshll.u32 %v11919_v53, 16  ;;  %v5417_v36 = vshrl.u32 %v11919_v53, 16  ;;  %v5344_v37 = vsel %vm9756_vm6, %v12195_v19, %v12116_v55  ;;  %v5354_v52 = vsel %vm9756_vm6, %v12222_v15, %v12197_v8 }
 0x1b4   : > { %v5404_v6 = vshrl.u32 %v8076_v35, 16  ;;  %v5407_v5 = vshll.u32 %v8076_v35, 16  ;;  %v5363_v26 = vrot.slane %v5362_v49, 4  ;;  %v5377_v13 = vrot.slane %v5375_v18, 5  ;;  %v13381_v35 = vld [vmem:[#allocation2_spill] sm:$0xff] }
 0x1b5   : > { %v5373_v46 = vrot.slane %v5372_v9, 4  ;;  %v5386_v53 = vor.u32 %v5385_v29, %v5382_v27  ;;  %v12251_v39 = vrot.slane %v5389_v62, 5  ;;  %v13382_v25 = vcombine.low %v11430_v45, %v13381_v35 }
 0x1b6   : > { %v5428_v2 = vshrl.u32 %v8079_v4, 16  ;;  %v5431_v55 = vshll.u32 %v8079_v4, 16  ;;  %v5437_v19 = vshll.u32 %v11925_v30, 16  ;;  %v5441_v8 = vshrl.u32 %v11925_v30, 16 }
 0x1b7   : > { %9094 = vmatmul.mubr.msk.bf16.vlgmr.msra.gmra.mrb[32].mxu1 %vm666_vm2, %v12081_v12  ;;  %v5406_v18 = vrot.slane %v5404_v6, 4  ;;  %v5409_v15 = vrot.slane %v5407_v5, 5  ;;  %v12261_v49 = vrot.slane %v5413_v40, 5  ;;  %v5419_v62 = vrot.slane %v5417_v36, 4  ;;  %v9617_v6 = vld [vmem:[%s9718_s25 + $0x24] sm:$0xff]  }
 0x1b8   : > { %9126 = vmatpush3.bf16.msra.mxu1 %v11713_v61  ;;  %9097 = vmatprep.mubr.msk.bf16.mxu1 %vm666_vm2, %v12141_v14  ;;  %v5395_v61 = vrot.slane %v5393_v16, 4  ;;  %v5368_v45 = vsel %vm9756_vm6, %v5363_v26, %v12165_v10  ;;  %v5452_v9 = vshrl.u32 %v8082_v44, 16  ;;  %v5455_v27 = vshll.u32 %v8082_v44, 16 }
 0x1b9   : > { %v12267_v29 = vrot.slane %v5386_v53, 4  ;;  %v5461_v16 = vshll.u32 %v11998_v51, 16  ;;  %v5430_v5 = vrot.slane %v5428_v2, 4  ;;  %v5433_v40 = vrot.slane %v5431_v55, 5 }
 0x1ba   : > { %8952 = vmatmul.mubr.msk.bf16.gmra.mrb[60].mxu0 %vm666_vm2, %v13382_v25  ;;  %v5399_v25 = vshll.u32 %v11863_v31, 16  ;;  %v5396_v30 = vor.u32 %v5395_v61, %v12251_v39  ;;  %v12273_v36 = vrot.slane %v5437_v19, 5  ;;  %v5443_v4 = vrot.slane %v5441_v8, 4  ;;  %v9618_v31 = vld [vmem:[%s9718_s25 + $0x30] sm:$0xff]  }
 0x1bb   : > { %8957 = vmatprep.mubr.msk.bf16.mxu0 %vm666_vm2, %v9616_v0  ;;  %v5465_v0 = vshrl.u32 %v11998_v51, 16  ;;  %v5378_v10 = vsel %vm9756_vm6, %v5373_v46, %v5377_v13  ;;  %v5410_v26 = vor.u32 %v5409_v15, %v5406_v18  ;;  %v5420_v53 = vor.u32 %v5419_v62, %v12261_v49  ;;  %v13383_v61 = vld [vmem:[#allocation24_spill] sm:$0xff]  ;;  %v13384_v51 = vld [vmem:[#allocation25_spill] sm:$0xff] }
 0x1bc   : > { %v5423_v44 = vshll.u32 %v13383_v61, 16  ;;  %v5447_v2 = vshll.u32 %v13384_v51, 16  ;;  %v5454_v35 = vrot.slane %v5452_v9, 4  ;;  %v5457_v55 = vrot.slane %v5455_v27, 5  ;;  %v8085_v13 = vld [vmem:[%s9718_s25 + $0x9c] sm:$0xf] }
 0x1bd   : > { %v12285_v19 = vcombine.low %v5344_v37, %v5354_v52  ;;  %v5401_v8 = vrot.slane %v5399_v25, 5  ;;  %v12287_v56 = vrot.slane %v5461_v16, 5  ;;  %v5467_v1 = vrot.slane %v5465_v0, 4  ;;  %v8088_v27 = vld [vmem:[%s9718_s25 + $0xa8] sm:$0xf] }
 0x1be   : > { %v12291_v46 = vcombine.low %v5368_v45, %v5378_v10  ;;  %v5392_v18 = vsel %vm9756_vm6, %v12267_v29, %v12251_v39  ;;  %v5434_v15 = vor.u32 %v5433_v40, %v5430_v5  ;;  %v5444_v62 = vor.u32 %v5443_v4, %v12273_v36  ;;  %v13385_v16 = vld [vmem:[#allocation11_spill] sm:$0xff]  ;;  %v12319_v51 = vld [vmem:[%s13158_s2] ss:$0 sm:$0xff] }
 0x1bf   : > { %9098 = vmatmul.mubr.msk.bf16.gmra.mrb[36].mxu1 %vm666_vm2, %v12231_v23  ;;  %v5397_v37 = vrot.slane %v5396_v30, 4  ;;  %v5411_v52 = vrot.slane %v5410_v26, 4  ;;  %v5421_v25 = vrot.slane %v5420_v53, 4  ;;  %v5425_v9 = vrot.slane %v5423_v44, 5  ;;  %v9619_v30 = vld [vmem:[%s9718_s25 + $0x3c] sm:$0xff]   ;;  %v9620_v61 = vld [vmem:[%s9718_s25 + $0x48] sm:$0xff]  }
 0x1c0   : > { %9101 = vmatprep.mubr.msk.bf16.mxu1 %vm666_vm2, %v12233_v3  ;;  %v5449_v45 = vrot.slane %v5447_v2, 5  ;;  %v5458_v0 = vor.u32 %v5457_v55, %v5454_v35  ;;  %v5479_v10 = vshll.u32 %v8085_v13, 16  ;;  %v5468_v39 = vor.u32 %v5467_v1, %v12287_v56 }
 0x1c1   : > { %v5471_v29 = vshll.u32 %v12005_v17, 16  ;;  %v5485_v5 = vshll.u32 %v12008_v22, 16  ;;  %v5489_v40 = vshrl.u32 %v12008_v22, 16  ;;  %v5435_v4 = vrot.slane %v5434_v15, 4 }
 0x1c2   : > { %8958 = vmatmul.mubr.msk.bf16.vlgmr.msra.gmra.mrb[32].mxu0 %vm666_vm2, %v9617_v6  ;;  %v5476_v6 = vshrl.u32 %v8085_v13, 16  ;;  %v5500_v26 = vshrl.u32 %v8088_v27, 16  ;;  %v5503_v53 = vshll.u32 %v8088_v27, 16  ;;  %v5402_v44 = vsel %vm9756_vm6, %v5397_v37, %v5401_v8 }
 0x1c3   : > { %8961 = vmatprep.mubr.msk.bf16.mxu0 %vm666_vm2, %v9618_v31  ;;  %8990 = vmatpush3.bf16.msra.mxu0 %v13385_v16  ;;  %v5445_v31 = vrot.slane %v5444_v62, 4  ;;  %v5416_v17 = vsel %vm9756_vm6, %v5411_v52, %v12261_v49  ;;  %v5509_v1 = vshll.u32 %v12072_v28, 16  ;;  %v5513_v22 = vshrl.u32 %v12072_v28, 16 }
 0x1c4   : > { %v5426_v2 = vsel %vm9756_vm6, %v5421_v25, %v5425_v9  ;;  %v12325_v35 = vrot.slane %v5458_v0, 4  ;;  %v5478_v55 = vrot.slane %v5476_v6, 4  ;;  %v5481_v8 = vrot.slane %v5479_v10, 5 }
 0x1c5   : > { %v12327_v49 = vrot.slane %v5468_v39, 4  ;;  %v12329_v13 = vrot.slane %v5471_v29, 5  ;;  %v12331_v28 = vrot.slane %v5485_v5, 5  ;;  %v5491_v15 = vrot.slane %v5489_v40, 4  ;;  %v8091_v39 = vld [vmem:[%s9718_s25 + $0xb4] sm:$0xf] }
 0x1c6   : > { %v5440_v37 = vsel %vm9756_vm6, %v5435_v4, %v12273_v36  ;;  %v5450_v52 = vsel %vm9756_vm6, %v5445_v31, %v5449_v45  ;;  %v5502_v25 = vrot.slane %v5500_v26, 4  ;;  %v5505_v9 = vrot.slane %v5503_v53, 5  ;;  %v9621_v53 = vld [vmem:[%s9718_s25 + $0x54] sm:$0xff]  }
 0x1c7   : > { %9102 = vmatmul.mubr.msk.bf16.gmra.mrb[40].mxu1 %vm666_vm2, %v12285_v19  ;;  %v12341_v0 = vcombine.low %v5392_v18, %v5402_v44  ;;  %v12343_v6 = vrot.slane %v5509_v1, 5  ;;  %v5515_v10 = vrot.slane %v5513_v22, 4  ;;  %v12347_v5 = vcombine.low %v5416_v17, %v5426_v2 }
 0x1c8   : > { %9105 = vmatprep.mubr.msk.bf16.mxu1 %vm666_vm2, %v12291_v46  ;;  %v5482_v45 = vor.u32 %v5481_v8, %v5478_v55  ;;  %v5495_v40 = vshll.u32 %v12017_v60, 16  ;;  %v5464_v4 = vsel %vm9756_vm6, %v12325_v35, %v12287_v56  ;;  %v5474_v31 = vsel %vm9756_vm6, %v12327_v49, %v12329_v13  ;;  %v8094_v60 = vld [vmem:[%s9718_s25 + $0xc0] sm:$0xf] }
 0x1c9   : > { %v5492_v26 = vor.u32 %v5491_v15, %v12331_v28  ;;  %v5519_v44 = vshll.u32 %v12086_v32, 16  ;;  %v5524_v17 = vshrl.u32 %v8091_v39, 16  ;;  %v5527_v1 = vshll.u32 %v8091_v39, 16  ;;  %v9622_v56 = vld [vmem:[%s9718_s25 + $0x60] sm:$0xff]  }
 0x1ca   : > { %8962 = vmatmul.mubr.msk.bf16.gmra.mrb[36].mxu0 %vm666_vm2, %v9619_v30  ;;  %v8857_v62 = vpop.f32.mrb[0].mxu1  ;;  %v12351_v30 = vcombine.low %v5440_v37, %v5450_v52  ;;  %v5516_v2 = vor.u32 %v5515_v10, %v12343_v6  ;;  %v5533_v35 = vshll.u32 %v12089_v47, 16  ;;  %v5537_v55 = vshrl.u32 %v12089_v47, 16 }
 0x1cb   : > { %v3580_v27 = vadd.f32 %v8857_v62, %v12319_v51  ;;  %8965 = vmatprep.mubr.msk.bf16.mxu0 %vm666_vm2, %v9620_v61  ;;  %v3419_v16 = vpop.f32.mrb[1].mxu1  ;;  %v5506_v61 = vor.u32 %v5505_v9, %v5502_v25  ;;  %v5483_v32 = vrot.slane %v5482_v45, 4  ;;  %v5497_v49 = vrot.slane %v5495_v40, 5 }
 0x1cc   : > { %v3578_v36 = vadd.f32 %v12319_v51, %v3419_v16  ;;  %v8858_v29 = vpop.f32.mrb[2].mxu1  ;;  %v5548_v13 = vshrl.u32 %v8094_v60, 16  ;;  %v5493_v15 = vrot.slane %v5492_v26, 4  ;;  %v5551_v62 = vshll.u32 %v8094_v60, 16  ;;  %v8097_v26 = vld [vmem:[%s9718_s25 + $0xcc] sm:$0xf] }
 0x1cd   : > { %3646 = vrot.lane.b32.xlu1 %v3580_v27, %s9662_s28  ;;  %v3422_v18 = vpop.f32.mrb[3].mxu1  ;;  %v3581_v22 = vadd.f32 %v8858_v29, %v12319_v51  ;;  %v5557_v37 = vshll.u32 %v12157_v21, 16  ;;  %v5561_v52 = vshrl.u32 %v12157_v21, 16  ;;  %v5507_v25 = vrot.slane %v5506_v61, 4 }
 0x1ce   : > { %3642 = vrot.lane.b32.xlu0 %v3578_v36, %s9662_s28  ;;  %v3579_v8 = vadd.f32 %v12319_v51, %v3422_v18  ;;  %v5521_v9 = vrot.slane %v5519_v44, 5  ;;  %v5526_v27 = vrot.slane %v5524_v17, 4  ;;  %v5529_v16 = vrot.slane %v5527_v1, 5 }
 0x1cf   : > { %9106 = vmatmul.mubr.msk.bf16.gmra.mrb[44].mxu1 %vm666_vm2, %v12341_v0  ;;  %v5517_v36 = vrot.slane %v5516_v2, 4  ;;  %v12383_v29 = vrot.slane %v5533_v35, 5  ;;  %v5539_v21 = vrot.slane %v5537_v55, 4  ;;  %v12385_v40 = vcombine.low %v5464_v4, %v5474_v31 }
 0x1d0   : > { %9109 = vmatprep.mubr.msk.bf16.mxu1 %vm666_vm2, %v12347_v5  ;;  %v5550_v18 = vrot.slane %v5548_v13, 4  ;;  %v5553_v44 = vrot.slane %v5551_v62, 5  ;;  %v12391_v17 = vrot.slane %v5557_v37, 5  ;;  %v5563_v1 = vrot.slane %v5561_v52, 4 }
 0x1d1   : > { %3648 = vrot.lane.b32.xlu1 %v3581_v22, %s9662_s28  ;;  %v5488_v4 = vsel %vm9756_vm6, %v5483_v32, %v12331_v28  ;;  %v5498_v31 = vsel %vm9756_vm6, %v5493_v15, %v5497_v49  ;;  %v5512_v2 = vsel %vm9756_vm6, %v5507_v25, %v12343_v6  ;;  %v5543_v35 = vshll.u32 %v12103_v7, 16 }
 0x1d2   : > { %8966 = vmatmul.mubr.msk.bf16.gmra.mrb[40].mxu0 %vm666_vm2, %v9621_v53  ;;  %3644 = vrot.lane.b32.xlu0 %v3579_v8, %s9662_s28  ;;  %v8861_v47 = vpop.f32.mrb[4].mxu1  ;;  %v9624_v8 = vld [vmem:[%s9718_s25 + $0x78] sm:$0xff]   ;;  %v5522_v28 = vsel %vm9756_vm6, %v5517_v36, %v5521_v9  ;;  %v5530_v32 = vor.u32 %v5529_v16, %v5526_v27  ;;  %v5540_v49 = vor.u32 %v5539_v21, %v12383_v29  ;;  %v5572_v13 = vshrl.u32 %v8097_v26, 16 }
 0x1d3   : > { %v3584_v10 = vadd.f32 %v8861_v47, %v12319_v51  ;;  %8969 = vmatprep.mubr.msk.bf16.mxu0 %vm666_vm2, %v9622_v56  ;;  %v3435_v39 = vpop.f32.mrb[5].mxu1  ;;  %v9623_v56 = vld [vmem:[%s9718_s25 + $0x6c] sm:$0xff]   ;;  %v5575_v7 = vshll.u32 %v8097_v26, 16  ;;  %v5581_v62 = vshll.u32 %v12171_v57, 16  ;;  %v5585_v37 = vshrl.u32 %v12171_v57, 16 }
 0x1d4   : > { %v8862_v45 = vpop.f32.mrb[6].mxu1  ;;  %v3582_v6 = vadd.f32 %v12319_v51, %v3435_v39  ;;  %v5554_v47 = vor.u32 %v5553_v44, %v5550_v18  ;;  %v5564_v25 = vor.u32 %v5563_v1, %v12391_v17  ;;  %v5567_v9 = vshll.u32 %v12168_v34, 16 }
 0x1d5   : > { %v12388_v60 = vpop.f32.mrb[0].mxu0  ;;  %v3585_v53 = vadd.f32 %v8862_v45, %v12319_v51  ;;  %v3438_v61 = vpop.f32.mrb[7].mxu1  ;;  %v12427_v16 = vcombine.low %v5488_v4, %v5498_v31  ;;  %v12432_v36 = vcombine.low %v5512_v2, %v5522_v28  ;;  %v5531_v21 = vrot.slane %v5530_v32, 4  ;;  %v9625_v2 = vld [vmem:[%s9718_s25 + $0x84] sm:$0xff]   ;;  %v9626_v32 = vld [vmem:[%s9718_s25 + $0x90] sm:$0xff]  }
 0x1d6   : > { %v12393_v22 = vpop.f32.mrb[1].mxu0  ;;  %3654 = vrot.lane.b32.xlu0 %v3584_v10, %s9662_s28  ;;  %v3583_v52 = vadd.f32 %v12319_v51, %v3438_v61  ;;  %v5545_v10 = vrot.slane %v5543_v35, 5  ;;  %v5541_v34 = vrot.slane %v5540_v49, 4  ;;  %v5574_v18 = vrot.slane %v5572_v13, 4 }
 0x1d7   : > { %v12406_v55 = vpop.f32.mrb[2].mxu0  ;;  %9110 = vmatmul.mubr.msk.bf16.gmra.mrb[48].mxu1 %vm666_vm2, %v12351_v30  ;;  %3656 = vrot.lane.b32.xlu1 %v3585_v53, %s9662_s28  ;;  %v5577_v26 = vrot.slane %v5575_v7, 5  ;;  %v12434_v53 = vrot.slane %v5581_v62, 5  ;;  %v5587_v61 = vrot.slane %v5585_v37, 4  ;;  %v5555_v4 = vrot.slane %v5554_v47, 4 }
 0x1d8   : > { %v12415_v15 = vpop.f32.mrb[3].mxu0  ;;  %9113 = vmatprep.mubr.msk.bf16.mxu1 %vm666_vm2, %v12385_v40  ;;  %v5565_v31 = vrot.slane %v5564_v25, 4  ;;  %v5569_v35 = vrot.slane %v5567_v9, 5  ;;  %v5536_v49 = vsel %vm9756_vm6, %v5531_v21, %v12383_v29  ;;  %v5546_v13 = vsel %vm9756_vm6, %v5541_v34, %v5545_v10  ;;  %v9649_v9 = vld [vmem:[%s9718_s25 + $0x1c] sm:$0xf] }
 0x1d9   : > { %v5578_v62 = vor.u32 %v5577_v26, %v5574_v18  ;;  %v5588_v37 = vor.u32 %v5587_v61, %v12434_v53  ;;  %v5560_v29 = vsel %vm9756_vm6, %v5555_v4, %v12391_v17 }
 0x1da   : > { %8970 = vmatmul.mubr.msk.bf16.gmra.mrb[44].mxu0 %vm666_vm2, %v9623_v56  ;;  %3650 = vrot.lane.b32.xlu0 %v3582_v6, %s9662_s28  ;;  %v8865_v27 = vpop.f32.mrb[8].mxu1  ;;  %v5570_v25 = vsel %vm9756_vm6, %v5565_v31, %v5569_v35  ;;  %v9650_v35 = vld [vmem:[%s9718_s25 + $0x20] sm:$0x1] }
 0x1db   : > { %v3588_v39 = vadd.f32 %v8865_v27, %v12319_v51  ;;  %8973 = vmatprep.mubr.msk.bf16.mxu0 %vm666_vm2, %v9624_v8  ;;  %3652 = vrot.lane.b32.xlu1 %v3583_v52, %s9662_s28  ;;  %v3451_v57 = vpop.f32.mrb[9].mxu1  ;;  %v5591_v52 = vshll.u32 %v12182_v38, 16  ;;  %v6796_v27 = vrot.slane %v9649_v9, 5  ;;  %v12476_v34 = vcombine.low %v5560_v29, %v5570_v25  ;;  %v9651_v29 = vld [vmem:[%s9718_s25 + $0x28] sm:$0xf] }
 0x1dc   : > { %v8866_v45 = vpop.f32.mrb[10].mxu1  ;;  %v3586_v7 = vadd.f32 %v12319_v51, %v3451_v57  ;;  %v12474_v57 = vcombine.low %v5536_v49, %v5546_v13  ;;  %v5589_v18 = vrot.slane %v5588_v37, 4  ;;  %v9627_v49 = vld [vmem:[%s9718_s25 + $0x9c] sm:$0xff]   ;;  %v6803_v25 = vrot.slane %v9651_v29, 5 }
 0x1dd   : > { %v12436_v44 = vpop.f32.mrb[4].mxu0  ;;  %v3589_v1 = vadd.f32 %v8866_v45, %v12319_v51  ;;  %v3454_v56 = vpop.f32.mrb[11].mxu1  ;;  %v5579_v45 = vrot.slane %v5578_v62, 4  ;;  %v5593_v26 = vrot.slane %v5591_v52, 5  ;;  %v6798_v31 = vrot.slane %v6796_v27, 4 }
 0x1de   : > { %v12439_v8 = vpop.f32.mrb[5].mxu0  ;;  %3662 = vrot.lane.b32.xlu0 %v3588_v39, %s9662_s28  ;;  %v3587_v47 = vadd.f32 %v12319_v51, %v3454_v56  ;;  %v8241_v39 = vld [vmem:[%s9718_s25 + $0x18] sm:$0xe] }
 0x1df   : > { %v12443_v28 = vpop.f32.mrb[6].mxu0  ;;  %9114 = vmatmul.mubr.msk.bf16.gmra.mrb[52].mxu1 %vm666_vm2, %v12427_v16  ;;  %3664 = vrot.lane.b32.xlu1 %v3589_v1, %s9662_s28  ;;  %v8257_v4 = vrot.slane %v8241_v39, 9  ;;  %v5584_v52 = vsel %vm9756_vm6, %v5579_v45, %v12434_v53  ;;  %v8243_v53 = vld [vmem:[%s9718_s25 + $0x30] sm:$0xe] }
 0x1e0   : > { %v12454_v6 = vpop.f32.mrb[7].mxu0  ;;  %9117 = vmatprep.mubr.msk.bf16.mxu1 %vm666_vm2, %v12432_v36  ;;  %v8259_v29 = vrot.slane %v8243_v53, 9 }
 0x1e2   : > { %8974 = vmatmul.mubr.msk.bf16.gmra.mrb[48].mxu0 %vm666_vm2, %v9625_v2  ;;  %3658 = vrot.lane.b32.xlu0 %v3586_v7, %s9662_s28  ;;  %v8869_v10 = vpop.f32.mrb[12].mxu1  ;;  %v6799_v2 = vrot.slane %v9650_v35, 5  ;;  %v9628_v7 = vld [vmem:[%s9718_s25 + $0xa8] sm:$0xff]  }
 0x1e3   : > { %v3592_v38 = vadd.f32 %v8869_v10, %v12319_v51  ;;  %8977 = vmatprep.mubr.msk.bf16.mxu0 %vm666_vm2, %v9626_v32  ;;  %3660 = vrot.lane.b32.xlu1 %v3587_v47, %s9662_s28  ;;  %v3467_v17 = vpop.f32.mrb[13].mxu1  ;;  %v5594_v47 = vsel %vm9756_vm6, %v5589_v18, %v5593_v26  ;;  %v6797_v10 = vsel %vm9711_vm4, %v8257_v4, %v6796_v27  ;;  %v6805_v4 = vrot.slane %v6803_v25, 4 }
 0x1e4   : > { %v8870_v21 = vpop.f32.mrb[14].mxu1  ;;  %v3590_v37 = vadd.f32 %v12319_v51, %v3467_v17  ;;  %v6800_v39 = vsel %vm9711_vm4, %v6798_v31, %v6799_v2  ;;  %v9652_v17 = vld [vmem:[%s9718_s25 + $0x34] sm:$0xf]  ;;  %v12516_v18 = vcombine.low %v5584_v52, %v5594_v47  ;;  %v9653_v31 = vld [vmem:[%s9718_s25 + $0x2c] sm:$0x1] }
 0x1e5   : > { %v12478_v61 = vpop.f32.mrb[8].mxu0  ;;  %v3593_v1 = vadd.f32 %v8870_v21, %v12319_v51  ;;  %v3470_v56 = vpop.f32.mrb[15].mxu1  ;;  %v6810_v21 = vrot.slane %v9652_v17, 5  ;;  %v6806_v35 = vrot.slane %v9653_v31, 5  ;;  %v13386_v17 = vld [vmem:[#allocation13_spill] sm:$0xff] }
 0x1e6   : > { %v12482_v32 = vpop.f32.mrb[9].mxu0  ;;  %3670 = vrot.lane.b32.xlu0 %v3592_v38, %s9662_s28  ;;  %v3591_v9 = vadd.f32 %v12319_v51, %v3470_v56  ;;  %v8242_v38 = vld [vmem:[%s9718_s25 + $0x24] sm:$0xe]  ;;  %v9629_v52 = vld [vmem:[%s9718_s25 + $0xb4] sm:$0xff]  }
 0x1e7   : > { %v12486_v13 = vpop.f32.mrb[10].mxu0  ;;  %9118 = vmatmul.mubr.msk.bf16.gmra.mrb[56].mxu1 %vm666_vm2, %v12474_v57  ;;  %3672 = vrot.lane.b32.xlu1 %v3593_v1, %s9662_s28  ;;  %v8275_v1 = vcombine.low %v6797_v10, %v6800_v39  ;;  %v8258_v56 = vrot.slane %v8242_v38, 9  ;;  %v9630_v10 = vld [vmem:[%s9718_s25 + $0xc0] sm:$0xff]   ;;  %v6811_v31 = vsel %vm9711_vm4, %v8259_v29, %v6810_v21 }
 0x1e8   : > { %v12492_v62 = vpop.f32.mrb[11].mxu0  ;;  %9121 = vmatprep.mubr.msk.bf16.mxu1 %vm666_vm2, %v12476_v34 }
 0x1e9   : > { %v6804_v53 = vsel %vm9711_vm4, %v8258_v56, %v6803_v25 }
 0x1ea   : > { %8978 = vmatmul.mubr.msk.bf16.gmra.mrb[52].mxu0 %vm666_vm2, %v9627_v49  ;;  %3666 = vrot.lane.b32.xlu0 %v3590_v37, %s9662_s28  ;;  %v8873_v43 = vpop.f32.mrb[16].mxu1 }
 0x1eb   : > { %v3596_v45 = vadd.f32 %v8873_v43, %v12319_v51  ;;  %8981 = vmatprep.mubr.msk.bf16.mxu0 %vm666_vm2, %v9628_v7  ;;  %3668 = vrot.lane.b32.xlu1 %v3591_v9, %s9662_s28  ;;  %v3483_v27 = vpop.f32.mrb[17].mxu1  ;;  %v6812_v7 = vrot.slane %v6810_v21, 4  ;;  %v6813_v9 = vrot.slane %v13386_v17, 5 }
 0x1ec   : > { %v8874_v26 = vpop.f32.mrb[18].mxu1  ;;  %v3594_v38 = vadd.f32 %v12319_v51, %v3483_v27 }
 0x1ed   : > { %v12519_v2 = vpop.f32.mrb[12].mxu0  ;;  %v3597_v49 = vadd.f32 %v8874_v26, %v12319_v51  ;;  %v3486_v37 = vpop.f32.mrb[19].mxu1 }
 0x1ee   : > { %v12523_v43 = vpop.f32.mrb[13].mxu0  ;;  %3678 = vrot.lane.b32.xlu0 %v3596_v45, %s9662_s28  ;;  %v6807_v45 = vsel %vm9711_vm4, %v6805_v4, %v6806_v35  ;;  %v3595_v26 = vadd.f32 %v12319_v51, %v3486_v37 }
 0x1ef   : > { %v12527_v47 = vpop.f32.mrb[14].mxu0  ;;  %9122 = vmatmul.mubr.msk.bf16.gmra.mrb[60].mxu1 %vm666_vm2, %v12516_v18  ;;  %3680 = vrot.lane.b32.xlu1 %v3597_v49, %s9662_s28  ;;  %v6814_v49 = vsel %vm9711_vm4, %v6812_v7, %v6813_v9  ;;  %v8276_v56 = vcombine.low %v6804_v53, %v6807_v45  ;;  %v9631_v7 = vld [vmem:[%s9718_s25 + $0xcc] sm:$0xff]   ;;  %s8342_s25 = sshll.u32 %s13417_s13, 9 }
 0x1f0   : > { %v12533_v39 = vpop.f32.mrb[15].mxu0  ;;  %9127 = vmatprep.mubr.msk.bf16.mxu1 %vm666_vm2, %v8275_v1  ;;  %v8277_v35 = vcombine.low %v6811_v31, %v6814_v49  ;;  %s12700_s4 = scalar_lea.vmem %s13159_s3, %s8342_s25 }
 0x1f2   : > { %8982 = vmatmul.mubr.msk.bf16.gmra.mrb[56].mxu0 %vm666_vm2, %v9629_v52  ;;  %3674 = vrot.lane.b32.xlu0 %v3594_v38, %s9662_s28  ;;  %v8877_v27 = vpop.f32.mrb[20].mxu1 }
 0x1f3   : > { %v3600_v1 = vadd.f32 %v8877_v27, %v12319_v51  ;;  %8985 = vmatprep.mubr.msk.bf16.mxu0 %vm666_vm2, %v9630_v10  ;;  %3676 = vrot.lane.b32.xlu1 %v3595_v26, %s9662_s28  ;;  %v3499_v25 = vpop.f32.mrb[21].mxu1 }
 0x1f4   : > { %v8878_v4 = vpop.f32.mrb[22].mxu1  ;;  %v3598_v52 = vadd.f32 %v12319_v51, %v3499_v25 }
 0x1f5   : > { %v12551_v21 = vpop.f32.mrb[16].mxu0  ;;  %v3601_v24 = vadd.f32 %v8878_v4, %v12319_v51  ;;  %v3502_v37 = vpop.f32.mrb[23].mxu1  ;;  %v13388_v4 = vld [vmem:[#allocation9_spill] sm:$0xff] }
 0x1f6   : > { %v12554_v29 = vpop.f32.mrb[17].mxu0  ;;  %3686 = vrot.lane.b32.xlu0 %v3600_v1, %s9662_s28  ;;  %v3599_v10 = vadd.f32 %v12319_v51, %v3502_v37  ;;  %v13390_v37 = vld [vmem:[#allocation19_spill] sm:$0xff] }
 0x1f7   : > { %v12558_v17 = vpop.f32.mrb[18].mxu0  ;;  %9128 = vmatmul.mubr.msk.bf16.vlgmr.msra.gmra.mrb[32].mxu1 %vm666_vm2, %v8276_v56  ;;  %3688 = vrot.lane.b32.xlu1 %v3601_v24, %s9662_s28  ;;  %v13387_v56 = vld [vmem:[#allocation16_spill] sm:$0xff] }
 0x1f8   : > { %v12562_v9 = vpop.f32.mrb[19].mxu0  ;;  %9131 = vmatprep.mubr.msk.bf16.mxu1 %vm666_vm2, %v8277_v35  ;;  %v13389_v35 = vcombine.low %v13387_v56, %v13388_v4 }
 0x1fa   : > { %8986 = vmatmul.mubr.msk.bf16.gmra.mrb[60].mxu0 %vm666_vm2, %v9631_v7  ;;  %3682 = vrot.lane.b32.xlu0 %v3598_v52, %s9662_s28  ;;  %v8881_v38 = vpop.f32.mrb[24].mxu1  ;;  %v13391_v7 = vld [vmem:[#allocation20_spill] sm:$0xff] }
 0x1fb   : > { %v3604_v53 = vadd.f32 %v8881_v38, %v12319_v51  ;;  %8991 = vmatprep.mubr.msk.bf16.mxu0 %vm666_vm2, %v12079_v33  ;;  %3684 = vrot.lane.b32.xlu1 %v3599_v10, %s9662_s28  ;;  %v3515_v45 = vpop.f32.mrb[25].mxu1  ;;  %v13392_v52 = vcombine.low %v13390_v37, %v13391_v7 }
 0x1fc   : > { %v8882_v26 = vpop.f32.mrb[26].mxu1  ;;  %v3602_v24 = vadd.f32 %v12319_v51, %v3515_v45 }
 0x1fd   : > { %v12573_v31 = vpop.f32.mrb[20].mxu0  ;;  %v3605_v49 = vadd.f32 %v8882_v26, %v12319_v51  ;;  %v3518_v27 = vpop.f32.mrb[27].mxu1 }
 0x1fe   : > { %v12576_v1 = vpop.f32.mrb[21].mxu0  ;;  %3694 = vrot.lane.b32.xlu0 %v3604_v53, %s9662_s28  ;;  %v3603_v10 = vadd.f32 %v12319_v51, %v3518_v27 }
 0x1ff   : > { %v12579_v25 = vpop.f32.mrb[22].mxu0  ;;  %9132 = vmatmul.mubr.msk.bf16.gmra.mrb[36].mxu1 %vm666_vm2, %v13389_v35  ;;  %3696 = vrot.lane.b32.xlu1 %v3605_v49, %s9662_s28  ;;  %v13393_v35 = vld [vmem:[#allocation21_spill] sm:$0xff] }
 0x200   : > { %v12586_v33 = vpop.f32.mrb[23].mxu0  ;;  %9135 = vmatprep.mubr.msk.bf16.mxu1 %vm666_vm2, %v13392_v52  ;;  %v13396_v52 = vld [vmem:[#allocation17_spill] sm:$0xff] }
 0x202   : > { %8992 = vmatmul.mubr.msk.bf16.vlgmr.msra.gmra.mrb[32].mxu0 %vm666_vm2, %v12081_v12  ;;  %3690 = vrot.lane.b32.xlu0 %v3602_v24, %s9662_s28  ;;  %v8885_v38 = vpop.f32.mrb[28].mxu1  ;;  %v13394_v24 = vld [vmem:[#allocation22_spill] sm:$0xff] }
 0x203   : > { %v3608_v53 = vadd.f32 %v8885_v38, %v12319_v51  ;;  %8995 = vmatprep.mubr.msk.bf16.mxu0 %vm666_vm2, %v12141_v14  ;;  %3692 = vrot.lane.b32.xlu1 %v3603_v10, %s9662_s28  ;;  %v3531_v45 = vpop.f32.mrb[29].mxu1  ;;  %v13395_v37 = vcombine.low %v13393_v35, %v13394_v24  ;;  %v13397_v10 = vld [vmem:[#allocation23_spill] sm:$0xff]  ;;  %v13399_v35 = vld [vmem:[#allocation12_spill] sm:$0xff] }
 0x204   : > { %v8886_v26 = vpop.f32.mrb[30].mxu1  ;;  %v3606_v7 = vadd.f32 %v12319_v51, %v3531_v45  ;;  %v13398_v38 = vcombine.low %v13396_v52, %v13397_v10  ;;  %v13400_v24 = vld [vmem:[#allocation15_spill] sm:$0xff]  ;;  %v13405_v52 = vcombine.low %v12033_v58, %v12037_v63  ;;  %v13409_v58 = vld [vmem:[#allocation5_spill] sm:$0xff]  ;;  %v13410_v63 = vld [vmem:[#allocation4_spill] sm:$0xff] }
 0x205   : > { %v12601_v49 = vpop.f32.mrb[24].mxu0  ;;  %v3609_v56 = vadd.f32 %v8886_v26, %v12319_v51  ;;  %v3534_v27 = vpop.f32.mrb[31].mxu1 }
 0x206   : > { %v12604_v4 = vpop.f32.mrb[25].mxu0  ;;  %3702 = vrot.lane.b32.xlu0 %v3608_v53, %s9662_s28  ;;  %v3607_v53 = vadd.f32 %v12319_v51, %v3534_v27 }
 0x207   : > { %v12607_v12 = vpop.f32.mrb[26].mxu0  ;;  %9136 = vmatmul.mubr.msk.bf16.gmra.mrb[40].mxu1 %vm666_vm2, %v13395_v37  ;;  %3704 = vrot.lane.b32.xlu1 %v3609_v56, %s9662_s28  ;;  %v13401_v37 = vcombine.low %v13399_v35, %v13400_v24  ;;  %v2275_v35 = vadd.f32 %v12319_v51, %v12439_v8  ;;  %v2282_v8 = vadd.f32 %v12486_v13, %v12319_v51 }
 0x208   : > { %v12614_v14 = vpop.f32.mrb[27].mxu0  ;;  %9139 = vmatprep.mubr.msk.bf16.mxu1 %vm666_vm2, %v13398_v38 }
 0x20a   : > { %8996 = vmatmul.mubr.msk.bf16.gmra.mrb[36].mxu0 %vm666_vm2, %v12231_v23  ;;  %3698 = vrot.lane.b32.xlu0 %v3606_v7, %s9662_s28  ;;  %v13402_v23 = vcombine.low %v11955_v59, %v11959_v42  ;;  %v13406_v59 = vld [vmem:[#allocation3_spill] sm:$0xff] }
 0x20b   : > { %8999 = vmatprep.mubr.msk.bf16.mxu0 %vm666_vm2, %v12233_v3  ;;  %3700 = vrot.lane.b32.xlu1 %v3607_v53, %s9662_s28  ;;  %v13403_v3 = vld [vmem:[#allocation6_spill] sm:$0xff]  ;;  %v13407_v42 = vcombine.low %v12049_v50, %v13406_v59  ;;  %v13412_v50 = vcombine.low %v12201_v54, %v12205_v48  ;;  %v2273_v54 = vadd.f32 %v12388_v60, %v12319_v51 }
 0x20c   : > { %v13404_v7 = vcombine.low %v11969_v20, %v13403_v3  ;;  %v13408_v20 = vcombine.low %v12121_v41, %v12125_v11  ;;  %v13413_v41 = vld [vmem:[#allocation8_spill] sm:$0xff]  ;;  %v13414_v11 = vld [vmem:[#allocation18_spill] sm:$0xff]  ;;  %v2271_v48 = vadd.f32 %v12319_v51, %v12393_v22  ;;  %v2274_v60 = vadd.f32 %v12406_v55, %v12319_v51 }
 0x20d   : > { %v12628_v26 = vpop.f32.mrb[28].mxu0  ;;  %v2277_v55 = vadd.f32 %v12436_v44, %v12319_v51  ;;  %v2276_v44 = vadd.f32 %v12319_v51, %v12454_v6  ;;  %v2281_v3 = vadd.f32 %v12478_v61, %v12319_v51  ;;  %v2280_v61 = vadd.f32 %v12319_v51, %v12492_v62 }
 0x20e   : > { %v12630_v45 = vpop.f32.mrb[29].mxu0 }
 0x20f   : > { %v12632_v56 = vpop.f32.mrb[30].mxu0  ;;  %9140 = vmatmul.mubr.msk.bf16.gmra.mrb[44].mxu1 %vm666_vm2, %v13401_v37 }
 0x210   : > { %v12638_v27 = vpop.f32.mrb[31].mxu0  ;;  %9143 = vmatprep.mubr.msk.bf16.mxu1 %vm666_vm2, %v13402_v23 }
 0x212   : > { %9000 = vmatmul.mubr.msk.bf16.gmra.mrb[40].mxu0 %vm666_vm2, %v12285_v19  ;;  %v13411_v19 = vcombine.low %v13409_v58, %v13410_v63 }
 0x213   : > { %9003 = vmatprep.mubr.msk.bf16.mxu0 %vm666_vm2, %v12291_v46  ;;  %v13415_v46 = vcombine.low %v13413_v41, %v13414_v11 }
 0x217   : > { %9144 = vmatmul.mubr.msk.bf16.gmra.mrb[48].mxu1 %vm666_vm2, %v13404_v7 }
 0x218   : > { %9147 = vmatprep.mubr.msk.bf16.mxu1 %vm666_vm2, %v13405_v52 }
 0x21a   : > { %9004 = vmatmul.mubr.msk.bf16.gmra.mrb[44].mxu0 %vm666_vm2, %v12341_v0 }
 0x21b   : > { %9007 = vmatprep.mubr.msk.bf16.mxu0 %vm666_vm2, %v12347_v5 }
 0x21f   : > { %9148 = vmatmul.mubr.msk.bf16.gmra.mrb[52].mxu1 %vm666_vm2, %v13407_v42  ;;  %v2279_v42 = vadd.f32 %v12319_v51, %v12482_v32  ;;  %v2286_v32 = vadd.f32 %v12527_v47, %v12319_v51 }
 0x220   : > { %9151 = vmatprep.mubr.msk.bf16.mxu1 %vm666_vm2, %v13408_v20 }
 0x222   : > { %9008 = vmatmul.mubr.msk.bf16.gmra.mrb[48].mxu0 %vm666_vm2, %v12351_v30 }
 0x223   : > { %9011 = vmatprep.mubr.msk.bf16.mxu0 %vm666_vm2, %v12385_v40 }
 0x227   : > { %9152 = vmatmul.mubr.msk.bf16.gmra.mrb[56].mxu1 %vm666_vm2, %v13411_v19  ;;  %v2285_v19 = vadd.f32 %v12519_v2, %v12319_v51  ;;  %v2284_v2 = vadd.f32 %v12319_v51, %v12533_v39 }
 0x228   : > { %9155 = vmatprep.mubr.msk.bf16.mxu1 %vm666_vm2, %v13412_v50 }
 0x22a   : > { %9012 = vmatmul.mubr.msk.bf16.gmra.mrb[52].mxu0 %vm666_vm2, %v12427_v16  ;;  %v2272_v16 = vadd.f32 %v12319_v51, %v12415_v15 }
 0x22b   : > { %9015 = vmatprep.mubr.msk.bf16.mxu0 %vm666_vm2, %v12432_v36 }
 0x22f   : > { %9156 = vmatmul.mubr.msk.bf16.gmra.mrb[60].mxu1 %vm666_vm2, %v13415_v46  ;;  %v2283_v46 = vadd.f32 %v12319_v51, %v12523_v43  ;;  %v2290_v43 = vadd.f32 %v12558_v17, %v12319_v51 }
 0x232   : > { %9016 = vmatmul.mubr.msk.bf16.gmra.mrb[56].mxu0 %vm666_vm2, %v12474_v57 }
 0x233   : > { %9019 = vmatprep.mubr.msk.bf16.mxu0 %vm666_vm2, %v12476_v34 }
 0x23a   : > { %9020 = vmatmul.mubr.msk.bf16.gmra.mrb[60].mxu0 %vm666_vm2, %v12516_v18  ;;  %v2278_v18 = vadd.f32 %v12443_v28, %v12319_v51 }
 0x23f   : > { %v3647_v0 = vpop.permute.xlu1 %3646 }
 0x240   : > { %v3741_v5 = vsel %vm3738_vm7, %v2273_v54, %v3647_v0  ;;  %v3643_v30 = vpop.permute.xlu0 %3642 }
 0x241   : > { %3774 = vst.msk [vmem:[%s12700_s4 + $0x20] sm:$0xff] %vm3771_vm8, %v3741_v5  ;;  %v3739_v40 = vsel %vm3738_vm7, %v2271_v48, %v3643_v30  ;;  %v2289_v5 = vadd.f32 %v12551_v21, %v12319_v51  ;;  %v2288_v21 = vadd.f32 %v12319_v51, %v12562_v9 }
 0x242   : > { %3772 = vst.msk [vmem:[%s12700_s4] sm:$0xff] %vm3771_vm8, %v3739_v40 }
 0x243   : > { %v3649_v36 = vpop.permute.xlu1 %3648 }
 0x244   : > { %v3742_v22 = vsel %vm3738_vm7, %v2274_v60, %v3649_v36  ;;  %v3645_v57 = vpop.permute.xlu0 %3644 }
 0x245   : > { %3775 = vst.msk [vmem:[%s12700_s4 + $0x28] sm:$0xff] %vm3771_vm8, %v3742_v22  ;;  %v3740_v34 = vsel %vm3738_vm7, %v2272_v16, %v3645_v57  ;;  %v2287_v16 = vadd.f32 %v12319_v51, %v12554_v29  ;;  %v2294_v29 = vadd.f32 %v12579_v25, %v12319_v51 }
 0x246   : > { %3773 = vst.msk [vmem:[%s12700_s4 + $0x8] sm:$0xff] %vm3771_vm8, %v3740_v34  ;;  %v2293_v34 = vadd.f32 %v12573_v31, %v12319_v51  ;;  %v2292_v31 = vadd.f32 %v12319_v51, %v12586_v33 }
 0x248   : > { %v3655_v10 = vpop.permute.xlu0 %3654 }
 0x249   : > { %v3745_v15 = vsel %vm3738_vm7, %v2277_v55, %v3655_v10  ;;  %v3657_v38 = vpop.permute.xlu1 %3656 }
 0x24a   : > { %3778 = vst.msk [vmem:[%s12700_s4 + $0x60] sm:$0xff] %vm3771_vm8, %v3745_v15  ;;  %v3746_v53 = vsel %vm3738_vm7, %v2278_v18, %v3657_v38  ;;  %v2291_v15 = vadd.f32 %v12319_v51, %v12576_v1  ;;  %v2298_v1 = vadd.f32 %v12607_v12, %v12319_v51 }
 0x24b   : > { %3779 = vst.msk [vmem:[%s12700_s4 + $0x68] sm:$0xff] %vm3771_vm8, %v3746_v53 }
 0x24c   : > { %v3651_v24 = vpop.permute.xlu0 %3650 }
 0x24d   : > { %v3743_v28 = vsel %vm3738_vm7, %v2275_v35, %v3651_v24  ;;  %v3653_v37 = vpop.permute.xlu1 %3652 }
 0x24e   : > { %3776 = vst.msk [vmem:[%s12700_s4 + $0x40] sm:$0xff] %vm3771_vm8, %v3743_v28  ;;  %v3744_v23 = vsel %vm3738_vm7, %v2276_v44, %v3653_v37  ;;  %v2297_v44 = vadd.f32 %v12601_v49, %v12319_v51  ;;  %v2296_v49 = vadd.f32 %v12319_v51, %v12614_v14 }
 0x24f   : > { %3777 = vst.msk [vmem:[%s12700_s4 + $0x48] sm:$0xff] %vm3771_vm8, %v3744_v23  ;;  %v2295_v23 = vadd.f32 %v12319_v51, %v12604_v4  ;;  %v2302_v4 = vadd.f32 %v12632_v56, %v12319_v51 }
 0x250   : > { %v3663_v7 = vpop.permute.xlu0 %3662 }
 0x251   : > { %v3749_v6 = vsel %vm3738_vm7, %v2281_v3, %v3663_v7  ;;  %v3665_v52 = vpop.permute.xlu1 %3664 }
 0x252   : > { %3782 = vst.msk [vmem:[%s12700_s4 + $0xa0] sm:$0xff] %vm3771_vm8, %v3749_v6  ;;  %v3750_v59 = vsel %vm3738_vm7, %v2282_v8, %v3665_v52  ;;  %v2301_v6 = vadd.f32 %v12628_v26, %v12319_v51  ;;  %v2300_v26 = vadd.f32 %v12319_v51, %v12638_v27 }
 0x253   : > { %3783 = vst.msk [vmem:[%s12700_s4 + $0xa8] sm:$0xff] %vm3771_vm8, %v3750_v59 }
 0x254   : > { %v3659_v20 = vpop.permute.xlu0 %3658 }
 0x255   : > { %v3747_v13 = vsel %vm3738_vm7, %v2279_v42, %v3659_v20  ;;  %v3661_v58 = vpop.permute.xlu1 %3660 }
 0x256   : > { %3780 = vst.msk [vmem:[%s12700_s4 + $0x80] sm:$0xff] %vm3771_vm8, %v3747_v13  ;;  %v3748_v63 = vsel %vm3738_vm7, %v2280_v61, %v3661_v58  ;;  %v2299_v61 = vadd.f32 %v12319_v51, %v12630_v45 }
 0x257   : > { %3781 = vst.msk [vmem:[%s12700_s4 + $0x88] sm:$0xff] %vm3771_vm8, %v3748_v63  ;;  %v12863_v63 = vld [vmem:[%s13158_s2] ss:$0 sm:$0xff] }
 0x258   : > { %v3671_v50 = vpop.permute.xlu0 %3670 }
 0x259   : > { %v3753_v62 = vsel %vm3738_vm7, %v2285_v19, %v3671_v50  ;;  %v3673_v41 = vpop.permute.xlu1 %3672 }
 0x25a   : > { %3786 = vst.msk [vmem:[%s12700_s4 + $0xe0] sm:$0xff] %vm3771_vm8, %v3753_v62  ;;  %v3754_v11 = vsel %vm3738_vm7, %v2286_v32, %v3673_v41 }
 0x25b   : > { %3787 = vst.msk [vmem:[%s12700_s4 + $0xe8] sm:$0xff] %vm3771_vm8, %v3754_v11 }
 0x25c   : > { %v3667_v54 = vpop.permute.xlu0 %3666 }
 0x25d   : > { %v3751_v47 = vsel %vm3738_vm7, %v2283_v46, %v3667_v54  ;;  %v3669_v48 = vpop.permute.xlu1 %3668 }
 0x25e   : > { %3784 = vst.msk [vmem:[%s12700_s4 + $0xc0] sm:$0xff] %vm3771_vm8, %v3751_v47  ;;  %v3752_v0 = vsel %vm3738_vm7, %v2284_v2, %v3669_v48 }
 0x25f   : > { %3785 = vst.msk [vmem:[%s12700_s4 + $0xc8] sm:$0xff] %vm3771_vm8, %v3752_v0 }
 0x260   : > { %v3679_v30 = vpop.permute.xlu0 %3678 }
 0x261   : > { %v3757_v39 = vsel %vm3738_vm7, %v2289_v5, %v3679_v30  ;;  %v3681_v40 = vpop.permute.xlu1 %3680 }
 0x262   : > { %3790 = vst.msk [vmem:[%s12700_s4 + $0x120] sm:$0xff] %vm3771_vm8, %v3757_v39  ;;  %v3758_v60 = vsel %vm3738_vm7, %v2290_v43, %v3681_v40 }
 0x263   : > { %3791 = vst.msk [vmem:[%s12700_s4 + $0x128] sm:$0xff] %vm3771_vm8, %v3758_v60 }
 0x264   : > { %v3675_v36 = vpop.permute.xlu0 %3674 }
 0x265   : > { %v3755_v17 = vsel %vm3738_vm7, %v2287_v16, %v3675_v36  ;;  %v3677_v22 = vpop.permute.xlu1 %3676 }
 0x266   : > { %3788 = vst.msk [vmem:[%s12700_s4 + $0x100] sm:$0xff] %vm3771_vm8, %v3755_v17  ;;  %v3756_v57 = vsel %vm3738_vm7, %v2288_v21, %v3677_v22 }
 0x267   : > { %3789 = vst.msk [vmem:[%s12700_s4 + $0x108] sm:$0xff] %vm3771_vm8, %v3756_v57 }
 0x268   : > { %v3687_v55 = vpop.permute.xlu0 %3686 }
 0x269   : > { %v3761_v9 = vsel %vm3738_vm7, %v2293_v34, %v3687_v55  ;;  %v3689_v18 = vpop.permute.xlu1 %3688 }
 0x26a   : > { %3794 = vst.msk [vmem:[%s12700_s4 + $0x160] sm:$0xff] %vm3771_vm8, %v3761_v9  ;;  %v3762_v10 = vsel %vm3738_vm7, %v2294_v29, %v3689_v18 }
 0x26b   : > { %3795 = vst.msk [vmem:[%s12700_s4 + $0x168] sm:$0xff] %vm3771_vm8, %v3762_v10 }
 0x26c   : > { %v3683_v38 = vpop.permute.xlu0 %3682 }
 0x26d   : > { %v3759_v25 = vsel %vm3738_vm7, %v2291_v15, %v3683_v38  ;;  %v3685_v53 = vpop.permute.xlu1 %3684 }
 0x26e   : > { %3792 = vst.msk [vmem:[%s12700_s4 + $0x140] sm:$0xff] %vm3771_vm8, %v3759_v25  ;;  %v3760_v35 = vsel %vm3738_vm7, %v2292_v31, %v3685_v53 }
 0x26f   : > { %3793 = vst.msk [vmem:[%s12700_s4 + $0x148] sm:$0xff] %vm3771_vm8, %v3760_v35 }
 0x270   : > { %v3695_v24 = vpop.permute.xlu0 %3694 }
 0x271   : > { %v3765_v33 = vsel %vm3738_vm7, %v2297_v44, %v3695_v24  ;;  %v3697_v28 = vpop.permute.xlu1 %3696 }
 0x272   : > { %3798 = vst.msk [vmem:[%s12700_s4 + $0x1a0] sm:$0xff] %vm3771_vm8, %v3765_v33  ;;  %v3766_v37 = vsel %vm3738_vm7, %v2298_v1, %v3697_v28 }
 0x273   : > { %3799 = vst.msk [vmem:[%s12700_s4 + $0x1a8] sm:$0xff] %vm3771_vm8, %v3766_v37 }
 0x274   : > { %v3691_v3 = vpop.permute.xlu0 %3690 }
 0x275   : > { %v3763_v12 = vsel %vm3738_vm7, %v2295_v23, %v3691_v3  ;;  %v3693_v8 = vpop.permute.xlu1 %3692 }
 0x276   : > { %3796 = vst.msk [vmem:[%s12700_s4 + $0x180] sm:$0xff] %vm3771_vm8, %v3763_v12  ;;  %v3764_v7 = vsel %vm3738_vm7, %v2296_v49, %v3693_v8 }
 0x277   : > { %3797 = vst.msk [vmem:[%s12700_s4 + $0x188] sm:$0xff] %vm3771_vm8, %v3764_v7 }
 0x278   : > { %v3703_v52 = vpop.permute.xlu0 %3702 }
 0x279   : > { %v3769_v14 = vsel %vm3738_vm7, %v2301_v6, %v3703_v52  ;;  %v3705_v59 = vpop.permute.xlu1 %3704 }
 0x27a   : > { %3802 = vst.msk [vmem:[%s12700_s4 + $0x1e0] sm:$0xff] %vm3771_vm8, %v3769_v14  ;;  %v3770_v42 = vsel %vm3738_vm7, %v2302_v4, %v3705_v59 }
 0x27b   : > { %3803 = vst.msk [vmem:[%s12700_s4 + $0x1e8] sm:$0xff] %vm3771_vm8, %v3770_v42 }
 0x27c   : > { %v3699_v20 = vpop.permute.xlu0 %3698 }
 0x27d   : > { %v3767_v13 = vsel %vm3738_vm7, %v2299_v61, %v3699_v20  ;;  %v3701_v56 = vpop.permute.xlu1 %3700 }
 0x27e   : > { %3800 = vst.msk [vmem:[%s12700_s4 + $0x1c0] sm:$0xff] %vm3771_vm8, %v3767_v13  ;;  %v3768_v58 = vsel %vm3738_vm7, %v2300_v26, %v3701_v56 }
 0x27f   : > { %3801 = vst.msk [vmem:[%s12700_s4 + $0x1c8] sm:$0xff] %vm3771_vm8, %v3768_v58 }
 0x2ca   : > { %v9129_v45 = vpop.f32.mrb[32].mxu1 }
 0x2cb   : > { %v7206_v19 = vadd.f32 %v9129_v45, %v12863_v63  ;;  %v7045_v32 = vpop.f32.mrb[33].mxu1 }
 0x2cc   : > { %v9130_v51 = vpop.f32.mrb[34].mxu1  ;;  %v7204_v62 = vadd.f32 %v12863_v63, %v7045_v32 }
 0x2cd   : > { %v7207_v27 = vadd.f32 %v9130_v51, %v12863_v63  ;;  %7272 = vrot.lane.b32.xlu0 %v7206_v19, %s9662_s28  ;;  %v7048_v50 = vpop.f32.mrb[35].mxu1 }
 0x2ce   : > { %v7205_v41 = vadd.f32 %v12863_v63, %v7048_v50 }
 0x2cf   : > { %7274 = vrot.lane.b32.xlu1 %v7207_v27, %s9662_s28 }
 0x2d1   : > { %7268 = vrot.lane.b32.xlu0 %v7204_v62, %s9662_s28 }
 0x2d2   : > { %v9133_v11 = vpop.f32.mrb[36].mxu1 }
 0x2d3   : > { %v7210_v46 = vadd.f32 %v9133_v11, %v12863_v63  ;;  %v7061_v2 = vpop.f32.mrb[37].mxu1  ;;  %7270 = vrot.lane.b32.xlu1 %v7205_v41, %s9662_s28 }
 0x2d4   : > { %v9134_v54 = vpop.f32.mrb[38].mxu1  ;;  %v7208_v30 = vadd.f32 %v12863_v63, %v7061_v2 }
 0x2d5   : > { %v12874_v47 = vpop.f32.mrb[32].mxu0  ;;  %v7211_v48 = vadd.f32 %v9134_v54, %v12863_v63  ;;  %7280 = vrot.lane.b32.xlu0 %v7210_v46, %s9662_s28  ;;  %v7064_v0 = vpop.f32.mrb[39].mxu1 }
 0x2d6   : > { %v12878_v5 = vpop.f32.mrb[33].mxu0  ;;  %v7209_v40 = vadd.f32 %v12863_v63, %v7064_v0 }
 0x2d7   : > { %v12880_v43 = vpop.f32.mrb[34].mxu0  ;;  %7282 = vrot.lane.b32.xlu1 %v7211_v48, %s9662_s28 }
 0x2d8   : > { %v12884_v39 = vpop.f32.mrb[35].mxu0 }
 0x2d9   : > { %7276 = vrot.lane.b32.xlu0 %v7208_v30, %s9662_s28 }
 0x2da   : > { %v9137_v60 = vpop.f32.mrb[40].mxu1 }
 0x2db   : > { %v7214_v16 = vadd.f32 %v9137_v60, %v12863_v63  ;;  %v7077_v21 = vpop.f32.mrb[41].mxu1  ;;  %7278 = vrot.lane.b32.xlu1 %v7209_v40, %s9662_s28 }
 0x2dc   : > { %v9138_v36 = vpop.f32.mrb[42].mxu1  ;;  %v7212_v55 = vadd.f32 %v12863_v63, %v7077_v21 }
 0x2dd   : > { %v12890_v17 = vpop.f32.mrb[36].mxu0  ;;  %v7215_v22 = vadd.f32 %v9138_v36, %v12863_v63  ;;  %7288 = vrot.lane.b32.xlu0 %v7214_v16, %s9662_s28  ;;  %v7080_v57 = vpop.f32.mrb[43].mxu1 }
 0x2de   : > { %v12894_v34 = vpop.f32.mrb[37].mxu0  ;;  %v7213_v18 = vadd.f32 %v12863_v63, %v7080_v57 }
 0x2df   : > { %v12896_v29 = vpop.f32.mrb[38].mxu0  ;;  %7290 = vrot.lane.b32.xlu1 %v7215_v22, %s9662_s28 }
 0x2e0   : > { %v12900_v9 = vpop.f32.mrb[39].mxu0 }
 0x2e1   : > { %7284 = vrot.lane.b32.xlu0 %v7212_v55, %s9662_s28 }
 0x2e2   : > { %v9141_v10 = vpop.f32.mrb[44].mxu1 }
 0x2e3   : > { %v7218_v15 = vadd.f32 %v9141_v10, %v12863_v63  ;;  %v7093_v31 = vpop.f32.mrb[45].mxu1  ;;  %7286 = vrot.lane.b32.xlu1 %v7213_v18, %s9662_s28 }
 0x2e4   : > { %v9142_v38 = vpop.f32.mrb[46].mxu1  ;;  %v7216_v24 = vadd.f32 %v12863_v63, %v7093_v31 }
 0x2e5   : > { %v12906_v25 = vpop.f32.mrb[40].mxu0  ;;  %v7219_v53 = vadd.f32 %v9142_v38, %v12863_v63  ;;  %7296 = vrot.lane.b32.xlu0 %v7218_v15, %s9662_s28  ;;  %v7096_v35 = vpop.f32.mrb[47].mxu1 }
 0x2e6   : > { %v12910_v44 = vpop.f32.mrb[41].mxu0  ;;  %v7217_v28 = vadd.f32 %v12863_v63, %v7096_v35 }
 0x2e7   : > { %v12912_v1 = vpop.f32.mrb[42].mxu0  ;;  %7298 = vrot.lane.b32.xlu1 %v7219_v53, %s9662_s28 }
 0x2e8   : > { %v12916_v33 = vpop.f32.mrb[43].mxu0 }
 0x2e9   : > { %7292 = vrot.lane.b32.xlu0 %v7216_v24, %s9662_s28 }
 0x2ea   : > { %v9145_v37 = vpop.f32.mrb[48].mxu1 }
 0x2eb   : > { %v7222_v23 = vadd.f32 %v9145_v37, %v12863_v63  ;;  %v7109_v49 = vpop.f32.mrb[49].mxu1  ;;  %7294 = vrot.lane.b32.xlu1 %v7217_v28, %s9662_s28 }
 0x2ec   : > { %v9146_v3 = vpop.f32.mrb[50].mxu1  ;;  %v7220_v52 = vadd.f32 %v12863_v63, %v7109_v49 }
 0x2ed   : > { %v12922_v12 = vpop.f32.mrb[44].mxu0  ;;  %v7223_v8 = vadd.f32 %v9146_v3, %v12863_v63  ;;  %7304 = vrot.lane.b32.xlu0 %v7222_v23, %s9662_s28  ;;  %v7112_v7 = vpop.f32.mrb[51].mxu1  ;;  %v5902_v23 = vadd.f32 %v12874_v47, %v12863_v63  ;;  %v5903_v3 = vadd.f32 %v12880_v43, %v12863_v63 }
 0x2ee   : > { %v12926_v6 = vpop.f32.mrb[45].mxu0  ;;  %v7221_v59 = vadd.f32 %v12863_v63, %v7112_v7 }
 0x2ef   : > { %v12928_v4 = vpop.f32.mrb[46].mxu0  ;;  %7306 = vrot.lane.b32.xlu1 %v7223_v8, %s9662_s28 }
 0x2f0   : > { %v12932_v14 = vpop.f32.mrb[47].mxu0 }
 0x2f1   : > { %7300 = vrot.lane.b32.xlu0 %v7220_v52, %s9662_s28  ;;  %v5900_v52 = vadd.f32 %v12863_v63, %v12878_v5 }
 0x2f2   : > { %v9149_v42 = vpop.f32.mrb[52].mxu1 }
 0x2f3   : > { %v7226_v61 = vadd.f32 %v9149_v42, %v12863_v63  ;;  %v7125_v26 = vpop.f32.mrb[53].mxu1  ;;  %7302 = vrot.lane.b32.xlu1 %v7221_v59, %s9662_s28  ;;  %v5901_v42 = vadd.f32 %v12863_v63, %v12884_v39 }
 0x2f4   : > { %v9150_v20 = vpop.f32.mrb[54].mxu1  ;;  %v7224_v32 = vadd.f32 %v12863_v63, %v7125_v26  ;;  %v5906_v26 = vadd.f32 %v12890_v17, %v12863_v63 }
 0x2f5   : > { %v12938_v13 = vpop.f32.mrb[48].mxu0  ;;  %v7227_v56 = vadd.f32 %v9150_v20, %v12863_v63  ;;  %7312 = vrot.lane.b32.xlu0 %v7226_v61, %s9662_s28  ;;  %v7128_v58 = vpop.f32.mrb[55].mxu1 }
 0x2f6   : > { %v12942_v45 = vpop.f32.mrb[49].mxu0  ;;  %v7225_v27 = vadd.f32 %v12863_v63, %v7128_v58 }
 0x2f7   : > { %v12944_v19 = vpop.f32.mrb[50].mxu0  ;;  %7314 = vrot.lane.b32.xlu1 %v7227_v56, %s9662_s28  ;;  %v5907_v56 = vadd.f32 %v12896_v29, %v12863_v63 }
 0x2f8   : > { %v12948_v51 = vpop.f32.mrb[51].mxu0 }
 0x2f9   : > { %7308 = vrot.lane.b32.xlu0 %v7224_v32, %s9662_s28  ;;  %v5904_v32 = vadd.f32 %v12863_v63, %v12894_v34 }
 0x2fa   : > { %v9153_v50 = vpop.f32.mrb[56].mxu1 }
 0x2fb   : > { %v7230_v62 = vadd.f32 %v9153_v50, %v12863_v63  ;;  %v7141_v41 = vpop.f32.mrb[57].mxu1  ;;  %7310 = vrot.lane.b32.xlu1 %v7225_v27, %s9662_s28  ;;  %v5905_v50 = vadd.f32 %v12863_v63, %v12900_v9 }
 0x2fc   : > { %v9154_v11 = vpop.f32.mrb[58].mxu1  ;;  %v7228_v30 = vadd.f32 %v12863_v63, %v7141_v41  ;;  %v5910_v41 = vadd.f32 %v12906_v25, %v12863_v63 }
 0x2fd   : > { %v12954_v46 = vpop.f32.mrb[52].mxu0  ;;  %v7231_v2 = vadd.f32 %v9154_v11, %v12863_v63  ;;  %7320 = vrot.lane.b32.xlu0 %v7230_v62, %s9662_s28  ;;  %v7144_v54 = vpop.f32.mrb[59].mxu1 }
 0x2fe   : > { %v12958_v48 = vpop.f32.mrb[53].mxu0  ;;  %v7229_v60 = vadd.f32 %v12863_v63, %v7144_v54 }
 0x2ff   : > { %v12960_v0 = vpop.f32.mrb[54].mxu0  ;;  %7322 = vrot.lane.b32.xlu1 %v7231_v2, %s9662_s28  ;;  %v5911_v2 = vadd.f32 %v12912_v1, %v12863_v63 }
 0x300   : > { %v12964_v40 = vpop.f32.mrb[55].mxu0 }
 0x301   : > { %7316 = vrot.lane.b32.xlu0 %v7228_v30, %s9662_s28  ;;  %v5908_v30 = vadd.f32 %v12863_v63, %v12910_v44 }
 0x302   : > { %v9157_v16 = vpop.f32.mrb[60].mxu1 }
 0x303   : > { %v7157_v21 = vpop.f32.mrb[61].mxu1  ;;  %7318 = vrot.lane.b32.xlu1 %v7229_v60, %s9662_s28  ;;  %v7234_v38 = vadd.f32 %v9157_v16, %v12863_v63  ;;  %v5909_v16 = vadd.f32 %v12863_v63, %v12916_v33 }
 0x304   : > { %v7232_v36 = vadd.f32 %v12863_v63, %v7157_v21  ;;  %v9158_v22 = vpop.f32.mrb[62].mxu1 }
 0x305   : > { %v12970_v57 = vpop.f32.mrb[56].mxu0  ;;  %v7160_v55 = vpop.f32.mrb[63].mxu1  ;;  %v7235_v53 = vadd.f32 %v9158_v22, %v12863_v63 }
 0x306   : > { %v12972_v18 = vpop.f32.mrb[57].mxu0  ;;  %v7233_v10 = vadd.f32 %v12863_v63, %v7160_v55  ;;  %7324 = vrot.lane.b32.xlu0 %v7232_v36, %s9662_s28  ;;  %v5914_v36 = vadd.f32 %v12922_v12, %v12863_v63  ;;  %v5915_v55 = vadd.f32 %v12928_v4, %v12863_v63 }
 0x307   : > { %v12976_v15 = vpop.f32.mrb[58].mxu0 }
 0x308   : > { %v12978_v31 = vpop.f32.mrb[59].mxu0  ;;  %7326 = vrot.lane.b32.xlu1 %v7233_v10, %s9662_s28 }
 0x30a   : > { %7328 = vrot.lane.b32.xlu0 %v7234_v38, %s9662_s28  ;;  %v5912_v38 = vadd.f32 %v12863_v63, %v12926_v6 }
 0x30c   : > { %7330 = vrot.lane.b32.xlu1 %v7235_v53, %s9662_s28 }
 0x30d   : > { %v12985_v35 = vpop.f32.mrb[60].mxu0 }
 0x30e   : > { %v12987_v24 = vpop.f32.mrb[61].mxu0 }
 0x30f   : > { %v12989_v28 = vpop.f32.mrb[62].mxu0 }
 0x310   : > { %v12991_v37 = vpop.f32.mrb[63].mxu0 }
 0x33f   : > { %v7273_v49 = vpop.permute.xlu0 %7272 }
 0x340   : > { %v7366_v8 = vsel %vm3738_vm7, %v5902_v23, %v7273_v49  ;;  %v5913_v23 = vadd.f32 %v12863_v63, %v12932_v14 }
 0x341   : > { %8310 = vst.msk [vmem:[%s12700_s4 + $0x30] sm:$0xff] %vm3771_vm8, %v7366_v8  ;;  %v7275_v7 = vpop.permute.xlu1 %7274 }
 0x342   : > { %v7367_v59 = vsel %vm3738_vm7, %v5903_v3, %v7275_v7  ;;  %v5918_v3 = vadd.f32 %v12938_v13, %v12863_v63  ;;  %v5919_v7 = vadd.f32 %v12944_v19, %v12863_v63 }
 0x343   : > { %8311 = vst.msk [vmem:[%s12700_s4 + $0x38] sm:$0xff] %vm3771_vm8, %v7367_v59  ;;  %v7269_v47 = vpop.permute.xlu0 %7268  ;;  %v5916_v59 = vadd.f32 %v12863_v63, %v12942_v45 }
 0x344   : > { %v7364_v43 = vsel %vm3738_vm7, %v5900_v52, %v7269_v47 }
 0x345   : > { %8308 = vst.msk [vmem:[%s12700_s4 + $0x10] sm:$0xff] %vm3771_vm8, %v7364_v43  ;;  %v7271_v61 = vpop.permute.xlu1 %7270 }
 0x346   : > { %v7365_v5 = vsel %vm3738_vm7, %v5901_v42, %v7271_v61  ;;  %v5917_v42 = vadd.f32 %v12863_v63, %v12948_v51  ;;  %v5922_v61 = vadd.f32 %v12954_v46, %v12863_v63 }
 0x347   : > { %8309 = vst.msk [vmem:[%s12700_s4 + $0x18] sm:$0xff] %vm3771_vm8, %v7365_v5  ;;  %v7281_v20 = vpop.permute.xlu0 %7280  ;;  %v5923_v5 = vadd.f32 %v12960_v0, %v12863_v63 }
 0x348   : > { %v7370_v39 = vsel %vm3738_vm7, %v5906_v26, %v7281_v20 }
 0x349   : > { %8314 = vst.msk [vmem:[%s12700_s4 + $0x70] sm:$0xff] %vm3771_vm8, %v7370_v39  ;;  %v7283_v58 = vpop.permute.xlu1 %7282 }
 0x34a   : > { %v7371_v17 = vsel %vm3738_vm7, %v5907_v56, %v7283_v58  ;;  %v5920_v56 = vadd.f32 %v12863_v63, %v12958_v48  ;;  %v5921_v58 = vadd.f32 %v12863_v63, %v12964_v40 }
 0x34b   : > { %8315 = vst.msk [vmem:[%s12700_s4 + $0x78] sm:$0xff] %vm3771_vm8, %v7371_v17  ;;  %v7277_v27 = vpop.permute.xlu0 %7276  ;;  %v5926_v17 = vadd.f32 %v12970_v57, %v12863_v63 }
 0x34c   : > { %v7368_v29 = vsel %vm3738_vm7, %v5904_v32, %v7277_v27 }
 0x34d   : > { %8312 = vst.msk [vmem:[%s12700_s4 + $0x50] sm:$0xff] %vm3771_vm8, %v7368_v29  ;;  %v7279_v62 = vpop.permute.xlu1 %7278 }
 0x34e   : > { %v7369_v34 = vsel %vm3738_vm7, %v5905_v50, %v7279_v62  ;;  %v5927_v50 = vadd.f32 %v12976_v15, %v12863_v63  ;;  %v5924_v62 = vadd.f32 %v12863_v63, %v12972_v18  ;;  %v5928_v18 = vadd.f32 %v12863_v63, %v12987_v24 }
 0x34f   : > { %8313 = vst.msk [vmem:[%s12700_s4 + $0x58] sm:$0xff] %vm3771_vm8, %v7369_v34  ;;  %v7289_v11 = vpop.permute.xlu0 %7288  ;;  %v5925_v34 = vadd.f32 %v12863_v63, %v12978_v31 }
 0x350   : > { %v7374_v9 = vsel %vm3738_vm7, %v5910_v41, %v7289_v11 }
 0x351   : > { %8318 = vst.msk [vmem:[%s12700_s4 + $0xb0] sm:$0xff] %vm3771_vm8, %v7374_v9  ;;  %v7291_v54 = vpop.permute.xlu1 %7290 }
 0x352   : > { %v7375_v25 = vsel %vm3738_vm7, %v5911_v2, %v7291_v54  ;;  %v5929_v54 = vadd.f32 %v12863_v63, %v12991_v37 }
 0x353   : > { %8319 = vst.msk [vmem:[%s12700_s4 + $0xb8] sm:$0xff] %vm3771_vm8, %v7375_v25  ;;  %v7285_v60 = vpop.permute.xlu0 %7284  ;;  %v5930_v25 = vadd.f32 %v12985_v35, %v12863_v63 }
 0x354   : > { %v7372_v1 = vsel %vm3738_vm7, %v5908_v30, %v7285_v60 }
 0x355   : > { %8316 = vst.msk [vmem:[%s12700_s4 + $0x90] sm:$0xff] %vm3771_vm8, %v7372_v1  ;;  %v7287_v21 = vpop.permute.xlu1 %7286 }
 0x356   : > { %v7373_v44 = vsel %vm3738_vm7, %v5909_v16, %v7287_v21  ;;  %v5931_v16 = vadd.f32 %v12989_v28, %v12863_v63 }
 0x357   : > { %8317 = vst.msk [vmem:[%s12700_s4 + $0x98] sm:$0xff] %vm3771_vm8, %v7373_v44  ;;  %v7297_v22 = vpop.permute.xlu0 %7296 }
 0x358   : > { %v7378_v33 = vsel %vm3738_vm7, %v5914_v36, %v7297_v22 }
 0x359   : > { %8322 = vst.msk [vmem:[%s12700_s4 + $0xf0] sm:$0xff] %vm3771_vm8, %v7378_v33  ;;  %v7299_v10 = vpop.permute.xlu1 %7298 }
 0x35a   : > { %v7379_v12 = vsel %vm3738_vm7, %v5915_v55, %v7299_v10 }
 0x35b   : > { %8323 = vst.msk [vmem:[%s12700_s4 + $0xf8] sm:$0xff] %vm3771_vm8, %v7379_v12  ;;  %v7293_v53 = vpop.permute.xlu0 %7292 }
 0x35c   : > { %v7376_v4 = vsel %vm3738_vm7, %v5912_v38, %v7293_v53 }
 0x35d   : > { %8320 = vst.msk [vmem:[%s12700_s4 + $0xd0] sm:$0xff] %vm3771_vm8, %v7376_v4  ;;  %v7295_v49 = vpop.permute.xlu1 %7294 }
 0x35e   : > { %v7377_v6 = vsel %vm3738_vm7, %v5913_v23, %v7295_v49 }
 0x35f   : > { %8321 = vst.msk [vmem:[%s12700_s4 + $0xd8] sm:$0xff] %vm3771_vm8, %v7377_v6  ;;  %v7305_v8 = vpop.permute.xlu0 %7304 }
 0x360   : > { %v7382_v14 = vsel %vm3738_vm7, %v5918_v3, %v7305_v8 }
 0x361   : > { %8326 = vst.msk [vmem:[%s12700_s4 + $0x130] sm:$0xff] %vm3771_vm8, %v7382_v14  ;;  %v7307_v52 = vpop.permute.xlu1 %7306 }
 0x362   : > { %v7383_v13 = vsel %vm3738_vm7, %v5919_v7, %v7307_v52 }
 0x363   : > { %8327 = vst.msk [vmem:[%s12700_s4 + $0x138] sm:$0xff] %vm3771_vm8, %v7383_v13  ;;  %v7301_v47 = vpop.permute.xlu0 %7300 }
 0x364   : > { %v7380_v19 = vsel %vm3738_vm7, %v5916_v59, %v7301_v47 }
 0x365   : > { %8324 = vst.msk [vmem:[%s12700_s4 + $0x110] sm:$0xff] %vm3771_vm8, %v7380_v19  ;;  %v7303_v43 = vpop.permute.xlu1 %7302 }
 0x366   : > { %v7381_v45 = vsel %vm3738_vm7, %v5917_v42, %v7303_v43 }
 0x367   : > { %8325 = vst.msk [vmem:[%s12700_s4 + $0x118] sm:$0xff] %vm3771_vm8, %v7381_v45  ;;  %v7313_v26 = vpop.permute.xlu0 %7312 }
 0x368   : > { %v7386_v51 = vsel %vm3738_vm7, %v5922_v61, %v7313_v26 }
 0x369   : > { %8330 = vst.msk [vmem:[%s12700_s4 + $0x170] sm:$0xff] %vm3771_vm8, %v7386_v51  ;;  %v7315_v20 = vpop.permute.xlu1 %7314 }
 0x36a   : > { %v7387_v46 = vsel %vm3738_vm7, %v5923_v5, %v7315_v20 }
 0x36b   : > { %8331 = vst.msk [vmem:[%s12700_s4 + $0x178] sm:$0xff] %vm3771_vm8, %v7387_v46  ;;  %v7309_v39 = vpop.permute.xlu0 %7308 }
 0x36c   : > { %v7384_v0 = vsel %vm3738_vm7, %v5920_v56, %v7309_v39 }
 0x36d   : > { %8328 = vst.msk [vmem:[%s12700_s4 + $0x150] sm:$0xff] %vm3771_vm8, %v7384_v0  ;;  %v7311_v32 = vpop.permute.xlu1 %7310 }
 0x36e   : > { %v7385_v48 = vsel %vm3738_vm7, %v5921_v58, %v7311_v32 }
 0x36f   : > { %8329 = vst.msk [vmem:[%s12700_s4 + $0x158] sm:$0xff] %vm3771_vm8, %v7385_v48  ;;  %v7321_v27 = vpop.permute.xlu0 %7320 }
 0x370   : > { %v7390_v40 = vsel %vm3738_vm7, %v5926_v17, %v7321_v27 }
 0x371   : > { %8334 = vst.msk [vmem:[%s12700_s4 + $0x1b0] sm:$0xff] %vm3771_vm8, %v7390_v40  ;;  %v7323_v29 = vpop.permute.xlu1 %7322 }
 0x372   : > { %v7391_v57 = vsel %vm3738_vm7, %v5927_v50, %v7323_v29 }
 0x373   : > { %8335 = vst.msk [vmem:[%s12700_s4 + $0x1b8] sm:$0xff] %vm3771_vm8, %v7391_v57  ;;  %v7317_v41 = vpop.permute.xlu0 %7316 }
 0x374   : > { %v7388_v15 = vsel %vm3738_vm7, %v5924_v62, %v7317_v41 }
 0x375   : > { %8332 = vst.msk [vmem:[%s12700_s4 + $0x190] sm:$0xff] %vm3771_vm8, %v7388_v15  ;;  %v7319_v11 = vpop.permute.xlu1 %7318 }
 0x376   : > { %v7389_v2 = vsel %vm3738_vm7, %v5925_v34, %v7319_v11 }
 0x377   : > { %8333 = vst.msk [vmem:[%s12700_s4 + $0x198] sm:$0xff] %vm3771_vm8, %v7389_v2 }
 0x378   : > { %v7325_v9 = vpop.permute.xlu0 %7324 }
 0x379   : > { %v7392_v31 = vsel %vm3738_vm7, %v5928_v18, %v7325_v9 }
 0x37a   : > { %8336 = vst.msk [vmem:[%s12700_s4 + $0x1d0] sm:$0xff] %vm3771_vm8, %v7392_v31  ;;  %v7327_v30 = vpop.permute.xlu1 %7326 }
 0x37b   : > { %v7393_v60 = vsel %vm3738_vm7, %v5929_v54, %v7327_v30 }
 0x37c   : > { %8337 = vst.msk [vmem:[%s12700_s4 + $0x1d8] sm:$0xff] %vm3771_vm8, %v7393_v60  ;;  %v7329_v24 = vpop.permute.xlu0 %7328 }
 0x37d   : > { %v7394_v1 = vsel %vm3738_vm7, %v5930_v25, %v7329_v24 }
 0x37e   : > { %8338 = vst.msk [vmem:[%s12700_s4 + $0x1f0] sm:$0xff] %vm3771_vm8, %v7394_v1  ;;  %v7331_v37 = vpop.permute.xlu1 %7330 }
 0x37f   : > { %v7395_v21 = vsel %vm3738_vm7, %v5931_v16, %v7331_v37 }
 0x380   : > { %8339 = vst.msk [vmem:[%s12700_s4 + $0x1f8] sm:$0xff] %vm3771_vm8, %v7395_v21 }
 0x381 PF: > { %s13_s12 = sadd.s32 1, %s9660_s12  }
 0x382   : > { %p10_p4 = scmp.ge.s32.totalorder %s13_s12, 4  }
 0x384   :  { %12 = sbr.rel (!%p10_p4) target bundleno = 1 (0x1), region = 80 }

</bundles_post_ra>
